<compile_context>
chip_gen: v7x
topology: tpu7x:2x2x1
jax: 0.10.0
libtpu: 0.0.40
codegen_flags: <defaults>
</compile_context>

<pallas_src>
import numpy as np
import jax
import jax.numpy as jnp
from jax import lax
from jax.experimental import pallas as pl
from jax.experimental.pallas import tpu as pltpu

LEAKY_SLOPE = 0.2
IN_EPS = 1e-5  # nn.InstanceNorm2d default eps

_COMPILER_PARAMS = pltpu.CompilerParams(
    dimension_semantics=("parallel",),          # batch grid -> megacore on v7x
    vmem_limit_bytes=32 * 1024 * 1024,
)

# ----------------------- in-kernel helpers -----------------------


def _conv3x3_flat(xp_ref, w_ref, b_ref):
    """3x3 SAME conv as 9 shifted matmuls.

    xp_ref: (1, H+2, W+2, Cin) pre-padded (bf16 in HBM); w_ref: (9, Cin, Cout)
    bf16; b_ref: (1, Cout) f32.  Returns f32 (H*W, Cout).
    MXU operands are bf16, accumulation is f32.
    """
    xp = xp_ref[0].astype(jnp.float32)          # slice/reshape in f32 layout
    Hp, Wp, Cin = xp.shape
    H, W = Hp - 2, Wp - 2
    Cout = w_ref.shape[-1]
    acc = jnp.zeros((H * W, Cout), jnp.float32)
    for dy in range(3):
        for dx in range(3):
            patch = xp[dy:dy + H, dx:dx + W, :].reshape(H * W, Cin)
            acc = acc + jnp.dot(
                patch.astype(jnp.bfloat16),      # bf16 MXU operand
                w_ref[dy * 3 + dx],              # stored bf16
                preferred_element_type=jnp.float32,
            )
    return acc + b_ref[0].astype(jnp.float32)[None, :]


def _in_modulate(x_flat, gb_flat, C, *, leaky):
    """Param-free instance norm (global H*W stats, f32) + SPADE modulation."""
    gamma = gb_flat[:, :C]
    beta = gb_flat[:, C:]
    mean = jnp.mean(x_flat, axis=0, keepdims=True)
    var = jnp.mean(jnp.square(x_flat - mean), axis=0, keepdims=True)
    normed = (x_flat - mean) * lax.rsqrt(var + IN_EPS)
    out = normed * (1.0 + gamma) + beta
    if leaky:
        out = jnp.where(out > 0, out, LEAKY_SLOPE * out)
    return out


# ----------------------- Pallas kernel bodies -----------------------


def _shared_kernel(seg_ref, w_ref, b_ref, o_ref):
    """K1: mlp_shared conv3x3 + ReLU -> actvs (bf16)."""
    _, H, W, Cout = o_ref.shape
    y = jnp.maximum(_conv3x3_flat(seg_ref, w_ref, b_ref), 0.0)
    o_ref[0] = y.reshape(H, W, Cout).astype(o_ref.dtype)


def _spade0_kernel(x_ref, a_ref, wgb_ref, bgb_ref, o_ref):
    """K2: norm_0 = gb-conv3x3(actv_0) + IN(x) + modulate + leaky -> h0 (bf16)."""
    _, H, W, C = x_ref.shape
    x = x_ref[0].astype(jnp.float32).reshape(H * W, C)
    gb = _conv3x3_flat(a_ref, wgb_ref, bgb_ref)             # (HW, 2C) f32
    h = _in_modulate(x, gb, C, leaky=True)
    o_ref[0] = h.reshape(H, W, C).astype(o_ref.dtype)


def _conv_spade_kernel(h0_ref, a_ref, wc_ref, bc_ref, wgb_ref, bgb_ref, o_ref):
    """K3: dx = conv_0(h0);  h1 = leaky(IN(dx)*(1+g1)+b1).  dx stays in VMEM."""
    _, H, W, Cmid = o_ref.shape
    dx = _conv3x3_flat(h0_ref, wc_ref, bc_ref)              # (HW, Cmid) f32
    gb = _conv3x3_flat(a_ref, wgb_ref, bgb_ref)             # (HW, 2*Cmid) f32
    h = _in_modulate(dx, gb, Cmid, leaky=True)
    o_ref[0] = h.reshape(H, W, Cmid).astype(o_ref.dtype)


def _final_kernel(h1_ref, x_ref, a_ref, wc1_ref, bc1_ref,
                  wgbs_ref, bgbs_ref, wcs_ref, o_ref):
    """K4: out = conv_1(h1) + conv_s(IN(x)*(1+gs)+bs).  hs/x_s stay in VMEM."""
    _, H, W, fout = o_ref.shape
    fin = x_ref.shape[-1]
    dx1 = _conv3x3_flat(h1_ref, wc1_ref, bc1_ref)           # (HW, fout) f32
    gbs = _conv3x3_flat(a_ref, wgbs_ref, bgbs_ref)          # (HW, 2*fin) f32
    xf = x_ref[0].astype(jnp.float32).reshape(H * W, fin)
    hs = _in_modulate(xf, gbs, fin, leaky=False)            # no activation
    x_s = jnp.dot(hs.astype(jnp.bfloat16), wcs_ref[...],    # 1x1 conv_s (bf16 MXU)
                  preferred_element_type=jnp.float32)
    o_ref[0] = (dx1 + x_s).reshape(H, W, fout).astype(o_ref.dtype)


# ----------------------- pallas_call plumbing -----------------------


def _batched_spec(shape):
    nd = len(shape)
    return pl.BlockSpec((1,) + tuple(shape[1:]), lambda n: (n,) + (0,) * (nd - 1))


def _shared_spec(shape):
    nd = len(shape)
    return pl.BlockSpec(tuple(shape), lambda n: (0,) * nd)


def _nbytes(*arrs):
    return int(sum(int(np.prod(a.shape)) * jnp.dtype(a.dtype).itemsize for a in arrs))


def _run(kernel, batched, shared, out_shape, *, flops, transcendentals=0):
    n = batched[0].shape[0]
    in_specs = ([_batched_spec(a.shape) for a in batched]
                + [_shared_spec(a.shape) for a in shared])
    return pl.pallas_call(
        kernel,
        out_shape=out_shape,
        grid=(n,),
        in_specs=in_specs,
        out_specs=_batched_spec(out_shape.shape),
        compiler_params=_COMPILER_PARAMS,
        cost_estimate=pl.CostEstimate(
            flops=int(flops),
            transcendentals=int(transcendentals),
            bytes_accessed=_nbytes(*batched, *shared, out_shape)),
    )(*batched, *shared)


def _shared_conv_relu(seg_p, w9, b):
    N, Hp, Wp, Cin = seg_p.shape
    H, W = Hp - 2, Wp - 2
    Cout = w9.shape[-1]
    out_shape = jax.ShapeDtypeStruct((N, H, W, Cout), jnp.bfloat16)
    return _run(_shared_kernel, [seg_p], [w9, b], out_shape,
                flops=2 * N * H * W * 9 * Cin * Cout)


def _spade_norm0(x, a_p, w_gb, b_gb):
    N, H, W, C = x.shape
    nh = w_gb.shape[1]
    out_shape = jax.ShapeDtypeStruct((N, H, W, C), jnp.bfloat16)
    return _run(_spade0_kernel, [x, a_p], [w_gb, b_gb], out_shape,
                flops=2 * N * H * W * 9 * nh * 2 * C + 10 * N * H * W * C,
                transcendentals=N * C)


def _conv0_spade1(h0_p, a_p, w_c, b_c, w_gb, b_gb):
    N, Hp, Wp, Cin = h0_p.shape
    H, W = Hp - 2, Wp - 2
    Cmid = w_c.shape[-1]
    nh = w_gb.shape[1]
    out_shape = jax.ShapeDtypeStruct((N, H, W, Cmid), jnp.bfloat16)
    flops = 2 * N * H * W * 9 * (Cin * Cmid + nh * 2 * Cmid) + 10 * N * H * W * Cmid
    return _run(_conv_spade_kernel, [h0_p, a_p], [w_c, b_c, w_gb, b_gb], out_shape,
                flops=flops, transcendentals=N * Cmid)


def _conv1_shortcut(h1_p, x, a_p, w_c1, b_c1, w_gbs, b_gbs, w_cs):
    N, Hp, Wp, Cmid = h1_p.shape
    H, W = Hp - 2, Wp - 2
    fin = x.shape[-1]
    fout = w_c1.shape[-1]
    nh = w_gbs.shape[1]
    out_shape = jax.ShapeDtypeStruct((N, H, W, fout), jnp.float32)
    flops = (2 * N * H * W * (9 * (Cmid * fout + nh * 2 * fin) + fin * fout)
             + 10 * N * H * W * fin)
    return _run(_final_kernel, [h1_p, x, a_p],
                [w_c1, b_c1, w_gbs, b_gbs, w_cs], out_shape,
                flops=flops, transcendentals=N * fin)


# ----------------------- full forward (Pallas) -----------------------


def _prep_w(w):   # (3,3,Cin,Cout) -> (9,Cin,Cout) bf16 (MXU operand)
    return w.reshape(9, w.shape[2], w.shape[3]).astype(jnp.bfloat16)


def _prep_b(b):   # (Cout,) -> (1,Cout) f32 (added after f32 accumulation)
    return b.reshape(1, -1).astype(jnp.float32)


def fused_spade_resnet_block(x_nchw, seg_nchw, params, nhidden):
    x = jnp.transpose(x_nchw, (0, 2, 3, 1)).astype(jnp.float32)   # (N,H,W,fin)
    seg = jnp.transpose(seg_nchw, (0, 2, 3, 1)).astype(jnp.float32)
    N, H, W, _ = x.shape
    Hs, Ws = seg.shape[1], seg.shape[2]

    # F.interpolate(seg, size=(H,W), mode='nearest')  -> floor(dst*in/out)
    rows = (jnp.arange(H) * Hs) // H
    cols = (jnp.arange(W) * Ws) // W
    seg_up = seg[:, rows][:, :, cols].astype(jnp.bfloat16)

    pad = lambda t: jnp.pad(t, ((0, 0), (1, 1), (1, 1), (0, 0)))

    w_sh, b_sh = _prep_w(params["w_shared"]), _prep_b(params["b_shared"])
    w_gb0, b_gb0 = _prep_w(params["w_gb0"]), _prep_b(params["b_gb0"])
    w_c0, b_c0 = _prep_w(params["w_conv0"]), _prep_b(params["b_conv0"])
    w_gb1, b_gb1 = _prep_w(params["w_gb1"]), _prep_b(params["b_gb1"])
    w_c1, b_c1 = _prep_w(params["w_conv1"]), _prep_b(params["b_conv1"])
    w_gbs, b_gbs = _prep_w(params["w_gbs"]), _prep_b(params["b_gbs"])
    w_cs = params["w_convs"].astype(jnp.bfloat16)

    # K1: mlp_shared conv + ReLU (fused output feeds norm_0/norm_1/norm_s)
    actvs = _shared_conv_relu(pad(seg_up), w_sh, b_sh)            # bf16
    actvs_p = pad(actvs)
    a0 = actvs_p[..., :nhidden]
    a1 = actvs_p[..., nhidden:2 * nhidden]
    a2 = actvs_p[..., 2 * nhidden:]

    # K2: h0 = leaky(norm_0(x, actv_0))
    h0 = _spade_norm0(x, a0, w_gb0, b_gb0)                        # bf16

    # K3: h1 = leaky(norm_1(conv_0(h0), actv_1))    (dx stays in VMEM)
    h1 = _conv0_spade1(pad(h0), a1, w_c0, b_c0, w_gb1, b_gb1)     # bf16

    # K4: out = conv_s(norm_s(x, actv_s)) + conv_1(h1)
    out = _conv1_shortcut(pad(h1), x, a2, w_c1, b_c1, w_gbs, b_gbs, w_cs)  # f32

    return jnp.transpose(out, (0, 3, 1, 2))


# ----------------------- pure-JAX reference (mirrors bf16 MXU operands) ------


def _conv3x3_ref(x, w, b):
    y = lax.conv_general_dilated(
        x.astype(jnp.bfloat16), w.astype(jnp.bfloat16), (1, 1), "SAME",
        dimension_numbers=("NHWC", "HWIO", "NHWC"),
        preferred_element_type=jnp.float32)
    return y + b.astype(jnp.float32)


def _spade_ref(x, gb, leaky):
    C = x.shape[-1]
    gamma, beta = gb[..., :C], gb[..., C:]
    mean = jnp.mean(x, axis=(1, 2), keepdims=True)
    var = jnp.mean(jnp.square(x - mean), axis=(1, 2), keepdims=True)
    normed = (x - mean) * lax.rsqrt(var + IN_EPS)
    out = normed * (1.0 + gamma) + beta
    if leaky:
        out = jnp.where(out > 0, out, LEAKY_SLOPE * out)
    return out


def reference(x_nchw, seg_nchw, params, nhidden):
    x = jnp.transpose(x_nchw, (0, 2, 3, 1)).astype(jnp.float32)
    seg = jnp.transpose(seg_nchw, (0, 2, 3, 1)).astype(jnp.float32)
    N, H, W, _ = x.shape
    Hs, Ws = seg.shape[1], seg.shape[2]
    rows = (jnp.arange(H) * Hs) // H
    cols = (jnp.arange(W) * Ws) // W
    seg_up = seg[:, rows][:, :, cols]

    actvs = jnp.maximum(
        _conv3x3_ref(seg_up, params["w_shared"], params["b_shared"]), 0.0
    ).astype(jnp.bfloat16)                      # mirrors bf16 storage of actvs
    actv_0 = actvs[..., :nhidden]
    actv_1 = actvs[..., nhidden:2 * nhidden]
    actv_s = actvs[..., 2 * nhidden:]

    gb0 = _conv3x3_ref(actv_0, params["w_gb0"], params["b_gb0"])
    h0 = _spade_ref(x, gb0, True).astype(jnp.bfloat16)     # mirrors bf16 h0

    dx = _conv3x3_ref(h0, params["w_conv0"], params["b_conv0"])
    gb1 = _conv3x3_ref(actv_1, params["w_gb1"], params["b_gb1"])
    h1 = _spade_ref(dx, gb1, True).astype(jnp.bfloat16)    # mirrors bf16 h1

    gbs = _conv3x3_ref(actv_s, params["w_gbs"], params["b_gbs"])
    hs = _spade_ref(x, gbs, False)
    x_s = jnp.einsum("nhwc,co->nhwo", hs.astype(jnp.bfloat16),
                     params["w_convs"].astype(jnp.bfloat16),
                     preferred_element_type=jnp.float32)

    out = x_s + _conv3x3_ref(h1, params["w_conv1"], params["b_conv1"])
    return jnp.transpose(out, (0, 3, 1, 2))


# ----------------------- main -----------------------

if __name__ == "__main__":
    # Module config (learned shortcut exercised: fin != fout)
    N = 2
    FIN, FOUT = 8, 4
    FMID = min(FIN, FOUT)
    NGF = 8
    NHIDDEN = 2 * NGF          # opt.ngf * 2
    SEM_NC = 4                 # opt.semantic_nc
    H = W = 16
    SEG_H = SEG_W = 8

    key = jax.random.PRNGKey(0)
    keys = jax.random.split(key, 16)

    def _w(k, shape, scale=0.05):
        return scale * jax.random.normal(k, shape, jnp.float32)

    params = {
        # mlp_shared: Conv2d(semantic_nc, 3*nhidden, 3, pad=1)   (HWIO layout)
        "w_shared": _w(keys[0], (3, 3, SEM_NC, 3 * NHIDDEN)),
        "b_shared": _w(keys[1], (3 * NHIDDEN,), 0.01),
        # norm_0.mlp_gamma_beta: Conv2d(nhidden, 2*fin, 3, pad=1)
        "w_gb0": _w(keys[2], (3, 3, NHIDDEN, 2 * FIN)),
        "b_gb0": _w(keys[3], (2 * FIN,), 0.01),
        # conv_0: Conv2d(fin, fmiddle, 3, pad=1)
        "w_conv0": _w(keys[4], (3, 3, FIN, FMID)),
        "b_conv0": _w(keys[5], (FMID,), 0.01),
        # norm_1.mlp_gamma_beta: Conv2d(nhidden, 2*fmiddle, 3, pad=1)
        "w_gb1": _w(keys[6], (3, 3, NHIDDEN, 2 * FMID)),
        "b_gb1": _w(keys[7], (2 * FMID,), 0.01),
        # conv_1: Conv2d(fmiddle, fout, 3, pad=1)
        "w_conv1": _w(keys[8], (3, 3, FMID, FOUT)),
        "b_conv1": _w(keys[9], (FOUT,), 0.01),
        # norm_s.mlp_gamma_beta: Conv2d(nhidden, 2*fin, 3, pad=1)
        "w_gbs": _w(keys[10], (3, 3, NHIDDEN, 2 * FIN)),
        "b_gbs": _w(keys[11], (2 * FIN,), 0.01),
        # conv_s: Conv2d(fin, fout, 1, bias=False)
        "w_convs": _w(keys[12], (FIN, FOUT)),
    }

    x = jax.random.normal(keys[13], (N, FIN, H, W), jnp.float32)   # NCHW like PyTorch
    seg = jax.random.normal(keys[14], (N, SEM_NC, SEG_H, SEG_W), jnp.float32)

    fwd = jax.jit(fused_spade_resnet_block, static_argnums=(3,))
    out = jax.block_until_ready(fwd(x, seg, params, NHIDDEN))
    assert out.shape == (N, FOUT, H, W), out.shape

    ref_fn = jax.jit(reference, static_argnums=(3,))
    ref = jax.block_until_ready(ref_fn(x, seg, params, NHIDDEN))
    np.testing.assert_allclose(np.asarray(out, dtype=np.float32),
                               np.asarray(ref, dtype=np.float32),
                               rtol=2e-3, atol=2e-3)

    print("KERNEL_OK")
</pallas_src>

<mosaic_0001>
module attributes {stable_mosaic.version = 11 : i64} {
  func.func @_shared_kernel(%arg0: i32, %arg1: memref<1x18x18x4xbf16, #tpu.memory_space<vmem>>, %arg2: memref<9x4x48xbf16, #tpu.memory_space<vmem>>, %arg3: memref<1x48xf32, #tpu.memory_space<vmem>>, %arg4: memref<1x16x16x48xbf16, #tpu.memory_space<vmem>>) attributes {dimension_semantics = [#tpu.dimension_semantics<parallel>], iteration_bounds = array<i64: 2>, scalar_prefetch = 0 : i64, scratch_operands = 0 : i64, tpu.core_type = #tpu.core_type<tc>, window_params = [{transform_indices = @transform_0, window_bounds = array<i64: 1, 18, 18, 4>}, {pipeline_mode = #tpu.pipeline_mode<synchronous>, transform_indices = @transform_1, window_bounds = array<i64: 9, 4, 48>}, {pipeline_mode = #tpu.pipeline_mode<synchronous>, transform_indices = @transform_2, window_bounds = array<i64: 1, 48>}, {transform_indices = @transform_3, window_bounds = array<i64: 1, 16, 16, 48>}]} {
    %c0 = arith.constant 0 : index
    %c0_0 = arith.constant 0 : index
    %c0_1 = arith.constant 0 : index
    %c0_2 = arith.constant 0 : index
    %0 = vector.load %arg1[%c0, %c0_0, %c0_1, %c0_2] : memref<1x18x18x4xbf16, #tpu.memory_space<vmem>>, vector<1x18x18x4xbf16>
    %1 = vector.shape_cast %0 : vector<1x18x18x4xbf16> to vector<18x18x4xbf16>
    %2 = arith.extf %1 : vector<18x18x4xbf16> to vector<18x18x4xf32>
    %cst = arith.constant 0.000000e+00 : f32
    %3 = vector.broadcast %cst : f32 to vector<256x48xf32>
    %4 = vector.extract_strided_slice %2 {offsets = [0, 0, 0], sizes = [16, 16, 4], strides = [1, 1, 1]} : vector<18x18x4xf32> to vector<16x16x4xf32>
    %5 = vector.shape_cast %4 : vector<16x16x4xf32> to vector<256x4xf32>
    %6 = arith.truncf %5 : vector<256x4xf32> to vector<256x4xbf16>
    %c0_3 = arith.constant 0 : index
    %c0_4 = arith.constant 0 : index
    %c0_5 = arith.constant 0 : index
    %7 = vector.load %arg2[%c0_3, %c0_4, %c0_5] : memref<9x4x48xbf16, #tpu.memory_space<vmem>>, vector<1x4x48xbf16>
    %8 = vector.shape_cast %7 : vector<1x4x48xbf16> to vector<4x48xbf16>
    %cst_6 = arith.constant dense<0.000000e+00> : vector<256x48xf32>
    %9 = tpu.matmul %6, %8, %cst_6 {dimension_numbers = #tpu.dot_dimension_numbers<[1], [0], [0], [1], [0, 0, 1, 1], [], []>} : vector<256x4xbf16>, vector<4x48xbf16>, vector<256x48xf32> -> vector<256x48xf32>
    %10 = arith.addf %3, %9 : vector<256x48xf32>
    %11 = vector.extract_strided_slice %2 {offsets = [0, 1, 0], sizes = [16, 16, 4], strides = [1, 1, 1]} : vector<18x18x4xf32> to vector<16x16x4xf32>
    %12 = vector.shape_cast %11 : vector<16x16x4xf32> to vector<256x4xf32>
    %13 = arith.truncf %12 : vector<256x4xf32> to vector<256x4xbf16>
    %c1 = arith.constant 1 : index
    %c0_7 = arith.constant 0 : index
    %c0_8 = arith.constant 0 : index
    %14 = vector.load %arg2[%c1, %c0_7, %c0_8] : memref<9x4x48xbf16, #tpu.memory_space<vmem>>, vector<1x4x48xbf16>
    %15 = vector.shape_cast %14 : vector<1x4x48xbf16> to vector<4x48xbf16>
    %cst_9 = arith.constant dense<0.000000e+00> : vector<256x48xf32>
    %16 = tpu.matmul %13, %15, %cst_9 {dimension_numbers = #tpu.dot_dimension_numbers<[1], [0], [0], [1], [0, 0, 1, 1], [], []>} : vector<256x4xbf16>, vector<4x48xbf16>, vector<256x48xf32> -> vector<256x48xf32>
    %17 = arith.addf %10, %16 : vector<256x48xf32>
    %18 = vector.extract_strided_slice %2 {offsets = [0, 2, 0], sizes = [16, 16, 4], strides = [1, 1, 1]} : vector<18x18x4xf32> to vector<16x16x4xf32>
    %19 = vector.shape_cast %18 : vector<16x16x4xf32> to vector<256x4xf32>
    %20 = arith.truncf %19 : vector<256x4xf32> to vector<256x4xbf16>
    %c2 = arith.constant 2 : index
    %c0_10 = arith.constant 0 : index
    %c0_11 = arith.constant 0 : index
    %21 = vector.load %arg2[%c2, %c0_10, %c0_11] : memref<9x4x48xbf16, #tpu.memory_space<vmem>>, vector<1x4x48xbf16>
    %22 = vector.shape_cast %21 : vector<1x4x48xbf16> to vector<4x48xbf16>
    %cst_12 = arith.constant dense<0.000000e+00> : vector<256x48xf32>
    %23 = tpu.matmul %20, %22, %cst_12 {dimension_numbers = #tpu.dot_dimension_numbers<[1], [0], [0], [1], [0, 0, 1, 1], [], []>} : vector<256x4xbf16>, vector<4x48xbf16>, vector<256x48xf32> -> vector<256x48xf32>
    %24 = arith.addf %17, %23 : vector<256x48xf32>
    %25 = vector.extract_strided_slice %2 {offsets = [1, 0, 0], sizes = [16, 16, 4], strides = [1, 1, 1]} : vector<18x18x4xf32> to vector<16x16x4xf32>
    %26 = vector.shape_cast %25 : vector<16x16x4xf32> to vector<256x4xf32>
    %27 = arith.truncf %26 : vector<256x4xf32> to vector<256x4xbf16>
    %c3 = arith.constant 3 : index
    %c0_13 = arith.constant 0 : index
    %c0_14 = arith.constant 0 : index
    %28 = vector.load %arg2[%c3, %c0_13, %c0_14] : memref<9x4x48xbf16, #tpu.memory_space<vmem>>, vector<1x4x48xbf16>
    %29 = vector.shape_cast %28 : vector<1x4x48xbf16> to vector<4x48xbf16>
    %cst_15 = arith.constant dense<0.000000e+00> : vector<256x48xf32>
    %30 = tpu.matmul %27, %29, %cst_15 {dimension_numbers = #tpu.dot_dimension_numbers<[1], [0], [0], [1], [0, 0, 1, 1], [], []>} : vector<256x4xbf16>, vector<4x48xbf16>, vector<256x48xf32> -> vector<256x48xf32>
    %31 = arith.addf %24, %30 : vector<256x48xf32>
    %32 = vector.extract_strided_slice %2 {offsets = [1, 1, 0], sizes = [16, 16, 4], strides = [1, 1, 1]} : vector<18x18x4xf32> to vector<16x16x4xf32>
    %33 = vector.shape_cast %32 : vector<16x16x4xf32> to vector<256x4xf32>
    %34 = arith.truncf %33 : vector<256x4xf32> to vector<256x4xbf16>
    %c4 = arith.constant 4 : index
    %c0_16 = arith.constant 0 : index
    %c0_17 = arith.constant 0 : index
    %35 = vector.load %arg2[%c4, %c0_16, %c0_17] : memref<9x4x48xbf16, #tpu.memory_space<vmem>>, vector<1x4x48xbf16>
    %36 = vector.shape_cast %35 : vector<1x4x48xbf16> to vector<4x48xbf16>
    %cst_18 = arith.constant dense<0.000000e+00> : vector<256x48xf32>
    %37 = tpu.matmul %34, %36, %cst_18 {dimension_numbers = #tpu.dot_dimension_numbers<[1], [0], [0], [1], [0, 0, 1, 1], [], []>} : vector<256x4xbf16>, vector<4x48xbf16>, vector<256x48xf32> -> vector<256x48xf32>
    %38 = arith.addf %31, %37 : vector<256x48xf32>
    %39 = vector.extract_strided_slice %2 {offsets = [1, 2, 0], sizes = [16, 16, 4], strides = [1, 1, 1]} : vector<18x18x4xf32> to vector<16x16x4xf32>
    %40 = vector.shape_cast %39 : vector<16x16x4xf32> to vector<256x4xf32>
    %41 = arith.truncf %40 : vector<256x4xf32> to vector<256x4xbf16>
    %c5 = arith.constant 5 : index
    %c0_19 = arith.constant 0 : index
    %c0_20 = arith.constant 0 : index
    %42 = vector.load %arg2[%c5, %c0_19, %c0_20] : memref<9x4x48xbf16, #tpu.memory_space<vmem>>, vector<1x4x48xbf16>
    %43 = vector.shape_cast %42 : vector<1x4x48xbf16> to vector<4x48xbf16>
    %cst_21 = arith.constant dense<0.000000e+00> : vector<256x48xf32>
    %44 = tpu.matmul %41, %43, %cst_21 {dimension_numbers = #tpu.dot_dimension_numbers<[1], [0], [0], [1], [0, 0, 1, 1], [], []>} : vector<256x4xbf16>, vector<4x48xbf16>, vector<256x48xf32> -> vector<256x48xf32>
    %45 = arith.addf %38, %44 : vector<256x48xf32>
    %46 = vector.extract_strided_slice %2 {offsets = [2, 0, 0], sizes = [16, 16, 4], strides = [1, 1, 1]} : vector<18x18x4xf32> to vector<16x16x4xf32>
    %47 = vector.shape_cast %46 : vector<16x16x4xf32> to vector<256x4xf32>
    %48 = arith.truncf %47 : vector<256x4xf32> to vector<256x4xbf16>
    %c6 = arith.constant 6 : index
    %c0_22 = arith.constant 0 : index
    %c0_23 = arith.constant 0 : index
    %49 = vector.load %arg2[%c6, %c0_22, %c0_23] : memref<9x4x48xbf16, #tpu.memory_space<vmem>>, vector<1x4x48xbf16>
    %50 = vector.shape_cast %49 : vector<1x4x48xbf16> to vector<4x48xbf16>
    %cst_24 = arith.constant dense<0.000000e+00> : vector<256x48xf32>
    %51 = tpu.matmul %48, %50, %cst_24 {dimension_numbers = #tpu.dot_dimension_numbers<[1], [0], [0], [1], [0, 0, 1, 1], [], []>} : vector<256x4xbf16>, vector<4x48xbf16>, vector<256x48xf32> -> vector<256x48xf32>
    %52 = arith.addf %45, %51 : vector<256x48xf32>
    %53 = vector.extract_strided_slice %2 {offsets = [2, 1, 0], sizes = [16, 16, 4], strides = [1, 1, 1]} : vector<18x18x4xf32> to vector<16x16x4xf32>
    %54 = vector.shape_cast %53 : vector<16x16x4xf32> to vector<256x4xf32>
    %55 = arith.truncf %54 : vector<256x4xf32> to vector<256x4xbf16>
    %c7 = arith.constant 7 : index
    %c0_25 = arith.constant 0 : index
    %c0_26 = arith.constant 0 : index
    %56 = vector.load %arg2[%c7, %c0_25, %c0_26] : memref<9x4x48xbf16, #tpu.memory_space<vmem>>, vector<1x4x48xbf16>
    %57 = vector.shape_cast %56 : vector<1x4x48xbf16> to vector<4x48xbf16>
    %cst_27 = arith.constant dense<0.000000e+00> : vector<256x48xf32>
    %58 = tpu.matmul %55, %57, %cst_27 {dimension_numbers = #tpu.dot_dimension_numbers<[1], [0], [0], [1], [0, 0, 1, 1], [], []>} : vector<256x4xbf16>, vector<4x48xbf16>, vector<256x48xf32> -> vector<256x48xf32>
    %59 = arith.addf %52, %58 : vector<256x48xf32>
    %60 = vector.extract_strided_slice %2 {offsets = [2, 2, 0], sizes = [16, 16, 4], strides = [1, 1, 1]} : vector<18x18x4xf32> to vector<16x16x4xf32>
    %61 = vector.shape_cast %60 : vector<16x16x4xf32> to vector<256x4xf32>
    %62 = arith.truncf %61 : vector<256x4xf32> to vector<256x4xbf16>
    %c8 = arith.constant 8 : index
    %c0_28 = arith.constant 0 : index
    %c0_29 = arith.constant 0 : index
    %63 = vector.load %arg2[%c8, %c0_28, %c0_29] : memref<9x4x48xbf16, #tpu.memory_space<vmem>>, vector<1x4x48xbf16>
    %64 = vector.shape_cast %63 : vector<1x4x48xbf16> to vector<4x48xbf16>
    %cst_30 = arith.constant dense<0.000000e+00> : vector<256x48xf32>
    %65 = tpu.matmul %62, %64, %cst_30 {dimension_numbers = #tpu.dot_dimension_numbers<[1], [0], [0], [1], [0, 0, 1, 1], [], []>} : vector<256x4xbf16>, vector<4x48xbf16>, vector<256x48xf32> -> vector<256x48xf32>
    %66 = arith.addf %59, %65 : vector<256x48xf32>
    %c0_31 = arith.constant 0 : index
    %c0_32 = arith.constant 0 : index
    %67 = vector.load %arg3[%c0_31, %c0_32] : memref<1x48xf32, #tpu.memory_space<vmem>>, vector<1x48xf32>
    %68 = vector.shape_cast %67 : vector<1x48xf32> to vector<48xf32>
    %69 = vector.shape_cast %68 : vector<48xf32> to vector<1x48xf32>
    %70 = vector.broadcast %69 : vector<1x48xf32> to vector<256x48xf32>
    %71 = arith.addf %66, %70 : vector<256x48xf32>
    %cst_33 = arith.constant 0.000000e+00 : f32
    %72 = vector.broadcast %cst_33 : f32 to vector<256x48xf32>
    %73 = arith.maximumf %71, %72 : vector<256x48xf32>
    %74 = vector.shape_cast %73 : vector<256x48xf32> to vector<16x16x48xf32>
    %75 = arith.truncf %74 : vector<16x16x48xf32> to vector<16x16x48xbf16>
    %c0_34 = arith.constant 0 : index
    %c0_35 = arith.constant 0 : index
    %c0_36 = arith.constant 0 : index
    %c0_37 = arith.constant 0 : index
    %76 = vector.load %arg4[%c0_34, %c0_35, %c0_36, %c0_37] : memref<1x16x16x48xbf16, #tpu.memory_space<vmem>>, vector<1x16x16x48xbf16>
    %77 = vector.shape_cast %76 : vector<1x16x16x48xbf16> to vector<16x16x48xbf16>
    %78 = vector.shape_cast %75 : vector<16x16x48xbf16> to vector<1x16x16x48xbf16>
    tpu.vector_store %arg4[%c0_34, %c0_35, %c0_36, %c0_37], %78 {strides = array<i32>} : memref<1x16x16x48xbf16, #tpu.memory_space<vmem>>, vector<1x16x16x48xbf16>,
    return
  }
  func.func @transform_0(%arg0: i32) -> (i32, i32, i32, i32) {
    %c0_i32 = arith.constant 0 : i32
    %c0_i32_0 = arith.constant 0 : i32
    %c0_i32_1 = arith.constant 0 : i32
    %c0_i32_2 = arith.constant 0 : i32
    return %arg0, %c0_i32, %c0_i32_0, %c0_i32_1 : i32, i32, i32, i32
  }
  func.func @transform_1(%arg0: i32) -> (i32, i32, i32) {
    %c0_i32 = arith.constant 0 : i32
    %c0_i32_0 = arith.constant 0 : i32
    %c0_i32_1 = arith.constant 0 : i32
    %c0_i32_2 = arith.constant 0 : i32
    return %c0_i32, %c0_i32_0, %c0_i32_1 : i32, i32, i32
  }
  func.func @transform_2(%arg0: i32) -> (i32, i32) {
    %c0_i32 = arith.constant 0 : i32
    %c0_i32_0 = arith.constant 0 : i32
    %c0_i32_1 = arith.constant 0 : i32
    return %c0_i32, %c0_i32_0 : i32, i32
  }
  func.func @transform_3(%arg0: i32) -> (i32, i32, i32, i32) {
    %c0_i32 = arith.constant 0 : i32
    %c0_i32_0 = arith.constant 0 : i32
    %c0_i32_1 = arith.constant 0 : i32
    %c0_i32_2 = arith.constant 0 : i32
    return %arg0, %c0_i32, %c0_i32_0, %c0_i32_1 : i32, i32, i32, i32
  }
}

module attributes {stable_mosaic.version = 11 : i64} {
  func.func @_spade0_kernel(%arg0: i32, %arg1: memref<1x16x16x8xf32, #tpu.memory_space<vmem>>, %arg2: memref<1x18x18x16xbf16, #tpu.memory_space<vmem>>, %arg3: memref<9x16x16xbf16, #tpu.memory_space<vmem>>, %arg4: memref<1x16xf32, #tpu.memory_space<vmem>>, %arg5: memref<1x16x16x8xbf16, #tpu.memory_space<vmem>>) attributes {dimension_semantics = [#tpu.dimension_semantics<parallel>], iteration_bounds = array<i64: 2>, scalar_prefetch = 0 : i64, scratch_operands = 0 : i64, tpu.core_type = #tpu.core_type<tc>, window_params = [{transform_indices = @transform_0, window_bounds = array<i64: 1, 16, 16, 8>}, {transform_indices = @transform_1, window_bounds = array<i64: 1, 18, 18, 16>}, {pipeline_mode = #tpu.pipeline_mode<synchronous>, transform_indices = @transform_2, window_bounds = array<i64: 9, 16, 16>}, {pipeline_mode = #tpu.pipeline_mode<synchronous>, transform_indices = @transform_3, window_bounds = array<i64: 1, 16>}, {transform_indices = @transform_4, window_bounds = array<i64: 1, 16, 16, 8>}]} {
    %c0 = arith.constant 0 : index
    %c0_0 = arith.constant 0 : index
    %c0_1 = arith.constant 0 : index
    %c0_2 = arith.constant 0 : index
    %0 = vector.load %arg1[%c0, %c0_0, %c0_1, %c0_2] : memref<1x16x16x8xf32, #tpu.memory_space<vmem>>, vector<1x16x16x8xf32>
    %1 = vector.shape_cast %0 : vector<1x16x16x8xf32> to vector<16x16x8xf32>
    %2 = vector.shape_cast %1 : vector<16x16x8xf32> to vector<256x8xf32>
    %c0_3 = arith.constant 0 : index
    %c0_4 = arith.constant 0 : index
    %c0_5 = arith.constant 0 : index
    %c0_6 = arith.constant 0 : index
    %3 = vector.load %arg2[%c0_3, %c0_4, %c0_5, %c0_6] : memref<1x18x18x16xbf16, #tpu.memory_space<vmem>>, vector<1x18x18x16xbf16>
    %4 = vector.shape_cast %3 : vector<1x18x18x16xbf16> to vector<18x18x16xbf16>
    %5 = arith.extf %4 : vector<18x18x16xbf16> to vector<18x18x16xf32>
    %cst = arith.constant 0.000000e+00 : f32
    %6 = vector.broadcast %cst : f32 to vector<256x16xf32>
    %7 = vector.extract_strided_slice %5 {offsets = [0, 0, 0], sizes = [16, 16, 16], strides = [1, 1, 1]} : vector<18x18x16xf32> to vector<16x16x16xf32>
    %8 = vector.shape_cast %7 : vector<16x16x16xf32> to vector<256x16xf32>
    %9 = arith.truncf %8 : vector<256x16xf32> to vector<256x16xbf16>
    %c0_7 = arith.constant 0 : index
    %c0_8 = arith.constant 0 : index
    %c0_9 = arith.constant 0 : index
    %10 = vector.load %arg3[%c0_7, %c0_8, %c0_9] : memref<9x16x16xbf16, #tpu.memory_space<vmem>>, vector<1x16x16xbf16>
    %11 = vector.shape_cast %10 : vector<1x16x16xbf16> to vector<16x16xbf16>
    %cst_10 = arith.constant dense<0.000000e+00> : vector<256x16xf32>
    %12 = tpu.matmul %9, %11, %cst_10 {dimension_numbers = #tpu.dot_dimension_numbers<[1], [0], [0], [1], [0, 0, 1, 1], [], []>} : vector<256x16xbf16>, vector<16x16xbf16>, vector<256x16xf32> -> vector<256x16xf32>
    %13 = arith.addf %6, %12 : vector<256x16xf32>
    %14 = vector.extract_strided_slice %5 {offsets = [0, 1, 0], sizes = [16, 16, 16], strides = [1, 1, 1]} : vector<18x18x16xf32> to vector<16x16x16xf32>
    %15 = vector.shape_cast %14 : vector<16x16x16xf32> to vector<256x16xf32>
    %16 = arith.truncf %15 : vector<256x16xf32> to vector<256x16xbf16>
    %c1 = arith.constant 1 : index
    %c0_11 = arith.constant 0 : index
    %c0_12 = arith.constant 0 : index
    %17 = vector.load %arg3[%c1, %c0_11, %c0_12] : memref<9x16x16xbf16, #tpu.memory_space<vmem>>, vector<1x16x16xbf16>
    %18 = vector.shape_cast %17 : vector<1x16x16xbf16> to vector<16x16xbf16>
    %cst_13 = arith.constant dense<0.000000e+00> : vector<256x16xf32>
    %19 = tpu.matmul %16, %18, %cst_13 {dimension_numbers = #tpu.dot_dimension_numbers<[1], [0], [0], [1], [0, 0, 1, 1], [], []>} : vector<256x16xbf16>, vector<16x16xbf16>, vector<256x16xf32> -> vector<256x16xf32>
    %20 = arith.addf %13, %19 : vector<256x16xf32>
    %21 = vector.extract_strided_slice %5 {offsets = [0, 2, 0], sizes = [16, 16, 16], strides = [1, 1, 1]} : vector<18x18x16xf32> to vector<16x16x16xf32>
    %22 = vector.shape_cast %21 : vector<16x16x16xf32> to vector<256x16xf32>
    %23 = arith.truncf %22 : vector<256x16xf32> to vector<256x16xbf16>
    %c2 = arith.constant 2 : index
    %c0_14 = arith.constant 0 : index
    %c0_15 = arith.constant 0 : index
    %24 = vector.load %arg3[%c2, %c0_14, %c0_15] : memref<9x16x16xbf16, #tpu.memory_space<vmem>>, vector<1x16x16xbf16>
    %25 = vector.shape_cast %24 : vector<1x16x16xbf16> to vector<16x16xbf16>
    %cst_16 = arith.constant dense<0.000000e+00> : vector<256x16xf32>
    %26 = tpu.matmul %23, %25, %cst_16 {dimension_numbers = #tpu.dot_dimension_numbers<[1], [0], [0], [1], [0, 0, 1, 1], [], []>} : vector<256x16xbf16>, vector<16x16xbf16>, vector<256x16xf32> -> vector<256x16xf32>
    %27 = arith.addf %20, %26 : vector<256x16xf32>
    %28 = vector.extract_strided_slice %5 {offsets = [1, 0, 0], sizes = [16, 16, 16], strides = [1, 1, 1]} : vector<18x18x16xf32> to vector<16x16x16xf32>
    %29 = vector.shape_cast %28 : vector<16x16x16xf32> to vector<256x16xf32>
    %30 = arith.truncf %29 : vector<256x16xf32> to vector<256x16xbf16>
    %c3 = arith.constant 3 : index
    %c0_17 = arith.constant 0 : index
    %c0_18 = arith.constant 0 : index
    %31 = vector.load %arg3[%c3, %c0_17, %c0_18] : memref<9x16x16xbf16, #tpu.memory_space<vmem>>, vector<1x16x16xbf16>
    %32 = vector.shape_cast %31 : vector<1x16x16xbf16> to vector<16x16xbf16>
    %cst_19 = arith.constant dense<0.000000e+00> : vector<256x16xf32>
    %33 = tpu.matmul %30, %32, %cst_19 {dimension_numbers = #tpu.dot_dimension_numbers<[1], [0], [0], [1], [0, 0, 1, 1], [], []>} : vector<256x16xbf16>, vector<16x16xbf16>, vector<256x16xf32> -> vector<256x16xf32>
    %34 = arith.addf %27, %33 : vector<256x16xf32>
    %35 = vector.extract_strided_slice %5 {offsets = [1, 1, 0], sizes = [16, 16, 16], strides = [1, 1, 1]} : vector<18x18x16xf32> to vector<16x16x16xf32>
    %36 = vector.shape_cast %35 : vector<16x16x16xf32> to vector<256x16xf32>
    %37 = arith.truncf %36 : vector<256x16xf32> to vector<256x16xbf16>
    %c4 = arith.constant 4 : index
    %c0_20 = arith.constant 0 : index
    %c0_21 = arith.constant 0 : index
    %38 = vector.load %arg3[%c4, %c0_20, %c0_21] : memref<9x16x16xbf16, #tpu.memory_space<vmem>>, vector<1x16x16xbf16>
    %39 = vector.shape_cast %38 : vector<1x16x16xbf16> to vector<16x16xbf16>
    %cst_22 = arith.constant dense<0.000000e+00> : vector<256x16xf32>
    %40 = tpu.matmul %37, %39, %cst_22 {dimension_numbers = #tpu.dot_dimension_numbers<[1], [0], [0], [1], [0, 0, 1, 1], [], []>} : vector<256x16xbf16>, vector<16x16xbf16>, vector<256x16xf32> -> vector<256x16xf32>
    %41 = arith.addf %34, %40 : vector<256x16xf32>
    %42 = vector.extract_strided_slice %5 {offsets = [1, 2, 0], sizes = [16, 16, 16], strides = [1, 1, 1]} : vector<18x18x16xf32> to vector<16x16x16xf32>
    %43 = vector.shape_cast %42 : vector<16x16x16xf32> to vector<256x16xf32>
    %44 = arith.truncf %43 : vector<256x16xf32> to vector<256x16xbf16>
    %c5 = arith.constant 5 : index
    %c0_23 = arith.constant 0 : index
    %c0_24 = arith.constant 0 : index
    %45 = vector.load %arg3[%c5, %c0_23, %c0_24] : memref<9x16x16xbf16, #tpu.memory_space<vmem>>, vector<1x16x16xbf16>
    %46 = vector.shape_cast %45 : vector<1x16x16xbf16> to vector<16x16xbf16>
    %cst_25 = arith.constant dense<0.000000e+00> : vector<256x16xf32>
    %47 = tpu.matmul %44, %46, %cst_25 {dimension_numbers = #tpu.dot_dimension_numbers<[1], [0], [0], [1], [0, 0, 1, 1], [], []>} : vector<256x16xbf16>, vector<16x16xbf16>, vector<256x16xf32> -> vector<256x16xf32>
    %48 = arith.addf %41, %47 : vector<256x16xf32>
    %49 = vector.extract_strided_slice %5 {offsets = [2, 0, 0], sizes = [16, 16, 16], strides = [1, 1, 1]} : vector<18x18x16xf32> to vector<16x16x16xf32>
    %50 = vector.shape_cast %49 : vector<16x16x16xf32> to vector<256x16xf32>
    %51 = arith.truncf %50 : vector<256x16xf32> to vector<256x16xbf16>
    %c6 = arith.constant 6 : index
    %c0_26 = arith.constant 0 : index
    %c0_27 = arith.constant 0 : index
    %52 = vector.load %arg3[%c6, %c0_26, %c0_27] : memref<9x16x16xbf16, #tpu.memory_space<vmem>>, vector<1x16x16xbf16>
    %53 = vector.shape_cast %52 : vector<1x16x16xbf16> to vector<16x16xbf16>
    %cst_28 = arith.constant dense<0.000000e+00> : vector<256x16xf32>
    %54 = tpu.matmul %51, %53, %cst_28 {dimension_numbers = #tpu.dot_dimension_numbers<[1], [0], [0], [1], [0, 0, 1, 1], [], []>} : vector<256x16xbf16>, vector<16x16xbf16>, vector<256x16xf32> -> vector<256x16xf32>
    %55 = arith.addf %48, %54 : vector<256x16xf32>
    %56 = vector.extract_strided_slice %5 {offsets = [2, 1, 0], sizes = [16, 16, 16], strides = [1, 1, 1]} : vector<18x18x16xf32> to vector<16x16x16xf32>
    %57 = vector.shape_cast %56 : vector<16x16x16xf32> to vector<256x16xf32>
    %58 = arith.truncf %57 : vector<256x16xf32> to vector<256x16xbf16>
    %c7 = arith.constant 7 : index
    %c0_29 = arith.constant 0 : index
    %c0_30 = arith.constant 0 : index
    %59 = vector.load %arg3[%c7, %c0_29, %c0_30] : memref<9x16x16xbf16, #tpu.memory_space<vmem>>, vector<1x16x16xbf16>
    %60 = vector.shape_cast %59 : vector<1x16x16xbf16> to vector<16x16xbf16>
    %cst_31 = arith.constant dense<0.000000e+00> : vector<256x16xf32>
    %61 = tpu.matmul %58, %60, %cst_31 {dimension_numbers = #tpu.dot_dimension_numbers<[1], [0], [0], [1], [0, 0, 1, 1], [], []>} : vector<256x16xbf16>, vector<16x16xbf16>, vector<256x16xf32> -> vector<256x16xf32>
    %62 = arith.addf %55, %61 : vector<256x16xf32>
    %63 = vector.extract_strided_slice %5 {offsets = [2, 2, 0], sizes = [16, 16, 16], strides = [1, 1, 1]} : vector<18x18x16xf32> to vector<16x16x16xf32>
    %64 = vector.shape_cast %63 : vector<16x16x16xf32> to vector<256x16xf32>
    %65 = arith.truncf %64 : vector<256x16xf32> to vector<256x16xbf16>
    %c8 = arith.constant 8 : index
    %c0_32 = arith.constant 0 : index
    %c0_33 = arith.constant 0 : index
    %66 = vector.load %arg3[%c8, %c0_32, %c0_33] : memref<9x16x16xbf16, #tpu.memory_space<vmem>>, vector<1x16x16xbf16>
    %67 = vector.shape_cast %66 : vector<1x16x16xbf16> to vector<16x16xbf16>
    %cst_34 = arith.constant dense<0.000000e+00> : vector<256x16xf32>
    %68 = tpu.matmul %65, %67, %cst_34 {dimension_numbers = #tpu.dot_dimension_numbers<[1], [0], [0], [1], [0, 0, 1, 1], [], []>} : vector<256x16xbf16>, vector<16x16xbf16>, vector<256x16xf32> -> vector<256x16xf32>
    %69 = arith.addf %62, %68 : vector<256x16xf32>
    %c0_35 = arith.constant 0 : index
    %c0_36 = arith.constant 0 : index
    %70 = vector.load %arg4[%c0_35, %c0_36] : memref<1x16xf32, #tpu.memory_space<vmem>>, vector<1x16xf32>
    %71 = vector.shape_cast %70 : vector<1x16xf32> to vector<16xf32>
    %72 = vector.shape_cast %71 : vector<16xf32> to vector<1x16xf32>
    %73 = vector.broadcast %72 : vector<1x16xf32> to vector<256x16xf32>
    %74 = arith.addf %69, %73 : vector<256x16xf32>
    %75 = vector.extract_strided_slice %74 {offsets = [0, 0], sizes = [256, 8], strides = [1, 1]} : vector<256x16xf32> to vector<256x8xf32>
    %76 = vector.extract_strided_slice %74 {offsets = [0, 8], sizes = [256, 8], strides = [1, 1]} : vector<256x16xf32> to vector<256x8xf32>
    %cst_37 = arith.constant dense<0.000000e+00> : vector<8xf32>
    %77 = vector.multi_reduction <add>, %2, %cst_37 [0] : vector<256x8xf32> to vector<8xf32>
    %78 = vector.shape_cast %77 : vector<8xf32> to vector<1x8xf32>
    %cst_38 = arith.constant 2.560000e+02 : f32
    %79 = vector.broadcast %cst_38 : f32 to vector<1x8xf32>
    %80 = arith.divf %78, %79 : vector<1x8xf32>
    %81 = vector.broadcast %80 : vector<1x8xf32> to vector<256x8xf32>
    %82 = arith.subf %2, %81 : vector<256x8xf32>
    %83 = arith.mulf %82, %82 : vector<256x8xf32>
    %cst_39 = arith.constant dense<0.000000e+00> : vector<8xf32>
    %84 = vector.multi_reduction <add>, %83, %cst_39 [0] : vector<256x8xf32> to vector<8xf32>
    %85 = vector.shape_cast %84 : vector<8xf32> to vector<1x8xf32>
    %cst_40 = arith.constant 2.560000e+02 : f32
    %86 = vector.broadcast %cst_40 : f32 to vector<1x8xf32>
    %87 = arith.divf %85, %86 : vector<1x8xf32>
    %88 = vector.broadcast %80 : vector<1x8xf32> to vector<256x8xf32>
    %89 = arith.subf %2, %88 : vector<256x8xf32>
    %cst_41 = arith.constant 9.99999974E-6 : f32
    %90 = vector.broadcast %cst_41 : f32 to vector<1x8xf32>
    %91 = arith.addf %87, %90 : vector<1x8xf32>
    %92 = math.rsqrt %91 : vector<1x8xf32>
    %93 = vector.broadcast %92 : vector<1x8xf32> to vector<256x8xf32>
    %94 = arith.mulf %89, %93 : vector<256x8xf32>
    %cst_42 = arith.constant 1.000000e+00 : f32
    %95 = vector.broadcast %cst_42 : f32 to vector<256x8xf32>
    %96 = arith.addf %95, %75 : vector<256x8xf32>
    %97 = arith.mulf %94, %96 : vector<256x8xf32>
    %98 = arith.addf %97, %76 : vector<256x8xf32>
    %cst_43 = arith.constant 0.000000e+00 : f32
    %99 = vector.broadcast %cst_43 : f32 to vector<256x8xf32>
    %100 = arith.cmpf ogt, %98, %99 : vector<256x8xf32>
    %cst_44 = arith.constant 2.000000e-01 : f32
    %101 = vector.broadcast %cst_44 : f32 to vector<256x8xf32>
    %102 = arith.mulf %101, %98 : vector<256x8xf32>
    %103 = arith.select %100, %98, %102 : vector<256x8xi1>, vector<256x8xf32>
    %104 = vector.shape_cast %103 : vector<256x8xf32> to vector<16x16x8xf32>
    %105 = arith.truncf %104 : vector<16x16x8xf32> to vector<16x16x8xbf16>
    %c0_45 = arith.constant 0 : index
    %c0_46 = arith.constant 0 : index
    %c0_47 = arith.constant 0 : index
    %c0_48 = arith.constant 0 : index
    %106 = vector.load %arg5[%c0_45, %c0_46, %c0_47, %c0_48] : memref<1x16x16x8xbf16, #tpu.memory_space<vmem>>, vector<1x16x16x8xbf16>
    %107 = vector.shape_cast %106 : vector<1x16x16x8xbf16> to vector<16x16x8xbf16>
    %108 = vector.shape_cast %105 : vector<16x16x8xbf16> to vector<1x16x16x8xbf16>
    tpu.vector_store %arg5[%c0_45, %c0_46, %c0_47, %c0_48], %108 {strides = array<i32>} : memref<1x16x16x8xbf16, #tpu.memory_space<vmem>>, vector<1x16x16x8xbf16>,
    return
  }
  func.func @transform_0(%arg0: i32) -> (i32, i32, i32, i32) {
    %c0_i32 = arith.constant 0 : i32
    %c0_i32_0 = arith.constant 0 : i32
    %c0_i32_1 = arith.constant 0 : i32
    %c0_i32_2 = arith.constant 0 : i32
    return %arg0, %c0_i32, %c0_i32_0, %c0_i32_1 : i32, i32, i32, i32
  }
  func.func @transform_1(%arg0: i32) -> (i32, i32, i32, i32) {
    %c0_i32 = arith.constant 0 : i32
    %c0_i32_0 = arith.constant 0 : i32
    %c0_i32_1 = arith.constant 0 : i32
    %c0_i32_2 = arith.constant 0 : i32
    return %arg0, %c0_i32, %c0_i32_0, %c0_i32_1 : i32, i32, i32, i32
  }
  func.func @transform_2(%arg0: i32) -> (i32, i32, i32) {
    %c0_i32 = arith.constant 0 : i32
    %c0_i32_0 = arith.constant 0 : i32
    %c0_i32_1 = arith.constant 0 : i32
    %c0_i32_2 = arith.constant 0 : i32
    return %c0_i32, %c0_i32_0, %c0_i32_1 : i32, i32, i32
  }
  func.func @transform_3(%arg0: i32) -> (i32, i32) {
    %c0_i32 = arith.constant 0 : i32
    %c0_i32_0 = arith.constant 0 : i32
    %c0_i32_1 = arith.constant 0 : i32
    return %c0_i32, %c0_i32_0 : i32, i32
  }
  func.func @transform_4(%arg0: i32) -> (i32, i32, i32, i32) {
    %c0_i32 = arith.constant 0 : i32
    %c0_i32_0 = arith.constant 0 : i32
    %c0_i32_1 = arith.constant 0 : i32
    %c0_i32_2 = arith.constant 0 : i32
    return %arg0, %c0_i32, %c0_i32_0, %c0_i32_1 : i32, i32, i32, i32
  }
}

module attributes {stable_mosaic.version = 11 : i64} {
  func.func @_conv_spade_kernel(%arg0: i32, %arg1: memref<1x18x18x8xbf16, #tpu.memory_space<vmem>>, %arg2: memref<1x18x18x16xbf16, #tpu.memory_space<vmem>>, %arg3: memref<9x8x4xbf16, #tpu.memory_space<vmem>>, %arg4: memref<1x4xf32, #tpu.memory_space<vmem>>, %arg5: memref<9x16x8xbf16, #tpu.memory_space<vmem>>, %arg6: memref<1x8xf32, #tpu.memory_space<vmem>>, %arg7: memref<1x16x16x4xbf16, #tpu.memory_space<vmem>>) attributes {dimension_semantics = [#tpu.dimension_semantics<parallel>], iteration_bounds = array<i64: 2>, scalar_prefetch = 0 : i64, scratch_operands = 0 : i64, tpu.core_type = #tpu.core_type<tc>, window_params = [{transform_indices = @transform_0, window_bounds = array<i64: 1, 18, 18, 8>}, {transform_indices = @transform_1, window_bounds = array<i64: 1, 18, 18, 16>}, {pipeline_mode = #tpu.pipeline_mode<synchronous>, transform_indices = @transform_2, window_bounds = array<i64: 9, 8, 4>}, {pipeline_mode = #tpu.pipeline_mode<synchronous>, transform_indices = @transform_3, window_bounds = array<i64: 1, 4>}, {pipeline_mode = #tpu.pipeline_mode<synchronous>, transform_indices = @transform_4, window_bounds = array<i64: 9, 16, 8>}, {pipeline_mode = #tpu.pipeline_mode<synchronous>, transform_indices = @transform_5, window_bounds = array<i64: 1, 8>}, {transform_indices = @transform_6, window_bounds = array<i64: 1, 16, 16, 4>}]} {
    %c0 = arith.constant 0 : index
    %c0_0 = arith.constant 0 : index
    %c0_1 = arith.constant 0 : index
    %c0_2 = arith.constant 0 : index
    %0 = vector.load %arg1[%c0, %c0_0, %c0_1, %c0_2] : memref<1x18x18x8xbf16, #tpu.memory_space<vmem>>, vector<1x18x18x8xbf16>
    %1 = vector.shape_cast %0 : vector<1x18x18x8xbf16> to vector<18x18x8xbf16>
    %2 = arith.extf %1 : vector<18x18x8xbf16> to vector<18x18x8xf32>
    %cst = arith.constant 0.000000e+00 : f32
    %3 = vector.broadcast %cst : f32 to vector<256x4xf32>
    %4 = vector.extract_strided_slice %2 {offsets = [0, 0, 0], sizes = [16, 16, 8], strides = [1, 1, 1]} : vector<18x18x8xf32> to vector<16x16x8xf32>
    %5 = vector.shape_cast %4 : vector<16x16x8xf32> to vector<256x8xf32>
    %6 = arith.truncf %5 : vector<256x8xf32> to vector<256x8xbf16>
    %c0_3 = arith.constant 0 : index
    %c0_4 = arith.constant 0 : index
    %c0_5 = arith.constant 0 : index
    %7 = vector.load %arg3[%c0_3, %c0_4, %c0_5] : memref<9x8x4xbf16, #tpu.memory_space<vmem>>, vector<1x8x4xbf16>
    %8 = vector.shape_cast %7 : vector<1x8x4xbf16> to vector<8x4xbf16>
    %cst_6 = arith.constant dense<0.000000e+00> : vector<256x4xf32>
    %9 = tpu.matmul %6, %8, %cst_6 {dimension_numbers = #tpu.dot_dimension_numbers<[1], [0], [0], [1], [0, 0, 1, 1], [], []>} : vector<256x8xbf16>, vector<8x4xbf16>, vector<256x4xf32> -> vector<256x4xf32>
    %10 = arith.addf %3, %9 : vector<256x4xf32>
    %11 = vector.extract_strided_slice %2 {offsets = [0, 1, 0], sizes = [16, 16, 8], strides = [1, 1, 1]} : vector<18x18x8xf32> to vector<16x16x8xf32>
    %12 = vector.shape_cast %11 : vector<16x16x8xf32> to vector<256x8xf32>
    %13 = arith.truncf %12 : vector<256x8xf32> to vector<256x8xbf16>
    %c1 = arith.constant 1 : index
    %c0_7 = arith.constant 0 : index
    %c0_8 = arith.constant 0 : index
    %14 = vector.load %arg3[%c1, %c0_7, %c0_8] : memref<9x8x4xbf16, #tpu.memory_space<vmem>>, vector<1x8x4xbf16>
    %15 = vector.shape_cast %14 : vector<1x8x4xbf16> to vector<8x4xbf16>
    %cst_9 = arith.constant dense<0.000000e+00> : vector<256x4xf32>
    %16 = tpu.matmul %13, %15, %cst_9 {dimension_numbers = #tpu.dot_dimension_numbers<[1], [0], [0], [1], [0, 0, 1, 1], [], []>} : vector<256x8xbf16>, vector<8x4xbf16>, vector<256x4xf32> -> vector<256x4xf32>
    %17 = arith.addf %10, %16 : vector<256x4xf32>
    %18 = vector.extract_strided_slice %2 {offsets = [0, 2, 0], sizes = [16, 16, 8], strides = [1, 1, 1]} : vector<18x18x8xf32> to vector<16x16x8xf32>
    %19 = vector.shape_cast %18 : vector<16x16x8xf32> to vector<256x8xf32>
    %20 = arith.truncf %19 : vector<256x8xf32> to vector<256x8xbf16>
    %c2 = arith.constant 2 : index
    %c0_10 = arith.constant 0 : index
    %c0_11 = arith.constant 0 : index
    %21 = vector.load %arg3[%c2, %c0_10, %c0_11] : memref<9x8x4xbf16, #tpu.memory_space<vmem>>, vector<1x8x4xbf16>
    %22 = vector.shape_cast %21 : vector<1x8x4xbf16> to vector<8x4xbf16>
    %cst_12 = arith.constant dense<0.000000e+00> : vector<256x4xf32>
    %23 = tpu.matmul %20, %22, %cst_12 {dimension_numbers = #tpu.dot_dimension_numbers<[1], [0], [0], [1], [0, 0, 1, 1], [], []>} : vector<256x8xbf16>, vector<8x4xbf16>, vector<256x4xf32> -> vector<256x4xf32>
    %24 = arith.addf %17, %23 : vector<256x4xf32>
    %25 = vector.extract_strided_slice %2 {offsets = [1, 0, 0], sizes = [16, 16, 8], strides = [1, 1, 1]} : vector<18x18x8xf32> to vector<16x16x8xf32>
    %26 = vector.shape_cast %25 : vector<16x16x8xf32> to vector<256x8xf32>
    %27 = arith.truncf %26 : vector<256x8xf32> to vector<256x8xbf16>
    %c3 = arith.constant 3 : index
    %c0_13 = arith.constant 0 : index
    %c0_14 = arith.constant 0 : index
    %28 = vector.load %arg3[%c3, %c0_13, %c0_14] : memref<9x8x4xbf16, #tpu.memory_space<vmem>>, vector<1x8x4xbf16>
    %29 = vector.shape_cast %28 : vector<1x8x4xbf16> to vector<8x4xbf16>
    %cst_15 = arith.constant dense<0.000000e+00> : vector<256x4xf32>
    %30 = tpu.matmul %27, %29, %cst_15 {dimension_numbers = #tpu.dot_dimension_numbers<[1], [0], [0], [1], [0, 0, 1, 1], [], []>} : vector<256x8xbf16>, vector<8x4xbf16>, vector<256x4xf32> -> vector<256x4xf32>
    %31 = arith.addf %24, %30 : vector<256x4xf32>
    %32 = vector.extract_strided_slice %2 {offsets = [1, 1, 0], sizes = [16, 16, 8], strides = [1, 1, 1]} : vector<18x18x8xf32> to vector<16x16x8xf32>
    %33 = vector.shape_cast %32 : vector<16x16x8xf32> to vector<256x8xf32>
    %34 = arith.truncf %33 : vector<256x8xf32> to vector<256x8xbf16>
    %c4 = arith.constant 4 : index
    %c0_16 = arith.constant 0 : index
    %c0_17 = arith.constant 0 : index
    %35 = vector.load %arg3[%c4, %c0_16, %c0_17] : memref<9x8x4xbf16, #tpu.memory_space<vmem>>, vector<1x8x4xbf16>
    %36 = vector.shape_cast %35 : vector<1x8x4xbf16> to vector<8x4xbf16>
    %cst_18 = arith.constant dense<0.000000e+00> : vector<256x4xf32>
    %37 = tpu.matmul %34, %36, %cst_18 {dimension_numbers = #tpu.dot_dimension_numbers<[1], [0], [0], [1], [0, 0, 1, 1], [], []>} : vector<256x8xbf16>, vector<8x4xbf16>, vector<256x4xf32> -> vector<256x4xf32>
    %38 = arith.addf %31, %37 : vector<256x4xf32>
    %39 = vector.extract_strided_slice %2 {offsets = [1, 2, 0], sizes = [16, 16, 8], strides = [1, 1, 1]} : vector<18x18x8xf32> to vector<16x16x8xf32>
    %40 = vector.shape_cast %39 : vector<16x16x8xf32> to vector<256x8xf32>
    %41 = arith.truncf %40 : vector<256x8xf32> to vector<256x8xbf16>
    %c5 = arith.constant 5 : index
    %c0_19 = arith.constant 0 : index
    %c0_20 = arith.constant 0 : index
    %42 = vector.load %arg3[%c5, %c0_19, %c0_20] : memref<9x8x4xbf16, #tpu.memory_space<vmem>>, vector<1x8x4xbf16>
    %43 = vector.shape_cast %42 : vector<1x8x4xbf16> to vector<8x4xbf16>
    %cst_21 = arith.constant dense<0.000000e+00> : vector<256x4xf32>
    %44 = tpu.matmul %41, %43, %cst_21 {dimension_numbers = #tpu.dot_dimension_numbers<[1], [0], [0], [1], [0, 0, 1, 1], [], []>} : vector<256x8xbf16>, vector<8x4xbf16>, vector<256x4xf32> -> vector<256x4xf32>
    %45 = arith.addf %38, %44 : vector<256x4xf32>
    %46 = vector.extract_strided_slice %2 {offsets = [2, 0, 0], sizes = [16, 16, 8], strides = [1, 1, 1]} : vector<18x18x8xf32> to vector<16x16x8xf32>
    %47 = vector.shape_cast %46 : vector<16x16x8xf32> to vector<256x8xf32>
    %48 = arith.truncf %47 : vector<256x8xf32> to vector<256x8xbf16>
    %c6 = arith.constant 6 : index
    %c0_22 = arith.constant 0 : index
    %c0_23 = arith.constant 0 : index
    %49 = vector.load %arg3[%c6, %c0_22, %c0_23] : memref<9x8x4xbf16, #tpu.memory_space<vmem>>, vector<1x8x4xbf16>
    %50 = vector.shape_cast %49 : vector<1x8x4xbf16> to vector<8x4xbf16>
    %cst_24 = arith.constant dense<0.000000e+00> : vector<256x4xf32>
    %51 = tpu.matmul %48, %50, %cst_24 {dimension_numbers = #tpu.dot_dimension_numbers<[1], [0], [0], [1], [0, 0, 1, 1], [], []>} : vector<256x8xbf16>, vector<8x4xbf16>, vector<256x4xf32> -> vector<256x4xf32>
    %52 = arith.addf %45, %51 : vector<256x4xf32>
    %53 = vector.extract_strided_slice %2 {offsets = [2, 1, 0], sizes = [16, 16, 8], strides = [1, 1, 1]} : vector<18x18x8xf32> to vector<16x16x8xf32>
    %54 = vector.shape_cast %53 : vector<16x16x8xf32> to vector<256x8xf32>
    %55 = arith.truncf %54 : vector<256x8xf32> to vector<256x8xbf16>
    %c7 = arith.constant 7 : index
    %c0_25 = arith.constant 0 : index
    %c0_26 = arith.constant 0 : index
    %56 = vector.load %arg3[%c7, %c0_25, %c0_26] : memref<9x8x4xbf16, #tpu.memory_space<vmem>>, vector<1x8x4xbf16>
    %57 = vector.shape_cast %56 : vector<1x8x4xbf16> to vector<8x4xbf16>
    %cst_27 = arith.constant dense<0.000000e+00> : vector<256x4xf32>
    %58 = tpu.matmul %55, %57, %cst_27 {dimension_numbers = #tpu.dot_dimension_numbers<[1], [0], [0], [1], [0, 0, 1, 1], [], []>} : vector<256x8xbf16>, vector<8x4xbf16>, vector<256x4xf32> -> vector<256x4xf32>
    %59 = arith.addf %52, %58 : vector<256x4xf32>
    %60 = vector.extract_strided_slice %2 {offsets = [2, 2, 0], sizes = [16, 16, 8], strides = [1, 1, 1]} : vector<18x18x8xf32> to vector<16x16x8xf32>
    %61 = vector.shape_cast %60 : vector<16x16x8xf32> to vector<256x8xf32>
    %62 = arith.truncf %61 : vector<256x8xf32> to vector<256x8xbf16>
    %c8 = arith.constant 8 : index
    %c0_28 = arith.constant 0 : index
    %c0_29 = arith.constant 0 : index
    %63 = vector.load %arg3[%c8, %c0_28, %c0_29] : memref<9x8x4xbf16, #tpu.memory_space<vmem>>, vector<1x8x4xbf16>
    %64 = vector.shape_cast %63 : vector<1x8x4xbf16> to vector<8x4xbf16>
    %cst_30 = arith.constant dense<0.000000e+00> : vector<256x4xf32>
    %65 = tpu.matmul %62, %64, %cst_30 {dimension_numbers = #tpu.dot_dimension_numbers<[1], [0], [0], [1], [0, 0, 1, 1], [], []>} : vector<256x8xbf16>, vector<8x4xbf16>, vector<256x4xf32> -> vector<256x4xf32>
    %66 = arith.addf %59, %65 : vector<256x4xf32>
    %c0_31 = arith.constant 0 : index
    %c0_32 = arith.constant 0 : index
    %67 = vector.load %arg4[%c0_31, %c0_32] : memref<1x4xf32, #tpu.memory_space<vmem>>, vector<1x4xf32>
    %68 = vector.shape_cast %67 : vector<1x4xf32> to vector<4xf32>
    %69 = vector.shape_cast %68 : vector<4xf32> to vector<1x4xf32>
    %70 = vector.broadcast %69 : vector<1x4xf32> to vector<256x4xf32>
    %71 = arith.addf %66, %70 : vector<256x4xf32>
    %c0_33 = arith.constant 0 : index
    %c0_34 = arith.constant 0 : index
    %c0_35 = arith.constant 0 : index
    %c0_36 = arith.constant 0 : index
    %72 = vector.load %arg2[%c0_33, %c0_34, %c0_35, %c0_36] : memref<1x18x18x16xbf16, #tpu.memory_space<vmem>>, vector<1x18x18x16xbf16>
    %73 = vector.shape_cast %72 : vector<1x18x18x16xbf16> to vector<18x18x16xbf16>
    %74 = arith.extf %73 : vector<18x18x16xbf16> to vector<18x18x16xf32>
    %cst_37 = arith.constant 0.000000e+00 : f32
    %75 = vector.broadcast %cst_37 : f32 to vector<256x8xf32>
    %76 = vector.extract_strided_slice %74 {offsets = [0, 0, 0], sizes = [16, 16, 16], strides = [1, 1, 1]} : vector<18x18x16xf32> to vector<16x16x16xf32>
    %77 = vector.shape_cast %76 : vector<16x16x16xf32> to vector<256x16xf32>
    %78 = arith.truncf %77 : vector<256x16xf32> to vector<256x16xbf16>
    %c0_38 = arith.constant 0 : index
    %c0_39 = arith.constant 0 : index
    %c0_40 = arith.constant 0 : index
    %79 = vector.load %arg5[%c0_38, %c0_39, %c0_40] : memref<9x16x8xbf16, #tpu.memory_space<vmem>>, vector<1x16x8xbf16>
    %80 = vector.shape_cast %79 : vector<1x16x8xbf16> to vector<16x8xbf16>
    %cst_41 = arith.constant dense<0.000000e+00> : vector<256x8xf32>
    %81 = tpu.matmul %78, %80, %cst_41 {dimension_numbers = #tpu.dot_dimension_numbers<[1], [0], [0], [1], [0, 0, 1, 1], [], []>} : vector<256x16xbf16>, vector<16x8xbf16>, vector<256x8xf32> -> vector<256x8xf32>
    %82 = arith.addf %75, %81 : vector<256x8xf32>
    %83 = vector.extract_strided_slice %74 {offsets = [0, 1, 0], sizes = [16, 16, 16], strides = [1, 1, 1]} : vector<18x18x16xf32> to vector<16x16x16xf32>
    %84 = vector.shape_cast %83 : vector<16x16x16xf32> to vector<256x16xf32>
    %85 = arith.truncf %84 : vector<256x16xf32> to vector<256x16xbf16>
    %c1_42 = arith.constant 1 : index
    %c0_43 = arith.constant 0 : index
    %c0_44 = arith.constant 0 : index
    %86 = vector.load %arg5[%c1_42, %c0_43, %c0_44] : memref<9x16x8xbf16, #tpu.memory_space<vmem>>, vector<1x16x8xbf16>
    %87 = vector.shape_cast %86 : vector<1x16x8xbf16> to vector<16x8xbf16>
    %cst_45 = arith.constant dense<0.000000e+00> : vector<256x8xf32>
    %88 = tpu.matmul %85, %87, %cst_45 {dimension_numbers = #tpu.dot_dimension_numbers<[1], [0], [0], [1], [0, 0, 1, 1], [], []>} : vector<256x16xbf16>, vector<16x8xbf16>, vector<256x8xf32> -> vector<256x8xf32>
    %89 = arith.addf %82, %88 : vector<256x8xf32>
    %90 = vector.extract_strided_slice %74 {offsets = [0, 2, 0], sizes = [16, 16, 16], strides = [1, 1, 1]} : vector<18x18x16xf32> to vector<16x16x16xf32>
    %91 = vector.shape_cast %90 : vector<16x16x16xf32> to vector<256x16xf32>
    %92 = arith.truncf %91 : vector<256x16xf32> to vector<256x16xbf16>
    %c2_46 = arith.constant 2 : index
    %c0_47 = arith.constant 0 : index
    %c0_48 = arith.constant 0 : index
    %93 = vector.load %arg5[%c2_46, %c0_47, %c0_48] : memref<9x16x8xbf16, #tpu.memory_space<vmem>>, vector<1x16x8xbf16>
    %94 = vector.shape_cast %93 : vector<1x16x8xbf16> to vector<16x8xbf16>
    %cst_49 = arith.constant dense<0.000000e+00> : vector<256x8xf32>
    %95 = tpu.matmul %92, %94, %cst_49 {dimension_numbers = #tpu.dot_dimension_numbers<[1], [0], [0], [1], [0, 0, 1, 1], [], []>} : vector<256x16xbf16>, vector<16x8xbf16>, vector<256x8xf32> -> vector<256x8xf32>
    %96 = arith.addf %89, %95 : vector<256x8xf32>
    %97 = vector.extract_strided_slice %74 {offsets = [1, 0, 0], sizes = [16, 16, 16], strides = [1, 1, 1]} : vector<18x18x16xf32> to vector<16x16x16xf32>
    %98 = vector.shape_cast %97 : vector<16x16x16xf32> to vector<256x16xf32>
    %99 = arith.truncf %98 : vector<256x16xf32> to vector<256x16xbf16>
    %c3_50 = arith.constant 3 : index
    %c0_51 = arith.constant 0 : index
    %c0_52 = arith.constant 0 : index
    %100 = vector.load %arg5[%c3_50, %c0_51, %c0_52] : memref<9x16x8xbf16, #tpu.memory_space<vmem>>, vector<1x16x8xbf16>
    %101 = vector.shape_cast %100 : vector<1x16x8xbf16> to vector<16x8xbf16>
    %cst_53 = arith.constant dense<0.000000e+00> : vector<256x8xf32>
    %102 = tpu.matmul %99, %101, %cst_53 {dimension_numbers = #tpu.dot_dimension_numbers<[1], [0], [0], [1], [0, 0, 1, 1], [], []>} : vector<256x16xbf16>, vector<16x8xbf16>, vector<256x8xf32> -> vector<256x8xf32>
    %103 = arith.addf %96, %102 : vector<256x8xf32>
    %104 = vector.extract_strided_slice %74 {offsets = [1, 1, 0], sizes = [16, 16, 16], strides = [1, 1, 1]} : vector<18x18x16xf32> to vector<16x16x16xf32>
    %105 = vector.shape_cast %104 : vector<16x16x16xf32> to vector<256x16xf32>
    %106 = arith.truncf %105 : vector<256x16xf32> to vector<256x16xbf16>
    %c4_54 = arith.constant 4 : index
    %c0_55 = arith.constant 0 : index
    %c0_56 = arith.constant 0 : index
    %107 = vector.load %arg5[%c4_54, %c0_55, %c0_56] : memref<9x16x8xbf16, #tpu.memory_space<vmem>>, vector<1x16x8xbf16>
    %108 = vector.shape_cast %107 : vector<1x16x8xbf16> to vector<16x8xbf16>
    %cst_57 = arith.constant dense<0.000000e+00> : vector<256x8xf32>
    %109 = tpu.matmul %106, %108, %cst_57 {dimension_numbers = #tpu.dot_dimension_numbers<[1], [0], [0], [1], [0, 0, 1, 1], [], []>} : vector<256x16xbf16>, vector<16x8xbf16>, vector<256x8xf32> -> vector<256x8xf32>
    %110 = arith.addf %103, %109 : vector<256x8xf32>
    %111 = vector.extract_strided_slice %74 {offsets = [1, 2, 0], sizes = [16, 16, 16], strides = [1, 1, 1]} : vector<18x18x16xf32> to vector<16x16x16xf32>
    %112 = vector.shape_cast %111 : vector<16x16x16xf32> to vector<256x16xf32>
    %113 = arith.truncf %112 : vector<256x16xf32> to vector<256x16xbf16>
    %c5_58 = arith.constant 5 : index
    %c0_59 = arith.constant 0 : index
    %c0_60 = arith.constant 0 : index
    %114 = vector.load %arg5[%c5_58, %c0_59, %c0_60] : memref<9x16x8xbf16, #tpu.memory_space<vmem>>, vector<1x16x8xbf16>
    %115 = vector.shape_cast %114 : vector<1x16x8xbf16> to vector<16x8xbf16>
    %cst_61 = arith.constant dense<0.000000e+00> : vector<256x8xf32>
    %116 = tpu.matmul %113, %115, %cst_61 {dimension_numbers = #tpu.dot_dimension_numbers<[1], [0], [0], [1], [0, 0, 1, 1], [], []>} : vector<256x16xbf16>, vector<16x8xbf16>, vector<256x8xf32> -> vector<256x8xf32>
    %117 = arith.addf %110, %116 : vector<256x8xf32>
    %118 = vector.extract_strided_slice %74 {offsets = [2, 0, 0], sizes = [16, 16, 16], strides = [1, 1, 1]} : vector<18x18x16xf32> to vector<16x16x16xf32>
    %119 = vector.shape_cast %118 : vector<16x16x16xf32> to vector<256x16xf32>
    %120 = arith.truncf %119 : vector<256x16xf32> to vector<256x16xbf16>
    %c6_62 = arith.constant 6 : index
    %c0_63 = arith.constant 0 : index
    %c0_64 = arith.constant 0 : index
    %121 = vector.load %arg5[%c6_62, %c0_63, %c0_64] : memref<9x16x8xbf16, #tpu.memory_space<vmem>>, vector<1x16x8xbf16>
    %122 = vector.shape_cast %121 : vector<1x16x8xbf16> to vector<16x8xbf16>
    %cst_65 = arith.constant dense<0.000000e+00> : vector<256x8xf32>
    %123 = tpu.matmul %120, %122, %cst_65 {dimension_numbers = #tpu.dot_dimension_numbers<[1], [0], [0], [1], [0, 0, 1, 1], [], []>} : vector<256x16xbf16>, vector<16x8xbf16>, vector<256x8xf32> -> vector<256x8xf32>
    %124 = arith.addf %117, %123 : vector<256x8xf32>
    %125 = vector.extract_strided_slice %74 {offsets = [2, 1, 0], sizes = [16, 16, 16], strides = [1, 1, 1]} : vector<18x18x16xf32> to vector<16x16x16xf32>
    %126 = vector.shape_cast %125 : vector<16x16x16xf32> to vector<256x16xf32>
    %127 = arith.truncf %126 : vector<256x16xf32> to vector<256x16xbf16>
    %c7_66 = arith.constant 7 : index
    %c0_67 = arith.constant 0 : index
    %c0_68 = arith.constant 0 : index
    %128 = vector.load %arg5[%c7_66, %c0_67, %c0_68] : memref<9x16x8xbf16, #tpu.memory_space<vmem>>, vector<1x16x8xbf16>
    %129 = vector.shape_cast %128 : vector<1x16x8xbf16> to vector<16x8xbf16>
    %cst_69 = arith.constant dense<0.000000e+00> : vector<256x8xf32>
    %130 = tpu.matmul %127, %129, %cst_69 {dimension_numbers = #tpu.dot_dimension_numbers<[1], [0], [0], [1], [0, 0, 1, 1], [], []>} : vector<256x16xbf16>, vector<16x8xbf16>, vector<256x8xf32> -> vector<256x8xf32>
    %131 = arith.addf %124, %130 : vector<256x8xf32>
    %132 = vector.extract_strided_slice %74 {offsets = [2, 2, 0], sizes = [16, 16, 16], strides = [1, 1, 1]} : vector<18x18x16xf32> to vector<16x16x16xf32>
    %133 = vector.shape_cast %132 : vector<16x16x16xf32> to vector<256x16xf32>
    %134 = arith.truncf %133 : vector<256x16xf32> to vector<256x16xbf16>
    %c8_70 = arith.constant 8 : index
    %c0_71 = arith.constant 0 : index
    %c0_72 = arith.constant 0 : index
    %135 = vector.load %arg5[%c8_70, %c0_71, %c0_72] : memref<9x16x8xbf16, #tpu.memory_space<vmem>>, vector<1x16x8xbf16>
    %136 = vector.shape_cast %135 : vector<1x16x8xbf16> to vector<16x8xbf16>
    %cst_73 = arith.constant dense<0.000000e+00> : vector<256x8xf32>
    %137 = tpu.matmul %134, %136, %cst_73 {dimension_numbers = #tpu.dot_dimension_numbers<[1], [0], [0], [1], [0, 0, 1, 1], [], []>} : vector<256x16xbf16>, vector<16x8xbf16>, vector<256x8xf32> -> vector<256x8xf32>
    %138 = arith.addf %131, %137 : vector<256x8xf32>
    %c0_74 = arith.constant 0 : index
    %c0_75 = arith.constant 0 : index
    %139 = vector.load %arg6[%c0_74, %c0_75] : memref<1x8xf32, #tpu.memory_space<vmem>>, vector<1x8xf32>
    %140 = vector.shape_cast %139 : vector<1x8xf32> to vector<8xf32>
    %141 = vector.shape_cast %140 : vector<8xf32> to vector<1x8xf32>
    %142 = vector.broadcast %141 : vector<1x8xf32> to vector<256x8xf32>
    %143 = arith.addf %138, %142 : vector<256x8xf32>
    %144 = vector.extract_strided_slice %143 {offsets = [0, 0], sizes = [256, 4], strides = [1, 1]} : vector<256x8xf32> to vector<256x4xf32>
    %145 = vector.extract_strided_slice %143 {offsets = [0, 4], sizes = [256, 4], strides = [1, 1]} : vector<256x8xf32> to vector<256x4xf32>
    %cst_76 = arith.constant dense<0.000000e+00> : vector<4xf32>
    %146 = vector.multi_reduction <add>, %71, %cst_76 [0] : vector<256x4xf32> to vector<4xf32>
    %147 = vector.shape_cast %146 : vector<4xf32> to vector<1x4xf32>
    %cst_77 = arith.constant 2.560000e+02 : f32
    %148 = vector.broadcast %cst_77 : f32 to vector<1x4xf32>
    %149 = arith.divf %147, %148 : vector<1x4xf32>
    %150 = vector.broadcast %149 : vector<1x4xf32> to vector<256x4xf32>
    %151 = arith.subf %71, %150 : vector<256x4xf32>
    %152 = arith.mulf %151, %151 : vector<256x4xf32>
    %cst_78 = arith.constant dense<0.000000e+00> : vector<4xf32>
    %153 = vector.multi_reduction <add>, %152, %cst_78 [0] : vector<256x4xf32> to vector<4xf32>
    %154 = vector.shape_cast %153 : vector<4xf32> to vector<1x4xf32>
    %cst_79 = arith.constant 2.560000e+02 : f32
    %155 = vector.broadcast %cst_79 : f32 to vector<1x4xf32>
    %156 = arith.divf %154, %155 : vector<1x4xf32>
    %157 = vector.broadcast %149 : vector<1x4xf32> to vector<256x4xf32>
    %158 = arith.subf %71, %157 : vector<256x4xf32>
    %cst_80 = arith.constant 9.99999974E-6 : f32
    %159 = vector.broadcast %cst_80 : f32 to vector<1x4xf32>
    %160 = arith.addf %156, %159 : vector<1x4xf32>
    %161 = math.rsqrt %160 : vector<1x4xf32>
    %162 = vector.broadcast %161 : vector<1x4xf32> to vector<256x4xf32>
    %163 = arith.mulf %158, %162 : vector<256x4xf32>
    %cst_81 = arith.constant 1.000000e+00 : f32
    %164 = vector.broadcast %cst_81 : f32 to vector<256x4xf32>
    %165 = arith.addf %164, %144 : vector<256x4xf32>
    %166 = arith.mulf %163, %165 : vector<256x4xf32>
    %167 = arith.addf %166, %145 : vector<256x4xf32>
    %cst_82 = arith.constant 0.000000e+00 : f32
    %168 = vector.broadcast %cst_82 : f32 to vector<256x4xf32>
    %169 = arith.cmpf ogt, %167, %168 : vector<256x4xf32>
    %cst_83 = arith.constant 2.000000e-01 : f32
    %170 = vector.broadcast %cst_83 : f32 to vector<256x4xf32>
    %171 = arith.mulf %170, %167 : vector<256x4xf32>
    %172 = arith.select %169, %167, %171 : vector<256x4xi1>, vector<256x4xf32>
    %173 = vector.shape_cast %172 : vector<256x4xf32> to vector<16x16x4xf32>
    %174 = arith.truncf %173 : vector<16x16x4xf32> to vector<16x16x4xbf16>
    %c0_84 = arith.constant 0 : index
    %c0_85 = arith.constant 0 : index
    %c0_86 = arith.constant 0 : index
    %c0_87 = arith.constant 0 : index
    %175 = vector.load %arg7[%c0_84, %c0_85, %c0_86, %c0_87] : memref<1x16x16x4xbf16, #tpu.memory_space<vmem>>, vector<1x16x16x4xbf16>
    %176 = vector.shape_cast %175 : vector<1x16x16x4xbf16> to vector<16x16x4xbf16>
    %177 = vector.shape_cast %174 : vector<16x16x4xbf16> to vector<1x16x16x4xbf16>
    tpu.vector_store %arg7[%c0_84, %c0_85, %c0_86, %c0_87], %177 {strides = array<i32>} : memref<1x16x16x4xbf16, #tpu.memory_space<vmem>>, vector<1x16x16x4xbf16>,
    return
  }
  func.func @transform_0(%arg0: i32) -> (i32, i32, i32, i32) {
    %c0_i32 = arith.constant 0 : i32
    %c0_i32_0 = arith.constant 0 : i32
    %c0_i32_1 = arith.constant 0 : i32
    %c0_i32_2 = arith.constant 0 : i32
    return %arg0, %c0_i32, %c0_i32_0, %c0_i32_1 : i32, i32, i32, i32
  }
  func.func @transform_1(%arg0: i32) -> (i32, i32, i32, i32) {
    %c0_i32 = arith.constant 0 : i32
    %c0_i32_0 = arith.constant 0 : i32
    %c0_i32_1 = arith.constant 0 : i32
    %c0_i32_2 = arith.constant 0 : i32
    return %arg0, %c0_i32, %c0_i32_0, %c0_i32_1 : i32, i32, i32, i32
  }
  func.func @transform_2(%arg0: i32) -> (i32, i32, i32) {
    %c0_i32 = arith.constant 0 : i32
    %c0_i32_0 = arith.constant 0 : i32
    %c0_i32_1 = arith.constant 0 : i32
    %c0_i32_2 = arith.constant 0 : i32
    return %c0_i32, %c0_i32_0, %c0_i32_1 : i32, i32, i32
  }
  func.func @transform_3(%arg0: i32) -> (i32, i32) {
    %c0_i32 = arith.constant 0 : i32
    %c0_i32_0 = arith.constant 0 : i32
    %c0_i32_1 = arith.constant 0 : i32
    return %c0_i32, %c0_i32_0 : i32, i32
  }
  func.func @transform_4(%arg0: i32) -> (i32, i32, i32) {
    %c0_i32 = arith.constant 0 : i32
    %c0_i32_0 = arith.constant 0 : i32
    %c0_i32_1 = arith.constant 0 : i32
    %c0_i32_2 = arith.constant 0 : i32
    return %c0_i32, %c0_i32_0, %c0_i32_1 : i32, i32, i32
  }
  func.func @transform_5(%arg0: i32) -> (i32, i32) {
    %c0_i32 = arith.constant 0 : i32
    %c0_i32_0 = arith.constant 0 : i32
    %c0_i32_1 = arith.constant 0 : i32
    return %c0_i32, %c0_i32_0 : i32, i32
  }
  func.func @transform_6(%arg0: i32) -> (i32, i32, i32, i32) {
    %c0_i32 = arith.constant 0 : i32
    %c0_i32_0 = arith.constant 0 : i32
    %c0_i32_1 = arith.constant 0 : i32
    %c0_i32_2 = arith.constant 0 : i32
    return %arg0, %c0_i32, %c0_i32_0, %c0_i32_1 : i32, i32, i32, i32
  }
}

module attributes {stable_mosaic.version = 11 : i64} {
  func.func @_final_kernel(%arg0: i32, %arg1: memref<1x18x18x4xbf16, #tpu.memory_space<vmem>>, %arg2: memref<1x16x16x8xf32, #tpu.memory_space<vmem>>, %arg3: memref<1x18x18x16xbf16, #tpu.memory_space<vmem>>, %arg4: memref<9x4x4xbf16, #tpu.memory_space<vmem>>, %arg5: memref<1x4xf32, #tpu.memory_space<vmem>>, %arg6: memref<9x16x16xbf16, #tpu.memory_space<vmem>>, %arg7: memref<1x16xf32, #tpu.memory_space<vmem>>, %arg8: memref<8x4xbf16, #tpu.memory_space<vmem>>, %arg9: memref<1x16x16x4xf32, #tpu.memory_space<vmem>>) attributes {dimension_semantics = [#tpu.dimension_semantics<parallel>], iteration_bounds = array<i64: 2>, scalar_prefetch = 0 : i64, scratch_operands = 0 : i64, tpu.core_type = #tpu.core_type<tc>, window_params = [{transform_indices = @transform_0, window_bounds = array<i64: 1, 18, 18, 4>}, {transform_indices = @transform_1, window_bounds = array<i64: 1, 16, 16, 8>}, {transform_indices = @transform_2, window_bounds = array<i64: 1, 18, 18, 16>}, {pipeline_mode = #tpu.pipeline_mode<synchronous>, transform_indices = @transform_3, window_bounds = array<i64: 9, 4, 4>}, {pipeline_mode = #tpu.pipeline_mode<synchronous>, transform_indices = @transform_4, window_bounds = array<i64: 1, 4>}, {pipeline_mode = #tpu.pipeline_mode<synchronous>, transform_indices = @transform_5, window_bounds = array<i64: 9, 16, 16>}, {pipeline_mode = #tpu.pipeline_mode<synchronous>, transform_indices = @transform_6, window_bounds = array<i64: 1, 16>}, {pipeline_mode = #tpu.pipeline_mode<synchronous>, transform_indices = @transform_7, window_bounds = array<i64: 8, 4>}, {transform_indices = @transform_8, window_bounds = array<i64: 1, 16, 16, 4>}]} {
    %c0 = arith.constant 0 : index
    %c0_0 = arith.constant 0 : index
    %c0_1 = arith.constant 0 : index
    %c0_2 = arith.constant 0 : index
    %0 = vector.load %arg1[%c0, %c0_0, %c0_1, %c0_2] : memref<1x18x18x4xbf16, #tpu.memory_space<vmem>>, vector<1x18x18x4xbf16>
    %1 = vector.shape_cast %0 : vector<1x18x18x4xbf16> to vector<18x18x4xbf16>
    %2 = arith.extf %1 : vector<18x18x4xbf16> to vector<18x18x4xf32>
    %cst = arith.constant 0.000000e+00 : f32
    %3 = vector.broadcast %cst : f32 to vector<256x4xf32>
    %4 = vector.extract_strided_slice %2 {offsets = [0, 0, 0], sizes = [16, 16, 4], strides = [1, 1, 1]} : vector<18x18x4xf32> to vector<16x16x4xf32>
    %5 = vector.shape_cast %4 : vector<16x16x4xf32> to vector<256x4xf32>
    %6 = arith.truncf %5 : vector<256x4xf32> to vector<256x4xbf16>
    %c0_3 = arith.constant 0 : index
    %c0_4 = arith.constant 0 : index
    %c0_5 = arith.constant 0 : index
    %7 = vector.load %arg4[%c0_3, %c0_4, %c0_5] : memref<9x4x4xbf16, #tpu.memory_space<vmem>>, vector<1x4x4xbf16>
    %8 = vector.shape_cast %7 : vector<1x4x4xbf16> to vector<4x4xbf16>
    %cst_6 = arith.constant dense<0.000000e+00> : vector<256x4xf32>
    %9 = tpu.matmul %6, %8, %cst_6 {dimension_numbers = #tpu.dot_dimension_numbers<[1], [0], [0], [1], [0, 0, 1, 1], [], []>} : vector<256x4xbf16>, vector<4x4xbf16>, vector<256x4xf32> -> vector<256x4xf32>
    %10 = arith.addf %3, %9 : vector<256x4xf32>
    %11 = vector.extract_strided_slice %2 {offsets = [0, 1, 0], sizes = [16, 16, 4], strides = [1, 1, 1]} : vector<18x18x4xf32> to vector<16x16x4xf32>
    %12 = vector.shape_cast %11 : vector<16x16x4xf32> to vector<256x4xf32>
    %13 = arith.truncf %12 : vector<256x4xf32> to vector<256x4xbf16>
    %c1 = arith.constant 1 : index
    %c0_7 = arith.constant 0 : index
    %c0_8 = arith.constant 0 : index
    %14 = vector.load %arg4[%c1, %c0_7, %c0_8] : memref<9x4x4xbf16, #tpu.memory_space<vmem>>, vector<1x4x4xbf16>
    %15 = vector.shape_cast %14 : vector<1x4x4xbf16> to vector<4x4xbf16>
    %cst_9 = arith.constant dense<0.000000e+00> : vector<256x4xf32>
    %16 = tpu.matmul %13, %15, %cst_9 {dimension_numbers = #tpu.dot_dimension_numbers<[1], [0], [0], [1], [0, 0, 1, 1], [], []>} : vector<256x4xbf16>, vector<4x4xbf16>, vector<256x4xf32> -> vector<256x4xf32>
    %17 = arith.addf %10, %16 : vector<256x4xf32>
    %18 = vector.extract_strided_slice %2 {offsets = [0, 2, 0], sizes = [16, 16, 4], strides = [1, 1, 1]} : vector<18x18x4xf32> to vector<16x16x4xf32>
    %19 = vector.shape_cast %18 : vector<16x16x4xf32> to vector<256x4xf32>
    %20 = arith.truncf %19 : vector<256x4xf32> to vector<256x4xbf16>
    %c2 = arith.constant 2 : index
    %c0_10 = arith.constant 0 : index
    %c0_11 = arith.constant 0 : index
    %21 = vector.load %arg4[%c2, %c0_10, %c0_11] : memref<9x4x4xbf16, #tpu.memory_space<vmem>>, vector<1x4x4xbf16>
    %22 = vector.shape_cast %21 : vector<1x4x4xbf16> to vector<4x4xbf16>
    %cst_12 = arith.constant dense<0.000000e+00> : vector<256x4xf32>
    %23 = tpu.matmul %20, %22, %cst_12 {dimension_numbers = #tpu.dot_dimension_numbers<[1], [0], [0], [1], [0, 0, 1, 1], [], []>} : vector<256x4xbf16>, vector<4x4xbf16>, vector<256x4xf32> -> vector<256x4xf32>
    %24 = arith.addf %17, %23 : vector<256x4xf32>
    %25 = vector.extract_strided_slice %2 {offsets = [1, 0, 0], sizes = [16, 16, 4], strides = [1, 1, 1]} : vector<18x18x4xf32> to vector<16x16x4xf32>
    %26 = vector.shape_cast %25 : vector<16x16x4xf32> to vector<256x4xf32>
    %27 = arith.truncf %26 : vector<256x4xf32> to vector<256x4xbf16>
    %c3 = arith.constant 3 : index
    %c0_13 = arith.constant 0 : index
    %c0_14 = arith.constant 0 : index
    %28 = vector.load %arg4[%c3, %c0_13, %c0_14] : memref<9x4x4xbf16, #tpu.memory_space<vmem>>, vector<1x4x4xbf16>
    %29 = vector.shape_cast %28 : vector<1x4x4xbf16> to vector<4x4xbf16>
    %cst_15 = arith.constant dense<0.000000e+00> : vector<256x4xf32>
    %30 = tpu.matmul %27, %29, %cst_15 {dimension_numbers = #tpu.dot_dimension_numbers<[1], [0], [0], [1], [0, 0, 1, 1], [], []>} : vector<256x4xbf16>, vector<4x4xbf16>, vector<256x4xf32> -> vector<256x4xf32>
    %31 = arith.addf %24, %30 : vector<256x4xf32>
    %32 = vector.extract_strided_slice %2 {offsets = [1, 1, 0], sizes = [16, 16, 4], strides = [1, 1, 1]} : vector<18x18x4xf32> to vector<16x16x4xf32>
    %33 = vector.shape_cast %32 : vector<16x16x4xf32> to vector<256x4xf32>
    %34 = arith.truncf %33 : vector<256x4xf32> to vector<256x4xbf16>
    %c4 = arith.constant 4 : index
    %c0_16 = arith.constant 0 : index
    %c0_17 = arith.constant 0 : index
    %35 = vector.load %arg4[%c4, %c0_16, %c0_17] : memref<9x4x4xbf16, #tpu.memory_space<vmem>>, vector<1x4x4xbf16>
    %36 = vector.shape_cast %35 : vector<1x4x4xbf16> to vector<4x4xbf16>
    %cst_18 = arith.constant dense<0.000000e+00> : vector<256x4xf32>
    %37 = tpu.matmul %34, %36, %cst_18 {dimension_numbers = #tpu.dot_dimension_numbers<[1], [0], [0], [1], [0, 0, 1, 1], [], []>} : vector<256x4xbf16>, vector<4x4xbf16>, vector<256x4xf32> -> vector<256x4xf32>
    %38 = arith.addf %31, %37 : vector<256x4xf32>
    %39 = vector.extract_strided_slice %2 {offsets = [1, 2, 0], sizes = [16, 16, 4], strides = [1, 1, 1]} : vector<18x18x4xf32> to vector<16x16x4xf32>
    %40 = vector.shape_cast %39 : vector<16x16x4xf32> to vector<256x4xf32>
    %41 = arith.truncf %40 : vector<256x4xf32> to vector<256x4xbf16>
    %c5 = arith.constant 5 : index
    %c0_19 = arith.constant 0 : index
    %c0_20 = arith.constant 0 : index
    %42 = vector.load %arg4[%c5, %c0_19, %c0_20] : memref<9x4x4xbf16, #tpu.memory_space<vmem>>, vector<1x4x4xbf16>
    %43 = vector.shape_cast %42 : vector<1x4x4xbf16> to vector<4x4xbf16>
    %cst_21 = arith.constant dense<0.000000e+00> : vector<256x4xf32>
    %44 = tpu.matmul %41, %43, %cst_21 {dimension_numbers = #tpu.dot_dimension_numbers<[1], [0], [0], [1], [0, 0, 1, 1], [], []>} : vector<256x4xbf16>, vector<4x4xbf16>, vector<256x4xf32> -> vector<256x4xf32>
    %45 = arith.addf %38, %44 : vector<256x4xf32>
    %46 = vector.extract_strided_slice %2 {offsets = [2, 0, 0], sizes = [16, 16, 4], strides = [1, 1, 1]} : vector<18x18x4xf32> to vector<16x16x4xf32>
    %47 = vector.shape_cast %46 : vector<16x16x4xf32> to vector<256x4xf32>
    %48 = arith.truncf %47 : vector<256x4xf32> to vector<256x4xbf16>
    %c6 = arith.constant 6 : index
    %c0_22 = arith.constant 0 : index
    %c0_23 = arith.constant 0 : index
    %49 = vector.load %arg4[%c6, %c0_22, %c0_23] : memref<9x4x4xbf16, #tpu.memory_space<vmem>>, vector<1x4x4xbf16>
    %50 = vector.shape_cast %49 : vector<1x4x4xbf16> to vector<4x4xbf16>
    %cst_24 = arith.constant dense<0.000000e+00> : vector<256x4xf32>
    %51 = tpu.matmul %48, %50, %cst_24 {dimension_numbers = #tpu.dot_dimension_numbers<[1], [0], [0], [1], [0, 0, 1, 1], [], []>} : vector<256x4xbf16>, vector<4x4xbf16>, vector<256x4xf32> -> vector<256x4xf32>
    %52 = arith.addf %45, %51 : vector<256x4xf32>
    %53 = vector.extract_strided_slice %2 {offsets = [2, 1, 0], sizes = [16, 16, 4], strides = [1, 1, 1]} : vector<18x18x4xf32> to vector<16x16x4xf32>
    %54 = vector.shape_cast %53 : vector<16x16x4xf32> to vector<256x4xf32>
    %55 = arith.truncf %54 : vector<256x4xf32> to vector<256x4xbf16>
    %c7 = arith.constant 7 : index
    %c0_25 = arith.constant 0 : index
    %c0_26 = arith.constant 0 : index
    %56 = vector.load %arg4[%c7, %c0_25, %c0_26] : memref<9x4x4xbf16, #tpu.memory_space<vmem>>, vector<1x4x4xbf16>
    %57 = vector.shape_cast %56 : vector<1x4x4xbf16> to vector<4x4xbf16>
    %cst_27 = arith.constant dense<0.000000e+00> : vector<256x4xf32>
    %58 = tpu.matmul %55, %57, %cst_27 {dimension_numbers = #tpu.dot_dimension_numbers<[1], [0], [0], [1], [0, 0, 1, 1], [], []>} : vector<256x4xbf16>, vector<4x4xbf16>, vector<256x4xf32> -> vector<256x4xf32>
    %59 = arith.addf %52, %58 : vector<256x4xf32>
    %60 = vector.extract_strided_slice %2 {offsets = [2, 2, 0], sizes = [16, 16, 4], strides = [1, 1, 1]} : vector<18x18x4xf32> to vector<16x16x4xf32>
    %61 = vector.shape_cast %60 : vector<16x16x4xf32> to vector<256x4xf32>
    %62 = arith.truncf %61 : vector<256x4xf32> to vector<256x4xbf16>
    %c8 = arith.constant 8 : index
    %c0_28 = arith.constant 0 : index
    %c0_29 = arith.constant 0 : index
    %63 = vector.load %arg4[%c8, %c0_28, %c0_29] : memref<9x4x4xbf16, #tpu.memory_space<vmem>>, vector<1x4x4xbf16>
    %64 = vector.shape_cast %63 : vector<1x4x4xbf16> to vector<4x4xbf16>
    %cst_30 = arith.constant dense<0.000000e+00> : vector<256x4xf32>
    %65 = tpu.matmul %62, %64, %cst_30 {dimension_numbers = #tpu.dot_dimension_numbers<[1], [0], [0], [1], [0, 0, 1, 1], [], []>} : vector<256x4xbf16>, vector<4x4xbf16>, vector<256x4xf32> -> vector<256x4xf32>
    %66 = arith.addf %59, %65 : vector<256x4xf32>
    %c0_31 = arith.constant 0 : index
    %c0_32 = arith.constant 0 : index
    %67 = vector.load %arg5[%c0_31, %c0_32] : memref<1x4xf32, #tpu.memory_space<vmem>>, vector<1x4xf32>
    %68 = vector.shape_cast %67 : vector<1x4xf32> to vector<4xf32>
    %69 = vector.shape_cast %68 : vector<4xf32> to vector<1x4xf32>
    %70 = vector.broadcast %69 : vector<1x4xf32> to vector<256x4xf32>
    %71 = arith.addf %66, %70 : vector<256x4xf32>
    %c0_33 = arith.constant 0 : index
    %c0_34 = arith.constant 0 : index
    %c0_35 = arith.constant 0 : index
    %c0_36 = arith.constant 0 : index
    %72 = vector.load %arg3[%c0_33, %c0_34, %c0_35, %c0_36] : memref<1x18x18x16xbf16, #tpu.memory_space<vmem>>, vector<1x18x18x16xbf16>
    %73 = vector.shape_cast %72 : vector<1x18x18x16xbf16> to vector<18x18x16xbf16>
    %74 = arith.extf %73 : vector<18x18x16xbf16> to vector<18x18x16xf32>
    %cst_37 = arith.constant 0.000000e+00 : f32
    %75 = vector.broadcast %cst_37 : f32 to vector<256x16xf32>
    %76 = vector.extract_strided_slice %74 {offsets = [0, 0, 0], sizes = [16, 16, 16], strides = [1, 1, 1]} : vector<18x18x16xf32> to vector<16x16x16xf32>
    %77 = vector.shape_cast %76 : vector<16x16x16xf32> to vector<256x16xf32>
    %78 = arith.truncf %77 : vector<256x16xf32> to vector<256x16xbf16>
    %c0_38 = arith.constant 0 : index
    %c0_39 = arith.constant 0 : index
    %c0_40 = arith.constant 0 : index
    %79 = vector.load %arg6[%c0_38, %c0_39, %c0_40] : memref<9x16x16xbf16, #tpu.memory_space<vmem>>, vector<1x16x16xbf16>
    %80 = vector.shape_cast %79 : vector<1x16x16xbf16> to vector<16x16xbf16>
    %cst_41 = arith.constant dense<0.000000e+00> : vector<256x16xf32>
    %81 = tpu.matmul %78, %80, %cst_41 {dimension_numbers = #tpu.dot_dimension_numbers<[1], [0], [0], [1], [0, 0, 1, 1], [], []>} : vector<256x16xbf16>, vector<16x16xbf16>, vector<256x16xf32> -> vector<256x16xf32>
    %82 = arith.addf %75, %81 : vector<256x16xf32>
    %83 = vector.extract_strided_slice %74 {offsets = [0, 1, 0], sizes = [16, 16, 16], strides = [1, 1, 1]} : vector<18x18x16xf32> to vector<16x16x16xf32>
    %84 = vector.shape_cast %83 : vector<16x16x16xf32> to vector<256x16xf32>
    %85 = arith.truncf %84 : vector<256x16xf32> to vector<256x16xbf16>
    %c1_42 = arith.constant 1 : index
    %c0_43 = arith.constant 0 : index
    %c0_44 = arith.constant 0 : index
    %86 = vector.load %arg6[%c1_42, %c0_43, %c0_44] : memref<9x16x16xbf16, #tpu.memory_space<vmem>>, vector<1x16x16xbf16>
    %87 = vector.shape_cast %86 : vector<1x16x16xbf16> to vector<16x16xbf16>
    %cst_45 = arith.constant dense<0.000000e+00> : vector<256x16xf32>
    %88 = tpu.matmul %85, %87, %cst_45 {dimension_numbers = #tpu.dot_dimension_numbers<[1], [0], [0], [1], [0, 0, 1, 1], [], []>} : vector<256x16xbf16>, vector<16x16xbf16>, vector<256x16xf32> -> vector<256x16xf32>
    %89 = arith.addf %82, %88 : vector<256x16xf32>
    %90 = vector.extract_strided_slice %74 {offsets = [0, 2, 0], sizes = [16, 16, 16], strides = [1, 1, 1]} : vector<18x18x16xf32> to vector<16x16x16xf32>
    %91 = vector.shape_cast %90 : vector<16x16x16xf32> to vector<256x16xf32>
    %92 = arith.truncf %91 : vector<256x16xf32> to vector<256x16xbf16>
    %c2_46 = arith.constant 2 : index
    %c0_47 = arith.constant 0 : index
    %c0_48 = arith.constant 0 : index
    %93 = vector.load %arg6[%c2_46, %c0_47, %c0_48] : memref<9x16x16xbf16, #tpu.memory_space<vmem>>, vector<1x16x16xbf16>
    %94 = vector.shape_cast %93 : vector<1x16x16xbf16> to vector<16x16xbf16>
    %cst_49 = arith.constant dense<0.000000e+00> : vector<256x16xf32>
    %95 = tpu.matmul %92, %94, %cst_49 {dimension_numbers = #tpu.dot_dimension_numbers<[1], [0], [0], [1], [0, 0, 1, 1], [], []>} : vector<256x16xbf16>, vector<16x16xbf16>, vector<256x16xf32> -> vector<256x16xf32>
    %96 = arith.addf %89, %95 : vector<256x16xf32>
    %97 = vector.extract_strided_slice %74 {offsets = [1, 0, 0], sizes = [16, 16, 16], strides = [1, 1, 1]} : vector<18x18x16xf32> to vector<16x16x16xf32>
    %98 = vector.shape_cast %97 : vector<16x16x16xf32> to vector<256x16xf32>
    %99 = arith.truncf %98 : vector<256x16xf32> to vector<256x16xbf16>
    %c3_50 = arith.constant 3 : index
    %c0_51 = arith.constant 0 : index
    %c0_52 = arith.constant 0 : index
    %100 = vector.load %arg6[%c3_50, %c0_51, %c0_52] : memref<9x16x16xbf16, #tpu.memory_space<vmem>>, vector<1x16x16xbf16>
    %101 = vector.shape_cast %100 : vector<1x16x16xbf16> to vector<16x16xbf16>
    %cst_53 = arith.constant dense<0.000000e+00> : vector<256x16xf32>
    %102 = tpu.matmul %99, %101, %cst_53 {dimension_numbers = #tpu.dot_dimension_numbers<[1], [0], [0], [1], [0, 0, 1, 1], [], []>} : vector<256x16xbf16>, vector<16x16xbf16>, vector<256x16xf32> -> vector<256x16xf32>
    %103 = arith.addf %96, %102 : vector<256x16xf32>
    %104 = vector.extract_strided_slice %74 {offsets = [1, 1, 0], sizes = [16, 16, 16], strides = [1, 1, 1]} : vector<18x18x16xf32> to vector<16x16x16xf32>
    %105 = vector.shape_cast %104 : vector<16x16x16xf32> to vector<256x16xf32>
    %106 = arith.truncf %105 : vector<256x16xf32> to vector<256x16xbf16>
    %c4_54 = arith.constant 4 : index
    %c0_55 = arith.constant 0 : index
    %c0_56 = arith.constant 0 : index
    %107 = vector.load %arg6[%c4_54, %c0_55, %c0_56] : memref<9x16x16xbf16, #tpu.memory_space<vmem>>, vector<1x16x16xbf16>
    %108 = vector.shape_cast %107 : vector<1x16x16xbf16> to vector<16x16xbf16>
    %cst_57 = arith.constant dense<0.000000e+00> : vector<256x16xf32>
    %109 = tpu.matmul %106, %108, %cst_57 {dimension_numbers = #tpu.dot_dimension_numbers<[1], [0], [0], [1], [0, 0, 1, 1], [], []>} : vector<256x16xbf16>, vector<16x16xbf16>, vector<256x16xf32> -> vector<256x16xf32>
    %110 = arith.addf %103, %109 : vector<256x16xf32>
    %111 = vector.extract_strided_slice %74 {offsets = [1, 2, 0], sizes = [16, 16, 16], strides = [1, 1, 1]} : vector<18x18x16xf32> to vector<16x16x16xf32>
    %112 = vector.shape_cast %111 : vector<16x16x16xf32> to vector<256x16xf32>
    %113 = arith.truncf %112 : vector<256x16xf32> to vector<256x16xbf16>
    %c5_58 = arith.constant 5 : index
    %c0_59 = arith.constant 0 : index
    %c0_60 = arith.constant 0 : index
    %114 = vector.load %arg6[%c5_58, %c0_59, %c0_60] : memref<9x16x16xbf16, #tpu.memory_space<vmem>>, vector<1x16x16xbf16>
    %115 = vector.shape_cast %114 : vector<1x16x16xbf16> to vector<16x16xbf16>
    %cst_61 = arith.constant dense<0.000000e+00> : vector<256x16xf32>
    %116 = tpu.matmul %113, %115, %cst_61 {dimension_numbers = #tpu.dot_dimension_numbers<[1], [0], [0], [1], [0, 0, 1, 1], [], []>} : vector<256x16xbf16>, vector<16x16xbf16>, vector<256x16xf32> -> vector<256x16xf32>
    %117 = arith.addf %110, %116 : vector<256x16xf32>
    %118 = vector.extract_strided_slice %74 {offsets = [2, 0, 0], sizes = [16, 16, 16], strides = [1, 1, 1]} : vector<18x18x16xf32> to vector<16x16x16xf32>
    %119 = vector.shape_cast %118 : vector<16x16x16xf32> to vector<256x16xf32>
    %120 = arith.truncf %119 : vector<256x16xf32> to vector<256x16xbf16>
    %c6_62 = arith.constant 6 : index
    %c0_63 = arith.constant 0 : index
    %c0_64 = arith.constant 0 : index
    %121 = vector.load %arg6[%c6_62, %c0_63, %c0_64] : memref<9x16x16xbf16, #tpu.memory_space<vmem>>, vector<1x16x16xbf16>
    %122 = vector.shape_cast %121 : vector<1x16x16xbf16> to vector<16x16xbf16>
    %cst_65 = arith.constant dense<0.000000e+00> : vector<256x16xf32>
    %123 = tpu.matmul %120, %122, %cst_65 {dimension_numbers = #tpu.dot_dimension_numbers<[1], [0], [0], [1], [0, 0, 1, 1], [], []>} : vector<256x16xbf16>, vector<16x16xbf16>, vector<256x16xf32> -> vector<256x16xf32>
    %124 = arith.addf %117, %123 : vector<256x16xf32>
    %125 = vector.extract_strided_slice %74 {offsets = [2, 1, 0], sizes = [16, 16, 16], strides = [1, 1, 1]} : vector<18x18x16xf32> to vector<16x16x16xf32>
    %126 = vector.shape_cast %125 : vector<16x16x16xf32> to vector<256x16xf32>
    %127 = arith.truncf %126 : vector<256x16xf32> to vector<256x16xbf16>
    %c7_66 = arith.constant 7 : index
    %c0_67 = arith.constant 0 : index
    %c0_68 = arith.constant 0 : index
    %128 = vector.load %arg6[%c7_66, %c0_67, %c0_68] : memref<9x16x16xbf16, #tpu.memory_space<vmem>>, vector<1x16x16xbf16>
    %129 = vector.shape_cast %128 : vector<1x16x16xbf16> to vector<16x16xbf16>
    %cst_69 = arith.constant dense<0.000000e+00> : vector<256x16xf32>
    %130 = tpu.matmul %127, %129, %cst_69 {dimension_numbers = #tpu.dot_dimension_numbers<[1], [0], [0], [1], [0, 0, 1, 1], [], []>} : vector<256x16xbf16>, vector<16x16xbf16>, vector<256x16xf32> -> vector<256x16xf32>
    %131 = arith.addf %124, %130 : vector<256x16xf32>
    %132 = vector.extract_strided_slice %74 {offsets = [2, 2, 0], sizes = [16, 16, 16], strides = [1, 1, 1]} : vector<18x18x16xf32> to vector<16x16x16xf32>
    %133 = vector.shape_cast %132 : vector<16x16x16xf32> to vector<256x16xf32>
    %134 = arith.truncf %133 : vector<256x16xf32> to vector<256x16xbf16>
    %c8_70 = arith.constant 8 : index
    %c0_71 = arith.constant 0 : index
    %c0_72 = arith.constant 0 : index
    %135 = vector.load %arg6[%c8_70, %c0_71, %c0_72] : memref<9x16x16xbf16, #tpu.memory_space<vmem>>, vector<1x16x16xbf16>
    %136 = vector.shape_cast %135 : vector<1x16x16xbf16> to vector<16x16xbf16>
    %cst_73 = arith.constant dense<0.000000e+00> : vector<256x16xf32>
    %137 = tpu.matmul %134, %136, %cst_73 {dimension_numbers = #tpu.dot_dimension_numbers<[1], [0], [0], [1], [0, 0, 1, 1], [], []>} : vector<256x16xbf16>, vector<16x16xbf16>, vector<256x16xf32> -> vector<256x16xf32>
    %138 = arith.addf %131, %137 : vector<256x16xf32>
    %c0_74 = arith.constant 0 : index
    %c0_75 = arith.constant 0 : index
    %139 = vector.load %arg7[%c0_74, %c0_75] : memref<1x16xf32, #tpu.memory_space<vmem>>, vector<1x16xf32>
    %140 = vector.shape_cast %139 : vector<1x16xf32> to vector<16xf32>
    %141 = vector.shape_cast %140 : vector<16xf32> to vector<1x16xf32>
    %142 = vector.broadcast %141 : vector<1x16xf32> to vector<256x16xf32>
    %143 = arith.addf %138, %142 : vector<256x16xf32>
    %c0_76 = arith.constant 0 : index
    %c0_77 = arith.constant 0 : index
    %c0_78 = arith.constant 0 : index
    %c0_79 = arith.constant 0 : index
    %144 = vector.load %arg2[%c0_76, %c0_77, %c0_78, %c0_79] : memref<1x16x16x8xf32, #tpu.memory_space<vmem>>, vector<1x16x16x8xf32>
    %145 = vector.shape_cast %144 : vector<1x16x16x8xf32> to vector<16x16x8xf32>
    %146 = vector.shape_cast %145 : vector<16x16x8xf32> to vector<256x8xf32>
    %147 = vector.extract_strided_slice %143 {offsets = [0, 0], sizes = [256, 8], strides = [1, 1]} : vector<256x16xf32> to vector<256x8xf32>
    %148 = vector.extract_strided_slice %143 {offsets = [0, 8], sizes = [256, 8], strides = [1, 1]} : vector<256x16xf32> to vector<256x8xf32>
    %cst_80 = arith.constant dense<0.000000e+00> : vector<8xf32>
    %149 = vector.multi_reduction <add>, %146, %cst_80 [0] : vector<256x8xf32> to vector<8xf32>
    %150 = vector.shape_cast %149 : vector<8xf32> to vector<1x8xf32>
    %cst_81 = arith.constant 2.560000e+02 : f32
    %151 = vector.broadcast %cst_81 : f32 to vector<1x8xf32>
    %152 = arith.divf %150, %151 : vector<1x8xf32>
    %153 = vector.broadcast %152 : vector<1x8xf32> to vector<256x8xf32>
    %154 = arith.subf %146, %153 : vector<256x8xf32>
    %155 = arith.mulf %154, %154 : vector<256x8xf32>
    %cst_82 = arith.constant dense<0.000000e+00> : vector<8xf32>
    %156 = vector.multi_reduction <add>, %155, %cst_82 [0] : vector<256x8xf32> to vector<8xf32>
    %157 = vector.shape_cast %156 : vector<8xf32> to vector<1x8xf32>
    %cst_83 = arith.constant 2.560000e+02 : f32
    %158 = vector.broadcast %cst_83 : f32 to vector<1x8xf32>
    %159 = arith.divf %157, %158 : vector<1x8xf32>
    %160 = vector.broadcast %152 : vector<1x8xf32> to vector<256x8xf32>
    %161 = arith.subf %146, %160 : vector<256x8xf32>
    %cst_84 = arith.constant 9.99999974E-6 : f32
    %162 = vector.broadcast %cst_84 : f32 to vector<1x8xf32>
    %163 = arith.addf %159, %162 : vector<1x8xf32>
    %164 = math.rsqrt %163 : vector<1x8xf32>
    %165 = vector.broadcast %164 : vector<1x8xf32> to vector<256x8xf32>
    %166 = arith.mulf %161, %165 : vector<256x8xf32>
    %cst_85 = arith.constant 1.000000e+00 : f32
    %167 = vector.broadcast %cst_85 : f32 to vector<256x8xf32>
    %168 = arith.addf %167, %147 : vector<256x8xf32>
    %169 = arith.mulf %166, %168 : vector<256x8xf32>
    %170 = arith.addf %169, %148 : vector<256x8xf32>
    %171 = arith.truncf %170 : vector<256x8xf32> to vector<256x8xbf16>
    %c0_86 = arith.constant 0 : index
    %c0_87 = arith.constant 0 : index
    %172 = vector.load %arg8[%c0_86, %c0_87] : memref<8x4xbf16, #tpu.memory_space<vmem>>, vector<8x4xbf16>
    %cst_88 = arith.constant dense<0.000000e+00> : vector<256x4xf32>
    %173 = tpu.matmul %171, %172, %cst_88 {dimension_numbers = #tpu.dot_dimension_numbers<[1], [0], [0], [1], [0, 0, 1, 1], [], []>} : vector<256x8xbf16>, vector<8x4xbf16>, vector<256x4xf32> -> vector<256x4xf32>
    %174 = arith.addf %71, %173 : vector<256x4xf32>
    %175 = vector.shape_cast %174 : vector<256x4xf32> to vector<16x16x4xf32>
    %c0_89 = arith.constant 0 : index
    %c0_90 = arith.constant 0 : index
    %c0_91 = arith.constant 0 : index
    %c0_92 = arith.constant 0 : index
    %176 = vector.load %arg9[%c0_89, %c0_90, %c0_91, %c0_92] : memref<1x16x16x4xf32, #tpu.memory_space<vmem>>, vector<1x16x16x4xf32>
    %177 = vector.shape_cast %176 : vector<1x16x16x4xf32> to vector<16x16x4xf32>
    %178 = vector.shape_cast %175 : vector<16x16x4xf32> to vector<1x16x16x4xf32>
    tpu.vector_store %arg9[%c0_89, %c0_90, %c0_91, %c0_92], %178 {strides = array<i32>} : memref<1x16x16x4xf32, #tpu.memory_space<vmem>>, vector<1x16x16x4xf32>,
    return
  }
  func.func @transform_0(%arg0: i32) -> (i32, i32, i32, i32) {
    %c0_i32 = arith.constant 0 : i32
    %c0_i32_0 = arith.constant 0 : i32
    %c0_i32_1 = arith.constant 0 : i32
    %c0_i32_2 = arith.constant 0 : i32
    return %arg0, %c0_i32, %c0_i32_0, %c0_i32_1 : i32, i32, i32, i32
  }
  func.func @transform_1(%arg0: i32) -> (i32, i32, i32, i32) {
    %c0_i32 = arith.constant 0 : i32
    %c0_i32_0 = arith.constant 0 : i32
    %c0_i32_1 = arith.constant 0 : i32
    %c0_i32_2 = arith.constant 0 : i32
    return %arg0, %c0_i32, %c0_i32_0, %c0_i32_1 : i32, i32, i32, i32
  }
  func.func @transform_2(%arg0: i32) -> (i32, i32, i32, i32) {
    %c0_i32 = arith.constant 0 : i32
    %c0_i32_0 = arith.constant 0 : i32
    %c0_i32_1 = arith.constant 0 : i32
    %c0_i32_2 = arith.constant 0 : i32
    return %arg0, %c0_i32, %c0_i32_0, %c0_i32_1 : i32, i32, i32, i32
  }
  func.func @transform_3(%arg0: i32) -> (i32, i32, i32) {
    %c0_i32 = arith.constant 0 : i32
    %c0_i32_0 = arith.constant 0 : i32
    %c0_i32_1 = arith.constant 0 : i32
    %c0_i32_2 = arith.constant 0 : i32
    return %c0_i32, %c0_i32_0, %c0_i32_1 : i32, i32, i32
  }
  func.func @transform_4(%arg0: i32) -> (i32, i32) {
    %c0_i32 = arith.constant 0 : i32
    %c0_i32_0 = arith.constant 0 : i32
    %c0_i32_1 = arith.constant 0 : i32
    return %c0_i32, %c0_i32_0 : i32, i32
  }
  func.func @transform_5(%arg0: i32) -> (i32, i32, i32) {
    %c0_i32 = arith.constant 0 : i32
    %c0_i32_0 = arith.constant 0 : i32
    %c0_i32_1 = arith.constant 0 : i32
    %c0_i32_2 = arith.constant 0 : i32
    return %c0_i32, %c0_i32_0, %c0_i32_1 : i32, i32, i32
  }
  func.func @transform_6(%arg0: i32) -> (i32, i32) {
    %c0_i32 = arith.constant 0 : i32
    %c0_i32_0 = arith.constant 0 : i32
    %c0_i32_1 = arith.constant 0 : i32
    return %c0_i32, %c0_i32_0 : i32, i32
  }
  func.func @transform_7(%arg0: i32) -> (i32, i32) {
    %c0_i32 = arith.constant 0 : i32
    %c0_i32_0 = arith.constant 0 : i32
    %c0_i32_1 = arith.constant 0 : i32
    return %c0_i32, %c0_i32_0 : i32, i32
  }
  func.func @transform_8(%arg0: i32) -> (i32, i32, i32, i32) {
    %c0_i32 = arith.constant 0 : i32
    %c0_i32_0 = arith.constant 0 : i32
    %c0_i32_1 = arith.constant 0 : i32
    %c0_i32_2 = arith.constant 0 : i32
    return %arg0, %c0_i32, %c0_i32_0, %c0_i32_1 : i32, i32, i32, i32
  }
}

</mosaic_0001>

<bundles_post_ra>
// kernel: fused_spade_resnet_block.4
= control target key start
LH: loop header
LB: loop body
LE: loop exit
PB: predicated region body
PF: predicated region fallthrough
CT: control target
= control target key end

     0   :  { %s3856_s12 = smov 0   ;;  %s4848_s0 = inlined_call_operand.vmem [shape: bf16[2,18,18,4], index: 0, kind: input, shape index: {}]   ;;  %s4849_s1 = inlined_call_operand.vmem [shape: bf16[9,4,48], index: 1, kind: input, shape index: {}]   ;;  %s4850_s2 = inlined_call_operand.vmem [shape: f32[1,48], index: 2, kind: input, shape index: {}]   ;;  %s4851_s3 = inlined_call_operand.vmem [shape: bf16[2,16,16,48], index: 3, kind: output, shape index: {}]  }
   0x1 LB: > { %s2810_s13 = sadd.s32 4294967295, %s3834_s12   ;;  %p2814_p0 = scmp.ge.s32.totalorder %s3834_s12, 1  ;;  %s3834_s12 = sphi %s3856_s12, %s13_s12  }
   0x2   : > { %p137_p1 = scmp.lt.s32.totalorder %s3834_s12, 3 }
   0x4   : > { %p138_p2 = pnand %p2814_p0, %p137_p1 }
   0x6   : > { %141 = sbr.rel (%p138_p2) target bundleno = 535 (0x217), region = 32 }
   0xd   : > { %v2834_v0 = vld [vmem:[%s4849_s1 + $0x2] sm:$0x3]  ;;  %vm525_vm0 = vcmask 1041408   ;;  %v3870_v1 = vld [vmem:[%s4849_s1 + $0x8] sm:$0x3]  ;;  %p161_p3 = scmp.lt.s32.totalorder %s2810_s13, 1 }
   0xe   : > { %3773 = vmatprep.subr.msk.bf16.mxu1 %vm525_vm0, %v2834_v0  ;;  %3777 = vmatprep.subr.msk.bf16.mxu0 %vm525_vm0, %v3870_v1  ;;  %v527_v2 = vsel %vm525_vm0, %v2834_v0, 0  ;;  %v3878_v3 = vsel %vm525_vm0, %v3870_v1, 0  ;;  %v296_v4 = vld [vmem:[%s4849_s1] sm:$0x3]  ;;  %v2919_v5 = vld [vmem:[%s4849_s1 + $0xa] sm:$0x3] }
   0xf   : > { %4890 = vst [vmem:[#allocation2_spill] sm:$0xff] %v3878_v3  ;;  %3210 = vmatpush3.bf16.msra.mxu1 %v527_v2  ;;  %3346 = vmatpush3.bf16.msra.mxu0 %v3878_v3  ;;  %s4932_s13 = smov (!%p161_p3, %s2810_s13), 1  ;;  %vm345_vm1 = vcmask 1046528   ;;  %vm476_vm2 = vcmask 31744   ;;  %v739_v37 = vsel %vm525_vm0, %v296_v4, 0  ;;  %v1705_v43 = vsel %vm525_vm0, %v2919_v5, 0 }
  0x10   : > { %3774 = vmatprep.subr.msk.bf16.mxu1 %vm525_vm0, %v296_v4  ;;  %3779 = vmatprep.subr.msk.bf16.mxu0 %vm525_vm0, %v2919_v5  ;;  %s3783_s22 = smul.u32 216, %s4932_s13  ;;  %v3966_v44 = vld [vmem:[%s4849_s1 + $0x4] sm:$0x3]  ;;  %v4010_v2 = vld [vmem:[%s4849_s1 + $0xc] sm:$0x3]  ;;  %vm902_vm3 = vcmask 1045504  }
  0x11   : > { %s3023_s11 = sshll.u32 %s4932_s13, 7  ;;  %vm2722_vm4 = vcmask 388096  }
  0x12   : > { %s3895_s25 = scalar_lea.vmem %s4848_s0, %s3783_s22  ;;  %s4744_s16 = scalar_lea.vmem %s4851_s3, %s3023_s11 }
  0x13   : > { %v3898_v6 = vld [vmem:[%s3895_s25] sm:$0xff]   ;;  %v3901_v7 = vld [vmem:[%s3895_s25 + $0x8] sm:$0x1]  ;;  %v3904_v8 = vld [vmem:[%s3895_s25 + $0xc] sm:$0xff]  }
  0x14   : > { %v4854_v9 = vunpack.c.l.bf16 %v3898_v6  ;;  %v4853_v10 = vunpack.c.h.bf16 %v3898_v6  ;;  %v4852_v11 = vunpack.c.l.bf16 %v3901_v7  ;;  %v3910_v12 = vld [vmem:[%s3895_s25 + $0x14] sm:$0x1]  ;;  %v229_v13 = vunpack.c.l.bf16 %v3904_v8  ;;  %v3914_v14 = vld [vmem:[%s3895_s25 + $0x18] sm:$0xff]   ;;  %v3930_v23 = vld [vmem:[%s3895_s25 + $0x20] sm:$0x1] }
  0x15   : > { %v230_v15 = vunpack.c.h.bf16 %v3904_v8  ;;  %v231_v16 = vunpack.c.l.bf16 %v3910_v12  ;;  %v232_v20 = vunpack.c.l.bf16 %v3914_v14  ;;  %v3937_v27 = vld [vmem:[%s3895_s25 + $0x24] sm:$0xff]   ;;  %v233_v31 = vunpack.c.h.bf16 %v3914_v14  ;;  %v3946_v34 = vld [vmem:[%s3895_s25 + $0x2c] sm:$0x1]  ;;  %v3949_v35 = vld [vmem:[%s3895_s25 + $0x30] sm:$0xff]  }
  0x16   : > { %v346_v17 = vrot.slane %v4854_v9, 1  ;;  %v347_v18 = vrot.slane %v4853_v10, 1  ;;  %v349_v19 = vrot.slane %v4852_v11, 1  ;;  %v351_v21 = vrot.slane %v229_v13, 1  ;;  %v3956_v40 = vld [vmem:[%s3895_s25 + $0x38] sm:$0x1] }
  0x17   : > { %v352_v22 = vrot.slane %v230_v15, 1  ;;  %v354_v26 = vrot.slane %v231_v16, 1  ;;  %v234_v32 = vunpack.c.l.bf16 %v3930_v23  ;;  %v356_v33 = vrot.slane %v232_v20, 1  ;;  %v3977_v49 = vld [vmem:[%s3895_s25 + $0x3c] sm:$0xff]   ;;  %v3984_v54 = vld [vmem:[%s3895_s25 + $0x44] sm:$0x1] }
  0x18   : > { %v348_v24 = vsel %vm345_vm1, %v346_v17, %v347_v18  ;;  %v350_v25 = vsel %vm345_vm1, %v347_v18, %v349_v19  ;;  %v235_v38 = vunpack.c.l.bf16 %v3937_v27  ;;  %v236_v39 = vunpack.c.h.bf16 %v3937_v27  ;;  %v3987_v55 = vld [vmem:[%s3895_s25 + $0x48] sm:$0xff]   ;;  %v4005_v0 = vld [vmem:[%s3895_s25 + $0x50] sm:$0x1]  ;;  %v4021_v19 = vld [vmem:[%s3895_s25 + $0x54] sm:$0xff]  }
  0x19   : > { %v458_v28 = vpack.c.bf16 %v350_v25, %v348_v24  ;;  %v353_v29 = vsel %vm345_vm1, %v351_v21, %v352_v22  ;;  %v355_v30 = vsel %vm345_vm1, %v352_v22, %v354_v26  ;;  %v357_v41 = vrot.slane %v233_v31, 1  ;;  %v4030_v26 = vld [vmem:[%s3895_s25 + $0x5c] sm:$0x1] }
  0x1a   : > { %v459_v36 = vpack.c.bf16 %v355_v30, %v353_v29  ;;  %v359_v42 = vrot.slane %v234_v32, 1  ;;  %v237_v45 = vunpack.c.l.bf16 %v3946_v34  ;;  %v361_v46 = vrot.slane %v235_v38, 1 }
  0x1b   : > { %3211 = vmatprep.mubr.msk.bf16.mxu1 %vm476_vm2, %v458_v28  ;;  %v362_v47 = vrot.slane %v236_v39, 1  ;;  %v238_v48 = vunpack.c.l.bf16 %v3949_v35  ;;  %v358_v50 = vsel %vm345_vm1, %v356_v33, %v357_v41  ;;  %v239_v52 = vunpack.c.h.bf16 %v3949_v35 }
  0x1c   : > { %3347 = vmatprep.mubr.msk.bf16.mxu0 %vm476_vm2, %v459_v36  ;;  %3212 = vmatmul.mubr.msk.bf16.vlgmr.msra.gmra.mrb[0].mxu1 %vm476_vm2, %v459_v36  ;;  %v360_v51 = vsel %vm345_vm1, %v357_v41, %v359_v42  ;;  %v240_v53 = vunpack.c.l.bf16 %v3956_v40  ;;  %v364_v58 = vrot.slane %v237_v45, 1  ;;  %v241_v62 = vunpack.c.l.bf16 %v3977_v49 }
  0x1d   : > { %3244 = vmatpush3.bf16.msra.mxu1 %v739_v37  ;;  %v3989_v56 = vpack.c.bf16 %v360_v51, %v358_v50  ;;  %v363_v57 = vsel %vm345_vm1, %v361_v46, %v362_v47  ;;  %v366_v59 = vrot.slane %v238_v48, 1  ;;  %v367_v60 = vrot.slane %v239_v52, 1  ;;  %v4057_v51 = vld [vmem:[%s3895_s25 + $0x60] sm:$0xff]  }
  0x1e   : > { %3775 = vmatprep.subr.msk.bf16.mxu1 %vm525_vm0, %v3966_v44  ;;  %v369_v61 = vrot.slane %v240_v53, 1  ;;  %v242_v63 = vunpack.c.h.bf16 %v3977_v49  ;;  %v365_v4 = vsel %vm345_vm1, %v362_v47, %v364_v58  ;;  %v4870_v5 = vunpack.c.l.bf16 %v3984_v54  ;;  %v4064_v58 = vld [vmem:[%s3895_s25 + $0x68] sm:$0x1] }
  0x1f   : > { %3348 = vmatmul.mubr.msk.bf16.vlgmr.msra.gmra.mrb[0].mxu0 %vm476_vm2, %v3989_v56  ;;  %3215 = vmatprep.mubr.msk.bf16.mxu1 %vm476_vm2, %v3989_v56  ;;  %v4869_v17 = vunpack.c.l.bf16 %v3987_v55  ;;  %v4864_v18 = vunpack.c.h.bf16 %v3987_v55  ;;  %v4023_v21 = vpack.c.bf16 %v365_v4, %v363_v57  ;;  %v368_v22 = vsel %vm345_vm1, %v366_v59, %v367_v60 }
  0x20   : > { %3380 = vmatpush3.bf16.msra.mxu0 %v1705_v43  ;;  %v370_v24 = vsel %vm345_vm1, %v367_v60, %v369_v61  ;;  %v371_v25 = vrot.slane %v241_v62, 1  ;;  %v372_v29 = vrot.slane %v242_v63, 1  ;;  %v374_v30 = vrot.slane %v4870_v5, 1 }
  0x21   : > { %v4032_v28 = vpack.c.bf16 %v370_v24, %v368_v22  ;;  %v4861_v33 = vunpack.c.l.bf16 %v4005_v0  ;;  %3780 = vmatprep.subr.msk.bf16.mxu0 %vm525_vm0, %v4010_v2  ;;  %3351 = vmatprep.mubr.msk.bf16.mxu0 %vm476_vm2, %v4023_v21  ;;  %v376_v36 = vrot.slane %v4869_v17, 1  ;;  %v377_v37 = vrot.slane %v4864_v18, 1 }
  0x22   : > { %v4860_v41 = vunpack.c.l.bf16 %v4021_v19  ;;  %v4859_v42 = vunpack.c.h.bf16 %v4021_v19  ;;  %v373_v43 = vsel %vm345_vm1, %v371_v25, %v372_v29  ;;  %v375_v46 = vsel %vm345_vm1, %v372_v29, %v374_v30  ;;  %v4082_v30 = vld [vmem:[%s3895_s25 + $0x6c] sm:$0xff]  }
  0x23   : > { %v379_v47 = vrot.slane %v4861_v33, 1  ;;  %v4855_v50 = vunpack.c.l.bf16 %v4030_v26  ;;  %v4061_v57 = vpack.c.bf16 %v375_v46, %v373_v43  ;;  %v4858_v4 = vunpack.c.l.bf16 %v4057_v51 }
  0x24   : > { %3216 = vmatmul.mubr.msk.bf16.gmra.mrb[4].mxu1 %vm476_vm2, %v4023_v21  ;;  %v381_v59 = vrot.slane %v4860_v41, 1  ;;  %v382_v60 = vrot.slane %v4859_v42, 1  ;;  %v378_v22 = vsel %vm345_vm1, %v376_v36, %v377_v37  ;;  %v4857_v25 = vunpack.c.h.bf16 %v4057_v51  ;;  %v4089_v36 = vld [vmem:[%s3895_s25 + $0x74] sm:$0x1] }
  0x25   : > { %3219 = vmatprep.mubr.msk.bf16.mxu1 %vm476_vm2, %v4032_v28  ;;  %v384_v61 = vrot.slane %v4855_v50, 1  ;;  %v380_v24 = vsel %vm345_vm1, %v377_v37, %v379_v47  ;;  %v4856_v29 = vunpack.c.l.bf16 %v4064_v58  ;;  %v908_v43 = vrot.slane %v229_v13, 2  ;;  %v4100_v50 = vld [vmem:[%s3895_s25 + $0x78] sm:$0xff]   ;;  %v4103_v13 = vld [vmem:[%s3895_s25 + $0x80] sm:$0x1] }
  0x26   : > { %v383_v46 = vsel %vm345_vm1, %v381_v59, %v382_v60  ;;  %v909_v37 = vrot.slane %v230_v15, 2  ;;  %v911_v47 = vrot.slane %v231_v16, 2  ;;  %v4095_v10 = vpack.c.bf16 %v380_v24, %v378_v22 }
  0x27   : > { %3352 = vmatmul.mubr.msk.bf16.gmra.mrb[4].mxu0 %vm476_vm2, %v4032_v28  ;;  %v385_v11 = vsel %vm345_vm1, %v382_v60, %v384_v61  ;;  %v386_v9 = vrot.slane %v4858_v4, 1  ;;  %v387_v59 = vrot.slane %v4857_v25, 1  ;;  %v389_v15 = vrot.slane %v4856_v29, 1 }
  0x28   : > { %3355 = vmatprep.mubr.msk.bf16.mxu0 %vm476_vm2, %v4061_v57  ;;  %v4863_v12 = vunpack.c.l.bf16 %v4082_v30  ;;  %v4862_v16 = vunpack.c.h.bf16 %v4082_v30  ;;  %v4115_v60 = vpack.c.bf16 %v385_v11, %v383_v46  ;;  %v4868_v61 = vunpack.c.l.bf16 %v4089_v36 }
  0x29   : > { %v913_v22 = vrot.slane %v232_v20, 2  ;;  %v4866_v24 = vunpack.c.l.bf16 %v4100_v50  ;;  %v4865_v29 = vunpack.c.h.bf16 %v4100_v50  ;;  %v4867_v25 = vunpack.c.l.bf16 %v4103_v13 }
  0x2a   : > { %v914_v4 = vrot.slane %v233_v31, 2  ;;  %v916_v42 = vrot.slane %v234_v32, 2  ;;  %v910_v11 = vsel %vm902_vm3, %v908_v43, %v909_v37  ;;  %v912_v46 = vsel %vm902_vm3, %v909_v37, %v911_v47  ;;  %v4138_v31 = vld [vmem:[%s3895_s25 + $0x84] sm:$0xff]   ;;  %v4141_v32 = vld [vmem:[%s3895_s25 + $0x8c] sm:$0x1] }
  0x2b   : > { %v388_v20 = vsel %vm345_vm1, %v386_v9, %v387_v59  ;;  %v390_v41 = vsel %vm345_vm1, %v387_v59, %v389_v15  ;;  %v391_v33 = vrot.slane %v4863_v12, 1  ;;  %v392_v23 = vrot.slane %v4862_v16, 1  ;;  %v4156_v15 = vld [vmem:[%s3895_s25 + $0x90] sm:$0xff]  }
  0x2c   : > { %3220 = vmatmul.mubr.msk.bf16.gmra.mrb[8].mxu1 %vm476_vm2, %v4061_v57  ;;  %v394_v43 = vrot.slane %v4868_v61, 1  ;;  %v4147_v9 = vpack.c.bf16 %v912_v46, %v910_v11  ;;  %v396_v37 = vrot.slane %v4866_v24, 1  ;;  %v397_v47 = vrot.slane %v4865_v29, 1  ;;  %v4164_v46 = vld [vmem:[%s3895_s25 + $0x98] sm:$0x1] }
  0x2d   : > { %3223 = vmatprep.mubr.msk.bf16.mxu1 %vm476_vm2, %v4095_v10  ;;  %v399_v59 = vrot.slane %v4867_v25, 1  ;;  %v4158_v16 = vpack.c.bf16 %v390_v41, %v388_v20  ;;  %v4876_v12 = vunpack.c.l.bf16 %v4138_v31  ;;  %v4875_v18 = vunpack.c.h.bf16 %v4138_v31 }
  0x2e   : > { %v4871_v11 = vunpack.c.l.bf16 %v4141_v32  ;;  %v393_v29 = vsel %vm345_vm1, %v391_v33, %v392_v23  ;;  %v915_v24 = vsel %vm902_vm3, %v913_v22, %v914_v4  ;;  %v917_v25 = vsel %vm902_vm3, %v914_v4, %v916_v42 }
  0x2f   : > { %3356 = vmatmul.mubr.msk.bf16.gmra.mrb[8].mxu0 %vm476_vm2, %v4095_v10  ;;  %v918_v41 = vrot.slane %v235_v38, 2  ;;  %v395_v20 = vsel %vm345_vm1, %v392_v23, %v394_v43  ;;  %v919_v61 = vrot.slane %v236_v39, 2  ;;  %v4874_v17 = vunpack.c.l.bf16 %v4156_v15 }
  0x30   : > { %3359 = vmatprep.mubr.msk.bf16.mxu0 %vm476_vm2, %v4115_v60  ;;  %v4872_v5 = vunpack.c.h.bf16 %v4156_v15  ;;  %v398_v33 = vsel %vm345_vm1, %v396_v37, %v397_v47  ;;  %v400_v42 = vsel %vm345_vm1, %v397_v47, %v399_v59  ;;  %v921_v38 = vrot.slane %v237_v45, 2 }
  0x31   : > { %v4873_v4 = vunpack.c.l.bf16 %v4164_v46  ;;  %v401_v22 = vrot.slane %v4876_v12, 1  ;;  %v402_v39 = vrot.slane %v4875_v18, 1  ;;  %v404_v23 = vrot.slane %v4871_v11, 1  ;;  %v4207_v11 = vld [vmem:[%s3895_s25 + $0x9c] sm:$0xff]  }
  0x32   : > { %v4193_v43 = vpack.c.bf16 %v395_v20, %v393_v29  ;;  %v4195_v37 = vpack.c.bf16 %v917_v25, %v915_v24  ;;  %v4199_v34 = vpack.c.bf16 %v400_v42, %v398_v33  ;;  %v920_v45 = vsel %vm902_vm3, %v918_v41, %v919_v61  ;;  %v4217_v41 = vld [vmem:[%s3895_s25 + $0xa4] sm:$0x1] }
  0x33   : > { %v406_v47 = vrot.slane %v4874_v17, 1  ;;  %v407_v59 = vrot.slane %v4872_v5, 1  ;;  %v922_v25 = vsel %vm902_vm3, %v919_v61, %v921_v38  ;;  %v923_v29 = vrot.slane %v238_v48, 2  ;;  %v4226_v38 = vld [vmem:[%s3895_s25 + $0xa8] sm:$0xff]   ;;  %v4229_v48 = vld [vmem:[%s3895_s25 + $0xb0] sm:$0x1] }
  0x34   : > { %3224 = vmatmul.mubr.msk.bf16.gmra.mrb[12].mxu1 %vm476_vm2, %v4115_v60  ;;  %v924_v24 = vrot.slane %v239_v52, 2  ;;  %v409_v20 = vrot.slane %v4873_v4, 1  ;;  %v403_v33 = vsel %vm345_vm1, %v401_v22, %v402_v39  ;;  %v405_v42 = vsel %vm345_vm1, %v402_v39, %v404_v23 }
  0x35   : > { %3227 = vmatprep.mubr.msk.bf16.mxu1 %vm476_vm2, %v4158_v16  ;;  %v926_v5 = vrot.slane %v240_v53, 2  ;;  %v928_v61 = vrot.slane %v241_v62, 2  ;;  %v929_v52 = vrot.slane %v242_v63, 2  ;;  %v4891_v22 = vunpack.c.l.bf16 %v3984_v54 }
  0x36   : > { %v4882_v39 = vunpack.c.l.bf16 %v4207_v11  ;;  %v4881_v40 = vunpack.c.h.bf16 %v4207_v11  ;;  %v1907_v53 = vsel %vm525_vm0, %v4010_v2, 0  ;;  %v4243_v62 = vpack.c.bf16 %v922_v25, %v920_v45 }
  0x37   : > { %3360 = vmatmul.mubr.msk.bf16.gmra.mrb[12].mxu0 %vm476_vm2, %v4158_v16  ;;  %v931_v4 = vrot.slane %v4891_v22, 2  ;;  %v408_v23 = vsel %vm345_vm1, %v406_v47, %v407_v59  ;;  %v4879_v17 = vunpack.c.l.bf16 %v4217_v41  ;;  %v410_v63 = vsel %vm345_vm1, %v407_v59, %v409_v20  ;;  %v4258_v47 = vld [vmem:[%s4849_s1 + $0xe] sm:$0x3] }
  0x38   : > { %3381 = vmatprep.mubr.msk.bf16.mxu0 %vm476_vm2, %v4147_v9  ;;  %v4877_v54 = vunpack.c.l.bf16 %v4226_v38  ;;  %v4878_v22 = vunpack.c.h.bf16 %v4226_v38  ;;  %v4880_v18 = vunpack.c.l.bf16 %v4229_v48  ;;  %v4251_v12 = vpack.c.bf16 %v405_v42, %v403_v33 }
  0x39   : > { %v925_v2 = vsel %vm902_vm3, %v923_v29, %v924_v24  ;;  %v927_v45 = vsel %vm902_vm3, %v924_v24, %v926_v5  ;;  %v930_v59 = vsel %vm902_vm3, %v928_v61, %v929_v52  ;;  %v932_v25 = vsel %vm902_vm3, %v929_v52, %v931_v4  ;;  %v4283_v52 = vld [vmem:[%s3895_s25 + $0xb4] sm:$0xff]  }
  0x3a   : > { %4892 = vst [vmem:[#allocation3_spill] sm:$0xff] %v4251_v12  ;;  %v411_v20 = vrot.slane %v4882_v39, 1  ;;  %v412_v29 = vrot.slane %v4881_v40, 1  ;;  %v4270_v5 = vpack.c.bf16 %v410_v63, %v408_v23  ;;  %v414_v24 = vrot.slane %v4879_v17, 1 }
  0x3b   : > { %v4274_v33 = vpack.c.bf16 %v927_v45, %v925_v2  ;;  %v416_v4 = vrot.slane %v4877_v54, 1  ;;  %v417_v42 = vrot.slane %v4878_v22, 1  ;;  %v419_v61 = vrot.slane %v4880_v18, 1 }
  0x3c   : > { %3228 = vmatmul.mubr.msk.bf16.gmra.mrb[16].mxu1 %vm476_vm2, %v4193_v43  ;;  %v4290_v23 = vpack.c.bf16 %v932_v25, %v930_v59  ;;  %v4893_v63 = vunpack.c.l.bf16 %v3987_v55  ;;  %v4894_v45 = vunpack.c.h.bf16 %v3987_v55  ;;  %v4895_v22 = vunpack.c.l.bf16 %v4005_v0 }
  0x3d   : > { %3231 = vmatprep.mubr.msk.bf16.mxu1 %vm476_vm2, %v4199_v34  ;;  %v413_v18 = vsel %vm345_vm1, %v411_v20, %v412_v29  ;;  %v4896_v40 = vunpack.c.l.bf16 %v4021_v19  ;;  %v4897_v59 = vunpack.c.h.bf16 %v4021_v19  ;;  %v4898_v3 = vunpack.c.l.bf16 %v4030_v26 }
  0x3e   : > { %v933_v2 = vrot.slane %v4893_v63, 2  ;;  %v934_v54 = vrot.slane %v4894_v45, 2  ;;  %v936_v17 = vrot.slane %v4895_v22, 2  ;;  %v415_v0 = vsel %vm345_vm1, %v412_v29, %v414_v24 }
  0x3f   : > { %3382 = vmatmul.mubr.msk.bf16.vlgmr.msra.gmra.mrb[0].mxu0 %vm476_vm2, %v4195_v37  ;;  %v938_v39 = vrot.slane %v4896_v40, 2  ;;  %v939_v25 = vrot.slane %v4897_v59, 2  ;;  %v941_v63 = vrot.slane %v4898_v3, 2  ;;  %v4887_v22 = vunpack.c.l.bf16 %v4283_v52 }
  0x40   : > { %3414 = vmatpush3.bf16.msra.mxu0 %v1907_v53  ;;  %3385 = vmatprep.mubr.msk.bf16.mxu0 %vm476_vm2, %v4243_v62  ;;  %v4286_v53 = vld [vmem:[%s3895_s25 + $0xbc] sm:$0x1]  ;;  %v4886_v45 = vunpack.c.h.bf16 %v4283_v52  ;;  %v420_v40 = vsel %vm345_vm1, %v417_v42, %v419_v61  ;;  %v935_v59 = vsel %vm902_vm3, %v933_v2, %v934_v54  ;;  %v4318_v3 = vpack.c.bf16 %v415_v0, %v413_v18 }
  0x41   : > { %3781 = vmatprep.subr.msk.bf16.mxu0 %vm525_vm0, %v4258_v47  ;;  %v937_v26 = vsel %vm902_vm3, %v934_v54, %v936_v17  ;;  %v940_v29 = vsel %vm902_vm3, %v938_v39, %v939_v25  ;;  %v942_v24 = vsel %vm902_vm3, %v939_v25, %v941_v63  ;;  %v4900_v18 = vunpack.c.l.bf16 %v4286_v53 }
  0x42   : > { %v4335_v17 = vpack.c.bf16 %v937_v26, %v935_v59  ;;  %v4337_v39 = vpack.c.bf16 %v942_v24, %v940_v29  ;;  %v4901_v54 = vunpack.c.l.bf16 %v4057_v51  ;;  %v4902_v63 = vunpack.c.h.bf16 %v4057_v51 }
  0x43   : > { %v424_v61 = vrot.slane %v4900_v18, 1  ;;  %v4904_v59 = vunpack.c.l.bf16 %v4082_v30  ;;  %v4905_v29 = vunpack.c.h.bf16 %v4082_v30 }
  0x44   : > { %3232 = vmatmul.mubr.msk.bf16.gmra.mrb[20].mxu1 %vm476_vm2, %v4251_v12  ;;  %v418_v12 = vsel %vm345_vm1, %v416_v4, %v417_v42  ;;  %v421_v4 = vrot.slane %v4887_v22, 1  ;;  %v422_v42 = vrot.slane %v4886_v45, 1  ;;  %v944_v0 = vrot.slane %v4902_v63, 2 }
  0x45   : > { %3235 = vmatprep.mubr.msk.bf16.mxu1 %vm476_vm2, %v4270_v5  ;;  %v4325_v20 = vpack.c.bf16 %v420_v40, %v418_v12  ;;  %v943_v12 = vrot.slane %v4901_v54, 2  ;;  %v4903_v40 = vunpack.c.l.bf16 %v4064_v58  ;;  %v948_v26 = vrot.slane %v4904_v59, 2 }
  0x46   : > { %v423_v2 = vsel %vm345_vm1, %v421_v4, %v422_v42  ;;  %v425_v25 = vsel %vm345_vm1, %v422_v42, %v424_v61  ;;  %v949_v24 = vrot.slane %v4905_v29, 2  ;;  %v4906_v54 = vunpack.c.l.bf16 %v4089_v36 }
  0x47   : > { %3386 = vmatmul.mubr.msk.bf16.gmra.mrb[4].mxu0 %vm476_vm2, %v4274_v33  ;;  %4899 = vst [vmem:[#allocation4_spill] sm:$0xff] %v4325_v20  ;;  %v946_v18 = vrot.slane %v4903_v40, 2  ;;  %v4907_v22 = vunpack.c.l.bf16 %v3898_v6  ;;  %v4908_v42 = vunpack.c.h.bf16 %v3898_v6  ;;  %v4909_v63 = vunpack.c.l.bf16 %v3901_v7 }
  0x48   : > { %3389 = vmatprep.mubr.msk.bf16.mxu0 %vm476_vm2, %v4290_v23  ;;  %v951_v45 = vrot.slane %v4906_v54, 2  ;;  %v4363_v58 = vpack.c.bf16 %v425_v25, %v423_v2  ;;  %v945_v36 = vsel %vm902_vm3, %v943_v12, %v944_v0  ;;  %v4910_v2 = vunpack.c.l.bf16 %v4100_v50 }
  0x49   : > { %v903_v4 = vrot.slane %v4907_v22, 2  ;;  %v904_v61 = vrot.slane %v4908_v42, 2  ;;  %v947_v40 = vsel %vm902_vm3, %v944_v0, %v946_v18  ;;  %v950_v22 = vsel %vm902_vm3, %v948_v26, %v949_v24 }
  0x4a   : > { %v952_v59 = vsel %vm902_vm3, %v949_v24, %v951_v45  ;;  %v4376_v7 = vpack.c.bf16 %v947_v40, %v945_v36  ;;  %v953_v25 = vrot.slane %v4910_v2, 2  ;;  %v4911_v45 = vunpack.c.h.bf16 %v4100_v50 }
  0x4b   : > { %v4372_v29 = vsel %vm902_vm3, %v903_v4, %v904_v61  ;;  %v4385_v12 = vpack.c.bf16 %v952_v59, %v950_v22  ;;  %v4912_v18 = vunpack.c.l.bf16 %v4103_v13  ;;  %v4913_v4 = vunpack.c.l.bf16 %v4138_v31 }
  0x4c   : > { %3236 = vmatmul.mubr.msk.bf16.gmra.mrb[24].mxu1 %vm476_vm2, %v4318_v3  ;;  %v954_v0 = vrot.slane %v4911_v45, 2  ;;  %v1082_v40 = vsel %vm525_vm0, %v3966_v44, 0  ;;  %v4916_v44 = vunpack.c.l.bf16 %v4156_v15 }
  0x4d   : > { %3239 = vmatprep.mubr.msk.bf16.mxu1 %vm476_vm2, %v4325_v20  ;;  %v906_v20 = vrot.slane %v4909_v63, 2  ;;  %v956_v26 = vrot.slane %v4912_v18, 2  ;;  %v958_v42 = vrot.slane %v4913_v4, 2  ;;  %v4915_v63 = vunpack.c.l.bf16 %v4141_v32  ;;  %v4412_v32 = vld [vmem:[%s4849_s1 + $0x6] sm:$0x3] }
  0x4e   : > { %v955_v13 = vsel %vm902_vm3, %v953_v25, %v954_v0  ;;  %v963_v45 = vrot.slane %v4916_v44, 2 }
  0x4f   : > { %3390 = vmatmul.mubr.msk.bf16.gmra.mrb[8].mxu0 %vm476_vm2, %v4335_v17  ;;  %v4381_v54 = vsel %vm902_vm3, %v904_v61, %v906_v20  ;;  %v4914_v20 = vunpack.c.h.bf16 %v4138_v31  ;;  %v957_v36 = vsel %vm902_vm3, %v954_v0, %v956_v26  ;;  %v4917_v0 = vunpack.c.h.bf16 %v4156_v15 }
  0x50   : > { %3393 = vmatprep.mubr.msk.bf16.mxu0 %vm476_vm2, %v4337_v39  ;;  %v1015_v24 = vpack.c.bf16 %v4381_v54, %v4372_v29  ;;  %v4416_v2 = vpack.c.bf16 %v957_v36, %v955_v13  ;;  %v4918_v26 = vunpack.c.l.bf16 %v4164_v46  ;;  %v225_v54 = vld [vmem:[%s3895_s25 + $0xd4] sm:$0x1] }
  0x51   : > { %v959_v61 = vrot.slane %v4914_v20, 2  ;;  %v964_v18 = vrot.slane %v4917_v0, 2  ;;  %v4923_v0 = vunpack.c.h.bf16 %v4226_v38 }
  0x52   : > { %v966_v4 = vrot.slane %v4918_v26, 2 }
  0x53   : > { %v960_v22 = vsel %vm902_vm3, %v958_v42, %v959_v61  ;;  %v4919_v42 = vunpack.c.l.bf16 %v4207_v11  ;;  %v965_v46 = vsel %vm902_vm3, %v963_v45, %v964_v18  ;;  %v974_v26 = vrot.slane %v4923_v0, 2 }
  0x54   : > { %3240 = vmatmul.mubr.msk.bf16.gmra.mrb[28].mxu1 %vm476_vm2, %v4363_v58  ;;  %v967_v36 = vsel %vm902_vm3, %v964_v18, %v966_v4  ;;  %v4924_v18 = vunpack.c.l.bf16 %v4229_v48 }
  0x55   : > { %3245 = vmatprep.mubr.msk.bf16.mxu1 %vm476_vm2, %v3898_v6  ;;  %v961_v6 = vrot.slane %v4915_v63, 2  ;;  %v968_v20 = vrot.slane %v4919_v42, 2  ;;  %v4925_v42 = vunpack.c.l.bf16 %v4283_v52 }
  0x56   : > { %v976_v4 = vrot.slane %v4924_v18, 2 }
  0x57   : > { %3394 = vmatmul.mubr.msk.bf16.gmra.mrb[12].mxu0 %vm476_vm2, %v4376_v7  ;;  %v962_v59 = vsel %vm902_vm3, %v959_v61, %v961_v6  ;;  %v4920_v61 = vunpack.c.h.bf16 %v4207_v11  ;;  %v4921_v6 = vunpack.c.l.bf16 %v4217_v41 }
  0x58   : > { %3397 = vmatprep.mubr.msk.bf16.mxu0 %vm476_vm2, %v4385_v12  ;;  %v4420_v25 = vpack.c.bf16 %v962_v59, %v960_v22  ;;  %v4446_v22 = vpack.c.bf16 %v967_v36, %v965_v46  ;;  %v4922_v59 = vunpack.c.l.bf16 %v4226_v38  ;;  %v4465_v46 = vld [vmem:[%s3895_s25 + $0xc0] sm:$0xff]   ;;  %v222_v36 = vld [vmem:[%s3895_s25 + $0xc8] sm:$0x1]  ;;  %v977_v48 = vsel %vm902_vm3, %v974_v26, %v976_v4 }
  0x59   : > { %v969_v63 = vrot.slane %v4920_v61, 2  ;;  %v971_v13 = vrot.slane %v4921_v6, 2  ;;  %v4926_v61 = vunpack.c.h.bf16 %v4283_v52  ;;  %v4927_v6 = vunpack.c.l.bf16 %v4286_v53 }
  0x5a   : > { %v973_v44 = vrot.slane %v4922_v59, 2  ;;  %v275_v59 = vunpack.c.h.bf16 %v4465_v46  ;;  %v276_v0 = vunpack.c.l.bf16 %v222_v36 }
  0x5b   : > { %v972_v41 = vsel %vm902_vm3, %v969_v63, %v971_v13  ;;  %v981_v13 = vrot.slane %v4927_v6, 2 }
  0x5c   : > { %3246 = vmatmul.mubr.msk.bf16.vlgmr.msra.gmra.mrb[0].mxu1 %vm476_vm2, %v3904_v8  ;;  %v1692_v4 = vrot.slane %v275_v59, 2  ;;  %v1485_v36 = vrot.slane %v276_v0, 1 }
  0x5d   : > { %3278 = vmatpush3.bf16.msra.mxu1 %v1082_v40  ;;  %3249 = vmatprep.mubr.msk.bf16.mxu1 %vm476_vm2, %v3914_v14  ;;  %v970_v40 = vsel %vm902_vm3, %v968_v20, %v969_v63  ;;  %v978_v20 = vrot.slane %v4925_v42, 2  ;;  %v979_v63 = vrot.slane %v4926_v61, 2  ;;  %v1694_v61 = vrot.slane %v276_v0, 2 }
  0x5e   : > { %3776 = vmatprep.subr.msk.bf16.mxu1 %vm525_vm0, %v4412_v32  ;;  %v4454_v45 = vpack.c.bf16 %v972_v41, %v970_v40  ;;  %v975_v40 = vsel %vm902_vm3, %v973_v44, %v974_v26  ;;  %v274_v41 = vunpack.c.l.bf16 %v4465_v46  ;;  %v279_v0 = vunpack.c.l.bf16 %v225_v54 }
  0x5f   : > { %3398 = vmatmul.mubr.msk.bf16.gmra.mrb[16].mxu0 %vm476_vm2, %v4416_v2  ;;  %v980_v53 = vsel %vm902_vm3, %v978_v20, %v979_v63  ;;  %v982_v18 = vsel %vm902_vm3, %v979_v63, %v981_v13  ;;  %v4480_v42 = vpack.c.bf16 %v977_v48, %v975_v40  ;;  %v1483_v20 = vrot.slane %v275_v59, 1  ;;  %v2971_v59 = vld [vmem:[%s4849_s1 + $0x10] sm:$0x3] }
  0x60   : > { %3401 = vmatprep.mubr.msk.bf16.mxu0 %vm476_vm2, %v4420_v25  ;;  %v4484_v44 = vpack.c.bf16 %v982_v18, %v980_v53  ;;  %v1691_v26 = vrot.slane %v274_v41, 2  ;;  %v1482_v6 = vrot.slane %v274_v41, 1  ;;  %v1695_v13 = vsel %vm902_vm3, %v1692_v4, %v1694_v61 }
  0x61   : > { %v1486_v48 = vsel %vm345_vm1, %v1483_v20, %v1485_v36  ;;  %v2119_v41 = vsel %vm525_vm0, %v4258_v47, 0  ;;  %v1284_v47 = vsel %vm525_vm0, %v4412_v32, 0 }
  0x62   : > { %v1693_v63 = vsel %vm902_vm3, %v1691_v26, %v1692_v4  ;;  %v1484_v40 = vsel %vm345_vm1, %v1482_v6, %v1483_v20  ;;  %v2317_v26 = vrot.slane %v279_v0, 2  ;;  %v2328_v20 = vsel %vm525_vm0, %v2971_v59, 0 }
  0x63   : > { %v4494_v53 = vpack.c.bf16 %v1486_v48, %v1484_v40  ;;  %v4498_v18 = vpack.c.bf16 %v1695_v13, %v1693_v63 }
  0x64   : > { %3250 = vmatmul.mubr.msk.bf16.gmra.mrb[4].mxu1 %vm476_vm2, %v3937_v27 }
  0x65   : > { %3253 = vmatprep.mubr.msk.bf16.mxu1 %vm476_vm2, %v3949_v35 }
  0x67   : > { %3402 = vmatmul.mubr.msk.bf16.gmra.mrb[20].mxu0 %vm476_vm2, %v4446_v22 }
  0x68   : > { %3405 = vmatprep.mubr.msk.bf16.mxu0 %vm476_vm2, %v4454_v45 }
  0x6c   : > { %3254 = vmatmul.mubr.msk.bf16.gmra.mrb[8].mxu1 %vm476_vm2, %v3977_v49 }
  0x6d   : > { %3257 = vmatprep.mubr.msk.bf16.mxu1 %vm476_vm2, %v3987_v55 }
  0x6f   : > { %3406 = vmatmul.mubr.msk.bf16.gmra.mrb[24].mxu0 %vm476_vm2, %v4480_v42 }
  0x70   : > { %3409 = vmatprep.mubr.msk.bf16.mxu0 %vm476_vm2, %v4484_v44 }
  0x74   : > { %3258 = vmatmul.mubr.msk.bf16.gmra.mrb[12].mxu1 %vm476_vm2, %v4021_v19 }
  0x75   : > { %3261 = vmatprep.mubr.msk.bf16.mxu1 %vm476_vm2, %v4057_v51 }
  0x77   : > { %3410 = vmatmul.mubr.msk.bf16.gmra.mrb[28].mxu0 %vm476_vm2, %v4498_v18 }
  0x78   : > { %3415 = vmatprep.mubr.msk.bf16.mxu0 %vm476_vm2, %v3914_v14 }
  0x7c   : > { %3262 = vmatmul.mubr.msk.bf16.gmra.mrb[16].mxu1 %vm476_vm2, %v4082_v30 }
  0x7d   : > { %3265 = vmatprep.mubr.msk.bf16.mxu1 %vm476_vm2, %v4100_v50 }
  0x7f   : > { %3416 = vmatmul.mubr.msk.bf16.vlgmr.msra.gmra.mrb[0].mxu0 %vm476_vm2, %v3937_v27 }
  0x80   : > { %3448 = vmatpush3.bf16.msra.mxu0 %v2119_v41  ;;  %3419 = vmatprep.mubr.msk.bf16.mxu0 %vm476_vm2, %v3949_v35 }
  0x81   : > { %3782 = vmatprep.subr.msk.bf16.mxu0 %vm525_vm0, %v2971_v59 }
  0x84   : > { %3266 = vmatmul.mubr.msk.bf16.gmra.mrb[20].mxu1 %vm476_vm2, %v4138_v31 }
  0x85   : > { %3269 = vmatprep.mubr.msk.bf16.mxu1 %vm476_vm2, %v4156_v15 }
  0x87   : > { %3420 = vmatmul.mubr.msk.bf16.gmra.mrb[4].mxu0 %vm476_vm2, %v3977_v49 }
  0x88   : > { %3423 = vmatprep.mubr.msk.bf16.mxu0 %vm476_vm2, %v3987_v55 }
  0x8c   : > { %3270 = vmatmul.mubr.msk.bf16.gmra.mrb[24].mxu1 %vm476_vm2, %v4207_v11 }
  0x8d   : > { %3273 = vmatprep.mubr.msk.bf16.mxu1 %vm476_vm2, %v4226_v38 }
  0x8f   : > { %3424 = vmatmul.mubr.msk.bf16.gmra.mrb[8].mxu0 %vm476_vm2, %v4021_v19 }
  0x90   : > { %3427 = vmatprep.mubr.msk.bf16.mxu0 %vm476_vm2, %v4057_v51 }
  0x94   : > { %3274 = vmatmul.mubr.msk.bf16.gmra.mrb[28].mxu1 %vm476_vm2, %v4283_v52 }
  0x95   : > { %3279 = vmatprep.mubr.msk.bf16.mxu1 %vm476_vm2, %v1015_v24 }
  0x97   : > { %3428 = vmatmul.mubr.msk.bf16.gmra.mrb[12].mxu0 %vm476_vm2, %v4082_v30 }
  0x98   : > { %3431 = vmatprep.mubr.msk.bf16.mxu0 %vm476_vm2, %v4100_v50 }
  0x9c   : > { %3280 = vmatmul.mubr.msk.bf16.vlgmr.msra.gmra.mrb[0].mxu1 %vm476_vm2, %v4147_v9 }
  0x9d   : > { %3312 = vmatpush3.bf16.msra.mxu1 %v1284_v47  ;;  %3283 = vmatprep.mubr.msk.bf16.mxu1 %vm476_vm2, %v4195_v37 }
  0x9e   : > { %3778 = vmatprep.subr.msk.bf16.mxu1 %vm525_vm0, %v3870_v1  ;;  %v223_v1 = vld [vmem:[%s3895_s25 + $0xcc] sm:$0xff]  }
  0x9f   : > { %3432 = vmatmul.mubr.msk.bf16.gmra.mrb[16].mxu0 %vm476_vm2, %v4138_v31  ;;  %v277_v9 = vunpack.c.l.bf16 %v223_v1  ;;  %v278_v29 = vunpack.c.h.bf16 %v223_v1 }
  0xa0   : > { %3435 = vmatprep.mubr.msk.bf16.mxu0 %vm476_vm2, %v4156_v15 }
  0xa1   : > { %v2314_v24 = vrot.slane %v277_v9, 2  ;;  %v2315_v32 = vrot.slane %v278_v29, 2 }
  0xa3   : > { %v4579_v4 = vsel %vm902_vm3, %v2314_v24, %v2315_v32  ;;  %v4584_v61 = vsel %vm902_vm3, %v2315_v32, %v2317_v26 }
  0xa4   : > { %3284 = vmatmul.mubr.msk.bf16.gmra.mrb[4].mxu1 %vm476_vm2, %v4243_v62  ;;  %v2321_v6 = vpack.c.bf16 %v4584_v61, %v4579_v4 }
  0xa5   : > { %3287 = vmatprep.mubr.msk.bf16.mxu1 %vm476_vm2, %v4274_v33 }
  0xa7   : > { %3436 = vmatmul.mubr.msk.bf16.gmra.mrb[20].mxu0 %vm476_vm2, %v4207_v11 }
  0xa8   : > { %3439 = vmatprep.mubr.msk.bf16.mxu0 %vm476_vm2, %v4226_v38 }
  0xac   : > { %3288 = vmatmul.mubr.msk.bf16.gmra.mrb[8].mxu1 %vm476_vm2, %v4290_v23 }
  0xad   : > { %3291 = vmatprep.mubr.msk.bf16.mxu1 %vm476_vm2, %v4335_v17 }
  0xaf   : > { %3440 = vmatmul.mubr.msk.bf16.gmra.mrb[24].mxu0 %vm476_vm2, %v4283_v52 }
  0xb0   : > { %3443 = vmatprep.mubr.msk.bf16.mxu0 %vm476_vm2, %v4465_v46 }
  0xb4   : > { %3292 = vmatmul.mubr.msk.bf16.gmra.mrb[12].mxu1 %vm476_vm2, %v4337_v39 }
  0xb5   : > { %3295 = vmatprep.mubr.msk.bf16.mxu1 %vm476_vm2, %v4376_v7 }
  0xb7   : > { %3444 = vmatmul.mubr.msk.bf16.gmra.mrb[28].mxu0 %vm476_vm2, %v223_v1 }
  0xb8   : > { %3449 = vmatprep.mubr.msk.bf16.mxu0 %vm476_vm2, %v3989_v56  ;;  %v4929_v56 = vld [vmem:[#allocation3_spill] sm:$0xff] }
  0xbc   : > { %3296 = vmatmul.mubr.msk.bf16.gmra.mrb[16].mxu1 %vm476_vm2, %v4385_v12 }
  0xbd   : > { %3299 = vmatprep.mubr.msk.bf16.mxu1 %vm476_vm2, %v4416_v2 }
  0xbf   : > { %3450 = vmatmul.mubr.msk.bf16.vlgmr.msra.gmra.mrb[0].mxu0 %vm476_vm2, %v4023_v21  ;;  %v2108_v21 = vrot.slane %v279_v0, 1 }
  0xc0   : > { %3482 = vmatpush3.bf16.msra.mxu0 %v2328_v20  ;;  %3453 = vmatprep.mubr.msk.bf16.mxu0 %vm476_vm2, %v4032_v28 }
  0xc4   : > { %3300 = vmatmul.mubr.msk.bf16.gmra.mrb[20].mxu1 %vm476_vm2, %v4420_v25 }
  0xc5   : > { %3303 = vmatprep.mubr.msk.bf16.mxu1 %vm476_vm2, %v4446_v22 }
  0xc7   : > { %3454 = vmatmul.mubr.msk.bf16.gmra.mrb[4].mxu0 %vm476_vm2, %v4061_v57 }
  0xc8   : > { %3457 = vmatprep.mubr.msk.bf16.mxu0 %vm476_vm2, %v4095_v10  ;;  %v4928_v10 = vld [vmem:[#allocation2_spill] sm:$0xff] }
  0xcc   : > { %3304 = vmatmul.mubr.msk.bf16.gmra.mrb[24].mxu1 %vm476_vm2, %v4454_v45 }
  0xcd   : > { %3307 = vmatprep.mubr.msk.bf16.mxu1 %vm476_vm2, %v4480_v42 }
  0xcf   : > { %3458 = vmatmul.mubr.msk.bf16.gmra.mrb[8].mxu0 %vm476_vm2, %v4115_v60 }
  0xd0   : > { %3461 = vmatprep.mubr.msk.bf16.mxu0 %vm476_vm2, %v4158_v16 }
  0xd4   : > { %3308 = vmatmul.mubr.msk.bf16.gmra.mrb[28].mxu1 %vm476_vm2, %v4484_v44 }
  0xd5   : > { %3313 = vmatprep.mubr.msk.bf16.mxu1 %vm476_vm2, %v3904_v8  ;;  %v4930_v8 = vld [vmem:[#allocation4_spill] sm:$0xff] }
  0xd7   : > { %3462 = vmatmul.mubr.msk.bf16.gmra.mrb[12].mxu0 %vm476_vm2, %v4193_v43 }
  0xd8   : > { %3465 = vmatprep.mubr.msk.bf16.mxu0 %vm476_vm2, %v4199_v34 }
  0xdc   : > { %3314 = vmatmul.mubr.msk.bf16.vlgmr.msra.gmra.mrb[0].mxu1 %vm476_vm2, %v3914_v14  ;;  %v2105_v14 = vrot.slane %v277_v9, 1 }
  0xdd   : > { %3516 = vmatpush3.bf16.msra.mxu1 %v4928_v10  ;;  %3317 = vmatprep.mubr.msk.bf16.mxu1 %vm476_vm2, %v3937_v27  ;;  %v2106_v27 = vrot.slane %v278_v29, 1 }
  0xdf   : > { %3466 = vmatmul.mubr.msk.bf16.gmra.mrb[16].mxu0 %vm476_vm2, %v4929_v56 }
  0xe0   : > { %3469 = vmatprep.mubr.msk.bf16.mxu0 %vm476_vm2, %v4270_v5 }
  0xe4   : > { %3318 = vmatmul.mubr.msk.bf16.gmra.mrb[4].mxu1 %vm476_vm2, %v3949_v35  ;;  %v2107_v35 = vsel %vm345_vm1, %v2105_v14, %v2106_v27 }
  0xe5   : > { %3321 = vmatprep.mubr.msk.bf16.mxu1 %vm476_vm2, %v3977_v49  ;;  %v2109_v49 = vsel %vm345_vm1, %v2106_v27, %v2108_v21 }
  0xe7   : > { %3470 = vmatmul.mubr.msk.bf16.gmra.mrb[20].mxu0 %vm476_vm2, %v4318_v3 }
  0xe8   : > { %3473 = vmatprep.mubr.msk.bf16.mxu0 %vm476_vm2, %v4930_v8 }
  0xec   : > { %3322 = vmatmul.mubr.msk.bf16.gmra.mrb[8].mxu1 %vm476_vm2, %v3987_v55  ;;  %v2112_v55 = vpack.c.bf16 %v2109_v49, %v2107_v35 }
  0xed   : > { %3325 = vmatprep.mubr.msk.bf16.mxu1 %vm476_vm2, %v4021_v19 }
  0xef   : > { %3474 = vmatmul.mubr.msk.bf16.gmra.mrb[24].mxu0 %vm476_vm2, %v4363_v58 }
  0xf0   : > { %3477 = vmatprep.mubr.msk.bf16.mxu0 %vm476_vm2, %v4494_v53 }
  0xf4   : > { %3326 = vmatmul.mubr.msk.bf16.gmra.mrb[12].mxu1 %vm476_vm2, %v4057_v51 }
  0xf5   : > { %3329 = vmatprep.mubr.msk.bf16.mxu1 %vm476_vm2, %v4082_v30 }
  0xf7   : > { %3478 = vmatmul.mubr.msk.bf16.gmra.mrb[28].mxu0 %vm476_vm2, %v2112_v55 }
  0xf8   : > { %3483 = vmatprep.mubr.msk.bf16.mxu0 %vm476_vm2, %v4195_v37 }
  0xfc   : > { %3330 = vmatmul.mubr.msk.bf16.gmra.mrb[16].mxu1 %vm476_vm2, %v4100_v50 }
  0xfd   : > { %3333 = vmatprep.mubr.msk.bf16.mxu1 %vm476_vm2, %v4138_v31 }
  0xff   : > { %3484 = vmatmul.mubr.msk.bf16.vlgmr.msra.gmra.mrb[0].mxu0 %vm476_vm2, %v4243_v62 }
 0x100   : > { %3487 = vmatprep.mubr.msk.bf16.mxu0 %vm476_vm2, %v4274_v33  ;;  %v4735_v33 = vld [vmem:[%s4850_s2] ss:$0 sm:$0xff] }
 0x104   : > { %3334 = vmatmul.mubr.msk.bf16.gmra.mrb[20].mxu1 %vm476_vm2, %v4156_v15 }
 0x105   : > { %3337 = vmatprep.mubr.msk.bf16.mxu1 %vm476_vm2, %v4207_v11 }
 0x107   : > { %3488 = vmatmul.mubr.msk.bf16.gmra.mrb[4].mxu0 %vm476_vm2, %v4290_v23 }
 0x108   : > { %3491 = vmatprep.mubr.msk.bf16.mxu0 %vm476_vm2, %v4335_v17 }
 0x10c   : > { %3338 = vmatmul.mubr.msk.bf16.gmra.mrb[24].mxu1 %vm476_vm2, %v4226_v38 }
 0x10d   : > { %3341 = vmatprep.mubr.msk.bf16.mxu1 %vm476_vm2, %v4283_v52 }
 0x10f   : > { %3492 = vmatmul.mubr.msk.bf16.gmra.mrb[8].mxu0 %vm476_vm2, %v4337_v39 }
 0x110   : > { %3495 = vmatprep.mubr.msk.bf16.mxu0 %vm476_vm2, %v4376_v7 }
 0x114   : > { %3342 = vmatmul.mubr.msk.bf16.gmra.mrb[28].mxu1 %vm476_vm2, %v4465_v46 }
 0x115   : > { %3363 = vmatprep.mubr.msk.bf16.mxu1 %vm476_vm2, %v4193_v43 }
 0x117   : > { %3496 = vmatmul.mubr.msk.bf16.gmra.mrb[12].mxu0 %vm476_vm2, %v4385_v12 }
 0x118   : > { %3499 = vmatprep.mubr.msk.bf16.mxu0 %vm476_vm2, %v4416_v2 }
 0x11c   : > { %3364 = vmatmul.mubr.msk.bf16.vlgmr.msra.gmra.mrb[16].mxu1 %vm476_vm2, %v4199_v34 }
 0x11d   : > { %3367 = vmatprep.mubr.msk.bf16.mxu1 %vm476_vm2, %v4929_v56 }
 0x11f   : > { %3500 = vmatmul.mubr.msk.bf16.gmra.mrb[16].mxu0 %vm476_vm2, %v4420_v25 }
 0x120   : > { %3503 = vmatprep.mubr.msk.bf16.mxu0 %vm476_vm2, %v4446_v22 }
 0x124   : > { %3368 = vmatmul.mubr.msk.bf16.gmra.mrb[20].mxu1 %vm476_vm2, %v4270_v5 }
 0x125   : > { %3371 = vmatprep.mubr.msk.bf16.mxu1 %vm476_vm2, %v4318_v3 }
 0x127   : > { %3504 = vmatmul.mubr.msk.bf16.gmra.mrb[20].mxu0 %vm476_vm2, %v4454_v45 }
 0x128   : > { %3507 = vmatprep.mubr.msk.bf16.mxu0 %vm476_vm2, %v4480_v42 }
 0x12c   : > { %3372 = vmatmul.mubr.msk.bf16.gmra.mrb[24].mxu1 %vm476_vm2, %v4930_v8 }
 0x12d   : > { %3375 = vmatprep.mubr.msk.bf16.mxu1 %vm476_vm2, %v4363_v58 }
 0x12f   : > { %3508 = vmatmul.mubr.msk.bf16.gmra.mrb[24].mxu0 %vm476_vm2, %v4484_v44 }
 0x130   : > { %3511 = vmatprep.mubr.msk.bf16.mxu0 %vm476_vm2, %v4498_v18 }
 0x134   : > { %3376 = vmatmul.mubr.msk.bf16.gmra.mrb[28].mxu1 %vm476_vm2, %v4494_v53 }
 0x137   : > { %3512 = vmatmul.mubr.msk.bf16.gmra.mrb[28].mxu0 %vm476_vm2, %v2321_v6 }
 0x1af   : > { %v3315_v19 = vpop.f32.mrb[0].mxu1 }
 0x1b0   : > { %v1320_v28 = vpop.f32.mrb[1].mxu1 }
 0x1b1   : > { %v3316_v50 = vpop.f32.mrb[2].mxu1 }
 0x1b2   : > { %v1323_v51 = vpop.f32.mrb[3].mxu1 }
 0x1b7   : > { %v3319_v57 = vpop.f32.mrb[4].mxu1 }
 0x1b8   : > { %v1336_v30 = vpop.f32.mrb[5].mxu1 }
 0x1b9   : > { %v3320_v16 = vpop.f32.mrb[6].mxu1 }
 0x1ba   : > { %v1339_v60 = vpop.f32.mrb[7].mxu1 }
 0x1bf   : > { %v3323_v31 = vpop.f32.mrb[8].mxu1 }
 0x1c0   : > { %v1352_v15 = vpop.f32.mrb[9].mxu1 }
 0x1c1   : > { %v4720_v11 = vpop.f32.mrb[10].mxu1 }
 0x1c2   : > { %v4722_v43 = vpop.f32.mrb[11].mxu1 }
 0x1c7   : > { %v4724_v37 = vpop.f32.mrb[12].mxu1 }
 0x1c8   : > { %v4726_v34 = vpop.f32.mrb[13].mxu1 }
 0x1c9   : > { %v4728_v38 = vpop.f32.mrb[14].mxu1 }
 0x1ca   : > { %v4730_v62 = vpop.f32.mrb[15].mxu1 }
 0x1d2   : > { %v3485_v5 = vpop.f32.mrb[0].mxu0 }
 0x1d3   : > { %v3517_v52 = vadd.f32 %v3485_v5, %v3315_v19  ;;  %v2364_v23 = vpop.f32.mrb[1].mxu0 }
 0x1d4   : > { %v3518_v3 = vadd.f32 %v2364_v23, %v1320_v28  ;;  %v3486_v17 = vpop.f32.mrb[2].mxu0 }
 0x1d5   : > { %v2532_v39 = vadd.f32 %v3517_v52, %v4735_v33  ;;  %v3519_v58 = vadd.f32 %v3486_v17, %v3316_v50  ;;  %v2367_v7 = vpop.f32.mrb[3].mxu0 }
 0x1d6   : > { %v2530_v12 = vadd.f32 %v3518_v3, %v4735_v33  ;;  %v3520_v2 = vadd.f32 %v2367_v7, %v1323_v51 }
 0x1d7   : > { %v2564_v25 = vmax.f32 %v2532_v39, 0.0  ;;  %v2533_v22 = vadd.f32 %v3519_v58, %v4735_v33 }
 0x1d8   : > { %v2562_v45 = vmax.f32 %v2530_v12, 0.0  ;;  %v2531_v46 = vadd.f32 %v3520_v2, %v4735_v33 }
 0x1d9   : > { %v3026_v42 = vpack.c.bf16 %v2564_v25, %v2564_v25  ;;  %v2565_v44 = vmax.f32 %v2533_v22, 0.0 }
 0x1da   : > { %v3024_v36 = vpack.c.bf16 %v2562_v45, %v2562_v45  ;;  %v2563_v63 = vmax.f32 %v2531_v46, 0.0  ;;  %v3489_v13 = vpop.f32.mrb[4].mxu0 }
 0x1db   : > { %2725 = vst.msk [vmem:[%s4744_s16 + $0x8] sm:$0xf] %vm2722_vm4, %v3026_v42  ;;  %v3027_v40 = vpack.c.bf16 %v2565_v44, %v2565_v44  ;;  %v3521_v48 = vadd.f32 %v3489_v13, %v3319_v57  ;;  %v2380_v53 = vpop.f32.mrb[5].mxu0 }
 0x1dc   : > { %2723 = vst.msk [vmem:[%s4744_s16] sm:$0xf] %vm2722_vm4, %v3024_v36  ;;  %v3025_v18 = vpack.c.bf16 %v2563_v63, %v2563_v63  ;;  %v3522_v41 = vadd.f32 %v2380_v53, %v1336_v30  ;;  %v3490_v59 = vpop.f32.mrb[6].mxu0 }
 0x1dd   : > { %2726 = vst.msk [vmem:[%s4744_s16 + $0xc] sm:$0xf] %vm2722_vm4, %v3027_v40  ;;  %v2536_v47 = vadd.f32 %v3521_v48, %v4735_v33  ;;  %v3523_v1 = vadd.f32 %v3490_v59, %v3320_v16  ;;  %v2383_v9 = vpop.f32.mrb[7].mxu0 }
 0x1de   : > { %2724 = vst.msk [vmem:[%s4744_s16 + $0x4] sm:$0xf] %vm2722_vm4, %v3025_v18  ;;  %v2534_v29 = vadd.f32 %v3522_v41, %v4735_v33  ;;  %v3524_v54 = vadd.f32 %v2383_v9, %v1339_v60 }
 0x1df   : > { %v2568_v24 = vmax.f32 %v2536_v47, 0.0  ;;  %v2537_v32 = vadd.f32 %v3523_v1, %v4735_v33 }
 0x1e0   : > { %v2566_v0 = vmax.f32 %v2534_v29, 0.0  ;;  %v2535_v26 = vadd.f32 %v3524_v54, %v4735_v33 }
 0x1e1   : > { %v3030_v4 = vpack.c.bf16 %v2568_v24, %v2568_v24  ;;  %v2569_v61 = vmax.f32 %v2537_v32, 0.0 }
 0x1e2   : > { %v3028_v6 = vpack.c.bf16 %v2566_v0, %v2566_v0  ;;  %v2567_v20 = vmax.f32 %v2535_v26, 0.0  ;;  %v3493_v10 = vpop.f32.mrb[8].mxu0 }
 0x1e3   : > { %2729 = vst.msk [vmem:[%s4744_s16 + $0x18] sm:$0xf] %vm2722_vm4, %v3030_v4  ;;  %v3031_v56 = vpack.c.bf16 %v2569_v61, %v2569_v61  ;;  %v3525_v8 = vadd.f32 %v3493_v10, %v3323_v31  ;;  %v2396_v14 = vpop.f32.mrb[9].mxu0 }
 0x1e4   : > { %2727 = vst.msk [vmem:[%s4744_s16 + $0x10] sm:$0xf] %vm2722_vm4, %v3028_v6  ;;  %v3029_v27 = vpack.c.bf16 %v2567_v20, %v2567_v20  ;;  %v3526_v21 = vadd.f32 %v2396_v14, %v1352_v15  ;;  %v3494_v35 = vpop.f32.mrb[10].mxu0 }
 0x1e5   : > { %2730 = vst.msk [vmem:[%s4744_s16 + $0x1c] sm:$0xf] %vm2722_vm4, %v3031_v56  ;;  %v2540_v49 = vadd.f32 %v3525_v8, %v4735_v33  ;;  %v3527_v55 = vadd.f32 %v3494_v35, %v4720_v11  ;;  %v2399_v19 = vpop.f32.mrb[11].mxu0 }
 0x1e6   : > { %2728 = vst.msk [vmem:[%s4744_s16 + $0x14] sm:$0xf] %vm2722_vm4, %v3029_v27  ;;  %v2538_v28 = vadd.f32 %v3526_v21, %v4735_v33  ;;  %v3528_v50 = vadd.f32 %v2399_v19, %v4722_v43 }
 0x1e7   : > { %v2572_v51 = vmax.f32 %v2540_v49, 0.0  ;;  %v2541_v57 = vadd.f32 %v3527_v55, %v4735_v33 }
 0x1e8   : > { %v2570_v30 = vmax.f32 %v2538_v28, 0.0  ;;  %v2539_v16 = vadd.f32 %v3528_v50, %v4735_v33 }
 0x1e9   : > { %v3034_v60 = vpack.c.bf16 %v2572_v51, %v2572_v51  ;;  %v2573_v31 = vmax.f32 %v2541_v57, 0.0 }
 0x1ea   : > { %v3032_v15 = vpack.c.bf16 %v2570_v30, %v2570_v30  ;;  %v2571_v11 = vmax.f32 %v2539_v16, 0.0  ;;  %v3497_v5 = vpop.f32.mrb[12].mxu0 }
 0x1eb   : > { %2733 = vst.msk [vmem:[%s4744_s16 + $0x28] sm:$0xf] %vm2722_vm4, %v3034_v60  ;;  %v3035_v52 = vpack.c.bf16 %v2573_v31, %v2573_v31  ;;  %v3529_v23 = vadd.f32 %v3497_v5, %v4724_v37  ;;  %v2412_v3 = vpop.f32.mrb[13].mxu0 }
 0x1ec   : > { %2731 = vst.msk [vmem:[%s4744_s16 + $0x20] sm:$0xf] %vm2722_vm4, %v3032_v15  ;;  %v3033_v43 = vpack.c.bf16 %v2571_v11, %v2571_v11  ;;  %v3530_v17 = vadd.f32 %v2412_v3, %v4726_v34  ;;  %v3498_v39 = vpop.f32.mrb[14].mxu0 }
 0x1ed   : > { %2734 = vst.msk [vmem:[%s4744_s16 + $0x2c] sm:$0xf] %vm2722_vm4, %v3035_v52  ;;  %v2544_v58 = vadd.f32 %v3529_v23, %v4735_v33  ;;  %v3531_v7 = vadd.f32 %v3498_v39, %v4728_v38  ;;  %v2415_v12 = vpop.f32.mrb[15].mxu0 }
 0x1ee   : > { %2732 = vst.msk [vmem:[%s4744_s16 + $0x24] sm:$0xf] %vm2722_vm4, %v3033_v43  ;;  %v2542_v2 = vadd.f32 %v3530_v17, %v4735_v33  ;;  %v3532_v37 = vadd.f32 %v2415_v12, %v4730_v62 }
 0x1ef   : > { %v3365_v25 = vpop.f32.mrb[16].mxu1  ;;  %v2576_v22 = vmax.f32 %v2544_v58, 0.0  ;;  %v2545_v34 = vadd.f32 %v3531_v7, %v4735_v33 }
 0x1f0   : > { %v1596_v45 = vpop.f32.mrb[17].mxu1  ;;  %v2574_v46 = vmax.f32 %v2542_v2, 0.0  ;;  %v2543_v42 = vadd.f32 %v3532_v37, %v4735_v33 }
 0x1f1   : > { %v3366_v44 = vpop.f32.mrb[18].mxu1  ;;  %v3038_v38 = vpack.c.bf16 %v2576_v22, %v2576_v22  ;;  %v2577_v36 = vmax.f32 %v2545_v34, 0.0 }
 0x1f2   : > { %v1599_v63 = vpop.f32.mrb[19].mxu1  ;;  %v3036_v13 = vpack.c.bf16 %v2574_v46, %v2574_v46  ;;  %v2575_v40 = vmax.f32 %v2543_v42, 0.0  ;;  %v3501_v48 = vpop.f32.mrb[16].mxu0 }
 0x1f3   : > { %2737 = vst.msk [vmem:[%s4744_s16 + $0x38] sm:$0xf] %vm2722_vm4, %v3038_v38  ;;  %v3039_v62 = vpack.c.bf16 %v2577_v36, %v2577_v36  ;;  %v3533_v53 = vadd.f32 %v3501_v48, %v3365_v25  ;;  %v2428_v18 = vpop.f32.mrb[17].mxu0 }
 0x1f4   : > { %2735 = vst.msk [vmem:[%s4744_s16 + $0x30] sm:$0xf] %vm2722_vm4, %v3036_v13  ;;  %v3037_v41 = vpack.c.bf16 %v2575_v40, %v2575_v40  ;;  %v3534_v59 = vadd.f32 %v2428_v18, %v1596_v45  ;;  %v3502_v47 = vpop.f32.mrb[18].mxu0 }
 0x1f5   : > { %2738 = vst.msk [vmem:[%s4744_s16 + $0x3c] sm:$0xf] %vm2722_vm4, %v3039_v62  ;;  %v2548_v1 = vadd.f32 %v3533_v53, %v4735_v33  ;;  %v3535_v9 = vadd.f32 %v3502_v47, %v3366_v44  ;;  %v2431_v29 = vpop.f32.mrb[19].mxu0 }
 0x1f6   : > { %2736 = vst.msk [vmem:[%s4744_s16 + $0x34] sm:$0xf] %vm2722_vm4, %v3037_v41  ;;  %v2546_v54 = vadd.f32 %v3534_v59, %v4735_v33  ;;  %v3536_v24 = vadd.f32 %v2431_v29, %v1599_v63 }
 0x1f7   : > { %v3369_v32 = vpop.f32.mrb[20].mxu1  ;;  %v2580_v0 = vmax.f32 %v2548_v1, 0.0  ;;  %v2549_v26 = vadd.f32 %v3535_v9, %v4735_v33 }
 0x1f8   : > { %v1612_v4 = vpop.f32.mrb[21].mxu1  ;;  %v2578_v61 = vmax.f32 %v2546_v54, 0.0  ;;  %v2547_v6 = vadd.f32 %v3536_v24, %v4735_v33 }
 0x1f9   : > { %v3370_v20 = vpop.f32.mrb[22].mxu1  ;;  %v3042_v10 = vpack.c.bf16 %v2580_v0, %v2580_v0  ;;  %v2581_v56 = vmax.f32 %v2549_v26, 0.0 }
 0x1fa   : > { %v1615_v8 = vpop.f32.mrb[23].mxu1  ;;  %v3040_v14 = vpack.c.bf16 %v2578_v61, %v2578_v61  ;;  %v2579_v27 = vmax.f32 %v2547_v6, 0.0  ;;  %v3505_v21 = vpop.f32.mrb[20].mxu0 }
 0x1fb   : > { %2741 = vst.msk [vmem:[%s4744_s16 + $0x48] sm:$0xf] %vm2722_vm4, %v3042_v10  ;;  %v3043_v35 = vpack.c.bf16 %v2581_v56, %v2581_v56  ;;  %v3537_v49 = vadd.f32 %v3505_v21, %v3369_v32  ;;  %v2444_v55 = vpop.f32.mrb[21].mxu0 }
 0x1fc   : > { %2739 = vst.msk [vmem:[%s4744_s16 + $0x40] sm:$0xf] %vm2722_vm4, %v3040_v14  ;;  %v3041_v19 = vpack.c.bf16 %v2579_v27, %v2579_v27  ;;  %v3538_v28 = vadd.f32 %v2444_v55, %v1612_v4  ;;  %v3506_v50 = vpop.f32.mrb[22].mxu0 }
 0x1fd   : > { %2742 = vst.msk [vmem:[%s4744_s16 + $0x4c] sm:$0xf] %vm2722_vm4, %v3043_v35  ;;  %v2552_v51 = vadd.f32 %v3537_v49, %v4735_v33  ;;  %v3539_v57 = vadd.f32 %v3506_v50, %v3370_v20  ;;  %v2447_v30 = vpop.f32.mrb[23].mxu0 }
 0x1fe   : > { %2740 = vst.msk [vmem:[%s4744_s16 + $0x44] sm:$0xf] %vm2722_vm4, %v3041_v19  ;;  %v2550_v16 = vadd.f32 %v3538_v28, %v4735_v33  ;;  %v3540_v60 = vadd.f32 %v2447_v30, %v1615_v8 }
 0x1ff   : > { %v3373_v31 = vpop.f32.mrb[24].mxu1  ;;  %v2584_v15 = vmax.f32 %v2552_v51, 0.0  ;;  %v2553_v11 = vadd.f32 %v3539_v57, %v4735_v33 }
 0x200   : > { %v1628_v5 = vpop.f32.mrb[25].mxu1  ;;  %v2582_v52 = vmax.f32 %v2550_v16, 0.0  ;;  %v2551_v23 = vadd.f32 %v3540_v60, %v4735_v33 }
 0x201   : > { %v3374_v3 = vpop.f32.mrb[26].mxu1  ;;  %v3046_v43 = vpack.c.bf16 %v2584_v15, %v2584_v15  ;;  %v2585_v17 = vmax.f32 %v2553_v11, 0.0 }
 0x202   : > { %v1631_v39 = vpop.f32.mrb[27].mxu1  ;;  %v3044_v58 = vpack.c.bf16 %v2582_v52, %v2582_v52  ;;  %v2583_v7 = vmax.f32 %v2551_v23, 0.0  ;;  %v3509_v12 = vpop.f32.mrb[24].mxu0 }
 0x203   : > { %2745 = vst.msk [vmem:[%s4744_s16 + $0x58] sm:$0xf] %vm2722_vm4, %v3046_v43  ;;  %v3047_v2 = vpack.c.bf16 %v2585_v17, %v2585_v17  ;;  %v3541_v37 = vadd.f32 %v3509_v12, %v3373_v31  ;;  %v2460_v25 = vpop.f32.mrb[25].mxu0 }
 0x204   : > { %2743 = vst.msk [vmem:[%s4744_s16 + $0x50] sm:$0xf] %vm2722_vm4, %v3044_v58  ;;  %v3045_v22 = vpack.c.bf16 %v2583_v7, %v2583_v7  ;;  %v3542_v34 = vadd.f32 %v2460_v25, %v1628_v5  ;;  %v3510_v45 = vpop.f32.mrb[26].mxu0 }
 0x205   : > { %2746 = vst.msk [vmem:[%s4744_s16 + $0x5c] sm:$0xf] %vm2722_vm4, %v3047_v2  ;;  %v2556_v46 = vadd.f32 %v3541_v37, %v4735_v33  ;;  %v3543_v42 = vadd.f32 %v3510_v45, %v3374_v3  ;;  %v2463_v44 = vpop.f32.mrb[27].mxu0 }
 0x206   : > { %2744 = vst.msk [vmem:[%s4744_s16 + $0x54] sm:$0xf] %vm2722_vm4, %v3045_v22  ;;  %v2554_v38 = vadd.f32 %v3542_v34, %v4735_v33  ;;  %v3544_v36 = vadd.f32 %v2463_v44, %v1631_v39 }
 0x207   : > { %v3377_v63 = vpop.f32.mrb[28].mxu1  ;;  %v2588_v13 = vmax.f32 %v2556_v46, 0.0  ;;  %v2557_v40 = vadd.f32 %v3543_v42, %v4735_v33 }
 0x208   : > { %v1644_v48 = vpop.f32.mrb[29].mxu1  ;;  %v2586_v62 = vmax.f32 %v2554_v38, 0.0  ;;  %v2555_v53 = vadd.f32 %v3544_v36, %v4735_v33 }
 0x209   : > { %v3378_v18 = vpop.f32.mrb[30].mxu1  ;;  %v3050_v41 = vpack.c.bf16 %v2588_v13, %v2588_v13  ;;  %v2589_v59 = vmax.f32 %v2557_v40, 0.0 }
 0x20a   : > { %v1647_v47 = vpop.f32.mrb[31].mxu1  ;;  %v3048_v1 = vpack.c.bf16 %v2586_v62, %v2586_v62  ;;  %v2587_v9 = vmax.f32 %v2555_v53, 0.0  ;;  %v3513_v29 = vpop.f32.mrb[28].mxu0 }
 0x20b   : > { %2749 = vst.msk [vmem:[%s4744_s16 + $0x68] sm:$0xf] %vm2722_vm4, %v3050_v41  ;;  %v3051_v54 = vpack.c.bf16 %v2589_v59, %v2589_v59  ;;  %v3545_v24 = vadd.f32 %v3513_v29, %v3377_v63  ;;  %v2476_v32 = vpop.f32.mrb[29].mxu0 }
 0x20c   : > { %2747 = vst.msk [vmem:[%s4744_s16 + $0x60] sm:$0xf] %vm2722_vm4, %v3048_v1  ;;  %v3049_v0 = vpack.c.bf16 %v2587_v9, %v2587_v9  ;;  %v3546_v26 = vadd.f32 %v2476_v32, %v1644_v48  ;;  %v3514_v4 = vpop.f32.mrb[30].mxu0 }
 0x20d   : > { %2750 = vst.msk [vmem:[%s4744_s16 + $0x6c] sm:$0xf] %vm2722_vm4, %v3051_v54  ;;  %v2560_v61 = vadd.f32 %v3545_v24, %v4735_v33  ;;  %v3547_v6 = vadd.f32 %v3514_v4, %v3378_v18  ;;  %v2479_v20 = vpop.f32.mrb[31].mxu0 }
 0x20e   : > { %2748 = vst.msk [vmem:[%s4744_s16 + $0x64] sm:$0xf] %vm2722_vm4, %v3049_v0  ;;  %v2558_v10 = vadd.f32 %v3546_v26, %v4735_v33  ;;  %v3548_v56 = vadd.f32 %v2479_v20, %v1647_v47 }
 0x20f   : > { %v2592_v8 = vmax.f32 %v2560_v61, 0.0  ;;  %v2561_v14 = vadd.f32 %v3547_v6, %v4735_v33 }
 0x210   : > { %v2590_v27 = vmax.f32 %v2558_v10, 0.0  ;;  %v2559_v21 = vadd.f32 %v3548_v56, %v4735_v33 }
 0x211   : > { %v3054_v35 = vpack.c.bf16 %v2592_v8, %v2592_v8  ;;  %v2593_v49 = vmax.f32 %v2561_v14, 0.0 }
 0x212   : > { %v3052_v55 = vpack.c.bf16 %v2590_v27, %v2590_v27  ;;  %v2591_v19 = vmax.f32 %v2559_v21, 0.0 }
 0x213   : > { %2753 = vst.msk [vmem:[%s4744_s16 + $0x78] sm:$0xf] %vm2722_vm4, %v3054_v35  ;;  %v3055_v28 = vpack.c.bf16 %v2593_v49, %v2593_v49 }
 0x214   : > { %2751 = vst.msk [vmem:[%s4744_s16 + $0x70] sm:$0xf] %vm2722_vm4, %v3052_v55  ;;  %v3053_v50 = vpack.c.bf16 %v2591_v19, %v2591_v19 }
 0x215   : > { %2754 = vst.msk [vmem:[%s4744_s16 + $0x7c] sm:$0xf] %vm2722_vm4, %v3055_v28 }
 0x216   : > { %2752 = vst.msk [vmem:[%s4744_s16 + $0x74] sm:$0xf] %vm2722_vm4, %v3053_v50 }
 0x217 PF: > { %s13_s12 = sadd.s32 1, %s3834_s12  }
 0x218   : > { %p10_p4 = scmp.ge.s32.totalorder %s13_s12, 4  }
 0x21a   :  { %12 = sbr.rel (!%p10_p4) target bundleno = 1 (0x1), region = 70 }

// kernel: fused_spade_resnet_block.5
= control target key start
LH: loop header
LB: loop body
LE: loop exit
PB: predicated region body
PF: predicated region fallthrough
CT: control target
= control target key end

     0   :  { %s4538_s15 = smov 0   ;;  %s6157_s0 = inlined_call_operand.vmem [shape: f32[2,16,16,8], index: 0, kind: input, shape index: {}]   ;;  %s6158_s1 = inlined_call_operand.vmem [shape: bf16[2,18,18,16], index: 1, kind: input, shape index: {}]   ;;  %s6159_s2 = inlined_call_operand.vmem [shape: bf16[9,16,16], index: 2, kind: input, shape index: {}]   ;;  %s6160_s3 = inlined_call_operand.vmem [shape: f32[1,16], index: 3, kind: input, shape index: {}]   ;;  %s6161_s4 = inlined_call_operand.vmem [shape: bf16[2,16,16,8], index: 4, kind: output, shape index: {}]  }
   0x1 LB: > { %s3464_s16 = sadd.s32 4294967295, %s4510_s15   ;;  %p3468_p0 = scmp.ge.s32.totalorder %s4510_s15, 1  ;;  %s4510_s15 = sphi %s4538_s15, %s14_s15  }
   0x2   : > { %p172_p1 = scmp.lt.s32.totalorder %s4510_s15, 3 }
   0x4   : > { %p173_p2 = pnand %p3468_p0, %p172_p1 }
   0x6   : > { %176 = sbr.rel (%p173_p2) target bundleno = 657 (0x291), region = 36 }
   0xd   : > { %v4457_v0 = vld [vmem:[%s6159_s2 + $0x8] sm:$0xff]   ;;  %p203_p3 = scmp.lt.s32.totalorder %s3464_s16, 1  ;;  %v4552_v1 = vld [vmem:[%s6159_s2 + $0x20] sm:$0xff]   ;;  %vm425_vm0 = vcmask 1046528   ;;  %vm563_vm1 = vcmask 130048   ;;  %v4636_v38 = vld [vmem:[%s6159_s2 + $0x10] sm:$0xff]  }
   0xe   : > { %3883 = vmatprep.subr.bf16.mxu1 %v4457_v0  ;;  %4019 = vmatprep.subr.bf16.mxu0 %v4552_v1  ;;  %v4459_v2 = vld [vmem:[%s6159_s2] sm:$0xff]   ;;  %v4565_v3 = vld [vmem:[%s6159_s2 + $0x28] sm:$0xff]   ;;  %v4673_v56 = vld [vmem:[%s6159_s2 + $0x30] sm:$0xff]   ;;  %vm988_vm2 = vcmask 1045504   ;;  %vm2676_vm3 = vcmask 64512   ;;  %s4512_s21 = smov 120  }
   0xf   : > { %s6279_s16 = smov (!%p203_p3, %s3464_s16), 1  ;;  %3884 = vmatpush3.bf16.msra.mxu1 %v4457_v0  ;;  %4020 = vmatpush3.bf16.msra.mxu0 %v4552_v1  ;;  %vm3364_vm6 = vcmask 60416  }
  0x10   : > { %s4447_s23 = smul.u32 216, %s6279_s16  ;;  %3917 = vmatprep.subr.bf16.mxu1 %v4459_v2  ;;  %4053 = vmatprep.subr.bf16.mxu0 %v4565_v3  ;;  %s3696_s13 = sshll.u32 %s6279_s16, 8 }
  0x11   : > { %s5270_s18 = scalar_lea.vmem %s6157_s0, %s3696_s13  ;;  %s3697_s22 = sshll.u32 %s6279_s16, 7 }
  0x12   : > { %s4570_s28 = scalar_lea.vmem %s6158_s1, %s4447_s23  ;;  %s6019_s16 = scalar_lea.vmem %s6161_s4, %s3697_s22 }
  0x13   : > { %v4574_v4 = vld [vmem:[%s4570_s28] sm:$0xff]   ;;  %v4577_v5 = vld [vmem:[%s4570_s28 + $0x8] sm:$0x1]  ;;  %v4580_v6 = vld [vmem:[%s4570_s28 + $0xc] sm:$0xff]  }
  0x14   : > { %v6164_v7 = vunpack.c.l.bf16 %v4574_v4  ;;  %v6163_v8 = vunpack.c.h.bf16 %v4574_v4  ;;  %v6162_v9 = vunpack.c.l.bf16 %v4577_v5  ;;  %v4586_v10 = vld [vmem:[%s4570_s28 + $0x14] sm:$0x1]  ;;  %v308_v11 = vunpack.c.l.bf16 %v4580_v6  ;;  %v4590_v12 = vld [vmem:[%s4570_s28 + $0x18] sm:$0xff]   ;;  %v4606_v21 = vld [vmem:[%s4570_s28 + $0x20] sm:$0x1] }
  0x15   : > { %v309_v13 = vunpack.c.h.bf16 %v4580_v6  ;;  %v310_v14 = vunpack.c.l.bf16 %v4586_v10  ;;  %v311_v18 = vunpack.c.l.bf16 %v4590_v12  ;;  %v4613_v25 = vld [vmem:[%s4570_s28 + $0x24] sm:$0xff]   ;;  %v312_v29 = vunpack.c.h.bf16 %v4590_v12  ;;  %v4622_v32 = vld [vmem:[%s4570_s28 + $0x2c] sm:$0x1]  ;;  %v4625_v33 = vld [vmem:[%s4570_s28 + $0x30] sm:$0xff]  }
  0x16   : > { %v426_v15 = vrot.slane %v6164_v7, 1  ;;  %v427_v16 = vrot.slane %v6163_v8, 1  ;;  %v429_v17 = vrot.slane %v6162_v9, 1  ;;  %v431_v19 = vrot.slane %v308_v11, 1  ;;  %v4631_v37 = vld [vmem:[%s4570_s28 + $0x38] sm:$0x1] }
  0x17   : > { %v432_v20 = vrot.slane %v309_v13, 1  ;;  %v434_v24 = vrot.slane %v310_v14, 1  ;;  %v313_v30 = vunpack.c.l.bf16 %v4606_v21  ;;  %v436_v31 = vrot.slane %v311_v18, 1  ;;  %v4651_v45 = vld [vmem:[%s4570_s28 + $0x3c] sm:$0xff]   ;;  %v4658_v50 = vld [vmem:[%s4570_s28 + $0x44] sm:$0x1] }
  0x18   : > { %v428_v22 = vsel %vm425_vm0, %v426_v15, %v427_v16  ;;  %v430_v23 = vsel %vm425_vm0, %v427_v16, %v429_v17  ;;  %v314_v35 = vunpack.c.l.bf16 %v4613_v25  ;;  %v315_v36 = vunpack.c.h.bf16 %v4613_v25  ;;  %v4661_v51 = vld [vmem:[%s4570_s28 + $0x48] sm:$0xff]   ;;  %v4683_v61 = vld [vmem:[%s4570_s28 + $0x50] sm:$0x1]  ;;  %v4686_v62 = vld [vmem:[%s4570_s28 + $0x54] sm:$0xff]  }
  0x19   : > { %v538_v26 = vpack.c.bf16 %v430_v23, %v428_v22  ;;  %v433_v27 = vsel %vm425_vm0, %v431_v19, %v432_v20  ;;  %v435_v28 = vsel %vm425_vm0, %v432_v20, %v434_v24  ;;  %v437_v39 = vrot.slane %v312_v29, 1  ;;  %v4704_v22 = vld [vmem:[%s4570_s28 + $0x5c] sm:$0x1] }
  0x1a   : > { %v539_v34 = vpack.c.bf16 %v435_v28, %v433_v27  ;;  %v439_v40 = vrot.slane %v313_v30, 1  ;;  %v316_v41 = vunpack.c.l.bf16 %v4622_v32  ;;  %v441_v42 = vrot.slane %v314_v35, 1  ;;  %v4773_v7 = vld [vmem:[%s4570_s28 + $0x78] sm:$0xff]  }
  0x1b   : > { %3885 = vmatprep.mubr.msk.bf16.mxu1 %vm563_vm1, %v538_v26  ;;  %v442_v43 = vrot.slane %v315_v36, 1  ;;  %v317_v44 = vunpack.c.l.bf16 %v4625_v33  ;;  %v438_v46 = vsel %vm425_vm0, %v436_v31, %v437_v39  ;;  %v318_v48 = vunpack.c.h.bf16 %v4625_v33 }
  0x1c   : > { %4021 = vmatprep.mubr.msk.bf16.mxu0 %vm563_vm1, %v539_v34  ;;  %3886 = vmatmul.mubr.msk.bf16.vlgmr.msra.gmra.mrb[0].mxu1 %vm563_vm1, %v539_v34  ;;  %v440_v47 = vsel %vm425_vm0, %v437_v39, %v439_v40  ;;  %v319_v49 = vunpack.c.l.bf16 %v4631_v37  ;;  %v444_v54 = vrot.slane %v316_v41, 1  ;;  %v320_v59 = vunpack.c.l.bf16 %v4651_v45 }
  0x1d   : > { %3918 = vmatpush3.bf16.msra.mxu1 %v4459_v2  ;;  %v4663_v52 = vpack.c.bf16 %v440_v47, %v438_v46  ;;  %v443_v53 = vsel %vm425_vm0, %v441_v42, %v442_v43  ;;  %v446_v55 = vrot.slane %v317_v44, 1  ;;  %v447_v57 = vrot.slane %v318_v48, 1  ;;  %v4730_v46 = vld [vmem:[%s4570_s28 + $0x60] sm:$0xff]  }
  0x1e   : > { %3951 = vmatprep.subr.bf16.mxu1 %v4636_v38  ;;  %v449_v58 = vrot.slane %v319_v49, 1  ;;  %v321_v60 = vunpack.c.h.bf16 %v4651_v45  ;;  %v445_v63 = vsel %vm425_vm0, %v442_v43, %v444_v54  ;;  %v322_v0 = vunpack.c.l.bf16 %v4658_v50 }
  0x1f   : > { %4022 = vmatmul.mubr.msk.bf16.vlgmr.msra.gmra.mrb[0].mxu0 %vm563_vm1, %v4663_v52  ;;  %3889 = vmatprep.mubr.msk.bf16.mxu1 %vm563_vm1, %v4663_v52  ;;  %v6179_v2 = vunpack.c.l.bf16 %v4661_v51  ;;  %v6178_v15 = vunpack.c.h.bf16 %v4661_v51  ;;  %v4697_v16 = vpack.c.bf16 %v445_v63, %v443_v53  ;;  %v448_v17 = vsel %vm425_vm0, %v446_v55, %v447_v57  ;;  %v4737_v53 = vld [vmem:[%s4570_s28 + $0x68] sm:$0x1] }
  0x20   : > { %4054 = vmatpush3.bf16.msra.mxu0 %v4565_v3  ;;  %v450_v19 = vsel %vm425_vm0, %v447_v57, %v449_v58  ;;  %v451_v20 = vrot.slane %v320_v59, 1  ;;  %v452_v24 = vrot.slane %v321_v60, 1  ;;  %v454_v3 = vrot.slane %v322_v0, 1 }
  0x21   : > { %v4706_v23 = vpack.c.bf16 %v450_v19, %v448_v17  ;;  %v6173_v26 = vunpack.c.l.bf16 %v4683_v61  ;;  %4087 = vmatprep.subr.bf16.mxu0 %v4673_v56  ;;  %4025 = vmatprep.mubr.msk.bf16.mxu0 %vm563_vm1, %v4697_v16  ;;  %v456_v27 = vrot.slane %v6179_v2, 1  ;;  %v457_v28 = vrot.slane %v6178_v15, 1 }
  0x22   : > { %v6170_v31 = vunpack.c.l.bf16 %v4686_v62  ;;  %v6169_v34 = vunpack.c.h.bf16 %v4686_v62  ;;  %v453_v39 = vsel %vm425_vm0, %v451_v20, %v452_v24  ;;  %v455_v40 = vsel %vm425_vm0, %v452_v24, %v454_v3  ;;  %v4755_v24 = vld [vmem:[%s4570_s28 + $0x6c] sm:$0xff]  }
  0x23   : > { %v459_v42 = vrot.slane %v6173_v26, 1  ;;  %v6168_v43 = vunpack.c.l.bf16 %v4704_v22  ;;  %v4734_v47 = vpack.c.bf16 %v455_v40, %v453_v39  ;;  %v6167_v58 = vunpack.c.l.bf16 %v4730_v46 }
  0x24   : > { %3890 = vmatmul.mubr.msk.bf16.gmra.mrb[4].mxu1 %vm563_vm1, %v4697_v16  ;;  %v461_v54 = vrot.slane %v6170_v31, 1  ;;  %v462_v55 = vrot.slane %v6169_v34, 1  ;;  %v458_v63 = vsel %vm425_vm0, %v456_v27, %v457_v28  ;;  %v6166_v19 = vunpack.c.h.bf16 %v4730_v46  ;;  %v4762_v27 = vld [vmem:[%s4570_s28 + $0x74] sm:$0x1] }
  0x25   : > { %3893 = vmatprep.mubr.msk.bf16.mxu1 %vm563_vm1, %v4706_v23  ;;  %v464_v57 = vrot.slane %v6168_v43, 1  ;;  %v460_v17 = vsel %vm425_vm0, %v457_v28, %v459_v42  ;;  %v6165_v20 = vunpack.c.l.bf16 %v4737_v53  ;;  %v994_v3 = vrot.slane %v308_v11, 2  ;;  %v4776_v11 = vld [vmem:[%s4570_s28 + $0x80] sm:$0x1] }
  0x26   : > { %v463_v39 = vsel %vm425_vm0, %v461_v54, %v462_v55  ;;  %v995_v28 = vrot.slane %v309_v13, 2  ;;  %v997_v42 = vrot.slane %v310_v14, 2  ;;  %v4768_v9 = vpack.c.bf16 %v460_v17, %v458_v63 }
  0x27   : > { %4026 = vmatmul.mubr.msk.bf16.gmra.mrb[4].mxu0 %vm563_vm1, %v4706_v23  ;;  %v465_v40 = vsel %vm425_vm0, %v462_v55, %v464_v57  ;;  %v466_v8 = vrot.slane %v6167_v58, 1  ;;  %v467_v54 = vrot.slane %v6166_v19, 1  ;;  %v469_v13 = vrot.slane %v6165_v20, 1 }
  0x28   : > { %4029 = vmatprep.mubr.msk.bf16.mxu0 %vm563_vm1, %v4734_v47  ;;  %v6172_v10 = vunpack.c.l.bf16 %v4755_v24  ;;  %v6171_v14 = vunpack.c.h.bf16 %v4755_v24  ;;  %v4788_v55 = vpack.c.bf16 %v465_v40, %v463_v39  ;;  %v6177_v57 = vunpack.c.l.bf16 %v4762_v27 }
  0x29   : > { %v999_v63 = vrot.slane %v311_v18, 2  ;;  %v6175_v17 = vunpack.c.l.bf16 %v4773_v7  ;;  %v6174_v20 = vunpack.c.h.bf16 %v4773_v7  ;;  %v6176_v19 = vunpack.c.l.bf16 %v4776_v11 }
  0x2a   : > { %v1000_v58 = vrot.slane %v312_v29, 2  ;;  %v1002_v43 = vrot.slane %v313_v30, 2  ;;  %v996_v39 = vsel %vm988_vm2, %v994_v3, %v995_v28  ;;  %v998_v40 = vsel %vm988_vm2, %v995_v28, %v997_v42  ;;  %v4811_v29 = vld [vmem:[%s4570_s28 + $0x84] sm:$0xff]   ;;  %v4814_v30 = vld [vmem:[%s4570_s28 + $0x8c] sm:$0x1] }
  0x2b   : > { %v468_v18 = vsel %vm425_vm0, %v466_v8, %v467_v54  ;;  %v470_v34 = vsel %vm425_vm0, %v467_v54, %v469_v13  ;;  %v471_v31 = vrot.slane %v6172_v10, 1  ;;  %v472_v21 = vrot.slane %v6171_v14, 1  ;;  %v4829_v13 = vld [vmem:[%s4570_s28 + $0x90] sm:$0xff]  }
  0x2c   : > { %3894 = vmatmul.mubr.msk.bf16.gmra.mrb[8].mxu1 %vm563_vm1, %v4734_v47  ;;  %v474_v3 = vrot.slane %v6177_v57, 1  ;;  %v4820_v8 = vpack.c.bf16 %v998_v40, %v996_v39  ;;  %v476_v28 = vrot.slane %v6175_v17, 1  ;;  %v477_v42 = vrot.slane %v6174_v20, 1  ;;  %v4837_v40 = vld [vmem:[%s4570_s28 + $0x98] sm:$0x1] }
  0x2d   : > { %3897 = vmatprep.mubr.msk.bf16.mxu1 %vm563_vm1, %v4768_v9  ;;  %v479_v54 = vrot.slane %v6176_v19, 1  ;;  %v4831_v14 = vpack.c.bf16 %v470_v34, %v468_v18  ;;  %v6191_v10 = vunpack.c.l.bf16 %v4811_v29  ;;  %v6184_v26 = vunpack.c.h.bf16 %v4811_v29 }
  0x2e   : > { %v6180_v39 = vunpack.c.l.bf16 %v4814_v30  ;;  %v473_v20 = vsel %vm425_vm0, %v471_v31, %v472_v21  ;;  %v1001_v17 = vsel %vm988_vm2, %v999_v63, %v1000_v58  ;;  %v1003_v19 = vsel %vm988_vm2, %v1000_v58, %v1002_v43 }
  0x2f   : > { %4030 = vmatmul.mubr.msk.bf16.gmra.mrb[8].mxu0 %vm563_vm1, %v4768_v9  ;;  %v1004_v34 = vrot.slane %v314_v35, 2  ;;  %v475_v18 = vsel %vm425_vm0, %v472_v21, %v474_v3  ;;  %v1005_v57 = vrot.slane %v315_v36, 2  ;;  %v6183_v15 = vunpack.c.l.bf16 %v4829_v13 }
  0x30   : > { %4033 = vmatprep.mubr.msk.bf16.mxu0 %vm563_vm1, %v4788_v55  ;;  %v6181_v2 = vunpack.c.h.bf16 %v4829_v13  ;;  %v478_v31 = vsel %vm425_vm0, %v476_v28, %v477_v42  ;;  %v480_v43 = vsel %vm425_vm0, %v477_v42, %v479_v54  ;;  %v1007_v35 = vrot.slane %v316_v41, 2 }
  0x31   : > { %v6182_v58 = vunpack.c.l.bf16 %v4837_v40  ;;  %v481_v63 = vrot.slane %v6191_v10, 1  ;;  %v482_v36 = vrot.slane %v6184_v26, 1  ;;  %v484_v21 = vrot.slane %v6180_v39, 1  ;;  %v4880_v39 = vld [vmem:[%s4570_s28 + $0x9c] sm:$0xff]  }
  0x32   : > { %v4866_v3 = vpack.c.bf16 %v475_v18, %v473_v20  ;;  %v4868_v28 = vpack.c.bf16 %v1003_v19, %v1001_v17  ;;  %v4872_v32 = vpack.c.bf16 %v480_v43, %v478_v31  ;;  %v1006_v41 = vsel %vm988_vm2, %v1004_v34, %v1005_v57  ;;  %v4890_v34 = vld [vmem:[%s4570_s28 + $0xa4] sm:$0x1] }
  0x33   : > { %v486_v42 = vrot.slane %v6183_v15, 1  ;;  %v487_v54 = vrot.slane %v6181_v2, 1  ;;  %v1008_v19 = vsel %vm988_vm2, %v1005_v57, %v1007_v35  ;;  %v1009_v20 = vrot.slane %v317_v44, 2  ;;  %v4899_v35 = vld [vmem:[%s4570_s28 + $0xa8] sm:$0xff]   ;;  %v4902_v44 = vld [vmem:[%s4570_s28 + $0xb0] sm:$0x1] }
  0x34   : > { %3898 = vmatmul.mubr.msk.bf16.gmra.mrb[12].mxu1 %vm563_vm1, %v4788_v55  ;;  %v1010_v17 = vrot.slane %v318_v48, 2  ;;  %v489_v18 = vrot.slane %v6182_v58, 1  ;;  %v483_v31 = vsel %vm425_vm0, %v481_v63, %v482_v36  ;;  %v485_v43 = vsel %vm425_vm0, %v482_v36, %v484_v21  ;;  %v4925_v15 = vld [vmem:[%s6159_s2 + $0x38] sm:$0xff]  }
  0x35   : > { %3901 = vmatprep.mubr.msk.bf16.mxu1 %vm563_vm1, %v4831_v14  ;;  %v1012_v2 = vrot.slane %v319_v49, 2  ;;  %v1014_v57 = vrot.slane %v320_v59, 2  ;;  %v1015_v48 = vrot.slane %v321_v60, 2  ;;  %v1017_v63 = vrot.slane %v322_v0, 2 }
  0x36   : > { %v6190_v36 = vunpack.c.l.bf16 %v4880_v39  ;;  %v6189_v37 = vunpack.c.h.bf16 %v4880_v39  ;;  %v4914_v49 = vpack.c.bf16 %v1008_v19, %v1006_v41  ;;  %v488_v59 = vsel %vm425_vm0, %v486_v42, %v487_v54 }
  0x37   : > { %4034 = vmatmul.mubr.msk.bf16.gmra.mrb[12].mxu0 %vm563_vm1, %v4831_v14  ;;  %v6186_v21 = vunpack.c.l.bf16 %v4890_v34  ;;  %v490_v58 = vsel %vm425_vm0, %v487_v54, %v489_v18  ;;  %v6185_v60 = vunpack.c.l.bf16 %v4899_v35  ;;  %v6187_v50 = vunpack.c.h.bf16 %v4899_v35 }
  0x38   : > { %4055 = vmatprep.mubr.msk.bf16.mxu0 %vm563_vm1, %v4820_v8  ;;  %v6188_v0 = vunpack.c.l.bf16 %v4902_v44  ;;  %v4927_v26 = vpack.c.bf16 %v485_v43, %v483_v31  ;;  %v1011_v41 = vsel %vm988_vm2, %v1009_v20, %v1010_v17  ;;  %v1013_v42 = vsel %vm988_vm2, %v1010_v17, %v1012_v2 }
  0x39   : > { %v1016_v54 = vsel %vm988_vm2, %v1014_v57, %v1015_v48  ;;  %v1018_v19 = vsel %vm988_vm2, %v1015_v48, %v1017_v63  ;;  %v491_v18 = vrot.slane %v6190_v36, 1  ;;  %v492_v31 = vrot.slane %v6189_v37, 1  ;;  %v4958_v63 = vld [vmem:[%s4570_s28 + $0xbc] sm:$0x1] }
  0x3a   : > { %6212 = vst [vmem:[#allocation2_spill] sm:$0xff] %v4927_v26  ;;  %v4942_v20 = vpack.c.bf16 %v490_v58, %v488_v59  ;;  %v494_v2 = vrot.slane %v6186_v21, 1  ;;  %v4946_v17 = vpack.c.bf16 %v1013_v42, %v1011_v41  ;;  %v496_v43 = vrot.slane %v6185_v60, 1 }
  0x3b   : > { %v497_v57 = vrot.slane %v6187_v50, 1  ;;  %v499_v48 = vrot.slane %v6188_v0, 1  ;;  %v4961_v58 = vpack.c.bf16 %v1018_v19, %v1016_v54  ;;  %v6213_v59 = vunpack.c.l.bf16 %v4661_v51 }
  0x3c   : > { %3902 = vmatmul.mubr.msk.bf16.gmra.mrb[16].mxu1 %vm563_vm1, %v4866_v3  ;;  %v6214_v42 = vunpack.c.h.bf16 %v4661_v51  ;;  %v6215_v21 = vunpack.c.l.bf16 %v4683_v61  ;;  %v493_v0 = vsel %vm425_vm0, %v491_v18, %v492_v31  ;;  %v6216_v37 = vunpack.c.l.bf16 %v4686_v62 }
  0x3d   : > { %3905 = vmatprep.mubr.msk.bf16.mxu1 %vm563_vm1, %v4872_v32  ;;  %v1019_v41 = vrot.slane %v6213_v59, 2  ;;  %v6217_v54 = vunpack.c.h.bf16 %v4686_v62  ;;  %v6218_v10 = vunpack.c.l.bf16 %v4704_v22  ;;  %v495_v61 = vsel %vm425_vm0, %v492_v31, %v494_v2 }
  0x3e   : > { %v1020_v60 = vrot.slane %v6214_v42, 2  ;;  %v1022_v50 = vrot.slane %v6215_v21, 2  ;;  %v1024_v36 = vrot.slane %v6216_v37, 2  ;;  %v500_v37 = vsel %vm425_vm0, %v497_v57, %v499_v48 }
  0x3f   : > { %4056 = vmatmul.mubr.msk.bf16.vlgmr.msra.gmra.mrb[0].mxu0 %vm563_vm1, %v4868_v28  ;;  %v1025_v19 = vrot.slane %v6217_v54, 2  ;;  %v1027_v59 = vrot.slane %v6218_v10, 2  ;;  %v4989_v22 = vpack.c.bf16 %v495_v61, %v493_v0  ;;  %v6220_v0 = vunpack.c.l.bf16 %v4958_v63 }
  0x40   : > { %4088 = vmatpush3.bf16.msra.mxu0 %v4673_v56  ;;  %4059 = vmatprep.mubr.msk.bf16.mxu0 %vm563_vm1, %v4914_v49  ;;  %v4955_v56 = vld [vmem:[%s4570_s28 + $0xb4] sm:$0xff]   ;;  %v1021_v54 = vsel %vm988_vm2, %v1019_v41, %v1020_v60  ;;  %v1023_v10 = vsel %vm988_vm2, %v1020_v60, %v1022_v50  ;;  %v6221_v50 = vunpack.c.l.bf16 %v4730_v46 }
  0x41   : > { %4121 = vmatprep.subr.bf16.mxu0 %v4925_v15  ;;  %v6195_v21 = vunpack.c.l.bf16 %v4955_v56  ;;  %v6194_v42 = vunpack.c.h.bf16 %v4955_v56  ;;  %v1026_v31 = vsel %vm988_vm2, %v1024_v36, %v1025_v19  ;;  %v1028_v2 = vsel %vm988_vm2, %v1025_v19, %v1027_v59 }
  0x42   : > { %v504_v48 = vrot.slane %v6220_v0, 1  ;;  %v5006_v36 = vpack.c.bf16 %v1023_v10, %v1021_v54  ;;  %v5008_v60 = vpack.c.bf16 %v1028_v2, %v1026_v31  ;;  %v6222_v59 = vunpack.c.h.bf16 %v4730_v46 }
  0x43   : > { %v6224_v54 = vunpack.c.l.bf16 %v4755_v24  ;;  %v6225_v31 = vunpack.c.h.bf16 %v4755_v24 }
  0x44   : > { %3906 = vmatmul.mubr.msk.bf16.gmra.mrb[20].mxu1 %vm563_vm1, %v4927_v26  ;;  %v498_v26 = vsel %vm425_vm0, %v496_v43, %v497_v57  ;;  %v501_v43 = vrot.slane %v6195_v21, 1  ;;  %v502_v57 = vrot.slane %v6194_v42, 1  ;;  %v1030_v61 = vrot.slane %v6222_v59, 2 }
  0x45   : > { %3909 = vmatprep.mubr.msk.bf16.mxu1 %vm563_vm1, %v4942_v20  ;;  %v4996_v18 = vpack.c.bf16 %v500_v37, %v498_v26  ;;  %v1029_v26 = vrot.slane %v6221_v50, 2  ;;  %v6223_v37 = vunpack.c.l.bf16 %v4737_v53  ;;  %v1034_v10 = vrot.slane %v6224_v54, 2 }
  0x46   : > { %v503_v41 = vsel %vm425_vm0, %v501_v43, %v502_v57  ;;  %v505_v19 = vsel %vm425_vm0, %v502_v57, %v504_v48  ;;  %v1035_v2 = vrot.slane %v6225_v31, 2  ;;  %v6226_v50 = vunpack.c.l.bf16 %v4762_v27 }
  0x47   : > { %4060 = vmatmul.mubr.msk.bf16.gmra.mrb[4].mxu0 %vm563_vm1, %v4946_v17  ;;  %6219 = vst [vmem:[#allocation3_spill] sm:$0xff] %v4996_v18  ;;  %v1032_v0 = vrot.slane %v6223_v37, 2  ;;  %v6227_v21 = vunpack.c.l.bf16 %v4574_v4  ;;  %v6228_v57 = vunpack.c.h.bf16 %v4574_v4  ;;  %v6229_v59 = vunpack.c.l.bf16 %v4577_v5 }
  0x48   : > { %4063 = vmatprep.mubr.msk.bf16.mxu0 %vm563_vm1, %v4961_v58  ;;  %v1037_v42 = vrot.slane %v6226_v50, 2  ;;  %v5034_v53 = vpack.c.bf16 %v505_v19, %v503_v41  ;;  %v1031_v27 = vsel %vm988_vm2, %v1029_v26, %v1030_v61  ;;  %v6230_v41 = vunpack.c.l.bf16 %v4773_v7 }
  0x49   : > { %v989_v43 = vrot.slane %v6227_v21, 2  ;;  %v990_v48 = vrot.slane %v6228_v57, 2  ;;  %v1033_v37 = vsel %vm988_vm2, %v1030_v61, %v1032_v0  ;;  %v1036_v21 = vsel %vm988_vm2, %v1034_v10, %v1035_v2 }
  0x4a   : > { %v1038_v54 = vsel %vm988_vm2, %v1035_v2, %v1037_v42  ;;  %v5047_v5 = vpack.c.bf16 %v1033_v37, %v1031_v27  ;;  %v1039_v19 = vrot.slane %v6230_v41, 2  ;;  %v6231_v42 = vunpack.c.h.bf16 %v4773_v7 }
  0x4b   : > { %v5043_v31 = vsel %vm988_vm2, %v989_v43, %v990_v48  ;;  %v5056_v26 = vpack.c.bf16 %v1038_v54, %v1036_v21  ;;  %v6232_v0 = vunpack.c.l.bf16 %v4776_v11  ;;  %v6233_v43 = vunpack.c.l.bf16 %v4811_v29  ;;  %v5081_v54 = vld [vmem:[%s6159_s2 + $0x18] sm:$0xff]  }
  0x4c   : > { %3910 = vmatmul.mubr.msk.bf16.gmra.mrb[24].mxu1 %vm563_vm1, %v4989_v22  ;;  %v1040_v61 = vrot.slane %v6231_v42, 2 }
  0x4d   : > { %3913 = vmatprep.mubr.msk.bf16.mxu1 %vm563_vm1, %v4996_v18  ;;  %v992_v18 = vrot.slane %v6229_v59, 2  ;;  %v1042_v10 = vrot.slane %v6232_v0, 2  ;;  %v1044_v57 = vrot.slane %v6233_v43, 2  ;;  %v6235_v59 = vunpack.c.l.bf16 %v4814_v30 }
  0x4e   : > { %v1041_v11 = vsel %vm988_vm2, %v1039_v19, %v1040_v61  ;;  %v6236_v19 = vunpack.c.l.bf16 %v4829_v13 }
  0x4f   : > { %4064 = vmatmul.mubr.msk.bf16.gmra.mrb[8].mxu0 %vm563_vm1, %v5006_v36  ;;  %v5052_v50 = vsel %vm988_vm2, %v990_v48, %v992_v18  ;;  %v6234_v18 = vunpack.c.h.bf16 %v4811_v29  ;;  %v1043_v27 = vsel %vm988_vm2, %v1040_v61, %v1042_v10  ;;  %v6237_v61 = vunpack.c.h.bf16 %v4829_v13 }
  0x50   : > { %4067 = vmatprep.mubr.msk.bf16.mxu0 %vm563_vm1, %v5008_v60  ;;  %v1101_v2 = vpack.c.bf16 %v5052_v50, %v5043_v31  ;;  %v5085_v30 = vpack.c.bf16 %v1043_v27, %v1041_v11  ;;  %v1049_v42 = vrot.slane %v6236_v19, 2  ;;  %v6238_v10 = vunpack.c.l.bf16 %v4837_v40  ;;  %v5241_v50 = vld [vmem:[%s4570_s28 + $0xd4] sm:$0x1] }
  0x51   : > { %v1045_v48 = vrot.slane %v6234_v18, 2  ;;  %v1050_v0 = vrot.slane %v6237_v61, 2  ;;  %v6243_v61 = vunpack.c.h.bf16 %v4899_v35 }
  0x52   : > { %v1052_v43 = vrot.slane %v6238_v10, 2 }
  0x53   : > { %v1046_v37 = vsel %vm988_vm2, %v1044_v57, %v1045_v48  ;;  %v6239_v57 = vunpack.c.l.bf16 %v4880_v39  ;;  %v1051_v40 = vsel %vm988_vm2, %v1049_v42, %v1050_v0  ;;  %v1060_v10 = vrot.slane %v6243_v61, 2 }
  0x54   : > { %3914 = vmatmul.mubr.msk.bf16.gmra.mrb[28].mxu1 %vm563_vm1, %v5034_v53  ;;  %v1053_v11 = vsel %vm988_vm2, %v1050_v0, %v1052_v43  ;;  %v6244_v0 = vunpack.c.l.bf16 %v4902_v44 }
  0x55   : > { %3919 = vmatprep.mubr.msk.bf16.mxu1 %vm563_vm1, %v4574_v4  ;;  %v1047_v4 = vrot.slane %v6235_v59, 2  ;;  %v1054_v18 = vrot.slane %v6239_v57, 2  ;;  %v6241_v59 = vunpack.c.l.bf16 %v4890_v34  ;;  %v5115_v34 = vpack.c.bf16 %v1053_v11, %v1051_v40  ;;  %v5134_v40 = vld [vmem:[%s4570_s28 + $0xc0] sm:$0xff]   ;;  %v301_v11 = vld [vmem:[%s4570_s28 + $0xc8] sm:$0x1] }
  0x56   : > { %v1062_v43 = vrot.slane %v6244_v0, 2  ;;  %v6245_v57 = vunpack.c.l.bf16 %v4955_v56  ;;  %v355_v61 = vunpack.c.l.bf16 %v301_v11 }
  0x57   : > { %4068 = vmatmul.mubr.msk.bf16.gmra.mrb[12].mxu0 %vm563_vm1, %v5047_v5  ;;  %v1048_v21 = vsel %vm988_vm2, %v1045_v48, %v1047_v4  ;;  %v6240_v48 = vunpack.c.h.bf16 %v4880_v39  ;;  %v1057_v4 = vrot.slane %v6241_v59, 2  ;;  %v6247_v59 = vunpack.c.l.bf16 %v4958_v63 }
  0x58   : > { %4071 = vmatprep.mubr.msk.bf16.mxu0 %vm563_vm1, %v5056_v26  ;;  %v5090_v41 = vpack.c.bf16 %v1048_v21, %v1046_v37  ;;  %v6242_v21 = vunpack.c.l.bf16 %v4899_v35  ;;  %v1063_v44 = vsel %vm988_vm2, %v1060_v10, %v1062_v43  ;;  %v1579_v11 = vrot.slane %v355_v61, 1 }
  0x5a   : > { %v1059_v19 = vrot.slane %v6242_v21, 2  ;;  %v354_v21 = vunpack.c.h.bf16 %v5134_v40 }
  0x5c   : > { %3920 = vmatmul.mubr.msk.bf16.vlgmr.msra.gmra.mrb[0].mxu1 %vm563_vm1, %v4580_v6  ;;  %v1790_v43 = vrot.slane %v354_v21, 2 }
  0x5d   : > { %3952 = vmatpush3.bf16.msra.mxu1 %v4636_v38  ;;  %3923 = vmatprep.mubr.msk.bf16.mxu1 %vm563_vm1, %v4590_v12  ;;  %v1055_v38 = vrot.slane %v6240_v48, 2  ;;  %v6246_v48 = vunpack.c.h.bf16 %v4955_v56 }
  0x5e   : > { %3985 = vmatprep.subr.bf16.mxu1 %v5081_v54 }
  0x5f   : > { %4072 = vmatmul.mubr.msk.bf16.gmra.mrb[16].mxu0 %vm563_vm1, %v5085_v30  ;;  %v1056_v27 = vsel %vm988_vm2, %v1054_v18, %v1055_v38  ;;  %v1058_v37 = vsel %vm988_vm2, %v1055_v38, %v1057_v4  ;;  %v1064_v18 = vrot.slane %v6245_v57, 2  ;;  %v1065_v38 = vrot.slane %v6246_v48, 2 }
  0x60   : > { %4075 = vmatprep.mubr.msk.bf16.mxu0 %vm563_vm1, %v5090_v41  ;;  %v5123_v42 = vpack.c.bf16 %v1058_v37, %v1056_v27  ;;  %v1067_v4 = vrot.slane %v6247_v59, 2  ;;  %v1061_v27 = vsel %vm988_vm2, %v1059_v19, %v1060_v10  ;;  %v353_v37 = vunpack.c.l.bf16 %v5134_v40 }
  0x61   : > { %v1066_v63 = vsel %vm988_vm2, %v1064_v18, %v1065_v38  ;;  %v5149_v57 = vpack.c.bf16 %v1063_v44, %v1061_v27  ;;  %v1792_v48 = vrot.slane %v355_v61, 2  ;;  %v1577_v18 = vrot.slane %v354_v21, 1 }
  0x62   : > { %v1068_v0 = vsel %vm988_vm2, %v1065_v38, %v1067_v4  ;;  %v1789_v10 = vrot.slane %v353_v37, 2  ;;  %v1576_v59 = vrot.slane %v353_v37, 1  ;;  %v4483_v37 = vld [vmem:[%s6159_s2 + $0x40] sm:$0xff]   ;;  %v358_v21 = vunpack.c.l.bf16 %v5241_v50 }
  0x63   : > { %v5153_v19 = vpack.c.bf16 %v1068_v0, %v1066_v63  ;;  %v1793_v4 = vsel %vm988_vm2, %v1790_v43, %v1792_v48  ;;  %v1580_v44 = vsel %vm425_vm0, %v1577_v18, %v1579_v11 }
  0x64   : > { %3924 = vmatmul.mubr.msk.bf16.gmra.mrb[4].mxu1 %vm563_vm1, %v4613_v25  ;;  %v1791_v38 = vsel %vm988_vm2, %v1789_v10, %v1790_v43  ;;  %v1578_v27 = vsel %vm425_vm0, %v1576_v59, %v1577_v18  ;;  %v2427_v61 = vrot.slane %v358_v21, 2  ;;  %v5277_v59 = vld [vmem:[%s5270_s18] sm:$0xff]  ;;  %v5280_v18 = vld [vmem:[%s5270_s18 + $0x8] sm:$0xff] }
  0x65   : > { %3927 = vmatprep.mubr.msk.bf16.mxu1 %vm563_vm1, %v4625_v33  ;;  %v5163_v63 = vpack.c.bf16 %v1580_v44, %v1578_v27  ;;  %v5167_v0 = vpack.c.bf16 %v1793_v4, %v1791_v38  ;;  %v2677_v11 = vsel %vm2676_vm3, %v5277_v59, 0.0  ;;  %v2678_v38 = vsel %vm2676_vm3, %v5280_v18, 0.0  ;;  %v5291_v4 = vld [vmem:[%s5270_s18 + $0x10] sm:$0xff]  ;;  %v5300_v44 = vld [vmem:[%s5270_s18 + $0x18] sm:$0xff] }
  0x66   : > { %v2680_v27 = vsel %vm2676_vm3, %v5291_v4, 0.0 }
  0x67   : > { %4076 = vmatmul.mubr.msk.bf16.gmra.mrb[20].mxu0 %vm563_vm1, %v5115_v34 }
  0x68   : > { %4079 = vmatprep.mubr.msk.bf16.mxu0 %vm563_vm1, %v5123_v42 }
  0x6c   : > { %3928 = vmatmul.mubr.msk.bf16.gmra.mrb[8].mxu1 %vm563_vm1, %v4651_v45 }
  0x6d   : > { %3931 = vmatprep.mubr.msk.bf16.mxu1 %vm563_vm1, %v4661_v51 }
  0x6f   : > { %4080 = vmatmul.mubr.msk.bf16.gmra.mrb[24].mxu0 %vm563_vm1, %v5149_v57 }
  0x70   : > { %4083 = vmatprep.mubr.msk.bf16.mxu0 %vm563_vm1, %v5153_v19 }
  0x74   : > { %3932 = vmatmul.mubr.msk.bf16.gmra.mrb[12].mxu1 %vm563_vm1, %v4686_v62 }
  0x75   : > { %3935 = vmatprep.mubr.msk.bf16.mxu1 %vm563_vm1, %v4730_v46 }
  0x77   : > { %4084 = vmatmul.mubr.msk.bf16.gmra.mrb[28].mxu0 %vm563_vm1, %v5167_v0 }
  0x78   : > { %4089 = vmatprep.mubr.msk.bf16.mxu0 %vm563_vm1, %v4590_v12 }
  0x7c   : > { %3936 = vmatmul.mubr.msk.bf16.gmra.mrb[16].mxu1 %vm563_vm1, %v4755_v24 }
  0x7d   : > { %3939 = vmatprep.mubr.msk.bf16.mxu1 %vm563_vm1, %v4773_v7 }
  0x7f   : > { %4090 = vmatmul.mubr.msk.bf16.vlgmr.msra.gmra.mrb[0].mxu0 %vm563_vm1, %v4613_v25 }
  0x80   : > { %4122 = vmatpush3.bf16.msra.mxu0 %v4925_v15  ;;  %4093 = vmatprep.mubr.msk.bf16.mxu0 %vm563_vm1, %v4625_v33  ;;  %v5236_v15 = vld [vmem:[%s4570_s28 + $0xcc] sm:$0xff]  }
  0x81   : > { %4155 = vmatprep.subr.bf16.mxu0 %v4483_v37  ;;  %v357_v31 = vunpack.c.h.bf16 %v5236_v15 }
  0x84   : > { %3940 = vmatmul.mubr.msk.bf16.gmra.mrb[20].mxu1 %vm563_vm1, %v4811_v29 }
  0x85   : > { %3943 = vmatprep.mubr.msk.bf16.mxu1 %vm563_vm1, %v4829_v13 }
  0x87   : > { %4094 = vmatmul.mubr.msk.bf16.gmra.mrb[4].mxu0 %vm563_vm1, %v4651_v45 }
  0x88   : > { %4097 = vmatprep.mubr.msk.bf16.mxu0 %vm563_vm1, %v4661_v51 }
  0x8c   : > { %3944 = vmatmul.mubr.msk.bf16.gmra.mrb[24].mxu1 %vm563_vm1, %v4880_v39 }
  0x8d   : > { %3947 = vmatprep.mubr.msk.bf16.mxu1 %vm563_vm1, %v4899_v35 }
  0x8f   : > { %4098 = vmatmul.mubr.msk.bf16.gmra.mrb[8].mxu0 %vm563_vm1, %v4686_v62 }
  0x90   : > { %4101 = vmatprep.mubr.msk.bf16.mxu0 %vm563_vm1, %v4730_v46 }
  0x94   : > { %3948 = vmatmul.mubr.msk.bf16.gmra.mrb[28].mxu1 %vm563_vm1, %v4955_v56 }
  0x95   : > { %3953 = vmatprep.mubr.msk.bf16.mxu1 %vm563_vm1, %v1101_v2 }
  0x97   : > { %4102 = vmatmul.mubr.msk.bf16.gmra.mrb[12].mxu0 %vm563_vm1, %v4755_v24 }
  0x98   : > { %4105 = vmatprep.mubr.msk.bf16.mxu0 %vm563_vm1, %v4773_v7 }
  0x9c   : > { %3954 = vmatmul.mubr.msk.bf16.vlgmr.msra.gmra.mrb[0].mxu1 %vm563_vm1, %v4820_v8  ;;  %v356_v8 = vunpack.c.l.bf16 %v5236_v15 }
  0x9d   : > { %3986 = vmatpush3.bf16.msra.mxu1 %v5081_v54  ;;  %3957 = vmatprep.mubr.msk.bf16.mxu1 %vm563_vm1, %v4868_v28  ;;  %v2425_v54 = vrot.slane %v357_v31, 2 }
  0x9e   : > { %4189 = vmatprep.subr.bf16.mxu1 %v4552_v1  ;;  %v2424_v2 = vrot.slane %v356_v8, 2 }
  0x9f   : > { %4106 = vmatmul.mubr.msk.bf16.gmra.mrb[16].mxu0 %vm563_vm1, %v4811_v29  ;;  %v5263_v43 = vsel %vm988_vm2, %v2425_v54, %v2427_v61  ;;  %v5318_v61 = vld [vmem:[%s5270_s18 + $0x28] sm:$0xff] }
  0xa0   : > { %4109 = vmatprep.mubr.msk.bf16.mxu0 %vm563_vm1, %v4829_v13  ;;  %v5258_v10 = vsel %vm988_vm2, %v2424_v2, %v2425_v54  ;;  %v2682_v54 = vsel %vm2676_vm3, %v5300_v44, 0.0 }
  0xa1   : > { %v2431_v48 = vpack.c.bf16 %v5263_v43, %v5258_v10 }
  0xa4   : > { %3958 = vmatmul.mubr.msk.bf16.gmra.mrb[4].mxu1 %vm563_vm1, %v4914_v49 }
  0xa5   : > { %3961 = vmatprep.mubr.msk.bf16.mxu1 %vm563_vm1, %v4946_v17 }
  0xa7   : > { %4110 = vmatmul.mubr.msk.bf16.gmra.mrb[20].mxu0 %vm563_vm1, %v4880_v39 }
  0xa8   : > { %4113 = vmatprep.mubr.msk.bf16.mxu0 %vm563_vm1, %v4899_v35 }
  0xac   : > { %3962 = vmatmul.mubr.msk.bf16.gmra.mrb[8].mxu1 %vm563_vm1, %v4961_v58 }
  0xad   : > { %3965 = vmatprep.mubr.msk.bf16.mxu1 %vm563_vm1, %v5006_v36 }
  0xaf   : > { %4114 = vmatmul.mubr.msk.bf16.gmra.mrb[24].mxu0 %vm563_vm1, %v4955_v56 }
  0xb0   : > { %4117 = vmatprep.mubr.msk.bf16.mxu0 %vm563_vm1, %v5134_v40 }
  0xb4   : > { %3966 = vmatmul.mubr.msk.bf16.gmra.mrb[12].mxu1 %vm563_vm1, %v5008_v60 }
  0xb5   : > { %3969 = vmatprep.mubr.msk.bf16.mxu1 %vm563_vm1, %v5047_v5 }
  0xb7   : > { %4118 = vmatmul.mubr.msk.bf16.gmra.mrb[28].mxu0 %vm563_vm1, %v5236_v15 }
  0xb8   : > { %4123 = vmatprep.mubr.msk.bf16.mxu0 %vm563_vm1, %v4663_v52  ;;  %v2679_v52 = vadd.f32 %v2678_v38, %v2677_v11  ;;  %v2686_v38 = vsel %vm2676_vm3, %v5318_v61, 0.0 }
  0xba   : > { %v2681_v2 = vadd.f32 %v2680_v27, %v2679_v52  ;;  %v5336_v27 = vld [vmem:[%s5270_s18 + $0x38] sm:$0xff] }
  0xbc   : > { %3970 = vmatmul.mubr.msk.bf16.gmra.mrb[16].mxu1 %vm563_vm1, %v5056_v26 }
  0xbd   : > { %3973 = vmatprep.mubr.msk.bf16.mxu1 %vm563_vm1, %v5085_v30 }
  0xbf   : > { %4124 = vmatmul.mubr.msk.bf16.vlgmr.msra.gmra.mrb[0].mxu0 %vm563_vm1, %v4697_v16  ;;  %v5309_v16 = vld [vmem:[%s5270_s18 + $0x20] sm:$0xff] }
  0xc0   : > { %4156 = vmatpush3.bf16.msra.mxu0 %v4483_v37  ;;  %4127 = vmatprep.mubr.msk.bf16.mxu0 %vm563_vm1, %v4706_v23  ;;  %v2683_v37 = vadd.f32 %v2682_v54, %v2681_v2  ;;  %v2684_v23 = vsel %vm2676_vm3, %v5309_v16, 0.0  ;;  %v2690_v54 = vsel %vm2676_vm3, %v5336_v27, 0.0 }
  0xc2   : > { %v2685_v11 = vadd.f32 %v2684_v23, %v2683_v37  ;;  %v5354_v23 = vld [vmem:[%s5270_s18 + $0x48] sm:$0xff] }
  0xc4   : > { %3974 = vmatmul.mubr.msk.bf16.gmra.mrb[20].mxu1 %vm563_vm1, %v5090_v41  ;;  %v2687_v52 = vadd.f32 %v2686_v38, %v2685_v11  ;;  %v5364_v38 = vld [vmem:[%s5270_s18 + $0x50] sm:$0xff] }
  0xc5   : > { %3977 = vmatprep.mubr.msk.bf16.mxu1 %vm563_vm1, %v5115_v34 }
  0xc7   : > { %4128 = vmatmul.mubr.msk.bf16.gmra.mrb[4].mxu0 %vm563_vm1, %v4734_v47  ;;  %v5327_v47 = vld [vmem:[%s5270_s18 + $0x30] sm:$0xff] }
  0xc8   : > { %4131 = vmatprep.mubr.msk.bf16.mxu0 %vm563_vm1, %v4768_v9  ;;  %v2688_v9 = vsel %vm2676_vm3, %v5327_v47, 0.0 }
  0xc9   : > { %v2689_v2 = vadd.f32 %v2688_v9, %v2687_v52  ;;  %v6248_v9 = vld [vmem:[#allocation2_spill] sm:$0xff] }
  0xcb   : > { %v2691_v37 = vadd.f32 %v2690_v54, %v2689_v2  ;;  %v2696_v2 = vsel %vm2676_vm3, %v5364_v38, 0.0 }
  0xcc   : > { %3978 = vmatmul.mubr.msk.bf16.gmra.mrb[24].mxu1 %vm563_vm1, %v5123_v42 }
  0xcd   : > { %3981 = vmatprep.mubr.msk.bf16.mxu1 %vm563_vm1, %v5149_v57 }
  0xcf   : > { %4132 = vmatmul.mubr.msk.bf16.gmra.mrb[8].mxu0 %vm563_vm1, %v4788_v55  ;;  %v5345_v55 = vld [vmem:[%s5270_s18 + $0x40] sm:$0xff] }
  0xd0   : > { %4135 = vmatprep.mubr.msk.bf16.mxu0 %vm563_vm1, %v4831_v14  ;;  %v2692_v14 = vsel %vm2676_vm3, %v5345_v55, 0.0 }
  0xd1   : > { %v2693_v11 = vadd.f32 %v2692_v14, %v2691_v37 }
  0xd4   : > { %3982 = vmatmul.mubr.msk.bf16.gmra.mrb[28].mxu1 %vm563_vm1, %v5153_v19 }
  0xd5   : > { %3987 = vmatprep.mubr.msk.bf16.mxu1 %vm563_vm1, %v4580_v6  ;;  %v2694_v6 = vsel %vm2676_vm3, %v5354_v23, 0.0 }
  0xd6   : > { %v2695_v52 = vadd.f32 %v2694_v6, %v2693_v11  ;;  %v6249_v11 = vld [vmem:[#allocation3_spill] sm:$0xff] }
  0xd7   : > { %4136 = vmatmul.mubr.msk.bf16.gmra.mrb[12].mxu0 %vm563_vm1, %v4866_v3 }
  0xd8   : > { %4139 = vmatprep.mubr.msk.bf16.mxu0 %vm563_vm1, %v4872_v32  ;;  %v2697_v54 = vadd.f32 %v2696_v2, %v2695_v52  ;;  %v2211_v52 = vrot.slane %v356_v8, 1  ;;  %v2212_v2 = vrot.slane %v357_v31, 1  ;;  %v5417_v8 = vld [vmem:[%s5270_s18 + $0x78] sm:$0xff] }
  0xda   : > { %v2213_v15 = vsel %vm425_vm0, %v2211_v52, %v2212_v2 }
  0xdc   : > { %3988 = vmatmul.mubr.msk.bf16.vlgmr.msra.gmra.mrb[0].mxu1 %vm563_vm1, %v4590_v12  ;;  %v5373_v12 = vld [vmem:[%s5270_s18 + $0x58] sm:$0xff] }
  0xdd   : > { %4190 = vmatpush3.bf16.msra.mxu1 %v4552_v1  ;;  %3991 = vmatprep.mubr.msk.bf16.mxu1 %vm563_vm1, %v4613_v25  ;;  %v2698_v1 = vsel %vm2676_vm3, %v5373_v12, 0.0  ;;  %v5382_v25 = vld [vmem:[%s5270_s18 + $0x60] sm:$0xff] }
  0xde   : > { %v2699_v37 = vadd.f32 %v2698_v1, %v2697_v54  ;;  %v2700_v14 = vsel %vm2676_vm3, %v5382_v25, 0.0  ;;  %v2214_v54 = vrot.slane %v358_v21, 1  ;;  %v5406_v1 = vld [vmem:[%s5270_s18 + $0x70] sm:$0xff]  ;;  %v2706_v21 = vsel %vm2676_vm3, %v5417_v8, 0.0 }
  0xdf   : > { %4140 = vmatmul.mubr.msk.bf16.gmra.mrb[16].mxu0 %vm563_vm1, %v6248_v9 }
  0xe0   : > { %4143 = vmatprep.mubr.msk.bf16.mxu0 %vm563_vm1, %v4942_v20  ;;  %v2701_v6 = vadd.f32 %v2700_v14, %v2699_v37  ;;  %v5426_v14 = vld [vmem:[%s5270_s18 + $0x80] sm:$0xff] }
  0xe4   : > { %3992 = vmatmul.mubr.msk.bf16.gmra.mrb[4].mxu1 %vm563_vm1, %v4625_v33  ;;  %v5391_v33 = vld [vmem:[%s5270_s18 + $0x68] sm:$0xff] }
  0xe5   : > { %3995 = vmatprep.mubr.msk.bf16.mxu1 %vm563_vm1, %v4651_v45  ;;  %v2702_v45 = vsel %vm2676_vm3, %v5391_v33, 0.0 }
  0xe6   : > { %v2703_v37 = vadd.f32 %v2702_v45, %v2701_v6  ;;  %v2708_v45 = vsel %vm2676_vm3, %v5426_v14, 0.0 }
  0xe7   : > { %4144 = vmatmul.mubr.msk.bf16.gmra.mrb[20].mxu0 %vm563_vm1, %v4989_v22 }
  0xe8   : > { %4147 = vmatprep.mubr.msk.bf16.mxu0 %vm563_vm1, %v6249_v11 }
  0xec   : > { %3996 = vmatmul.mubr.msk.bf16.gmra.mrb[8].mxu1 %vm563_vm1, %v4661_v51  ;;  %v2704_v51 = vsel %vm2676_vm3, %v5406_v1, 0.0 }
  0xed   : > { %3999 = vmatprep.mubr.msk.bf16.mxu1 %vm563_vm1, %v4686_v62  ;;  %v2215_v62 = vsel %vm425_vm0, %v2212_v2, %v2214_v54  ;;  %v2705_v31 = vadd.f32 %v2704_v51, %v2703_v37  ;;  %v5443_v2 = vld [vmem:[%s5270_s18 + $0x90] sm:$0xff] }
  0xee   : > { %v2218_v50 = vpack.c.bf16 %v2215_v62, %v2213_v15 }
  0xef   : > { %4148 = vmatmul.mubr.msk.bf16.gmra.mrb[24].mxu0 %vm563_vm1, %v5034_v53  ;;  %v2707_v6 = vadd.f32 %v2706_v21, %v2705_v31 }
  0xf0   : > { %4151 = vmatprep.mubr.msk.bf16.mxu0 %vm563_vm1, %v5163_v63 }
  0xf1   : > { %v2709_v52 = vadd.f32 %v2708_v45, %v2707_v6 }
  0xf4   : > { %4000 = vmatmul.mubr.msk.bf16.gmra.mrb[12].mxu1 %vm563_vm1, %v4730_v46  ;;  %v5434_v46 = vld [vmem:[%s5270_s18 + $0x88] sm:$0xff] }
  0xf5   : > { %4003 = vmatprep.mubr.msk.bf16.mxu1 %vm563_vm1, %v4755_v24  ;;  %v2710_v24 = vsel %vm2676_vm3, %v5434_v46, 0.0 }
  0xf6   : > { %v2711_v54 = vadd.f32 %v2710_v24, %v2709_v52 }
  0xf7   : > { %4152 = vmatmul.mubr.msk.bf16.gmra.mrb[28].mxu0 %vm563_vm1, %v2218_v50 }
  0xf8   : > { %4157 = vmatprep.mubr.msk.bf16.mxu0 %vm563_vm1, %v4868_v28  ;;  %v2712_v28 = vsel %vm2676_vm3, %v5443_v2, 0.0 }
  0xf9   : > { %v2713_v37 = vadd.f32 %v2712_v28, %v2711_v54  ;;  %v5551_v54 = vld [vmem:[%s5270_s18 + $0xf0] sm:$0xff]  ;;  %v5560_v28 = vld [vmem:[%s5270_s18 + $0xf8] sm:$0xff] }
  0xfc   : > { %4004 = vmatmul.mubr.msk.bf16.gmra.mrb[16].mxu1 %vm563_vm1, %v4773_v7  ;;  %v5452_v7 = vld [vmem:[%s5270_s18 + $0x98] sm:$0xff] }
  0xfd   : > { %4007 = vmatprep.mubr.msk.bf16.mxu1 %vm563_vm1, %v4811_v29  ;;  %v2714_v29 = vsel %vm2676_vm3, %v5452_v7, 0.0 }
  0xfe   : > { %v2715_v51 = vadd.f32 %v2714_v29, %v2713_v37 }
  0xff   : > { %4158 = vmatmul.mubr.msk.bf16.vlgmr.msra.gmra.mrb[0].mxu0 %vm563_vm1, %v4914_v49  ;;  %v5461_v49 = vld [vmem:[%s5270_s18 + $0xa0] sm:$0xff] }
 0x100   : > { %4161 = vmatprep.mubr.msk.bf16.mxu0 %vm563_vm1, %v4946_v17  ;;  %v2716_v17 = vsel %vm2676_vm3, %v5461_v49, 0.0 }
 0x101   : > { %v2717_v15 = vadd.f32 %v2716_v17, %v2715_v51 }
 0x104   : > { %4008 = vmatmul.mubr.msk.bf16.gmra.mrb[20].mxu1 %vm563_vm1, %v4829_v13  ;;  %v5470_v13 = vld [vmem:[%s5270_s18 + $0xa8] sm:$0xff] }
 0x105   : > { %4011 = vmatprep.mubr.msk.bf16.mxu1 %vm563_vm1, %v4880_v39  ;;  %v2718_v39 = vsel %vm2676_vm3, %v5470_v13, 0.0 }
 0x106   : > { %v2719_v62 = vadd.f32 %v2718_v39, %v2717_v15 }
 0x107   : > { %4162 = vmatmul.mubr.msk.bf16.gmra.mrb[4].mxu0 %vm563_vm1, %v4961_v58  ;;  %v5479_v58 = vld [vmem:[%s5270_s18 + $0xb0] sm:$0xff] }
 0x108   : > { %4165 = vmatprep.mubr.msk.bf16.mxu0 %vm563_vm1, %v5006_v36  ;;  %v2720_v36 = vsel %vm2676_vm3, %v5479_v58, 0.0 }
 0x109   : > { %v2721_v31 = vadd.f32 %v2720_v36, %v2719_v62 }
 0x10c   : > { %4012 = vmatmul.mubr.msk.bf16.gmra.mrb[24].mxu1 %vm563_vm1, %v4899_v35  ;;  %v5488_v35 = vld [vmem:[%s5270_s18 + $0xb8] sm:$0xff] }
 0x10d   : > { %4015 = vmatprep.mubr.msk.bf16.mxu1 %vm563_vm1, %v4955_v56  ;;  %v2722_v56 = vsel %vm2676_vm3, %v5488_v35, 0.0 }
 0x10e   : > { %v2723_v50 = vadd.f32 %v2722_v56, %v2721_v31 }
 0x10f   : > { %4166 = vmatmul.mubr.msk.bf16.gmra.mrb[8].mxu0 %vm563_vm1, %v5008_v60  ;;  %v5497_v60 = vld [vmem:[%s5270_s18 + $0xc0] sm:$0xff] }
 0x110   : > { %4169 = vmatprep.mubr.msk.bf16.mxu0 %vm563_vm1, %v5047_v5  ;;  %v2724_v5 = vsel %vm2676_vm3, %v5497_v60, 0.0 }
 0x111   : > { %v2725_v21 = vadd.f32 %v2724_v5, %v2723_v50 }
 0x114   : > { %4016 = vmatmul.mubr.msk.bf16.gmra.mrb[28].mxu1 %vm563_vm1, %v5134_v40  ;;  %v5506_v40 = vld [vmem:[%s5270_s18 + $0xc8] sm:$0xff] }
 0x115   : > { %4037 = vmatprep.mubr.msk.bf16.mxu1 %vm563_vm1, %v4866_v3  ;;  %v2726_v3 = vsel %vm2676_vm3, %v5506_v40, 0.0 }
 0x116   : > { %v2727_v6 = vadd.f32 %v2726_v3, %v2725_v21 }
 0x117   : > { %4170 = vmatmul.mubr.msk.bf16.gmra.mrb[12].mxu0 %vm563_vm1, %v5056_v26  ;;  %v5515_v26 = vld [vmem:[%s5270_s18 + $0xd0] sm:$0xff] }
 0x118   : > { %4173 = vmatprep.mubr.msk.bf16.mxu0 %vm563_vm1, %v5085_v30  ;;  %v2728_v30 = vsel %vm2676_vm3, %v5515_v26, 0.0 }
 0x119   : > { %v2729_v45 = vadd.f32 %v2728_v30, %v2727_v6 }
 0x11c   : > { %4038 = vmatmul.mubr.msk.bf16.vlgmr.msra.gmra.mrb[16].mxu1 %vm563_vm1, %v4872_v32  ;;  %v5524_v32 = vld [vmem:[%s5270_s18 + $0xd8] sm:$0xff] }
 0x11d   : > { %4041 = vmatprep.mubr.msk.bf16.mxu1 %vm563_vm1, %v6248_v9  ;;  %v2730_v9 = vsel %vm2676_vm3, %v5524_v32, 0.0 }
 0x11e   : > { %v2731_v52 = vadd.f32 %v2730_v9, %v2729_v45 }
 0x11f   : > { %4174 = vmatmul.mubr.msk.bf16.gmra.mrb[16].mxu0 %vm563_vm1, %v5090_v41  ;;  %v5533_v41 = vld [vmem:[%s5270_s18 + $0xe0] sm:$0xff] }
 0x120   : > { %4177 = vmatprep.mubr.msk.bf16.mxu0 %vm563_vm1, %v5115_v34  ;;  %v2732_v34 = vsel %vm2676_vm3, %v5533_v41, 0.0 }
 0x121   : > { %v2733_v24 = vadd.f32 %v2732_v34, %v2731_v52 }
 0x124   : > { %4042 = vmatmul.mubr.msk.bf16.gmra.mrb[20].mxu1 %vm563_vm1, %v4942_v20  ;;  %v5542_v20 = vld [vmem:[%s5270_s18 + $0xe8] sm:$0xff] }
 0x125   : > { %4045 = vmatprep.mubr.msk.bf16.mxu1 %vm563_vm1, %v4989_v22  ;;  %v2734_v22 = vsel %vm2676_vm3, %v5542_v20, 0.0 }
 0x127   : > { %4178 = vmatmul.mubr.msk.bf16.gmra.mrb[20].mxu0 %vm563_vm1, %v5123_v42  ;;  %v2735_v42 = vadd.f32 %v2734_v22, %v2733_v24 }
 0x128   : > { %4181 = vmatprep.mubr.msk.bf16.mxu0 %vm563_vm1, %v5149_v57  ;;  %v2736_v57 = vsel %vm2676_vm3, %v5551_v54, 0.0 }
 0x12c   : > { %4046 = vmatmul.mubr.msk.bf16.gmra.mrb[24].mxu1 %vm563_vm1, %v6249_v11  ;;  %v2737_v11 = vadd.f32 %v2736_v57, %v2735_v42 }
 0x12d   : > { %4049 = vmatprep.mubr.msk.bf16.mxu1 %vm563_vm1, %v5034_v53  ;;  %v2738_v53 = vsel %vm2676_vm3, %v5560_v28, 0.0 }
 0x12e   : > { %v2739_v37 = vadd.f32 %v2738_v53, %v2737_v11 }
 0x12f   : > { %4182 = vmatmul.mubr.msk.bf16.gmra.mrb[24].mxu0 %vm563_vm1, %v5153_v19 }
 0x130   : > { %4185 = vmatprep.mubr.msk.bf16.mxu0 %vm563_vm1, %v5167_v0  ;;  %v2740_v19 = vrot.slane %v2739_v37, 4 }
 0x132   : > { %v2741_v29 = vadd.f32 %v2740_v19, %v2739_v37 }
 0x134   : > { %4050 = vmatmul.mubr.msk.bf16.gmra.mrb[28].mxu1 %vm563_vm1, %v5163_v63  ;;  %v2742_v51 = vrot.slane %v2741_v29, 2 }
 0x136   : > { %v2743_v17 = vadd.f32 %v2742_v51, %v2741_v29 }
 0x137   : > { %4186 = vmatmul.mubr.msk.bf16.gmra.mrb[28].mxu0 %vm563_vm1, %v2431_v48 }
 0x138   : > { %v2744_v0 = vrot.slane %v2743_v17, 1 }
 0x13a   : > { %v2745_v15 = vadd.f32 %v2744_v0, %v2743_v17 }
 0x13c   : > { %v5570_v39 = vmul.f32 0.00390625, %v2745_v15 }
 0x13e   : > { %v5574_v63 = vsub.f32 %v5277_v59, %v5570_v39  ;;  %v5578_v62 = vsub.f32 %v5280_v18, %v5570_v39  ;;  %v5582_v10 = vsub.f32 %v5291_v4, %v5570_v39  ;;  %v5590_v36 = vsub.f32 %v5300_v44, %v5570_v39 }
 0x13f   : > { %v5598_v4 = vsub.f32 %v5309_v16, %v5570_v39  ;;  %v5605_v44 = vsub.f32 %v5318_v61, %v5570_v39  ;;  %v5612_v16 = vsub.f32 %v5327_v47, %v5570_v39  ;;  %v5619_v61 = vsub.f32 %v5336_v27, %v5570_v39 }
 0x140   : > { %v2780_v43 = vmul.f32 %v5574_v63, %v5574_v63  ;;  %v2781_v48 = vmul.f32 %v5578_v62, %v5578_v62  ;;  %v2782_v59 = vmul.f32 %v5582_v10, %v5582_v10  ;;  %v2783_v50 = vmul.f32 %v5590_v36, %v5590_v36 }
 0x141   : > { %v2784_v3 = vmul.f32 %v5598_v4, %v5598_v4  ;;  %v2785_v45 = vmul.f32 %v5605_v44, %v5605_v44  ;;  %v2786_v34 = vmul.f32 %v5612_v16, %v5612_v16  ;;  %v5626_v47 = vsub.f32 %v5345_v55, %v5570_v39 }
 0x142   : > { %v2812_v18 = vsel %vm2676_vm3, %v2780_v43, 0.0  ;;  %v2813_v31 = vsel %vm2676_vm3, %v2781_v48, 0.0  ;;  %v2815_v5 = vsel %vm2676_vm3, %v2782_v59, 0.0  ;;  %v2817_v6 = vsel %vm2676_vm3, %v2783_v50, 0.0 }
 0x143   : > { %v2814_v56 = vadd.f32 %v2813_v31, %v2812_v18  ;;  %v2819_v9 = vsel %vm2676_vm3, %v2784_v3, 0.0  ;;  %v2821_v24 = vsel %vm2676_vm3, %v2785_v45, 0.0  ;;  %v2787_v42 = vmul.f32 %v5619_v61, %v5619_v61 }
 0x144   : > { %v2823_v57 = vsel %vm2676_vm3, %v2786_v34, 0.0  ;;  %v5633_v27 = vsub.f32 %v5354_v23, %v5570_v39  ;;  %v2788_v53 = vmul.f32 %v5626_v47, %v5626_v47  ;;  %v5640_v55 = vsub.f32 %v5364_v38, %v5570_v39 }
 0x145   : > { %v2816_v21 = vadd.f32 %v2815_v5, %v2814_v56  ;;  %v2825_v37 = vsel %vm2676_vm3, %v2787_v42, 0.0  ;;  %v5647_v23 = vsub.f32 %v5373_v12, %v5570_v39  ;;  %v5654_v38 = vsub.f32 %v5382_v25, %v5570_v39 }
 0x146   : > { %v2789_v29 = vmul.f32 %v5633_v27, %v5633_v27  ;;  %v2827_v51 = vsel %vm2676_vm3, %v2788_v53, 0.0  ;;  %v2790_v0 = vmul.f32 %v5640_v55, %v5640_v55  ;;  %v5661_v12 = vsub.f32 %v5391_v33, %v5570_v39 }
 0x147   : > { %v2818_v30 = vadd.f32 %v2817_v6, %v2816_v21  ;;  %v2791_v48 = vmul.f32 %v5647_v23, %v5647_v23  ;;  %v2792_v31 = vmul.f32 %v5654_v38, %v5654_v38  ;;  %v5668_v25 = vsub.f32 %v5406_v1, %v5570_v39 }
 0x148   : > { %v2829_v15 = vsel %vm2676_vm3, %v2789_v29, 0.0  ;;  %v2831_v59 = vsel %vm2676_vm3, %v2790_v0, 0.0  ;;  %v2793_v5 = vmul.f32 %v5661_v12, %v5661_v12  ;;  %v5675_v33 = vsub.f32 %v5417_v8, %v5570_v39 }
 0x149   : > { %v2820_v52 = vadd.f32 %v2819_v9, %v2818_v30  ;;  %v2833_v56 = vsel %vm2676_vm3, %v2791_v48, 0.0  ;;  %v2835_v21 = vsel %vm2676_vm3, %v2792_v31, 0.0  ;;  %v2794_v6 = vmul.f32 %v5668_v25, %v5668_v25 }
 0x14a   : > { %v2837_v30 = vsel %vm2676_vm3, %v2793_v5, 0.0  ;;  %v5682_v1 = vsub.f32 %v5426_v14, %v5570_v39  ;;  %v2795_v9 = vmul.f32 %v5675_v33, %v5675_v33  ;;  %v5689_v8 = vsub.f32 %v5434_v46, %v5570_v39 }
 0x14b   : > { %v2822_v22 = vadd.f32 %v2821_v24, %v2820_v52  ;;  %v2839_v52 = vsel %vm2676_vm3, %v2794_v6, 0.0  ;;  %v5696_v14 = vsub.f32 %v5443_v2, %v5570_v39  ;;  %v5703_v46 = vsub.f32 %v5452_v7, %v5570_v39 }
 0x14c   : > { %v2796_v24 = vmul.f32 %v5682_v1, %v5682_v1  ;;  %v5710_v2 = vsub.f32 %v5461_v49, %v5570_v39  ;;  %v5717_v7 = vsub.f32 %v5470_v13, %v5570_v39  ;;  %v5724_v49 = vsub.f32 %v5479_v58, %v5570_v39 }
 0x14d   : > { %v2824_v11 = vadd.f32 %v2823_v57, %v2822_v22  ;;  %v2841_v22 = vsel %vm2676_vm3, %v2795_v9, 0.0  ;;  %v2797_v57 = vmul.f32 %v5689_v8, %v5689_v8  ;;  %v5731_v13 = vsub.f32 %v5488_v35, %v5570_v39 }
 0x14e   : > { %6250 = vst [vmem:[#allocation2_spill] sm:$0xff] %v5710_v2  ;;  %6251 = vst [vmem:[#allocation3_spill] sm:$0xff] %v5717_v7 }
 0x14f   : > { %v2826_v19 = vadd.f32 %v2825_v37, %v2824_v11  ;;  %v2843_v11 = vsel %vm2676_vm3, %v2796_v24, 0.0  ;;  %v2798_v37 = vmul.f32 %v5696_v14, %v5696_v14  ;;  %6252 = vst [vmem:[#allocation4_spill] sm:$0xff] %v5724_v49  ;;  %6253 = vst [vmem:[#allocation5_spill] sm:$0xff] %v5731_v13 }
 0x151   : > { %v2828_v17 = vadd.f32 %v2827_v51, %v2826_v19  ;;  %v2845_v19 = vsel %vm2676_vm3, %v2797_v57, 0.0  ;;  %v2799_v51 = vmul.f32 %v5703_v46, %v5703_v46 }
 0x153   : > { %v2830_v43 = vadd.f32 %v2829_v15, %v2828_v17  ;;  %v2847_v17 = vsel %vm2676_vm3, %v2798_v37, 0.0  ;;  %v2800_v15 = vmul.f32 %v5710_v2, %v5710_v2 }
 0x155   : > { %v2832_v18 = vadd.f32 %v2831_v59, %v2830_v43  ;;  %v2849_v43 = vsel %vm2676_vm3, %v2799_v51, 0.0  ;;  %v2801_v59 = vmul.f32 %v5717_v7, %v5717_v7  ;;  %v5765_v51 = vsub.f32 %v5524_v32, %v5570_v39 }
 0x157   : > { %v2834_v50 = vadd.f32 %v2833_v56, %v2832_v18  ;;  %v2851_v18 = vsel %vm2676_vm3, %v2800_v15, 0.0  ;;  %v2853_v5 = vsel %vm2676_vm3, %v2801_v59, 0.0  ;;  %6256 = vst [vmem:[#allocation8_spill] sm:$0xff] %v5765_v51  ;;  %v5778_v59 = vsub.f32 %v5533_v41, %v5570_v39 }
 0x158   : > { %v2807_v32 = vmul.f32 %v5765_v51, %v5765_v51 }
 0x159   : > { %v2836_v3 = vadd.f32 %v2835_v21, %v2834_v50  ;;  %v2802_v50 = vmul.f32 %v5724_v49, %v5724_v49 }
 0x15b   : > { %v2838_v45 = vadd.f32 %v2837_v30, %v2836_v3  ;;  %v5738_v30 = vsub.f32 %v5497_v60, %v5570_v39  ;;  %v2855_v9 = vsel %vm2676_vm3, %v2802_v50, 0.0 }
 0x15d   : > { %v2840_v34 = vadd.f32 %v2839_v52, %v2838_v45  ;;  %6254 = vst [vmem:[#allocation6_spill] sm:$0xff] %v5738_v30  ;;  %v2803_v45 = vmul.f32 %v5731_v13, %v5731_v13  ;;  %v2804_v24 = vmul.f32 %v5738_v30, %v5738_v30 }
 0x15f   : > { %v2842_v42 = vadd.f32 %v2841_v22, %v2840_v34  ;;  %v5745_v34 = vsub.f32 %v5506_v40, %v5570_v39  ;;  %v2857_v22 = vsel %vm2676_vm3, %v2803_v45, 0.0  ;;  %v2859_v40 = vsel %vm2676_vm3, %v2804_v24, 0.0 }
 0x160   : > { %v2865_v45 = vsel %vm2676_vm3, %v2807_v32, 0.0 }
 0x161   : > { %v2844_v53 = vadd.f32 %v2843_v11, %v2842_v42  ;;  %v2805_v37 = vmul.f32 %v5745_v34, %v5745_v34 }
 0x163   : > { %v2846_v29 = vadd.f32 %v2845_v19, %v2844_v53  ;;  %v5756_v53 = vsub.f32 %v5515_v26, %v5570_v39 }
 0x165   : > { %v2848_v0 = vadd.f32 %v2847_v17, %v2846_v29  ;;  %6255 = vst [vmem:[#allocation7_spill] sm:$0xff] %v5756_v53  ;;  %v2806_v17 = vmul.f32 %v5756_v53, %v5756_v53 }
 0x167   : > { %v2850_v48 = vadd.f32 %v2849_v43, %v2848_v0  ;;  %v2861_v0 = vsel %vm2676_vm3, %v2805_v37, 0.0 }
 0x169   : > { %v2852_v31 = vadd.f32 %v2851_v18, %v2850_v48  ;;  %v2863_v18 = vsel %vm2676_vm3, %v2806_v17, 0.0 }
 0x16b   : > { %v2854_v6 = vadd.f32 %v2853_v5, %v2852_v31  ;;  %v5787_v5 = vsub.f32 %v5542_v20, %v5570_v39 }
 0x16d   : > { %v2856_v35 = vadd.f32 %v2855_v9, %v2854_v6  ;;  %v2808_v6 = vmul.f32 %v5778_v59, %v5778_v59  ;;  %v2809_v20 = vmul.f32 %v5787_v5, %v5787_v5 }
 0x16f   : > { %v2858_v11 = vadd.f32 %v2857_v22, %v2856_v35  ;;  %v5800_v22 = vsub.f32 %v5551_v54, %v5570_v39  ;;  %v2869_v17 = vsel %vm2676_vm3, %v2809_v20, 0.0  ;;  %v5815_v54 = vld [vmem:[%s6160_s3] ss:$0 sm:$0xff] }
 0x171   : > { %v2860_v19 = vadd.f32 %v2859_v40, %v2858_v11  ;;  %v2867_v11 = vsel %vm2676_vm3, %v2808_v6, 0.0  ;;  %v5807_v40 = vsub.f32 %v5560_v28, %v5570_v39 }
 0x173   : > { %v2862_v48 = vadd.f32 %v2861_v0, %v2860_v19  ;;  %v2810_v19 = vmul.f32 %v5800_v22, %v5800_v22  ;;  %v2811_v32 = vmul.f32 %v5807_v40, %v5807_v40 }
 0x175   : > { %v2864_v31 = vadd.f32 %v2863_v18, %v2862_v48  ;;  %v2871_v18 = vsel %vm2676_vm3, %v2810_v19, 0.0  ;;  %v2873_v30 = vsel %vm2676_vm3, %v2811_v32, 0.0 }
 0x177   : > { %v2866_v24 = vadd.f32 %v2865_v45, %v2864_v31 }
 0x179   : > { %v2868_v37 = vadd.f32 %v2867_v11, %v2866_v24 }
 0x17b   : > { %v2870_v0 = vadd.f32 %v2869_v17, %v2868_v37 }
 0x17d   : > { %v2872_v11 = vadd.f32 %v2871_v18, %v2870_v0 }
 0x1af   : > { %v3989_v56 = vpop.f32.mrb[0].mxu1 }
 0x1b0   : > { %v1414_v21 = vpop.f32.mrb[1].mxu1 }
 0x1b1   : > { %v3990_v3 = vpop.f32.mrb[2].mxu1 }
 0x1b2   : > { %v1417_v58 = vpop.f32.mrb[3].mxu1 }
 0x1b7   : > { %v3993_v52 = vpop.f32.mrb[4].mxu1 }
 0x1b8   : > { %v1430_v42 = vpop.f32.mrb[5].mxu1 }
 0x1b9   : > { %v5750_v57 = vpop.f32.mrb[6].mxu1 }
 0x1ba   : > { %v5752_v60 = vpop.f32.mrb[7].mxu1 }
 0x1bf   : > { %v5761_v29 = vpop.f32.mrb[8].mxu1 }
 0x1c0   : > { %v5770_v15 = vpop.f32.mrb[9].mxu1 }
 0x1c1   : > { %v5772_v26 = vpop.f32.mrb[10].mxu1 }
 0x1c2   : > { %v5774_v43 = vpop.f32.mrb[11].mxu1 }
 0x1c7   : > { %v5783_v50 = vpop.f32.mrb[12].mxu1 }
 0x1c8   : > { %v5792_v9 = vpop.f32.mrb[13].mxu1 }
 0x1c9   : > { %v5794_v41 = vpop.f32.mrb[14].mxu1 }
 0x1ca   : > { %v5796_v35 = vpop.f32.mrb[15].mxu1 }
 0x1d2   : > { %v4159_v48 = vpop.f32.mrb[0].mxu0 }
 0x1d3   : > { %v4191_v31 = vadd.f32 %v4159_v48, %v3989_v56  ;;  %v2478_v28 = vpop.f32.mrb[1].mxu0 }
 0x1d4   : > { %v4192_v39 = vadd.f32 %v2478_v28, %v1414_v21  ;;  %v4160_v6 = vpop.f32.mrb[2].mxu0  ;;  %v2874_v21 = vadd.f32 %v2873_v30, %v2872_v11 }
 0x1d5   : > { %v4193_v45 = vadd.f32 %v4160_v6, %v3990_v3  ;;  %v2481_v24 = vpop.f32.mrb[3].mxu0  ;;  %v5821_v20 = vadd.f32 %v4191_v31, %v5815_v54 }
 0x1d6   : > { %v4194_v37 = vadd.f32 %v2481_v24, %v1417_v58  ;;  %v5824_v17 = vadd.f32 %v4192_v39, %v5815_v54  ;;  %v2875_v28 = vrot.slane %v2874_v21, 4 }
 0x1d7   : > { %3016 = vrot.lane.b32.xlu1 %v5821_v20, %s4512_s21  ;;  %v5832_v56 = vadd.f32 %v4193_v45, %v5815_v54 }
 0x1d8   : > { %3012 = vrot.lane.b32.xlu0 %v5824_v17, %s4512_s21  ;;  %v5835_v3 = vadd.f32 %v4194_v37, %v5815_v54 }
 0x1da   : > { %v4163_v58 = vpop.f32.mrb[4].mxu0 }
 0x1db   : > { %v4195_v19 = vadd.f32 %v4163_v58, %v3993_v52  ;;  %v2494_v0 = vpop.f32.mrb[5].mxu0  ;;  %3018 = vrot.lane.b32.xlu1 %v5832_v56, %s4512_s21 }
 0x1dc   : > { %v4196_v48 = vadd.f32 %v2494_v0, %v1430_v42  ;;  %v4164_v32 = vpop.f32.mrb[6].mxu0  ;;  %3014 = vrot.lane.b32.xlu0 %v5835_v3, %s4512_s21  ;;  %v2876_v42 = vadd.f32 %v2875_v28, %v2874_v21 }
 0x1dd   : > { %v5842_v18 = vadd.f32 %v4195_v19, %v5815_v54  ;;  %v4197_v31 = vadd.f32 %v4164_v32, %v5750_v57  ;;  %v2497_v30 = vpop.f32.mrb[7].mxu0 }
 0x1de   : > { %v4198_v39 = vadd.f32 %v2497_v30, %v5752_v60  ;;  %v5854_v6 = vadd.f32 %v4196_v48, %v5815_v54  ;;  %v2877_v0 = vrot.slane %v2876_v42, 2 }
 0x1df   : > { %v5847_v52 = vadd.f32 %v4197_v31, %v5815_v54 }
 0x1e0   : > { %3024 = vrot.lane.b32.xlu0 %v5842_v18, %s4512_s21  ;;  %v5857_v57 = vadd.f32 %v4198_v39, %v5815_v54 }
 0x1e1   : > { %3026 = vrot.lane.b32.xlu1 %v5847_v52, %s4512_s21 }
 0x1e2   : > { %v4167_v45 = vpop.f32.mrb[8].mxu0 }
 0x1e3   : > { %v4199_v24 = vadd.f32 %v4167_v45, %v5761_v29  ;;  %v2510_v60 = vpop.f32.mrb[9].mxu0 }
 0x1e4   : > { %v4200_v11 = vadd.f32 %v2510_v60, %v5770_v15  ;;  %v4168_v37 = vpop.f32.mrb[10].mxu0  ;;  %3020 = vrot.lane.b32.xlu0 %v5854_v6, %s4512_s21  ;;  %v2878_v15 = vadd.f32 %v2877_v0, %v2876_v42 }
 0x1e5   : > { %v5864_v58 = vadd.f32 %v4199_v24, %v5815_v54  ;;  %v4201_v21 = vadd.f32 %v4168_v37, %v5772_v26  ;;  %v2513_v19 = vpop.f32.mrb[11].mxu0  ;;  %3022 = vrot.lane.b32.xlu1 %v5857_v57, %s4512_s21 }
 0x1e6   : > { %v4202_v48 = vadd.f32 %v2513_v19, %v5774_v43  ;;  %v5878_v32 = vadd.f32 %v4200_v11, %v5815_v54  ;;  %v2879_v60 = vrot.slane %v2878_v15, 1 }
 0x1e7   : > { %v5871_v29 = vadd.f32 %v4201_v21, %v5815_v54 }
 0x1e8   : > { %3032 = vrot.lane.b32.xlu0 %v5864_v58, %s4512_s21  ;;  %v5881_v31 = vadd.f32 %v4202_v48, %v5815_v54  ;;  %v2880_v19 = vadd.f32 %v2879_v60, %v2878_v15 }
 0x1e9   : > { %3034 = vrot.lane.b32.xlu1 %v5871_v29, %s4512_s21 }
 0x1ea   : > { %v4171_v26 = vpop.f32.mrb[12].mxu0  ;;  %v2881_v15 = vmul.f32 0.00390625, %v2880_v19 }
 0x1eb   : > { %v4203_v30 = vadd.f32 %v4171_v26, %v5783_v50  ;;  %v2526_v43 = vpop.f32.mrb[13].mxu0 }
 0x1ec   : > { %v4204_v28 = vadd.f32 %v2526_v43, %v5792_v9  ;;  %v4172_v39 = vpop.f32.mrb[14].mxu0  ;;  %3028 = vrot.lane.b32.xlu0 %v5878_v32, %s4512_s21 }
 0x1ed   : > { %v5888_v45 = vadd.f32 %v4203_v30, %v5815_v54  ;;  %v4205_v42 = vadd.f32 %v4172_v39, %v5794_v41  ;;  %v2529_v24 = vpop.f32.mrb[15].mxu0  ;;  %3030 = vrot.lane.b32.xlu1 %v5881_v31, %s4512_s21 }
 0x1ee   : > { %v4206_v11 = vadd.f32 %v2529_v24, %v5796_v35  ;;  %v5902_v0 = vadd.f32 %v4204_v28, %v5815_v54 }
 0x1ef   : > { %v4039_v50 = vpop.f32.mrb[16].mxu1  ;;  %v5895_v37 = vadd.f32 %v4205_v42, %v5815_v54 }
 0x1f0   : > { %v1694_v9 = vpop.f32.mrb[17].mxu1  ;;  %3040 = vrot.lane.b32.xlu0 %v5888_v45, %s4512_s21  ;;  %v5905_v35 = vadd.f32 %v4206_v11, %v5815_v54 }
 0x1f1   : > { %v4040_v21 = vpop.f32.mrb[18].mxu1  ;;  %3042 = vrot.lane.b32.xlu1 %v5895_v37, %s4512_s21 }
 0x1f2   : > { %v1697_v41 = vpop.f32.mrb[19].mxu1  ;;  %v4175_v48 = vpop.f32.mrb[16].mxu0 }
 0x1f3   : > { %v4207_v26 = vadd.f32 %v4175_v48, %v4039_v50  ;;  %v2542_v30 = vpop.f32.mrb[17].mxu0 }
 0x1f4   : > { %v4208_v43 = vadd.f32 %v2542_v30, %v1694_v9  ;;  %v4176_v39 = vpop.f32.mrb[18].mxu0  ;;  %3036 = vrot.lane.b32.xlu0 %v5902_v0, %s4512_s21 }
 0x1f5   : > { %v5910_v42 = vadd.f32 %v4207_v26, %v5815_v54  ;;  %v4209_v24 = vadd.f32 %v4176_v39, %v4040_v21  ;;  %v2545_v51 = vpop.f32.mrb[19].mxu0  ;;  %3038 = vrot.lane.b32.xlu1 %v5905_v35, %s4512_s21  ;;  %v2882_v21 = vadd.f32 1e-05, %v2881_v15 }
 0x1f6   : > { %v4210_v28 = vadd.f32 %v2545_v51, %v1697_v41  ;;  %v5922_v26 = vadd.f32 %v4208_v43, %v5815_v54 }
 0x1f7   : > { %v4043_v60 = vpop.f32.mrb[20].mxu1  ;;  %v5915_v11 = vadd.f32 %v4209_v24, %v5815_v54  ;;  %4502 = vrsqrt.f32 %v2882_v21 }
 0x1f8   : > { %v1710_v50 = vpop.f32.mrb[21].mxu1  ;;  %3048 = vrot.lane.b32.xlu0 %v5910_v42, %s4512_s21  ;;  %v5925_v51 = vadd.f32 %v4210_v28, %v5815_v54 }
 0x1f9   : > { %v4044_v9 = vpop.f32.mrb[22].mxu1  ;;  %3050 = vrot.lane.b32.xlu1 %v5915_v11, %s4512_s21 }
 0x1fa   : > { %v1713_v48 = vpop.f32.mrb[23].mxu1  ;;  %v4179_v30 = vpop.f32.mrb[20].mxu0  ;;  %6257 = vst [vmem:[#allocation9_spill] sm:$0xff] %v5925_v51 }
 0x1fb   : > { %v4211_v41 = vadd.f32 %v4179_v30, %v4043_v60  ;;  %v2558_v19 = vpop.f32.mrb[21].mxu0 }
 0x1fc   : > { %v4212_v39 = vadd.f32 %v2558_v19, %v1710_v50  ;;  %v4180_v24 = vpop.f32.mrb[22].mxu0  ;;  %3044 = vrot.lane.b32.xlu0 %v5922_v26, %s4512_s21 }
 0x1fd   : > { %v5930_v53 = vadd.f32 %v4211_v41, %v5815_v54  ;;  %v4213_v7 = vadd.f32 %v4180_v24, %v4044_v9  ;;  %v2561_v2 = vpop.f32.mrb[23].mxu0  ;;  %3046 = vrot.lane.b32.xlu1 %v5925_v51, %s4512_s21 }
 0x1fe   : > { %v4214_v43 = vadd.f32 %v2561_v2, %v1713_v48  ;;  %v5942_v9 = vadd.f32 %v4212_v39, %v5815_v54 }
 0x1ff   : > { %6258 = vst [vmem:[#allocation10_spill] sm:$0xff] %v5930_v53  ;;  %v4047_v15 = vpop.f32.mrb[24].mxu1  ;;  %v5935_v28 = vadd.f32 %v4213_v7, %v5815_v54 }
 0x200   : > { %v1726_v60 = vpop.f32.mrb[25].mxu1  ;;  %3056 = vrot.lane.b32.xlu0 %v5930_v53, %s4512_s21  ;;  %6260 = vst [vmem:[#allocation12_spill] sm:$0xff] %v5942_v9  ;;  %v5945_v21 = vadd.f32 %v4214_v43, %v5815_v54 }
 0x201   : > { %6259 = vst [vmem:[#allocation11_spill] sm:$0xff] %v5935_v28  ;;  %v4048_v50 = vpop.f32.mrb[26].mxu1  ;;  %3058 = vrot.lane.b32.xlu1 %v5935_v28, %s4512_s21  ;;  %v5954_v49 = vpop.eup %4502 }
 0x202   : > { %v1729_v30 = vpop.f32.mrb[27].mxu1  ;;  %v4183_v41 = vpop.f32.mrb[24].mxu0  ;;  %6261 = vst [vmem:[#allocation13_spill] sm:$0xff] %v5945_v21 }
 0x203   : > { %v4215_v2 = vadd.f32 %v4183_v41, %v4047_v15  ;;  %v2574_v48 = vpop.f32.mrb[25].mxu0 }
 0x204   : > { %v4216_v7 = vadd.f32 %v2574_v48, %v1726_v60  ;;  %v4184_v19 = vpop.f32.mrb[26].mxu0  ;;  %3052 = vrot.lane.b32.xlu0 %v5942_v9, %s4512_s21 }
 0x205   : > { %v5950_v24 = vadd.f32 %v4215_v2, %v5815_v54  ;;  %v4217_v53 = vadd.f32 %v4184_v19, %v4048_v50  ;;  %v2577_v28 = vpop.f32.mrb[27].mxu0  ;;  %3054 = vrot.lane.b32.xlu1 %v5945_v21, %s4512_s21  ;;  %v2909_v50 = vmul.f32 %v5954_v49, %v5745_v34 }
 0x206   : > { %v4218_v39 = vadd.f32 %v2577_v28, %v1729_v30  ;;  %v5967_v30 = vadd.f32 %v4216_v7, %v5815_v54  ;;  %v2914_v7 = vmul.f32 %v5954_v49, %v5800_v22  ;;  %v2913_v22 = vmul.f32 %v5954_v49, %v5787_v5 }
 0x207   : > { %6262 = vst [vmem:[#allocation14_spill] sm:$0xff] %v5950_v24  ;;  %v4051_v13 = vpop.f32.mrb[28].mxu1  ;;  %v5957_v43 = vadd.f32 %v4217_v53, %v5815_v54  ;;  %v2886_v5 = vmul.f32 %v5954_v49, %v5582_v10 }
 0x208   : > { %v1742_v15 = vpop.f32.mrb[29].mxu1  ;;  %v2669_v60 = vadd.f32 %v4218_v39, %v5815_v54  ;;  %3064 = vrot.lane.b32.xlu0 %v5950_v24, %s4512_s21 }
 0x209   : > { %6263 = vst [vmem:[#allocation15_spill] sm:$0xff] %v5957_v43  ;;  %v4052_v41 = vpop.f32.mrb[30].mxu1  ;;  %3066 = vrot.lane.b32.xlu1 %v5957_v43, %s4512_s21 }
 0x20a   : > { %v1745_v28 = vpop.f32.mrb[31].mxu1  ;;  %v4187_v2 = vpop.f32.mrb[28].mxu0  ;;  %v2941_v53 = vadd.f32 1.0, %v2669_v60 }
 0x20b   : > { %v4219_v48 = vadd.f32 %v4187_v2, %v4051_v13  ;;  %v2590_v19 = vpop.f32.mrb[29].mxu0 }
 0x20c   : > { %v4220_v21 = vadd.f32 %v2590_v19, %v1742_v15  ;;  %v4188_v39 = vpop.f32.mrb[30].mxu0  ;;  %3060 = vrot.lane.b32.xlu0 %v5967_v30, %s4512_s21  ;;  %v5971_v24 = vmul.f32 %v2941_v53, %v2909_v50  ;;  %v2912_v15 = vmul.f32 %v5954_v49, %v5778_v59  ;;  %v2915_v50 = vmul.f32 %v5954_v49, %v5807_v40 }
 0x20d   : > { %v2674_v34 = vadd.f32 %v4219_v48, %v5815_v54  ;;  %v4221_v9 = vadd.f32 %v4188_v39, %v4052_v41  ;;  %v2593_v51 = vpop.f32.mrb[31].mxu0  ;;  %3062 = vrot.lane.b32.xlu1 %v2669_v60, %s4512_s21  ;;  %v2887_v39 = vmul.f32 %v5954_v49, %v5590_v36  ;;  %v2891_v36 = vmul.f32 %v5954_v49, %v5619_v61 }
 0x20e   : > { %v2672_v43 = vadd.f32 %v4220_v21, %v5815_v54  ;;  %v4222_v13 = vadd.f32 %v2593_v51, %v1745_v28  ;;  %v2884_v28 = vmul.f32 %v5954_v49, %v5574_v63  ;;  %v2890_v63 = vmul.f32 %v5954_v49, %v5612_v16 }
 0x20f   : > { %v2675_v2 = vadd.f32 %v4221_v9, %v5815_v54  ;;  %v2946_v19 = vadd.f32 1.0, %v2674_v34 }
 0x210   : > { %v2673_v41 = vadd.f32 %v4222_v13, %v5815_v54  ;;  %3068 = vrot.lane.b32.xlu0 %v2672_v43, %s4512_s21  ;;  %v2944_v60 = vadd.f32 1.0, %v2672_v43  ;;  %v2918_v54 = vadd.f32 1.0, %v5821_v20  ;;  %v2916_v43 = vadd.f32 1.0, %v5824_v17 }
 0x211   : > { %v5987_v53 = vmul.f32 %v2946_v19, %v2914_v7  ;;  %v2947_v51 = vadd.f32 1.0, %v2675_v2  ;;  %v2917_v20 = vadd.f32 1.0, %v5835_v3 }
 0x212   : > { %3070 = vrot.lane.b32.xlu1 %v2673_v41, %s4512_s21  ;;  %v5990_v59 = vmul.f32 %v2944_v60, %v2912_v15  ;;  %v2945_v9 = vadd.f32 1.0, %v2673_v41  ;;  %v2950_v48 = vmul.f32 %v2918_v54, %v2886_v5  ;;  %v2948_v13 = vmul.f32 %v2916_v43, %v2884_v28 }
 0x213   : > { %v5992_v21 = vmul.f32 %v2947_v51, %v2915_v50  ;;  %v2885_v15 = vmul.f32 %v5954_v49, %v5578_v62  ;;  %v2922_v62 = vadd.f32 1.0, %v5842_v18  ;;  %v2923_v51 = vadd.f32 1.0, %v5847_v52 }
 0x214   : > { %3072 = vrot.lane.b32.xlu0 %v2674_v34, %s4512_s21  ;;  %v5995_v40 = vmul.f32 %v2945_v9, %v2913_v22  ;;  %v2919_v34 = vadd.f32 1.0, %v5832_v56  ;;  %v2888_v18 = vmul.f32 %v5954_v49, %v5598_v4 }
 0x215   : > { %v2949_v60 = vmul.f32 %v2917_v20, %v2885_v15  ;;  %v2921_v15 = vadd.f32 1.0, %v5857_v57 }
 0x216   : > { %3074 = vrot.lane.b32.xlu1 %v2675_v2, %s4512_s21  ;;  %v2951_v50 = vmul.f32 %v2919_v34, %v2887_v39  ;;  %v2920_v39 = vadd.f32 1.0, %v5854_v6  ;;  %v2894_v6 = vmul.f32 %v5954_v49, %v5640_v55 }
 0x249   : > { %v3017_v7 = vpop.permute.xlu1 %3016 }
 0x24a   : > { %v3110_v2 = vadd.f32 %v3017_v7, %v2950_v48  ;;  %v3013_v10 = vpop.permute.xlu0 %3012  ;;  %v2954_v48 = vmul.f32 %v2922_v62, %v2890_v63  ;;  %v2955_v7 = vmul.f32 %v2923_v51, %v2891_v36  ;;  %v2952_v36 = vmul.f32 %v2920_v39, %v2888_v18 }
 0x24b   : > { %v3108_v17 = vadd.f32 %v3013_v10, %v2948_v13  ;;  %v2889_v13 = vmul.f32 %v5954_v49, %v5605_v44  ;;  %v2926_v44 = vadd.f32 1.0, %v5864_v58  ;;  %v2899_v39 = vmul.f32 %v5954_v49, %v5675_v33 }
 0x24c   : > { %vm3142_vm4 = vcmp.gt.f32.partialorder %v3110_v2, 0.0  ;;  %v3174_v19 = vmul.f32 0.2, %v3110_v2 }
 0x24d   : > { %vm3140_vm5 = vcmp.gt.f32.partialorder %v3108_v17, 0.0  ;;  %v3172_v56 = vmul.f32 0.2, %v3108_v17  ;;  %v3019_v41 = vpop.permute.xlu1 %3018 }
 0x24e   : > { %v3206_v16 = vsel %vm3142_vm4, %v3110_v2, %v3174_v19  ;;  %v3111_v3 = vadd.f32 %v3019_v41, %v2951_v50  ;;  %v3015_v22 = vpop.permute.xlu0 %3014  ;;  %v2895_v19 = vmul.f32 %v5954_v49, %v5647_v23  ;;  %v2953_v41 = vmul.f32 %v2921_v15, %v2889_v13 }
 0x24f   : > { %v3700_v61 = vpack.c.bf16 %v3206_v16, %v3206_v16  ;;  %v3204_v9 = vsel %vm3140_vm5, %v3108_v17, %v3172_v56  ;;  %v3109_v54 = vadd.f32 %v3015_v22, %v2949_v60  ;;  %v2927_v60 = vadd.f32 1.0, %v5871_v29 }
 0x250   : > { %v3698_v5 = vpack.c.bf16 %v3204_v9, %v3204_v9  ;;  %vm3143_vm7 = vcmp.gt.f32.partialorder %v3111_v3, 0.0  ;;  %v3175_v43 = vmul.f32 0.2, %v3111_v3  ;;  %v2892_v23 = vmul.f32 %v5954_v49, %v5626_v47 }
 0x251   : > { %3367 = vst.msk [vmem:[%s6019_s16 + $0x8] sm:$0xf] %vm3364_vm6, %v3700_v61  ;;  %vm3141_vm8 = vcmp.gt.f32.partialorder %v3109_v54, 0.0  ;;  %v3173_v28 = vmul.f32 0.2, %v3109_v54  ;;  %v2924_v61 = vadd.f32 1.0, %v5878_v32  ;;  %v2959_v18 = vmul.f32 %v2927_v60, %v2895_v19 }
 0x252   : > { %3365 = vst.msk [vmem:[%s6019_s16] sm:$0xf] %vm3364_vm6, %v3698_v5  ;;  %v3207_v52 = vsel %vm3143_vm7, %v3111_v3, %v3175_v43  ;;  %v3025_v34 = vpop.permute.xlu0 %3024  ;;  %v2893_v3 = vmul.f32 %v5954_v49, %v5633_v27  ;;  %v2958_v5 = vmul.f32 %v2926_v44, %v2894_v6  ;;  %v2925_v47 = vadd.f32 1.0, %v5881_v31 }
 0x253   : > { %v3701_v4 = vpack.c.bf16 %v3207_v52, %v3207_v52  ;;  %v3205_v20 = vsel %vm3141_vm8, %v3109_v54, %v3173_v28  ;;  %v3114_v2 = vadd.f32 %v3025_v34, %v2954_v48  ;;  %v3027_v10 = vpop.permute.xlu1 %3026  ;;  %v2898_v32 = vmul.f32 %v5954_v49, %v5668_v25 }
 0x254   : > { %v3699_v17 = vpack.c.bf16 %v3205_v20, %v3205_v20  ;;  %v3115_v63 = vadd.f32 %v3027_v10, %v2955_v7  ;;  %v2956_v13 = vmul.f32 %v2924_v61, %v2892_v23  ;;  %v2930_v31 = vadd.f32 1.0, %v5888_v45 }
 0x255   : > { %3368 = vst.msk [vmem:[%s6019_s16 + $0xc] sm:$0xf] %vm3364_vm6, %v3701_v4  ;;  %vm3146_vm9 = vcmp.gt.f32.partialorder %v3114_v2, 0.0  ;;  %v3178_v50 = vmul.f32 0.2, %v3114_v2  ;;  %v2957_v10 = vmul.f32 %v2925_v47, %v2893_v3  ;;  %v2931_v25 = vadd.f32 1.0, %v5895_v37 }
 0x256   : > { %3366 = vst.msk [vmem:[%s6019_s16 + $0x4] sm:$0xf] %vm3364_vm6, %v3699_v17  ;;  %vm3147_vm10 = vcmp.gt.f32.partialorder %v3115_v63, 0.0  ;;  %v3179_v57 = vmul.f32 0.2, %v3115_v63  ;;  %v3021_v56 = vpop.permute.xlu0 %3020  ;;  %v2896_v6 = vmul.f32 %v5954_v49, %v5654_v38  ;;  %v2897_v45 = vmul.f32 %v5954_v49, %v5661_v12 }
 0x257   : > { %v3210_v55 = vsel %vm3146_vm9, %v3114_v2, %v3178_v50  ;;  %v3112_v62 = vadd.f32 %v3021_v56, %v2952_v36  ;;  %v3023_v16 = vpop.permute.xlu1 %3022  ;;  %v2928_v44 = vadd.f32 1.0, %v5902_v0  ;;  %v2962_v56 = vmul.f32 %v2930_v31, %v2898_v32 }
 0x258   : > { %v3704_v58 = vpack.c.bf16 %v3210_v55, %v3210_v55  ;;  %v3211_v22 = vsel %vm3147_vm10, %v3115_v63, %v3179_v57  ;;  %v3113_v51 = vadd.f32 %v3023_v16, %v2953_v41  ;;  %v2963_v55 = vmul.f32 %v2931_v25, %v2899_v39 }
 0x259   : > { %v3705_v9 = vpack.c.bf16 %v3211_v22, %v3211_v22  ;;  %vm3144_vm11 = vcmp.gt.f32.partialorder %v3112_v62, 0.0  ;;  %v3176_v54 = vmul.f32 0.2, %v3112_v62  ;;  %v2929_v38 = vadd.f32 1.0, %v5905_v35 }
 0x25a   : > { %3371 = vst.msk [vmem:[%s6019_s16 + $0x18] sm:$0xf] %vm3364_vm6, %v3704_v58  ;;  %vm3145_vm12 = vcmp.gt.f32.partialorder %v3113_v51, 0.0  ;;  %v3177_v29 = vmul.f32 0.2, %v3113_v51  ;;  %v3033_v43 = vpop.permute.xlu0 %3032  ;;  %v2902_v0 = vmul.f32 %v5954_v49, %v5696_v14  ;;  %v2903_v23 = vmul.f32 %v5954_v49, %v5703_v46 }
 0x25b   : > { %3372 = vst.msk [vmem:[%s6019_s16 + $0x1c] sm:$0xf] %vm3364_vm6, %v3705_v9  ;;  %v3208_v27 = vsel %vm3144_vm11, %v3112_v62, %v3176_v54  ;;  %v3118_v28 = vadd.f32 %v3033_v43, %v2958_v5  ;;  %v3035_v48 = vpop.permute.xlu1 %3034  ;;  %v2934_v35 = vadd.f32 1.0, %v5910_v42  ;;  %v2935_v14 = vadd.f32 1.0, %v5915_v11 }
 0x25c   : > { %v3702_v52 = vpack.c.bf16 %v3208_v27, %v3208_v27  ;;  %v3209_v34 = vsel %vm3145_vm12, %v3113_v51, %v3177_v29  ;;  %v3119_v7 = vadd.f32 %v3035_v48, %v2959_v18  ;;  %v2960_v51 = vmul.f32 %v2928_v44, %v2896_v6 }
 0x25d   : > { %v3703_v15 = vpack.c.bf16 %v3209_v34, %v3209_v34  ;;  %vm3150_vm13 = vcmp.gt.f32.partialorder %v3118_v28, 0.0  ;;  %v3182_v4 = vmul.f32 0.2, %v3118_v28  ;;  %v2961_v29 = vmul.f32 %v2929_v38, %v2897_v45  ;;  %v6269_v38 = vld [vmem:[#allocation2_spill] sm:$0xff] }
 0x25e   : > { %3369 = vst.msk [vmem:[%s6019_s16 + $0x10] sm:$0xf] %vm3364_vm6, %v3702_v52  ;;  %vm3151_vm14 = vcmp.gt.f32.partialorder %v3119_v7, 0.0  ;;  %v3183_v20 = vmul.f32 0.2, %v3119_v7  ;;  %v3029_v2 = vpop.permute.xlu0 %3028  ;;  %v2900_v47 = vmul.f32 %v5954_v49, %v5682_v1  ;;  %v2901_v42 = vmul.f32 %v5954_v49, %v5689_v8  ;;  %v6264_v1 = vld [vmem:[#allocation9_spill] sm:$0xff] }
 0x25f   : > { %3370 = vst.msk [vmem:[%s6019_s16 + $0x14] sm:$0xf] %vm3364_vm6, %v3703_v15  ;;  %v3214_v33 = vsel %vm3150_vm13, %v3118_v28, %v3182_v4  ;;  %v3116_v17 = vadd.f32 %v3029_v2, %v2956_v13  ;;  %v3031_v63 = vpop.permute.xlu1 %3030  ;;  %v2932_v32 = vadd.f32 1.0, %v5922_v26  ;;  %v2966_v52 = vmul.f32 %v2934_v35, %v2902_v0  ;;  %v6266_v2 = vld [vmem:[#allocation5_spill] sm:$0xff] }
 0x260   : > { %v3708_v19 = vpack.c.bf16 %v3214_v33, %v3214_v33  ;;  %v3215_v50 = vsel %vm3151_vm14, %v3119_v7, %v3183_v20  ;;  %v3117_v36 = vadd.f32 %v3031_v63, %v2957_v10  ;;  %v2967_v13 = vmul.f32 %v2935_v14, %v2903_v23  ;;  %v6265_v20 = vld [vmem:[#allocation4_spill] sm:$0xff] }
 0x261   : > { %v3709_v57 = vpack.c.bf16 %v3215_v50, %v3215_v50  ;;  %vm3148_vm15 = vcmp.gt.f32.partialorder %v3116_v17, 0.0  ;;  %v3180_v37 = vmul.f32 0.2, %v3116_v17  ;;  %v2933_v15 = vadd.f32 1.0, %v6264_v1 }
 0x262   : > { %3375 = vst.msk [vmem:[%s6019_s16 + $0x28] sm:$0xf] %vm3364_vm6, %v3708_v19  ;;  %vm3149_vm0 = vcmp.gt.f32.partialorder %v3117_v36, 0.0  ;;  %v3181_v41 = vmul.f32 0.2, %v3117_v36  ;;  %v3041_v60 = vpop.permute.xlu0 %3040  ;;  %v2906_v26 = vmul.f32 %v5954_v49, %v6265_v20  ;;  %v2907_v10 = vmul.f32 %v5954_v49, %v6266_v2  ;;  %v6267_v19 = vld [vmem:[#allocation10_spill] sm:$0xff] }
 0x263   : > { %3376 = vst.msk [vmem:[%s6019_s16 + $0x2c] sm:$0xf] %vm3364_vm6, %v3709_v57  ;;  %v3212_v12 = vsel %vm3148_vm15, %v3116_v17, %v3180_v37  ;;  %v3122_v62 = vadd.f32 %v3041_v60, %v2962_v56  ;;  %v3043_v16 = vpop.permute.xlu1 %3042  ;;  %v2964_v63 = vmul.f32 %v2932_v32, %v2900_v47  ;;  %v2938_v50 = vadd.f32 1.0, %v6267_v19  ;;  %v6268_v37 = vld [vmem:[#allocation11_spill] sm:$0xff] }
 0x264   : > { %v3706_v3 = vpack.c.bf16 %v3212_v12, %v3212_v12  ;;  %v3213_v58 = vsel %vm3149_vm0, %v3117_v36, %v3181_v41  ;;  %v3123_v22 = vadd.f32 %v3043_v16, %v2963_v55  ;;  %v2965_v57 = vmul.f32 %v2933_v15, %v2901_v42  ;;  %v6273_v47 = vld [vmem:[#allocation7_spill] sm:$0xff] }
 0x265   : > { %v3707_v61 = vpack.c.bf16 %v3213_v58, %v3213_v58  ;;  %vm3154_vm1 = vcmp.gt.f32.partialorder %v3122_v62, 0.0  ;;  %v3186_v9 = vmul.f32 0.2, %v3122_v62  ;;  %v2939_v56 = vadd.f32 1.0, %v6268_v37  ;;  %v6271_v58 = vld [vmem:[#allocation12_spill] sm:$0xff] }
 0x266   : > { %3373 = vst.msk [vmem:[%s6019_s16 + $0x20] sm:$0xf] %vm3364_vm6, %v3706_v3  ;;  %vm3155_vm2 = vcmp.gt.f32.partialorder %v3123_v22, 0.0  ;;  %v3187_v54 = vmul.f32 0.2, %v3123_v22  ;;  %v3037_v5 = vpop.permute.xlu0 %3036  ;;  %v2904_v12 = vmul.f32 %v5954_v49, %v6269_v38  ;;  %v2910_v42 = vmul.f32 %v5954_v49, %v6273_v47 }
 0x267   : > { %3374 = vst.msk [vmem:[%s6019_s16 + $0x24] sm:$0xf] %vm3364_vm6, %v3707_v61  ;;  %v3218_v46 = vsel %vm3154_vm1, %v3122_v62, %v3186_v9  ;;  %v3120_v43 = vadd.f32 %v3037_v5, %v2960_v51  ;;  %v3039_v18 = vpop.permute.xlu1 %3038  ;;  %v6270_v62 = vld [vmem:[#allocation3_spill] sm:$0xff]  ;;  %v2970_v9 = vmul.f32 %v2938_v50, %v2906_v26  ;;  %v2971_v5 = vmul.f32 %v2939_v56, %v2907_v10  ;;  %v6277_v10 = vld [vmem:[#allocation6_spill] sm:$0xff] }
 0x268   : > { %v3712_v27 = vpack.c.bf16 %v3218_v46, %v3218_v46  ;;  %v3219_v28 = vsel %vm3155_vm2, %v3123_v22, %v3187_v54  ;;  %v3121_v48 = vadd.f32 %v3039_v18, %v2961_v29  ;;  %v2905_v16 = vmul.f32 %v5954_v49, %v6270_v62  ;;  %v6272_v29 = vld [vmem:[#allocation13_spill] sm:$0xff] }
 0x269   : > { %v3713_v39 = vpack.c.bf16 %v3219_v28, %v3219_v28  ;;  %vm3152_vm3 = vcmp.gt.f32.partialorder %v3120_v43, 0.0  ;;  %v3184_v11 = vmul.f32 0.2, %v3120_v43  ;;  %v2936_v22 = vadd.f32 1.0, %v6271_v58 }
 0x26a   : > { %3379 = vst.msk [vmem:[%s6019_s16 + $0x38] sm:$0xf] %vm3364_vm6, %v3712_v27  ;;  %vm3153_vm4 = vcmp.gt.f32.partialorder %v3121_v48, 0.0  ;;  %v3185_v34 = vmul.f32 0.2, %v3121_v48  ;;  %v3049_v7 = vpop.permute.xlu0 %3048  ;;  %v2937_v14 = vadd.f32 1.0, %v6272_v29 }
 0x26b   : > { %3380 = vst.msk [vmem:[%s6019_s16 + $0x3c] sm:$0xf] %vm3364_vm6, %v3713_v39  ;;  %v3216_v8 = vsel %vm3152_vm3, %v3120_v43, %v3184_v11  ;;  %v3126_v4 = vadd.f32 %v3049_v7, %v2966_v52  ;;  %v3051_v31 = vpop.permute.xlu1 %3050  ;;  %v6274_v27 = vld [vmem:[#allocation8_spill] sm:$0xff]  ;;  %v2968_v11 = vmul.f32 %v2936_v22, %v2904_v12  ;;  %v6275_v7 = vld [vmem:[#allocation14_spill] sm:$0xff] }
 0x26c   : > { %v3710_v25 = vpack.c.bf16 %v3216_v8, %v3216_v8  ;;  %v3217_v33 = vsel %vm3153_vm4, %v3121_v48, %v3185_v34  ;;  %v3127_v17 = vadd.f32 %v3051_v31, %v2967_v13  ;;  %v2911_v28 = vmul.f32 %v5954_v49, %v6274_v27 }
 0x26d   : > { %v3711_v6 = vpack.c.bf16 %v3217_v33, %v3217_v33  ;;  %vm3158_vm5 = vcmp.gt.f32.partialorder %v3126_v4, 0.0  ;;  %v3190_v45 = vmul.f32 0.2, %v3126_v4  ;;  %v2942_v13 = vadd.f32 1.0, %v6275_v7 }
 0x26e   : > { %3377 = vst.msk [vmem:[%s6019_s16 + $0x30] sm:$0xf] %vm3364_vm6, %v3710_v25  ;;  %vm3159_vm7 = vcmp.gt.f32.partialorder %v3127_v17, 0.0  ;;  %v3191_v36 = vmul.f32 0.2, %v3127_v17  ;;  %v3045_v44 = vpop.permute.xlu0 %3044  ;;  %v2969_v8 = vmul.f32 %v2937_v14, %v2905_v16  ;;  %v2908_v25 = vmul.f32 %v5954_v49, %v6277_v10 }
 0x26f   : > { %3378 = vst.msk [vmem:[%s6019_s16 + $0x34] sm:$0xf] %vm3364_vm6, %v3711_v6  ;;  %v3222_v41 = vsel %vm3158_vm5, %v3126_v4, %v3190_v45  ;;  %v3124_v60 = vadd.f32 %v3045_v44, %v2964_v63  ;;  %v3047_v55 = vpop.permute.xlu1 %3046  ;;  %v6276_v4 = vld [vmem:[#allocation15_spill] sm:$0xff]  ;;  %v2940_v6 = vadd.f32 1.0, %v5967_v30  ;;  %v2974_v50 = vmul.f32 %v2942_v13, %v2910_v42 }
 0x270   : > { %v3716_v0 = vpack.c.bf16 %v3222_v41, %v3222_v41  ;;  %v3223_v23 = vsel %vm3159_vm7, %v3127_v17, %v3191_v36  ;;  %v3125_v3 = vadd.f32 %v3047_v55, %v2965_v57  ;;  %v2943_v31 = vadd.f32 1.0, %v6276_v4 }
 0x271   : > { %v3717_v51 = vpack.c.bf16 %v3223_v23, %v3223_v23  ;;  %vm3156_vm8 = vcmp.gt.f32.partialorder %v3124_v60, 0.0  ;;  %v3188_v61 = vmul.f32 0.2, %v3124_v60  ;;  %v2972_v12 = vmul.f32 %v2940_v6, %v2908_v25 }
 0x272   : > { %3383 = vst.msk [vmem:[%s6019_s16 + $0x48] sm:$0xf] %vm3364_vm6, %v3716_v0  ;;  %vm3157_vm9 = vcmp.gt.f32.partialorder %v3125_v3, 0.0  ;;  %v3189_v35 = vmul.f32 0.2, %v3125_v3  ;;  %v3057_v54 = vpop.permute.xlu0 %3056  ;;  %v2975_v57 = vmul.f32 %v2943_v31, %v2911_v28 }
 0x273   : > { %3384 = vst.msk [vmem:[%s6019_s16 + $0x4c] sm:$0xf] %vm3364_vm6, %v3717_v51  ;;  %v3220_v46 = vsel %vm3156_vm8, %v3124_v60, %v3188_v61  ;;  %v3130_v43 = vadd.f32 %v3057_v54, %v2970_v9  ;;  %v3059_v18 = vpop.permute.xlu1 %3058 }
 0x274   : > { %v3714_v48 = vpack.c.bf16 %v3220_v46, %v3220_v46  ;;  %v3221_v32 = vsel %vm3157_vm9, %v3125_v3, %v3189_v35  ;;  %v3131_v39 = vadd.f32 %v3059_v18, %v2971_v5 }
 0x275   : > { %v3715_v52 = vpack.c.bf16 %v3221_v32, %v3221_v32  ;;  %vm3162_vm10 = vcmp.gt.f32.partialorder %v3130_v43, 0.0  ;;  %v3194_v34 = vmul.f32 0.2, %v3130_v43 }
 0x276   : > { %3381 = vst.msk [vmem:[%s6019_s16 + $0x40] sm:$0xf] %vm3364_vm6, %v3714_v48  ;;  %vm3163_vm11 = vcmp.gt.f32.partialorder %v3131_v39, 0.0  ;;  %v3195_v1 = vmul.f32 0.2, %v3131_v39  ;;  %v3053_v15 = vpop.permute.xlu0 %3052 }
 0x277   : > { %3382 = vst.msk [vmem:[%s6019_s16 + $0x44] sm:$0xf] %vm3364_vm6, %v3715_v52  ;;  %v3226_v20 = vsel %vm3162_vm10, %v3130_v43, %v3194_v34  ;;  %v3128_v26 = vadd.f32 %v3053_v15, %v2968_v11  ;;  %v3055_v2 = vpop.permute.xlu1 %3054 }
 0x278   : > { %v3720_v33 = vpack.c.bf16 %v3226_v20, %v3226_v20  ;;  %v3227_v17 = vsel %vm3163_vm11, %v3131_v39, %v3195_v1  ;;  %v3129_v63 = vadd.f32 %v3055_v2, %v2969_v8 }
 0x279   : > { %v3721_v45 = vpack.c.bf16 %v3227_v17, %v3227_v17  ;;  %vm3160_vm12 = vcmp.gt.f32.partialorder %v3128_v26, 0.0  ;;  %v3192_v19 = vmul.f32 0.2, %v3128_v26 }
 0x27a   : > { %3387 = vst.msk [vmem:[%s6019_s16 + $0x58] sm:$0xf] %vm3364_vm6, %v3720_v33  ;;  %vm3161_vm13 = vcmp.gt.f32.partialorder %v3129_v63, 0.0  ;;  %v3193_v36 = vmul.f32 0.2, %v3129_v63  ;;  %v3065_v44 = vpop.permute.xlu0 %3064 }
 0x27b   : > { %3388 = vst.msk [vmem:[%s6019_s16 + $0x5c] sm:$0xf] %vm3364_vm6, %v3721_v45  ;;  %v3224_v49 = vsel %vm3160_vm12, %v3128_v26, %v3192_v19  ;;  %v3134_v37 = vadd.f32 %v3065_v44, %v2974_v50  ;;  %v3067_v56 = vpop.permute.xlu1 %3066 }
 0x27c   : > { %v3718_v41 = vpack.c.bf16 %v3224_v49, %v3224_v49  ;;  %v3225_v60 = vsel %vm3161_vm13, %v3129_v63, %v3193_v36  ;;  %v3135_v30 = vadd.f32 %v3067_v56, %v2975_v57 }
 0x27d   : > { %v3719_v55 = vpack.c.bf16 %v3225_v60, %v3225_v60  ;;  %vm3166_vm14 = vcmp.gt.f32.partialorder %v3134_v37, 0.0  ;;  %v3198_v38 = vmul.f32 0.2, %v3134_v37 }
 0x27e   : > { %3385 = vst.msk [vmem:[%s6019_s16 + $0x50] sm:$0xf] %vm3364_vm6, %v3718_v41  ;;  %vm3167_vm15 = vcmp.gt.f32.partialorder %v3135_v30, 0.0  ;;  %v3199_v62 = vmul.f32 0.2, %v3135_v30  ;;  %v3061_v16 = vpop.permute.xlu0 %3060 }
 0x27f   : > { %3386 = vst.msk [vmem:[%s6019_s16 + $0x54] sm:$0xf] %vm3364_vm6, %v3719_v55  ;;  %v3230_v0 = vsel %vm3166_vm14, %v3134_v37, %v3198_v38  ;;  %v3132_v23 = vadd.f32 %v3061_v16, %v2972_v12  ;;  %v3063_v3 = vpop.permute.xlu1 %3062 }
 0x280   : > { %v3724_v58 = vpack.c.bf16 %v3230_v0, %v3230_v0  ;;  %v3231_v22 = vsel %vm3167_vm15, %v3135_v30, %v3199_v62  ;;  %v3133_v51 = vadd.f32 %v3063_v3, %v5971_v24 }
 0x281   : > { %v3725_v61 = vpack.c.bf16 %v3231_v22, %v3231_v22  ;;  %vm3164_vm0 = vcmp.gt.f32.partialorder %v3132_v23, 0.0  ;;  %v3196_v9 = vmul.f32 0.2, %v3132_v23 }
 0x282   : > { %3391 = vst.msk [vmem:[%s6019_s16 + $0x68] sm:$0xf] %vm3364_vm6, %v3724_v58  ;;  %vm3165_vm1 = vcmp.gt.f32.partialorder %v3133_v51, 0.0  ;;  %v3197_v35 = vmul.f32 0.2, %v3133_v51  ;;  %v3069_v54 = vpop.permute.xlu0 %3068 }
 0x283   : > { %3392 = vst.msk [vmem:[%s6019_s16 + $0x6c] sm:$0xf] %vm3364_vm6, %v3725_v61  ;;  %v3228_v5 = vsel %vm3164_vm0, %v3132_v23, %v3196_v9  ;;  %v3136_v29 = vadd.f32 %v3069_v54, %v5990_v59 }
 0x284   : > { %v3722_v14 = vpack.c.bf16 %v3228_v5, %v3228_v5  ;;  %v3229_v46 = vsel %vm3165_vm1, %v3133_v51, %v3197_v35  ;;  %v3071_v43 = vpop.permute.xlu1 %3070 }
 0x285   : > { %v3723_v18 = vpack.c.bf16 %v3229_v46, %v3229_v46  ;;  %vm3168_vm2 = vcmp.gt.f32.partialorder %v3136_v29, 0.0  ;;  %v3200_v24 = vmul.f32 0.2, %v3136_v29  ;;  %v3137_v47 = vadd.f32 %v3071_v43, %v5995_v40 }
 0x286   : > { %3389 = vst.msk [vmem:[%s6019_s16 + $0x60] sm:$0xf] %vm3364_vm6, %v3722_v14  ;;  %v3073_v42 = vpop.permute.xlu0 %3072 }
 0x287   : > { %3390 = vst.msk [vmem:[%s6019_s16 + $0x64] sm:$0xf] %vm3364_vm6, %v3723_v18  ;;  %v3232_v27 = vsel %vm3168_vm2, %v3136_v29, %v3200_v24  ;;  %vm3169_vm3 = vcmp.gt.f32.partialorder %v3137_v47, 0.0  ;;  %v3201_v28 = vmul.f32 0.2, %v3137_v47  ;;  %v3138_v59 = vadd.f32 %v3073_v42, %v5987_v53 }
 0x288   : > { %v3726_v48 = vpack.c.bf16 %v3232_v27, %v3232_v27  ;;  %v3075_v32 = vpop.permute.xlu1 %3074 }
 0x289   : > { %v3233_v39 = vsel %vm3169_vm3, %v3137_v47, %v3201_v28  ;;  %vm3170_vm4 = vcmp.gt.f32.partialorder %v3138_v59, 0.0  ;;  %v3202_v11 = vmul.f32 0.2, %v3138_v59  ;;  %v3139_v40 = vadd.f32 %v3075_v32, %v5992_v21 }
 0x28a   : > { %3393 = vst.msk [vmem:[%s6019_s16 + $0x70] sm:$0xf] %vm3364_vm6, %v3726_v48  ;;  %v3727_v52 = vpack.c.bf16 %v3233_v39, %v3233_v39 }
 0x28b   : > { %v3234_v34 = vsel %vm3170_vm4, %v3138_v59, %v3202_v11  ;;  %vm3171_vm5 = vcmp.gt.f32.partialorder %v3139_v40, 0.0  ;;  %v3203_v7 = vmul.f32 0.2, %v3139_v40 }
 0x28c   : > { %3394 = vst.msk [vmem:[%s6019_s16 + $0x74] sm:$0xf] %vm3364_vm6, %v3727_v52  ;;  %v3728_v13 = vpack.c.bf16 %v3234_v34, %v3234_v34 }
 0x28d   : > { %v3235_v1 = vsel %vm3171_vm5, %v3139_v40, %v3203_v7 }
 0x28e   : > { %3395 = vst.msk [vmem:[%s6019_s16 + $0x78] sm:$0xf] %vm3364_vm6, %v3728_v13  ;;  %v3729_v53 = vpack.c.bf16 %v3235_v1, %v3235_v1 }
 0x290   : > { %3396 = vst.msk [vmem:[%s6019_s16 + $0x7c] sm:$0xf] %vm3364_vm6, %v3729_v53 }
 0x291 PF: > { %s14_s15 = sadd.s32 1, %s4510_s15  }
 0x292   : > { %p11_p4 = scmp.ge.s32.totalorder %s14_s15, 4  }
 0x294   :  { %13 = sbr.rel (!%p11_p4) target bundleno = 1 (0x1), region = 77 }

// kernel: fused_spade_resnet_block.6
= control target key start
LH: loop header
LB: loop body
LE: loop exit
PB: predicated region body
PF: predicated region fallthrough
CT: control target
= control target key end

     0   :  { %s7885_s21 = smov 0   ;;  %s10391_s0 = inlined_call_operand.vmem [shape: bf16[2,18,18,8], index: 0, kind: input, shape index: {}]   ;;  %s10392_s1 = inlined_call_operand.vmem [shape: bf16[2,18,18,16], index: 1, kind: input, shape index: {}]   ;;  %s10393_s2 = inlined_call_operand.vmem [shape: bf16[9,8,4], index: 2, kind: input, shape index: {}]   ;;  %s10394_s3 = inlined_call_operand.vmem [shape: f32[1,4], index: 3, kind: input, shape index: {}]   ;;  %s10395_s4 = inlined_call_operand.vmem [shape: bf16[9,16,8], index: 4, kind: input, shape index: {}]   ;;  %s10396_s5 = inlined_call_operand.vmem [shape: f32[1,8], index: 5, kind: input, shape index: {}]   ;;  %s10397_s6 = inlined_call_operand.vmem [shape: bf16[2,16,16,4], index: 6, kind: output, shape index: {}]  }
   0x1 LB: > { %s5874_s22 = sadd.s32 4294967295, %s7847_s21   ;;  %p5878_p0 = scmp.ge.s32.totalorder %s7847_s21, 1  ;;  %s7847_s21 = sphi %s7885_s21, %s16_s21  }
   0x2   : > { %p222_p1 = scmp.lt.s32.totalorder %s7847_s21, 3 }
   0x4   : > { %p223_p2 = pnand %p5878_p0, %p222_p1 }
   0x6   : > { %226 = sbr.rel (%p223_p2) target bundleno = 1006 (0x3ee), region = 44 }
   0xd   : > { %v5899_v0 = vld [vmem:[%s10393_s2 + $0x4] sm:$0xf]  ;;  %vm626_vm0 = vcmask 1043456   ;;  %v7758_v1 = vld [vmem:[%s10395_s4 + $0x8] sm:$0xff]   ;;  %p257_p3 = scmp.lt.s32.totalorder %s5874_s22, 1  ;;  %vm446_vm1 = vcmask 1046528  }
   0xe   : > { %7739 = vmatprep.subr.msk.bf16.mxu0 %vm626_vm0, %v5899_v0  ;;  %v628_v2 = vsel %vm626_vm0, %v5899_v0, 0  ;;  %6921 = vmatprep.subr.bf16.mxu1 %v7758_v1  ;;  %v397_v3 = vld [vmem:[%s10393_s2] sm:$0xf]  ;;  %vm577_vm2 = vcmask 64512   ;;  %vm2974_vm3 = vcmask 130048   ;;  %vm1003_vm4 = vcmask 1045504  }
   0xf   : > { %6616 = vmatpush3.bf16.msra.mxu0 %v628_v2  ;;  %v7907_v4 = vld [vmem:[%s10395_s4] sm:$0xff]   ;;  %6922 = vmatpush3.bf16.msra.mxu1 %v7758_v1  ;;  %s10997_s22 = smov (!%p257_p3, %s5874_s22), 1  ;;  %v840_v50 = vsel %vm626_vm0, %v397_v3, 0  ;;  %v8019_v57 = vld [vmem:[%s10393_s2 + $0x8] sm:$0xf]  ;;  %vm5086_vm5 = vcmask 31744  }
  0x10   : > { %7740 = vmatprep.subr.msk.bf16.mxu0 %vm626_vm0, %v397_v3  ;;  %6955 = vmatprep.subr.bf16.mxu1 %v7907_v4  ;;  %s7748_s7 = smul.u32 216, %s10997_s22  ;;  %v8040_v3 = vld [vmem:[%s10395_s4 + $0x10] sm:$0xff]   ;;  %s7849_s26 = smov 124   ;;  %vm5774_vm6 = vcmask 27648  }
  0x11   : > { %s6276_s27 = sshll.u32 %s10997_s22, 7 }
  0x12   : > { %s7917_s10 = scalar_lea.vmem %s10391_s0, %s7748_s7  ;;  %s7922_s13 = scalar_lea.vmem %s10392_s1, %s7748_s7 }
  0x13   : > { %v7925_v5 = vld [vmem:[%s7917_s10] sm:$0xff]   ;;  %v7928_v6 = vld [vmem:[%s7917_s10 + $0x8] sm:$0x1]  ;;  %v7941_v13 = vld [vmem:[%s7917_s10 + $0xc] sm:$0xff]   ;;  %s10220_s29 = scalar_lea.vmem %s10397_s6, %s6276_s27 }
  0x14   : > { %v7931_v7 = vld [vmem:[%s7922_s13] sm:$0xff]   ;;  %v10445_v8 = vunpack.c.l.bf16 %v7925_v5  ;;  %v10441_v9 = vunpack.c.h.bf16 %v7925_v5  ;;  %v10438_v10 = vunpack.c.l.bf16 %v7928_v6  ;;  %v7937_v11 = vld [vmem:[%s7922_s13 + $0x8] sm:$0x1]  ;;  %v10432_v19 = vunpack.c.l.bf16 %v7941_v13  ;;  %v7957_v22 = vld [vmem:[%s7917_s10 + $0x14] sm:$0x1] }
  0x15   : > { %v10435_v12 = vunpack.c.l.bf16 %v7931_v7  ;;  %v10434_v14 = vunpack.c.h.bf16 %v7931_v7  ;;  %v10433_v15 = vunpack.c.l.bf16 %v7937_v11  ;;  %v10429_v23 = vunpack.c.h.bf16 %v7941_v13  ;;  %v7966_v29 = vld [vmem:[%s7922_s13 + $0xc] sm:$0xff]   ;;  %v7973_v33 = vld [vmem:[%s7922_s13 + $0x14] sm:$0x1]  ;;  %v7976_v34 = vld [vmem:[%s7917_s10 + $0x18] sm:$0xff]  }
  0x16   : > { %v447_v16 = vrot.slane %v10445_v8, 1  ;;  %v448_v17 = vrot.slane %v10441_v9, 1  ;;  %v450_v18 = vrot.slane %v10438_v10, 1  ;;  %10615 = vst [vmem:[#allocation2_spill] sm:$0xff] %v7966_v29  ;;  %v10427_v31 = vunpack.c.l.bf16 %v7957_v22  ;;  %v7989_v42 = vld [vmem:[%s7917_s10 + $0x20] sm:$0x1] }
  0x17   : > { %v2837_v20 = vrot.slane %v10435_v12, 1  ;;  %v2838_v21 = vrot.slane %v10434_v14, 1  ;;  %v2840_v26 = vrot.slane %v10433_v15, 1  ;;  %v452_v32 = vrot.slane %v10432_v19, 1  ;;  %10616 = vst [vmem:[#allocation3_spill] sm:$0xff] %v7989_v42  ;;  %v7998_v47 = vld [vmem:[%s7922_s13 + $0x18] sm:$0xff]  }
  0x18   : > { %v449_v24 = vsel %vm446_vm1, %v447_v16, %v448_v17  ;;  %v451_v25 = vsel %vm446_vm1, %v448_v17, %v450_v18  ;;  %v453_v36 = vrot.slane %v10429_v23, 1  ;;  %v455_v37 = vrot.slane %v10427_v31, 1  ;;  %v8001_v48 = vld [vmem:[%s7922_s13 + $0x20] sm:$0x1]  ;;  %v8009_v52 = vld [vmem:[%s7917_s10 + $0x24] sm:$0xff]  }
  0x19   : > { %v559_v27 = vpack.c.bf16 %v451_v25, %v449_v24  ;;  %v2839_v28 = vsel %vm446_vm1, %v2837_v20, %v2838_v21  ;;  %v2841_v30 = vsel %vm446_vm1, %v2838_v21, %v2840_v26  ;;  %v10424_v38 = vunpack.c.l.bf16 %v7966_v29  ;;  %10617 = vst [vmem:[#allocation4_spill] sm:$0xff] %v8001_v48  ;;  %v8028_v62 = vld [vmem:[%s7917_s10 + $0x2c] sm:$0x1]  ;;  %v8050_v21 = vld [vmem:[%s7922_s13 + $0x24] sm:$0xff]  }
  0x1a   : > { %v2949_v35 = vpack.c.bf16 %v2841_v30, %v2839_v28  ;;  %v10423_v39 = vunpack.c.h.bf16 %v7966_v29  ;;  %v454_v40 = vsel %vm446_vm1, %v452_v32, %v453_v36  ;;  %v10422_v41 = vunpack.c.l.bf16 %v7973_v33  ;;  %10619 = vst [vmem:[#allocation6_spill] sm:$0xff] %v8028_v62  ;;  %v8062_v28 = vld [vmem:[%s7922_s13 + $0x2c] sm:$0x1]  ;;  %v8065_v30 = vld [vmem:[%s7917_s10 + $0x30] sm:$0xff]   ;;  %v8249_v10 = vld [vmem:[%s7917_s10 + $0x68] sm:$0x1] }
  0x1b   : > { %6617 = vmatprep.mubr.msk.bf16.mxu0 %vm577_vm2, %v559_v27  ;;  %v10420_v43 = vunpack.c.l.bf16 %v7976_v34  ;;  %v456_v44 = vsel %vm446_vm1, %v453_v36, %v455_v37  ;;  %v2842_v45 = vrot.slane %v10424_v38, 1  ;;  %v10417_v54 = vunpack.c.h.bf16 %v7976_v34  ;;  %10621 = vst [vmem:[#allocation8_spill] sm:$0xff] %v8062_v28  ;;  %v8204_v38 = vld [vmem:[%s7917_s10 + $0x5c] sm:$0x1] }
  0x1c   : > { %6923 = vmatprep.mubr.msk.bf16.mxu1 %vm2974_vm3, %v2949_v35  ;;  %v2843_v46 = vrot.slane %v10423_v39, 1  ;;  %v8003_v49 = vpack.c.bf16 %v456_v44, %v454_v40  ;;  %v2845_v51 = vrot.slane %v10422_v41, 1  ;;  %v10414_v55 = vunpack.c.l.bf16 %v7989_v42  ;;  %v8075_v40 = vld [vmem:[%s7917_s10 + $0x38] sm:$0x1]  ;;  %10635 = vst [vmem:[#allocation22_spill] sm:$0xff] %v8204_v38 }
  0x1d   : > { %v457_v56 = vrot.slane %v10420_v43, 1  ;;  %v10413_v59 = vunpack.c.l.bf16 %v7998_v47  ;;  %v10408_v60 = vunpack.c.h.bf16 %v7998_v47  ;;  %v10407_v61 = vunpack.c.l.bf16 %v8001_v48  ;;  %10623 = vst [vmem:[#allocation10_spill] sm:$0xff] %v8075_v40 }
  0x1e   : > { %10618 = vst [vmem:[#allocation5_spill] sm:$0xff] %v8003_v49  ;;  %v2844_v53 = vsel %vm446_vm1, %v2842_v45, %v2843_v46  ;;  %6618 = vmatmul.mubr.msk.bf16.vlgmr.msra.gmra.mrb[0].mxu0 %vm577_vm2, %v8003_v49  ;;  %v2846_v58 = vsel %vm446_vm1, %v2843_v46, %v2845_v51  ;;  %v458_v0 = vrot.slane %v10417_v54, 1  ;;  %v460_v1 = vrot.slane %v10414_v55, 1 }
  0x1f   : > { %6650 = vmatpush3.bf16.msra.mxu0 %v840_v50  ;;  %v8030_v63 = vpack.c.bf16 %v2846_v58, %v2844_v53  ;;  %v10406_v2 = vunpack.c.l.bf16 %v8009_v52  ;;  %v2847_v16 = vrot.slane %v10413_v59, 1  ;;  %v2848_v17 = vrot.slane %v10408_v60, 1  ;;  %v8091_v58 = vld [vmem:[%s7922_s13 + $0x30] sm:$0xff]  }
  0x20   : > { %v2850_v18 = vrot.slane %v10407_v61, 1  ;;  %v10405_v20 = vunpack.c.h.bf16 %v8009_v52  ;;  %7741 = vmatprep.subr.msk.bf16.mxu0 %vm626_vm0, %v8019_v57  ;;  %v459_v24 = vsel %vm446_vm1, %v457_v56, %v458_v0  ;;  %v461_v25 = vsel %vm446_vm1, %v458_v0, %v460_v1 }
  0x21   : > { %10620 = vst [vmem:[#allocation7_spill] sm:$0xff] %v8030_v63  ;;  %6924 = vmatmul.mubr.msk.bf16.vlgmr.msra.gmra.mrb[0].mxu1 %vm2974_vm3, %v8030_v63  ;;  %v10404_v26 = vunpack.c.l.bf16 %v8028_v62  ;;  %v462_v27 = vrot.slane %v10406_v2, 1  ;;  %v8068_v32 = vpack.c.bf16 %v461_v25, %v459_v24  ;;  %v2849_v35 = vsel %vm446_vm1, %v2847_v16, %v2848_v17  ;;  %v8105_v24 = vld [vmem:[%s7917_s10 + $0x3c] sm:$0xff]  }
  0x22   : > { %6956 = vmatpush3.bf16.msra.mxu1 %v7907_v4  ;;  %v2851_v36 = vsel %vm446_vm1, %v2848_v17, %v2850_v18  ;;  %v463_v37 = vrot.slane %v10405_v20, 1  ;;  %v10399_v4 = vunpack.c.l.bf16 %v8050_v21  ;;  %v10398_v46 = vunpack.c.h.bf16 %v8050_v21  ;;  %v8102_v18 = vld [vmem:[%s7922_s13 + $0x38] sm:$0x1] }
  0x23   : > { %10622 = vst [vmem:[#allocation9_spill] sm:$0xff] %v8068_v32  ;;  %v8077_v44 = vpack.c.bf16 %v2851_v36, %v2849_v35  ;;  %v465_v45 = vrot.slane %v10404_v26, 1  ;;  %6989 = vmatprep.subr.bf16.mxu1 %v8040_v3  ;;  %6621 = vmatprep.mubr.msk.bf16.mxu0 %vm577_vm2, %v8068_v32  ;;  %v10400_v51 = vunpack.c.l.bf16 %v8062_v28  ;;  %v10402_v53 = vunpack.c.l.bf16 %v8065_v30  ;;  %10625 = vst [vmem:[#allocation12_spill] sm:$0xff] %v8102_v18 }
  0x24   : > { %v464_v50 = vsel %vm446_vm1, %v462_v27, %v463_v37  ;;  %v10401_v56 = vunpack.c.h.bf16 %v8065_v30  ;;  %v2852_v1 = vrot.slane %v10399_v4, 1  ;;  %v2853_v16 = vrot.slane %v10398_v46, 1 }
  0x25   : > { %10624 = vst [vmem:[#allocation11_spill] sm:$0xff] %v8077_v44  ;;  %6927 = vmatprep.mubr.msk.bf16.mxu1 %vm2974_vm3, %v8077_v44  ;;  %v466_v0 = vsel %vm446_vm1, %v463_v37, %v465_v45  ;;  %v10403_v17 = vunpack.c.l.bf16 %v8075_v40  ;;  %v2855_v27 = vrot.slane %v10400_v51, 1  ;;  %v467_v35 = vrot.slane %v10402_v53, 1  ;;  %v8130_v53 = vld [vmem:[%s7922_s13 + $0x3c] sm:$0xff]  }
  0x26   : > { %v8107_v25 = vpack.c.bf16 %v466_v0, %v464_v50  ;;  %v468_v36 = vrot.slane %v10401_v56, 1  ;;  %v2854_v37 = vsel %vm446_vm1, %v2852_v1, %v2853_v16  ;;  %v10412_v46 = vunpack.c.l.bf16 %v8091_v58  ;;  %v8121_v50 = vld [vmem:[%s7917_s10 + $0x44] sm:$0x1] }
  0x27   : > { %v470_v45 = vrot.slane %v10403_v17, 1  ;;  %v10410_v4 = vunpack.c.h.bf16 %v8091_v58  ;;  %10627 = vst [vmem:[#allocation14_spill] sm:$0xff] %v8121_v50  ;;  %v2856_v0 = vsel %vm446_vm1, %v2853_v16, %v2855_v27  ;;  %v10409_v56 = vunpack.c.l.bf16 %v8102_v18  ;;  %v8133_v17 = vld [vmem:[%s7922_s13 + $0x44] sm:$0x1] }
  0x28   : > { %10626 = vst [vmem:[#allocation13_spill] sm:$0xff] %v8107_v25  ;;  %6622 = vmatmul.mubr.msk.bf16.gmra.mrb[4].mxu0 %vm577_vm2, %v8107_v25  ;;  %v469_v51 = vsel %vm446_vm1, %v467_v35, %v468_v36  ;;  %v10411_v1 = vunpack.c.l.bf16 %v8105_v24  ;;  %10628 = vst [vmem:[#allocation15_spill] sm:$0xff] %v8133_v17  ;;  %v8135_v26 = vpack.c.bf16 %v2856_v0, %v2854_v37  ;;  %v2857_v2 = vrot.slane %v10412_v46, 1  ;;  %v8149_v37 = vld [vmem:[%s7917_s10 + $0x48] sm:$0xff]  }
  0x29   : > { %v471_v20 = vsel %vm446_vm1, %v468_v36, %v470_v45  ;;  %v2858_v16 = vrot.slane %v10410_v4, 1  ;;  %v2860_v35 = vrot.slane %v10409_v56, 1  ;;  %v10415_v61 = vunpack.c.h.bf16 %v8105_v24 }
  0x2a   : > { %10629 = vst [vmem:[#allocation16_spill] sm:$0xff] %v8135_v26  ;;  %v8142_v27 = vpack.c.bf16 %v471_v20, %v469_v51  ;;  %v10416_v60 = vunpack.c.l.bf16 %v8121_v50  ;;  %6928 = vmatmul.mubr.msk.bf16.gmra.mrb[4].mxu1 %vm2974_vm3, %v8135_v26  ;;  %v472_v45 = vrot.slane %v10411_v1, 1  ;;  %v10418_v20 = vunpack.c.l.bf16 %v8130_v53  ;;  %v8167_v1 = vld [vmem:[%s7917_s10 + $0x50] sm:$0x1] }
  0x2b   : > { %v2859_v36 = vsel %vm446_vm1, %v2857_v2, %v2858_v16  ;;  %v10419_v51 = vunpack.c.h.bf16 %v8130_v53  ;;  %v2861_v0 = vsel %vm446_vm1, %v2858_v16, %v2860_v35  ;;  %v473_v56 = vrot.slane %v10415_v61, 1  ;;  %10631 = vst [vmem:[#allocation18_spill] sm:$0xff] %v8167_v1  ;;  %v8177_v35 = vld [vmem:[%s7922_s13 + $0x48] sm:$0xff]  }
  0x2c   : > { %10630 = vst [vmem:[#allocation17_spill] sm:$0xff] %v8142_v27  ;;  %6625 = vmatprep.mubr.msk.bf16.mxu0 %vm577_vm2, %v8142_v27  ;;  %v475_v2 = vrot.slane %v10416_v60, 1  ;;  %v10421_v4 = vunpack.c.l.bf16 %v8133_v17  ;;  %v8169_v46 = vpack.c.bf16 %v2861_v0, %v2859_v36  ;;  %v2862_v59 = vrot.slane %v10418_v20, 1  ;;  %v8185_v0 = vld [vmem:[%s7922_s13 + $0x50] sm:$0x1]  ;;  %v8188_v20 = vld [vmem:[%s7917_s10 + $0x54] sm:$0xff]  }
  0x2d   : > { %v2863_v55 = vrot.slane %v10419_v51, 1  ;;  %v10426_v16 = vunpack.c.l.bf16 %v8149_v37  ;;  %v474_v61 = vsel %vm446_vm1, %v472_v45, %v473_v56  ;;  %v10425_v36 = vunpack.c.h.bf16 %v8149_v37  ;;  %10633 = vst [vmem:[#allocation20_spill] sm:$0xff] %v8185_v0 }
  0x2e   : > { %10632 = vst [vmem:[#allocation19_spill] sm:$0xff] %v8169_v46  ;;  %v476_v60 = vsel %vm446_vm1, %v473_v56, %v475_v2  ;;  %v2865_v54 = vrot.slane %v10421_v4, 1  ;;  %6931 = vmatprep.mubr.msk.bf16.mxu1 %vm2974_vm3, %v8169_v46  ;;  %v10428_v45 = vunpack.c.l.bf16 %v8167_v1  ;;  %v10430_v41 = vunpack.c.l.bf16 %v8177_v35 }
  0x2f   : > { %v8192_v51 = vpack.c.bf16 %v476_v60, %v474_v61  ;;  %v2864_v43 = vsel %vm446_vm1, %v2862_v59, %v2863_v55  ;;  %v477_v56 = vrot.slane %v10426_v16, 1  ;;  %v478_v4 = vrot.slane %v10425_v36, 1  ;;  %v8215_v61 = vld [vmem:[%s7922_s13 + $0x54] sm:$0xff]  }
  0x30   : > { %v2866_v2 = vsel %vm446_vm1, %v2863_v55, %v2865_v54  ;;  %v10431_v39 = vunpack.c.h.bf16 %v8177_v35  ;;  %v480_v60 = vrot.slane %v10428_v45, 1  ;;  %v10436_v54 = vunpack.c.l.bf16 %v8185_v0  ;;  %10637 = vst [vmem:[#allocation24_spill] sm:$0xff] %v8215_v61 }
  0x31   : > { %10634 = vst [vmem:[#allocation21_spill] sm:$0xff] %v8192_v51  ;;  %6626 = vmatmul.mubr.msk.bf16.gmra.mrb[8].mxu0 %vm577_vm2, %v8192_v51  ;;  %v8208_v59 = vpack.c.bf16 %v2866_v2, %v2864_v43  ;;  %v10437_v55 = vunpack.c.l.bf16 %v8188_v20  ;;  %v479_v36 = vsel %vm446_vm1, %v477_v56, %v478_v4  ;;  %v2867_v16 = vrot.slane %v10430_v41, 1  ;;  %v8224_v2 = vld [vmem:[%s7922_s13 + $0x5c] sm:$0x1] }
  0x32   : > { %v2868_v31 = vrot.slane %v10431_v39, 1  ;;  %v10440_v43 = vunpack.c.h.bf16 %v8188_v20  ;;  %v481_v45 = vsel %vm446_vm1, %v478_v4, %v480_v60  ;;  %v2870_v56 = vrot.slane %v10436_v54, 1  ;;  %v8235_v39 = vld [vmem:[%s7917_s10 + $0x60] sm:$0xff]  }
  0x33   : > { %10636 = vst [vmem:[#allocation23_spill] sm:$0xff] %v8208_v59  ;;  %6932 = vmatmul.mubr.msk.bf16.gmra.mrb[8].mxu1 %vm2974_vm3, %v8208_v59  ;;  %v10439_v23 = vunpack.c.l.bf16 %v8204_v38  ;;  %v482_v41 = vrot.slane %v10437_v55, 1  ;;  %10638 = vst [vmem:[#allocation25_spill] sm:$0xff] %v8235_v39  ;;  %v8237_v19 = vpack.c.bf16 %v481_v45, %v479_v36  ;;  %v10442_v12 = vunpack.c.l.bf16 %v8215_v61  ;;  %v8252_v36 = vld [vmem:[%s7922_s13 + $0x60] sm:$0xff]  }
  0x34   : > { %v2869_v15 = vsel %vm446_vm1, %v2867_v16, %v2868_v31  ;;  %v483_v14 = vrot.slane %v10440_v43, 1  ;;  %v2871_v4 = vsel %vm446_vm1, %v2868_v31, %v2870_v56  ;;  %v10443_v54 = vunpack.c.h.bf16 %v8215_v61  ;;  %10640 = vst [vmem:[#allocation27_spill] sm:$0xff] %v8252_v36 }
  0x35   : > { %10639 = vst [vmem:[#allocation26_spill] sm:$0xff] %v8237_v19  ;;  %v485_v60 = vrot.slane %v10439_v23, 1  ;;  %v10444_v55 = vunpack.c.l.bf16 %v8224_v2  ;;  %6629 = vmatprep.mubr.msk.bf16.mxu0 %vm577_vm2, %v8237_v19  ;;  %v8256_v16 = vpack.c.bf16 %v2871_v4, %v2869_v15  ;;  %v2872_v31 = vrot.slane %v10442_v12, 1  ;;  %v8269_v4 = vld [vmem:[%s7922_s13 + $0x68] sm:$0x1]  ;;  %v8291_v12 = vld [vmem:[%s7922_s13 + $0x6c] sm:$0xff]  }
  0x36   : > { %v484_v45 = vsel %vm446_vm1, %v482_v41, %v483_v14  ;;  %v10448_v56 = vunpack.c.l.bf16 %v8235_v39  ;;  %v2873_v43 = vrot.slane %v10443_v54, 1  ;;  %v10449_v15 = vunpack.c.h.bf16 %v8235_v39  ;;  %v8280_v54 = vld [vmem:[%s7917_s10 + $0x6c] sm:$0xff]   ;;  %10644 = vst [vmem:[#allocation31_spill] sm:$0xff] %v8291_v12 }
  0x37   : > { %10641 = vst [vmem:[#allocation28_spill] sm:$0xff] %v8256_v16  ;;  %v486_v23 = vsel %vm446_vm1, %v483_v14, %v485_v60  ;;  %v2875_v9 = vrot.slane %v10444_v55, 1  ;;  %6935 = vmatprep.mubr.msk.bf16.mxu1 %vm2974_vm3, %v8256_v16  ;;  %10643 = vst [vmem:[#allocation30_spill] sm:$0xff] %v8280_v54  ;;  %v10646_v60 = vunpack.c.l.bf16 %v8249_v10  ;;  %v10648_v16 = vunpack.c.h.bf16 %v8252_v36 }
  0x38   : > { %v8273_v41 = vpack.c.bf16 %v486_v23, %v484_v45  ;;  %v487_v14 = vrot.slane %v10448_v56, 1  ;;  %v2874_v55 = vsel %vm446_vm1, %v2872_v31, %v2873_v43  ;;  %v488_v19 = vrot.slane %v10449_v15, 1  ;;  %v8288_v45 = vld [vmem:[%s7917_s10 + $0x74] sm:$0x1] }
  0x39   : > { %v2876_v8 = vsel %vm446_vm1, %v2873_v43, %v2875_v9  ;;  %v490_v31 = vrot.slane %v10646_v60, 1  ;;  %v10466_v9 = vunpack.c.l.bf16 %v8269_v4  ;;  %v10647_v43 = vunpack.c.l.bf16 %v8252_v36 }
  0x3a   : > { %10642 = vst [vmem:[#allocation29_spill] sm:$0xff] %v8273_v41  ;;  %6630 = vmatmul.mubr.msk.bf16.gmra.mrb[12].mxu0 %vm577_vm2, %v8273_v41  ;;  %v8295_v56 = vpack.c.bf16 %v2876_v8, %v2874_v55  ;;  %v489_v23 = vsel %vm446_vm1, %v487_v14, %v488_v19  ;;  %v2878_v59 = vrot.slane %v10648_v16, 1  ;;  %v8308_v8 = vld [vmem:[%s7922_s13 + $0x74] sm:$0x1]  ;;  %v10467_v14 = vunpack.c.l.bf16 %v8288_v45 }
  0x3b   : > { %v2877_v15 = vrot.slane %v10647_v43, 1  ;;  %v491_v55 = vsel %vm446_vm1, %v488_v19, %v490_v31  ;;  %v2880_v60 = vrot.slane %v10466_v9, 1  ;;  %v8318_v43 = vld [vmem:[%s7917_s10 + $0x78] sm:$0xff]   ;;  %v10651_v41 = vunpack.c.l.bf16 %v8280_v54 }
  0x3c   : > { %10645 = vst [vmem:[#allocation32_spill] sm:$0xff] %v8295_v56  ;;  %6936 = vmatmul.mubr.msk.bf16.gmra.mrb[12].mxu1 %vm2974_vm3, %v8295_v56  ;;  %10649 = vst [vmem:[#allocation33_spill] sm:$0xff] %v8318_v43  ;;  %v8320_v46 = vpack.c.bf16 %v491_v55, %v489_v23  ;;  %v10652_v56 = vunpack.c.h.bf16 %v8280_v54  ;;  %v495_v31 = vrot.slane %v10467_v14, 1  ;;  %v10472_v9 = vunpack.c.h.bf16 %v8291_v12  ;;  %v8333_v23 = vld [vmem:[%s7917_s10 + $0x80] sm:$0x1]  ;;  %v8336_v55 = vld [vmem:[%s7922_s13 + $0x78] sm:$0xff]  }
  0x3d   : > { %v2879_v51 = vsel %vm446_vm1, %v2877_v15, %v2878_v59  ;;  %v492_v27 = vrot.slane %v10651_v41, 1  ;;  %v2881_v19 = vsel %vm446_vm1, %v2878_v59, %v2880_v60  ;;  %10653 = vst [vmem:[#allocation35_spill] sm:$0xff] %v8336_v55  ;;  %v10655_v59 = vunpack.c.l.bf16 %v8291_v12 }
  0x3e   : > { %10650 = vst [vmem:[#allocation34_spill] sm:$0xff] %v8320_v46  ;;  %v493_v26 = vrot.slane %v10652_v56, 1  ;;  %6633 = vmatprep.mubr.msk.bf16.mxu0 %vm577_vm2, %v8320_v46  ;;  %v8340_v15 = vpack.c.bf16 %v2881_v19, %v2879_v51  ;;  %v10477_v60 = vunpack.c.l.bf16 %v8318_v43  ;;  %v2883_v16 = vrot.slane %v10472_v9, 1  ;;  %v8353_v19 = vld [vmem:[%s7922_s13 + $0x80] sm:$0x1]  ;;  %v8364_v9 = vld [vmem:[%s7917_s10 + $0x84] sm:$0xff]  }
  0x3f   : > { %v2882_v41 = vrot.slane %v10655_v59, 1  ;;  %v10656_v44 = vunpack.c.l.bf16 %v8308_v8  ;;  %10658 = vst [vmem:[#allocation38_spill] sm:$0xff] %v8364_v9  ;;  %v10659_v46 = vunpack.c.h.bf16 %v8318_v43  ;;  %v8375_v59 = vld [vmem:[%s7922_s13 + $0x84] sm:$0xff]  }
  0x40   : > { %10654 = vst [vmem:[#allocation36_spill] sm:$0xff] %v8340_v15  ;;  %v494_v56 = vsel %vm446_vm1, %v492_v27, %v493_v26  ;;  %v496_v14 = vsel %vm446_vm1, %v493_v26, %v495_v31  ;;  %6939 = vmatprep.mubr.msk.bf16.mxu1 %vm2974_vm3, %v8340_v15  ;;  %v497_v26 = vrot.slane %v10477_v60, 1  ;;  %10660 = vst [vmem:[#allocation39_spill] sm:$0xff] %v8375_v59  ;;  %v10662_v31 = vunpack.c.l.bf16 %v8333_v23 }
  0x41   : > { %v2885_v25 = vrot.slane %v10656_v44, 1  ;;  %v8357_v27 = vpack.c.bf16 %v496_v14, %v494_v56  ;;  %v2884_v44 = vsel %vm446_vm1, %v2882_v41, %v2883_v16  ;;  %v498_v32 = vrot.slane %v10659_v46, 1  ;;  %v8372_v56 = vld [vmem:[%s7917_s10 + $0x8c] sm:$0x1] }
  0x42   : > { %v500_v41 = vrot.slane %v10662_v31, 1  ;;  %v10664_v15 = vunpack.c.h.bf16 %v8336_v55 }
  0x43   : > { %10657 = vst [vmem:[#allocation37_spill] sm:$0xff] %v8357_v27  ;;  %v2886_v51 = vsel %vm446_vm1, %v2883_v16, %v2885_v25  ;;  %6634 = vmatmul.mubr.msk.bf16.gmra.mrb[16].mxu0 %vm577_vm2, %v8357_v27  ;;  %v10489_v25 = vunpack.c.l.bf16 %v8353_v19  ;;  %v10663_v16 = vunpack.c.l.bf16 %v8336_v55  ;;  %v499_v14 = vsel %vm446_vm1, %v497_v26, %v498_v32 }
  0x44   : > { %v8379_v60 = vpack.c.bf16 %v2886_v51, %v2884_v44  ;;  %v2888_v63 = vrot.slane %v10664_v15, 1  ;;  %v8392_v51 = vld [vmem:[%s7922_s13 + $0x8c] sm:$0x1]  ;;  %v501_v31 = vsel %vm446_vm1, %v498_v32, %v500_v41  ;;  %v10490_v26 = vunpack.c.l.bf16 %v8372_v56 }
  0x45   : > { %v2887_v46 = vrot.slane %v10663_v16, 1  ;;  %v2890_v44 = vrot.slane %v10489_v25, 1  ;;  %v8402_v16 = vld [vmem:[%s7917_s10 + $0x90] sm:$0xff]   ;;  %v8404_v49 = vpack.c.bf16 %v501_v31, %v499_v14  ;;  %v10667_v27 = vunpack.c.l.bf16 %v8364_v9  ;;  %v8417_v14 = vld [vmem:[%s7917_s10 + $0x98] sm:$0x1] }
  0x46   : > { %10661 = vst [vmem:[#allocation40_spill] sm:$0xff] %v8379_v60  ;;  %6940 = vmatmul.mubr.msk.bf16.gmra.mrb[16].mxu1 %vm2974_vm3, %v8379_v60  ;;  %10665 = vst [vmem:[#allocation41_spill] sm:$0xff] %v8402_v16  ;;  %v10668_v60 = vunpack.c.h.bf16 %v8364_v9  ;;  %v505_v41 = vrot.slane %v10490_v26, 1  ;;  %v10493_v25 = vunpack.c.h.bf16 %v8375_v59  ;;  %v8420_v31 = vld [vmem:[%s7922_s13 + $0x90] sm:$0xff]   ;;  %v10672_v1 = vunpack.c.l.bf16 %v8392_v51 }
  0x47   : > { %10666 = vst [vmem:[#allocation42_spill] sm:$0xff] %v8404_v49  ;;  %v2889_v38 = vsel %vm446_vm1, %v2887_v46, %v2888_v63  ;;  %v502_v0 = vrot.slane %v10667_v27, 1  ;;  %v2891_v32 = vsel %vm446_vm1, %v2888_v63, %v2890_v44  ;;  %10669 = vst [vmem:[#allocation43_spill] sm:$0xff] %v8420_v31  ;;  %6637 = vmatprep.mubr.msk.bf16.mxu0 %vm577_vm2, %v8404_v49  ;;  %v10671_v63 = vunpack.c.l.bf16 %v8375_v59 }
  0x48   : > { %v503_v17 = vrot.slane %v10668_v60, 1  ;;  %v8424_v27 = vpack.c.bf16 %v2891_v32, %v2889_v38  ;;  %v10497_v44 = vunpack.c.l.bf16 %v8402_v16  ;;  %v2893_v15 = vrot.slane %v10493_v25, 1  ;;  %v8437_v32 = vld [vmem:[%s7922_s13 + $0x98] sm:$0x1]  ;;  %v8448_v25 = vld [vmem:[%s7917_s10 + $0x9c] sm:$0xff]  }
  0x49   : > { %v2892_v46 = vrot.slane %v10671_v63, 1  ;;  %v2895_v50 = vrot.slane %v10672_v1, 1  ;;  %10673 = vst [vmem:[#allocation45_spill] sm:$0xff] %v8437_v32  ;;  %10675 = vst [vmem:[#allocation47_spill] sm:$0xff] %v8448_v25  ;;  %v10676_v49 = vunpack.c.h.bf16 %v8402_v16  ;;  %v8459_v63 = vld [vmem:[%s7922_s13 + $0x9c] sm:$0xff]  }
  0x4a   : > { %10670 = vst [vmem:[#allocation44_spill] sm:$0xff] %v8424_v27  ;;  %v504_v60 = vsel %vm446_vm1, %v502_v0, %v503_v17  ;;  %v506_v26 = vsel %vm446_vm1, %v503_v17, %v505_v41  ;;  %6943 = vmatprep.mubr.msk.bf16.mxu1 %vm2974_vm3, %v8424_v27  ;;  %v507_v17 = vrot.slane %v10497_v44, 1  ;;  %10678 = vst [vmem:[#allocation49_spill] sm:$0xff] %v8459_v63  ;;  %v10680_v41 = vunpack.c.l.bf16 %v8417_v14 }
  0x4b   : > { %v8441_v0 = vpack.c.bf16 %v506_v26, %v504_v60  ;;  %v2894_v1 = vsel %vm446_vm1, %v2892_v46, %v2893_v15  ;;  %v2896_v38 = vsel %vm446_vm1, %v2893_v15, %v2895_v50  ;;  %v508_v18 = vrot.slane %v10676_v49, 1  ;;  %v8456_v60 = vld [vmem:[%s7917_s10 + $0xa4] sm:$0x1] }
  0x4c   : > { %10677 = vst [vmem:[#allocation48_spill] sm:$0xff] %v8456_v60  ;;  %v8463_v44 = vpack.c.bf16 %v2896_v38, %v2894_v1  ;;  %v510_v46 = vrot.slane %v10680_v41, 1  ;;  %v10509_v50 = vunpack.c.l.bf16 %v8437_v32  ;;  %v10681_v15 = vunpack.c.l.bf16 %v8420_v31  ;;  %v8476_v38 = vld [vmem:[%s7922_s13 + $0xa4] sm:$0x1] }
  0x4d   : > { %10674 = vst [vmem:[#allocation46_spill] sm:$0xff] %v8441_v0  ;;  %6638 = vmatmul.mubr.msk.bf16.gmra.mrb[20].mxu0 %vm577_vm2, %v8441_v0  ;;  %v509_v26 = vsel %vm446_vm1, %v507_v17, %v508_v18  ;;  %v10682_v27 = vunpack.c.h.bf16 %v8420_v31  ;;  %10683 = vst [vmem:[#allocation51_spill] sm:$0xff] %v8476_v38  ;;  %v10510_v17 = vunpack.c.l.bf16 %v8456_v60  ;;  %v10686_v0 = vunpack.c.l.bf16 %v8448_v25 }
  0x4e   : > { %10679 = vst [vmem:[#allocation50_spill] sm:$0xff] %v8463_v44  ;;  %v2897_v49 = vrot.slane %v10681_v15, 1  ;;  %6944 = vmatmul.mubr.msk.bf16.gmra.mrb[20].mxu1 %vm2974_vm3, %v8463_v44  ;;  %v511_v41 = vsel %vm446_vm1, %v508_v18, %v510_v46  ;;  %v2900_v1 = vrot.slane %v10509_v50, 1  ;;  %v8486_v15 = vld [vmem:[%s7917_s10 + $0xa8] sm:$0xff]   ;;  %v10687_v44 = vunpack.c.h.bf16 %v8448_v25 }
  0x4f   : > { %v2898_v28 = vrot.slane %v10682_v27, 1  ;;  %10684 = vst [vmem:[#allocation52_spill] sm:$0xff] %v8486_v15  ;;  %v8488_v40 = vpack.c.bf16 %v511_v41, %v509_v26  ;;  %v512_v48 = vrot.slane %v10686_v0, 1  ;;  %v515_v46 = vrot.slane %v10510_v17, 1  ;;  %v8501_v26 = vld [vmem:[%s7917_s10 + $0xb0] sm:$0x1] }
  0x50   : > { %v513_v42 = vrot.slane %v10687_v44, 1  ;;  %v10514_v50 = vunpack.c.h.bf16 %v8459_v63  ;;  %10688 = vst [vmem:[#allocation54_spill] sm:$0xff] %v8501_v26  ;;  %v8504_v41 = vld [vmem:[%s7922_s13 + $0xa8] sm:$0xff]   ;;  %v10692_v60 = vunpack.c.l.bf16 %v8476_v38 }
  0x51   : > { %10685 = vst [vmem:[#allocation53_spill] sm:$0xff] %v8488_v40  ;;  %v2899_v62 = vsel %vm446_vm1, %v2897_v49, %v2898_v28  ;;  %v2901_v18 = vsel %vm446_vm1, %v2898_v28, %v2900_v1  ;;  %10689 = vst [vmem:[#allocation55_spill] sm:$0xff] %v8504_v41  ;;  %6641 = vmatprep.mubr.msk.bf16.mxu0 %vm577_vm2, %v8488_v40  ;;  %v10691_v28 = vunpack.c.l.bf16 %v8459_v63  ;;  %v10518_v1 = vunpack.c.l.bf16 %v8486_v15 }
  0x52   : > { %v8508_v0 = vpack.c.bf16 %v2901_v18, %v2899_v62  ;;  %v514_v44 = vsel %vm446_vm1, %v512_v48, %v513_v42  ;;  %v516_v17 = vsel %vm446_vm1, %v513_v42, %v515_v46  ;;  %v2903_v27 = vrot.slane %v10514_v50, 1  ;;  %v8521_v18 = vld [vmem:[%s7922_s13 + $0xb0] sm:$0x1]  ;;  %v8532_v50 = vld [vmem:[%s7917_s10 + $0xb4] sm:$0xff]  }
  0x53   : > { %v2902_v49 = vrot.slane %v10691_v28, 1  ;;  %v2905_v25 = vrot.slane %v10692_v60, 1  ;;  %v8525_v48 = vpack.c.bf16 %v516_v17, %v514_v44  ;;  %v517_v42 = vrot.slane %v10518_v1, 1  ;;  %10694 = vst [vmem:[#allocation58_spill] sm:$0xff] %v8532_v50  ;;  %v8540_v44 = vld [vmem:[%s7917_s10 + $0xbc] sm:$0x1] }
  0x54   : > { %10690 = vst [vmem:[#allocation56_spill] sm:$0xff] %v8508_v0  ;;  %6947 = vmatprep.mubr.msk.bf16.mxu1 %vm2974_vm3, %v8508_v0  ;;  %v10695_v40 = vunpack.c.h.bf16 %v8486_v15  ;;  %v10528_v17 = vunpack.c.h.bf16 %v8504_v41  ;;  %v8543_v28 = vld [vmem:[%s7922_s13 + $0xb4] sm:$0xff]   ;;  %v10698_v46 = vunpack.c.l.bf16 %v8501_v26  ;;  %v10539_v63 = vunpack.c.l.bf16 %v8532_v50 }
  0x55   : > { %10693 = vst [vmem:[#allocation57_spill] sm:$0xff] %v8525_v48  ;;  %v2904_v60 = vsel %vm446_vm1, %v2902_v49, %v2903_v27  ;;  %v2906_v62 = vsel %vm446_vm1, %v2903_v27, %v2905_v25  ;;  %10696 = vst [vmem:[#allocation59_spill] sm:$0xff] %v8543_v28  ;;  %6642 = vmatmul.mubr.msk.bf16.gmra.mrb[24].mxu0 %vm577_vm2, %v8525_v48  ;;  %v10534_v49 = vunpack.c.l.bf16 %v8521_v18  ;;  %v10699_v25 = vunpack.c.l.bf16 %v8504_v41  ;;  %v8560_v48 = vld [vmem:[%s7922_s13 + $0xbc] sm:$0x1] }
  0x56   : > { %v518_v38 = vrot.slane %v10695_v40, 1  ;;  %v8547_v1 = vpack.c.bf16 %v2906_v62, %v2904_v60  ;;  %v520_v0 = vrot.slane %v10698_v46, 1  ;;  %v2908_v15 = vrot.slane %v10528_v17, 1 }
  0x57   : > { %v2907_v27 = vrot.slane %v10699_v25, 1  ;;  %v2910_v46 = vrot.slane %v10534_v49, 1  ;;  %v10535_v60 = vunpack.c.l.bf16 %v8540_v44  ;;  %v522_v32 = vrot.slane %v10539_v63, 1 }
  0x58   : > { %10697 = vst [vmem:[#allocation60_spill] sm:$0xff] %v8547_v1  ;;  %v519_v40 = vsel %vm446_vm1, %v517_v42, %v518_v38  ;;  %6948 = vmatmul.mubr.msk.bf16.gmra.mrb[24].mxu1 %vm2974_vm3, %v8547_v1  ;;  %v521_v62 = vsel %vm446_vm1, %v518_v38, %v520_v0  ;;  %v10538_v42 = vunpack.c.l.bf16 %v8543_v28  ;;  %v10701_v41 = vunpack.c.h.bf16 %v8532_v50 }
  0x59   : > { %v8569_v25 = vpack.c.bf16 %v521_v62, %v519_v40  ;;  %v2909_v17 = vsel %vm446_vm1, %v2907_v27, %v2908_v15  ;;  %v2911_v1 = vsel %vm446_vm1, %v2908_v15, %v2910_v46  ;;  %v525_v38 = vrot.slane %v10535_v60, 1 }
  0x5a   : > { %v523_v26 = vrot.slane %v10701_v41, 1  ;;  %v10537_v0 = vunpack.c.h.bf16 %v8543_v28  ;;  %v10536_v49 = vunpack.c.l.bf16 %v8560_v48  ;;  %v8583_v40 = vpack.c.bf16 %v2911_v1, %v2909_v17 }
  0x5b   : > { %10700 = vst [vmem:[#allocation61_spill] sm:$0xff] %v8569_v25  ;;  %6645 = vmatprep.mubr.msk.bf16.mxu0 %vm577_vm2, %v8569_v25  ;;  %v2912_v62 = vrot.slane %v10538_v42, 1 }
  0x5c   : > { %10702 = vst [vmem:[#allocation62_spill] sm:$0xff] %v8583_v40  ;;  %v524_v27 = vsel %vm446_vm1, %v522_v32, %v523_v26  ;;  %v526_v41 = vsel %vm446_vm1, %v523_v26, %v525_v38  ;;  %v2913_v15 = vrot.slane %v10537_v0, 1  ;;  %v2915_v46 = vrot.slane %v10536_v49, 1  ;;  %6951 = vmatprep.mubr.msk.bf16.mxu1 %vm2974_vm3, %v8583_v40 }
  0x5d   : > { %v8595_v60 = vpack.c.bf16 %v526_v41, %v524_v27  ;;  %v10705_v26 = vunpack.c.l.bf16 %v7925_v5  ;;  %v10706_v49 = vunpack.c.h.bf16 %v7925_v5  ;;  %v10707_v27 = vunpack.c.l.bf16 %v7928_v6 }
  0x5e   : > { %v2914_v1 = vsel %vm446_vm1, %v2912_v62, %v2913_v15  ;;  %v2916_v32 = vsel %vm446_vm1, %v2913_v15, %v2915_v46  ;;  %v10708_v41 = vunpack.c.l.bf16 %v7931_v7  ;;  %v10709_v46 = vunpack.c.h.bf16 %v7931_v7 }
  0x5f   : > { %10703 = vst [vmem:[#allocation63_spill] sm:$0xff] %v8595_v60  ;;  %6646 = vmatmul.mubr.msk.bf16.gmra.mrb[28].mxu0 %vm577_vm2, %v8595_v60  ;;  %v8601_v17 = vpack.c.bf16 %v2916_v32, %v2914_v1  ;;  %v1004_v38 = vrot.slane %v10705_v26, 2  ;;  %v1005_v0 = vrot.slane %v10706_v49, 2  ;;  %v1007_v62 = vrot.slane %v10707_v27, 2 }
  0x60   : > { %6651 = vmatprep.mubr.msk.bf16.mxu0 %vm577_vm2, %v7925_v5  ;;  %v3399_v15 = vrot.slane %v10708_v41, 2  ;;  %v3400_v1 = vrot.slane %v10709_v46, 2  ;;  %v10710_v32 = vunpack.c.l.bf16 %v7937_v11  ;;  %v10711_v5 = vunpack.c.l.bf16 %v7941_v13 }
  0x61   : > { %10704 = vst [vmem:[#allocation64_spill] sm:$0xff] %v8601_v17  ;;  %6952 = vmatmul.mubr.msk.bf16.gmra.mrb[28].mxu1 %vm2974_vm3, %v8601_v17  ;;  %v10712_v26 = vunpack.c.h.bf16 %v7941_v13  ;;  %v10713_v6 = vunpack.c.l.bf16 %v7957_v22  ;;  %v10714_v41 = vunpack.c.l.bf16 %v7966_v29  ;;  %v10715_v46 = vunpack.c.h.bf16 %v7966_v29  ;;  %v8644_v22 = vld [vmem:[%s10393_s2 + $0xc] sm:$0xf] }
  0x62   : > { %v3402_v42 = vrot.slane %v10710_v32, 2  ;;  %6957 = vmatprep.mubr.msk.bf16.mxu1 %vm2974_vm3, %v7931_v7  ;;  %v1009_v49 = vrot.slane %v10711_v5, 2  ;;  %v10716_v11 = vunpack.c.l.bf16 %v7973_v33  ;;  %v1183_v7 = vsel %vm626_vm0, %v8019_v57, 0 }
  0x63   : > { %v1010_v63 = vrot.slane %v10712_v26, 2  ;;  %v1012_v27 = vrot.slane %v10713_v6, 2  ;;  %v3404_v17 = vrot.slane %v10714_v41, 2  ;;  %v3405_v40 = vrot.slane %v10715_v46, 2 }
  0x64   : > { %v3407_v32 = vrot.slane %v10716_v11, 2  ;;  %v8636_v5 = vsel %vm1003_vm4, %v1004_v38, %v1005_v0  ;;  %v8639_v26 = vsel %vm1003_vm4, %v1005_v0, %v1007_v62  ;;  %v8647_v6 = vsel %vm1003_vm4, %v3399_v15, %v3400_v1  ;;  %v8661_v38 = vld [vmem:[%s10395_s4 + $0x18] sm:$0xff]  }
  0x65   : > { %v8650_v33 = vsel %vm1003_vm4, %v3400_v1, %v3402_v42  ;;  %v1011_v62 = vsel %vm1003_vm4, %v1009_v49, %v1010_v63  ;;  %v1013_v15 = vsel %vm1003_vm4, %v1010_v63, %v1012_v27  ;;  %v3406_v1 = vsel %vm1003_vm4, %v3404_v17, %v3405_v40 }
  0x66   : > { %v8667_v42 = vpack.c.bf16 %v1013_v15, %v1011_v62  ;;  %v3408_v41 = vsel %vm1003_vm4, %v3405_v40, %v3407_v32  ;;  %v10720_v40 = vunpack.c.h.bf16 %v8215_v61  ;;  %v10721_v49 = vunpack.c.l.bf16 %v8224_v2 }
  0x67   : > { %6652 = vmatmul.mubr.msk.bf16.vlgmr.msra.gmra.mrb[0].mxu0 %vm577_vm2, %v7941_v13  ;;  %v8675_v46 = vpack.c.bf16 %v3408_v41, %v3406_v1  ;;  %v10722_v11 = vunpack.c.l.bf16 %v8235_v39  ;;  %v10724_v41 = vunpack.c.l.bf16 %v8249_v10  ;;  %v10726_v0 = vunpack.c.h.bf16 %v8252_v36 }
  0x68   : > { %6684 = vmatpush3.bf16.msra.mxu0 %v1183_v7  ;;  %6655 = vmatprep.mubr.msk.bf16.mxu0 %vm577_vm2, %v7976_v34  ;;  %10717 = vst [vmem:[#allocation65_spill] sm:$0xff] %v8667_v42  ;;  %v3435_v17 = vrot.slane %v10720_v40, 2  ;;  %v3437_v27 = vrot.slane %v10721_v49, 2  ;;  %v10723_v7 = vunpack.c.h.bf16 %v8235_v39  ;;  %v10725_v49 = vunpack.c.l.bf16 %v8252_v36 }
  0x69   : > { %6958 = vmatmul.mubr.msk.bf16.vlgmr.msra.gmra.mrb[0].mxu1 %vm2974_vm3, %v7966_v29  ;;  %7742 = vmatprep.subr.msk.bf16.mxu0 %vm626_vm0, %v8644_v22  ;;  %10718 = vst [vmem:[#allocation66_spill] sm:$0xff] %v8675_v46  ;;  %v1044_v32 = vrot.slane %v10722_v11, 2  ;;  %v1047_v2 = vrot.slane %v10724_v41, 2  ;;  %v10727_v60 = vunpack.c.l.bf16 %v8269_v4  ;;  %v10729_v10 = vunpack.c.h.bf16 %v8280_v54 }
  0x6a   : > { %6990 = vmatpush3.bf16.msra.mxu1 %v8040_v3  ;;  %6961 = vmatprep.mubr.msk.bf16.mxu1 %vm2974_vm3, %v7998_v47  ;;  %v10719_v3 = vunpack.c.l.bf16 %v8215_v61  ;;  %v1045_v62 = vrot.slane %v10723_v7, 2  ;;  %v3438_v1 = vsel %vm1003_vm4, %v3435_v17, %v3437_v27  ;;  %v3439_v11 = vrot.slane %v10725_v49, 2 }
  0x6b   : > { %7023 = vmatprep.subr.bf16.mxu1 %v8661_v38  ;;  %v3440_v7 = vrot.slane %v10726_v0, 2  ;;  %v10730_v41 = vunpack.c.l.bf16 %v8288_v45  ;;  %v10731_v0 = vunpack.c.l.bf16 %v8291_v12 }
  0x6c   : > { %v3434_v63 = vrot.slane %v10719_v3, 2  ;;  %v1046_v40 = vsel %vm1003_vm4, %v1044_v32, %v1045_v62  ;;  %v1048_v57 = vsel %vm1003_vm4, %v1045_v62, %v1047_v2 }
  0x6d   : > { %v3441_v32 = vsel %vm1003_vm4, %v3439_v11, %v3440_v7  ;;  %v1052_v49 = vrot.slane %v10730_v41, 2  ;;  %v3444_v25 = vrot.slane %v10731_v0, 2 }
  0x6e   : > { %v3436_v15 = vsel %vm1003_vm4, %v3434_v63, %v3435_v17  ;;  %v3442_v63 = vrot.slane %v10727_v60, 2  ;;  %v10728_v17 = vunpack.c.l.bf16 %v8280_v54  ;;  %v10732_v60 = vunpack.c.h.bf16 %v8291_v12 }
  0x6f   : > { %6656 = vmatmul.mubr.msk.bf16.gmra.mrb[4].mxu0 %vm577_vm2, %v8009_v52  ;;  %v8711_v3 = vpack.c.bf16 %v3438_v1, %v3436_v15  ;;  %v1050_v15 = vrot.slane %v10729_v10, 2  ;;  %v8725_v1 = vpack.c.bf16 %v1048_v57, %v1046_v40  ;;  %v10734_v40 = vunpack.c.l.bf16 %v8318_v43 }
  0x70   : > { %6659 = vmatprep.mubr.msk.bf16.mxu0 %vm577_vm2, %v8065_v30  ;;  %v1049_v27 = vrot.slane %v10728_v17, 2  ;;  %v3443_v62 = vsel %vm1003_vm4, %v3440_v7, %v3442_v63  ;;  %v3445_v2 = vrot.slane %v10732_v60, 2  ;;  %v10733_v17 = vunpack.c.l.bf16 %v8308_v8 }
  0x71   : > { %6962 = vmatmul.mubr.msk.bf16.gmra.mrb[4].mxu1 %vm2974_vm3, %v8050_v21  ;;  %v8740_v57 = vpack.c.bf16 %v3443_v62, %v3441_v32  ;;  %v1053_v45 = vsel %vm1003_vm4, %v1050_v15, %v1052_v49  ;;  %v1054_v11 = vrot.slane %v10734_v40, 2  ;;  %v10735_v7 = vunpack.c.h.bf16 %v8318_v43 }
  0x72   : > { %6965 = vmatprep.mubr.msk.bf16.mxu1 %vm2974_vm3, %v8091_v58  ;;  %v1051_v4 = vsel %vm1003_vm4, %v1049_v27, %v1050_v15  ;;  %v3447_v10 = vrot.slane %v10733_v17, 2  ;;  %v3446_v8 = vsel %vm1003_vm4, %v3444_v25, %v3445_v2  ;;  %v10736_v32 = vunpack.c.l.bf16 %v8333_v23 }
  0x73   : > { %v1055_v63 = vrot.slane %v10735_v7, 2  ;;  %v8749_v27 = vpack.c.bf16 %v1053_v45, %v1051_v4  ;;  %v10737_v62 = vunpack.c.l.bf16 %v8336_v55  ;;  %v10738_v4 = vunpack.c.h.bf16 %v8336_v55 }
  0x74   : > { %v3448_v41 = vsel %vm1003_vm4, %v3445_v2, %v3447_v10  ;;  %v1057_v0 = vrot.slane %v10736_v32, 2  ;;  %v10739_v23 = vunpack.c.l.bf16 %v8353_v19  ;;  %v10740_v10 = vunpack.c.l.bf16 %v8364_v9 }
  0x75   : > { %v8757_v15 = vpack.c.bf16 %v3448_v41, %v3446_v8  ;;  %v1056_v49 = vsel %vm1003_vm4, %v1054_v11, %v1055_v63  ;;  %v3449_v60 = vrot.slane %v10737_v62, 2  ;;  %v3450_v17 = vrot.slane %v10738_v4, 2 }
  0x76   : > { %v1058_v25 = vsel %vm1003_vm4, %v1055_v63, %v1057_v0  ;;  %v3452_v2 = vrot.slane %v10739_v23, 2  ;;  %v1059_v45 = vrot.slane %v10740_v10, 2  ;;  %v10741_v40 = vunpack.c.h.bf16 %v8364_v9 }
  0x77   : > { %6660 = vmatmul.mubr.msk.bf16.gmra.mrb[8].mxu0 %vm577_vm2, %v8105_v24  ;;  %v8773_v7 = vpack.c.bf16 %v1058_v25, %v1056_v49  ;;  %v3451_v8 = vsel %vm1003_vm4, %v3449_v60, %v3450_v17  ;;  %v10742_v41 = vunpack.c.l.bf16 %v8372_v56  ;;  %v10743_v62 = vunpack.c.l.bf16 %v8375_v59 }
  0x78   : > { %6663 = vmatprep.mubr.msk.bf16.mxu0 %vm577_vm2, %v8149_v37  ;;  %v1060_v11 = vrot.slane %v10741_v40, 2  ;;  %v3453_v63 = vsel %vm1003_vm4, %v3450_v17, %v3452_v2  ;;  %v10744_v0 = vunpack.c.h.bf16 %v8375_v59  ;;  %v10745_v10 = vunpack.c.l.bf16 %v8392_v51 }
  0x79   : > { %6966 = vmatmul.mubr.msk.bf16.gmra.mrb[8].mxu1 %vm2974_vm3, %v8130_v53  ;;  %v1062_v32 = vrot.slane %v10742_v41, 2  ;;  %v3454_v4 = vrot.slane %v10743_v62, 2  ;;  %v8786_v49 = vpack.c.bf16 %v3453_v63, %v3451_v8  ;;  %v10746_v56 = vunpack.c.l.bf16 %v8402_v16 }
  0x7a   : > { %6969 = vmatprep.mubr.msk.bf16.mxu1 %vm2974_vm3, %v8177_v35  ;;  %v1061_v19 = vsel %vm1003_vm4, %v1059_v45, %v1060_v11  ;;  %v3455_v23 = vrot.slane %v10744_v0, 2  ;;  %v3457_v40 = vrot.slane %v10745_v10, 2  ;;  %v10747_v41 = vunpack.c.h.bf16 %v8402_v16 }
  0x7b   : > { %v1063_v60 = vsel %vm1003_vm4, %v1060_v11, %v1062_v32  ;;  %v1064_v25 = vrot.slane %v10746_v56, 2  ;;  %v10748_v45 = vunpack.c.l.bf16 %v8417_v14  ;;  %v10749_v32 = vunpack.c.l.bf16 %v8420_v31  ;;  %v10751_v14 = vld [vmem:[#allocation45_spill] sm:$0xff] }
  0x7c   : > { %v1065_v62 = vrot.slane %v10747_v41, 2  ;;  %v3456_v17 = vsel %vm1003_vm4, %v3454_v4, %v3455_v23  ;;  %v3458_v2 = vsel %vm1003_vm4, %v3455_v23, %v3457_v40  ;;  %v10752_v23 = vunpack.c.l.bf16 %v10751_v14  ;;  %v10753_v40 = vld [vmem:[#allocation47_spill] sm:$0xff] }
  0x7d   : > { %v1067_v51 = vrot.slane %v10748_v45, 2  ;;  %v8801_v8 = vpack.c.bf16 %v3458_v2, %v3456_v17  ;;  %v3459_v63 = vrot.slane %v10749_v32, 2  ;;  %v10755_v41 = vunpack.c.h.bf16 %v10753_v40  ;;  %v10756_v45 = vld [vmem:[#allocation48_spill] sm:$0xff] }
  0x7e   : > { %v1066_v11 = vsel %vm1003_vm4, %v1064_v25, %v1065_v62  ;;  %v3462_v10 = vrot.slane %v10752_v23, 2  ;;  %v10757_v32 = vunpack.c.l.bf16 %v10756_v45 }
  0x7f   : > { %6664 = vmatmul.mubr.msk.bf16.gmra.mrb[12].mxu0 %vm577_vm2, %v8188_v20  ;;  %v1068_v4 = vsel %vm1003_vm4, %v1065_v62, %v1067_v51  ;;  %v1070_v25 = vrot.slane %v10755_v41, 2  ;;  %v10758_v62 = vld [vmem:[#allocation49_spill] sm:$0xff] }
  0x80   : > { %6667 = vmatprep.mubr.msk.bf16.mxu0 %vm577_vm2, %v8235_v39  ;;  %v8819_v17 = vpack.c.bf16 %v1068_v4, %v1066_v11  ;;  %v10759_v51 = vunpack.c.l.bf16 %v10758_v62  ;;  %v10760_v41 = vunpack.c.h.bf16 %v10758_v62  ;;  %v10761_v11 = vld [vmem:[#allocation51_spill] sm:$0xff] }
  0x81   : > { %6970 = vmatmul.mubr.msk.bf16.gmra.mrb[12].mxu1 %vm2974_vm3, %v8215_v61  ;;  %v10762_v4 = vunpack.c.l.bf16 %v10761_v11 }
  0x82   : > { %6973 = vmatprep.mubr.msk.bf16.mxu1 %vm2974_vm3, %v8252_v36  ;;  %v8793_v36 = vpack.c.bf16 %v1063_v60, %v1061_v19  ;;  %v10750_v19 = vunpack.c.h.bf16 %v8420_v31  ;;  %v10754_v60 = vunpack.c.l.bf16 %v10753_v40  ;;  %v3464_v14 = vrot.slane %v10759_v51, 2 }
  0x84   : > { %v3460_v0 = vrot.slane %v10750_v19, 2  ;;  %v1069_v56 = vrot.slane %v10754_v60, 2  ;;  %v1072_v19 = vrot.slane %v10757_v32, 2  ;;  %v10763_v32 = vld [vmem:[#allocation52_spill] sm:$0xff] }
  0x85   : > { %v10765_v39 = vunpack.c.h.bf16 %v10763_v32 }
  0x86   : > { %v3461_v2 = vsel %vm1003_vm4, %v3459_v63, %v3460_v0  ;;  %v3463_v23 = vsel %vm1003_vm4, %v3460_v0, %v3462_v10  ;;  %v1071_v60 = vsel %vm1003_vm4, %v1069_v56, %v1070_v25  ;;  %v1073_v45 = vsel %vm1003_vm4, %v1070_v25, %v1072_v19  ;;  %v10766_v56 = vld [vmem:[#allocation54_spill] sm:$0xff]  ;;  %v10768_v25 = vld [vmem:[#allocation55_spill] sm:$0xff] }
  0x87   : > { %6668 = vmatmul.mubr.msk.bf16.gmra.mrb[16].mxu0 %vm577_vm2, %v8280_v54  ;;  %v8834_v63 = vpack.c.bf16 %v3463_v23, %v3461_v2  ;;  %v10764_v54 = vunpack.c.l.bf16 %v10763_v32  ;;  %v8841_v61 = vpack.c.bf16 %v1073_v45, %v1071_v60  ;;  %v10769_v19 = vunpack.c.l.bf16 %v10768_v25 }
  0x88   : > { %6671 = vmatprep.mubr.msk.bf16.mxu0 %vm577_vm2, %v8318_v43  ;;  %v3465_v43 = vrot.slane %v10760_v41, 2  ;;  %v10767_v41 = vunpack.c.l.bf16 %v10766_v56  ;;  %v10771_v60 = vunpack.c.l.bf16 %v8521_v18  ;;  %v10773_v45 = vunpack.c.h.bf16 %v8532_v50 }
  0x89   : > { %6974 = vmatmul.mubr.msk.bf16.gmra.mrb[16].mxu1 %vm2974_vm3, %v8291_v12  ;;  %v3467_v12 = vrot.slane %v10762_v4, 2  ;;  %v1074_v51 = vrot.slane %v10764_v54, 2  ;;  %v3469_v23 = vrot.slane %v10769_v19, 2  ;;  %v10770_v54 = vunpack.c.h.bf16 %v10768_v25 }
  0x8a   : > { %6977 = vmatprep.mubr.msk.bf16.mxu1 %vm2974_vm3, %v8336_v55  ;;  %v1075_v55 = vrot.slane %v10765_v39, 2  ;;  %v3466_v0 = vsel %vm1003_vm4, %v3464_v14, %v3465_v43  ;;  %v1077_v11 = vrot.slane %v10767_v41, 2  ;;  %v3472_v14 = vrot.slane %v10771_v60, 2 }
  0x8b   : > { %v3468_v10 = vsel %vm1003_vm4, %v3465_v43, %v3467_v12  ;;  %v3470_v29 = vrot.slane %v10770_v54, 2  ;;  %v10772_v12 = vunpack.c.l.bf16 %v8532_v50  ;;  %v10774_v56 = vunpack.c.l.bf16 %v8540_v44 }
  0x8c   : > { %v8847_v4 = vpack.c.bf16 %v3468_v10, %v3466_v0  ;;  %v1076_v2 = vsel %vm1003_vm4, %v1074_v51, %v1075_v55  ;;  %v1078_v39 = vsel %vm1003_vm4, %v1075_v55, %v1077_v11  ;;  %v1080_v0 = vrot.slane %v10773_v45, 2 }
  0x8d   : > { %v1079_v43 = vrot.slane %v10772_v12, 2  ;;  %v8863_v51 = vpack.c.bf16 %v1078_v39, %v1076_v2  ;;  %v3471_v10 = vsel %vm1003_vm4, %v3469_v23, %v3470_v29  ;;  %v1082_v41 = vrot.slane %v10774_v56, 2  ;;  %v10780_v56 = vld [vmem:[#allocation3_spill] sm:$0xff] }
  0x8e   : > { %v10775_v55 = vunpack.c.l.bf16 %v8543_v28  ;;  %v3473_v11 = vsel %vm1003_vm4, %v3470_v29, %v3472_v14  ;;  %v10776_v54 = vunpack.c.h.bf16 %v8543_v28  ;;  %v10777_v2 = vunpack.c.l.bf16 %v8560_v48 }
  0x8f   : > { %6672 = vmatmul.mubr.msk.bf16.gmra.mrb[20].mxu0 %vm577_vm2, %v8364_v9  ;;  %v1081_v19 = vsel %vm1003_vm4, %v1079_v43, %v1080_v0  ;;  %v8880_v44 = vpack.c.bf16 %v3473_v11, %v3471_v10  ;;  %v1083_v23 = vsel %vm1003_vm4, %v1080_v0, %v1082_v41  ;;  %v10778_v48 = vunpack.c.l.bf16 %v7976_v34 }
  0x90   : > { %v3474_v18 = vrot.slane %v10775_v55, 2  ;;  %6675 = vmatprep.mubr.msk.bf16.mxu0 %vm577_vm2, %v8402_v16  ;;  %v3475_v60 = vrot.slane %v10776_v54, 2  ;;  %v3477_v39 = vrot.slane %v10777_v2, 2  ;;  %v8885_v12 = vpack.c.bf16 %v1083_v23, %v1081_v19 }
  0x91   : > { %6978 = vmatmul.mubr.msk.bf16.gmra.mrb[20].mxu1 %vm2974_vm3, %v8375_v59  ;;  %v1014_v45 = vrot.slane %v10778_v48, 2  ;;  %v10779_v0 = vunpack.c.h.bf16 %v7976_v34  ;;  %v10781_v41 = vunpack.c.l.bf16 %v10780_v56  ;;  %v10783_v19 = vunpack.c.h.bf16 %v7998_v47 }
  0x92   : > { %6981 = vmatprep.mubr.msk.bf16.mxu1 %vm2974_vm3, %v8420_v31  ;;  %v3476_v29 = vsel %vm1003_vm4, %v3474_v18, %v3475_v60  ;;  %v3478_v14 = vsel %vm1003_vm4, %v3475_v60, %v3477_v39  ;;  %v10782_v18 = vunpack.c.l.bf16 %v7998_v47  ;;  %v10784_v60 = vld [vmem:[#allocation4_spill] sm:$0xff]  ;;  %v10786_v23 = vpack.c.bf16 %v8639_v26, %v8636_v5 }
  0x93   : > { %v8889_v43 = vpack.c.bf16 %v3478_v14, %v3476_v29  ;;  %v1015_v10 = vrot.slane %v10779_v0, 2  ;;  %v1017_v55 = vrot.slane %v10781_v41, 2  ;;  %v3410_v54 = vrot.slane %v10783_v19, 2 }
  0x94   : > { %v3409_v11 = vrot.slane %v10782_v18, 2  ;;  %v10785_v2 = vunpack.c.l.bf16 %v10784_v60  ;;  %v10787_v48 = vpack.c.bf16 %v8650_v33, %v8647_v6  ;;  %v10789_v5 = vunpack.c.l.bf16 %v8009_v52 }
  0x95   : > { %v1016_v29 = vsel %vm1003_vm4, %v1014_v45, %v1015_v10  ;;  %v1018_v14 = vsel %vm1003_vm4, %v1015_v10, %v1017_v55  ;;  %v10790_v18 = vunpack.c.h.bf16 %v8009_v52  ;;  %v10791_v45 = vld [vmem:[#allocation6_spill] sm:$0xff]  ;;  %v1385_v6 = vsel %vm626_vm0, %v8644_v22, 0 }
  0x96   : > { %v3412_v39 = vrot.slane %v10785_v2, 2  ;;  %v3411_v0 = vsel %vm1003_vm4, %v3409_v11, %v3410_v54  ;;  %v8927_v41 = vpack.c.bf16 %v1018_v14, %v1016_v29  ;;  %v1019_v26 = vrot.slane %v10789_v5, 2  ;;  %v10795_v2 = vld [vmem:[#allocation10_spill] sm:$0xff] }
  0x97   : > { %6676 = vmatmul.mubr.msk.bf16.gmra.mrb[24].mxu0 %vm577_vm2, %v10753_v40  ;;  %v1020_v19 = vrot.slane %v10790_v18, 2  ;;  %v10792_v60 = vunpack.c.l.bf16 %v10791_v45  ;;  %v10793_v33 = vunpack.c.l.bf16 %v8065_v30  ;;  %v10794_v11 = vunpack.c.h.bf16 %v8065_v30  ;;  %v10800_v45 = vld [vmem:[#allocation8_spill] sm:$0xff] }
  0x98   : > { %6679 = vmatprep.mubr.msk.bf16.mxu0 %vm577_vm2, %v10763_v32  ;;  %v3413_v56 = vsel %vm1003_vm4, %v3410_v54, %v3412_v39  ;;  %10788 = vst [vmem:[#allocation45_spill] sm:$0xff] %v8927_v41  ;;  %v10796_v39 = vunpack.c.l.bf16 %v10795_v2  ;;  %v10798_v14 = vunpack.c.l.bf16 %v8050_v21  ;;  %v10799_v5 = vunpack.c.h.bf16 %v8050_v21 }
  0x99   : > { %6982 = vmatmul.mubr.msk.bf16.gmra.mrb[24].mxu1 %vm2974_vm3, %v10758_v62  ;;  %v1022_v10 = vrot.slane %v10792_v60, 2  ;;  %v1024_v55 = vrot.slane %v10793_v33, 2  ;;  %v1025_v54 = vrot.slane %v10794_v11, 2  ;;  %v8943_v29 = vpack.c.bf16 %v3413_v56, %v3411_v0  ;;  %v8954_v33 = vld [vmem:[%s10393_s2 + $0x10] sm:$0xf] }
  0x9a   : > { %6985 = vmatprep.mubr.msk.bf16.mxu1 %vm2974_vm3, %v10768_v25  ;;  %v3415_v18 = vrot.slane %v10799_v5, 2  ;;  %v10801_v60 = vunpack.c.l.bf16 %v10800_v45  ;;  %v10802_v0 = vunpack.c.l.bf16 %v8091_v58  ;;  %v10803_v11 = vunpack.c.h.bf16 %v8091_v58  ;;  %v8967_v45 = vld [vmem:[%s10395_s4 + $0x20] sm:$0xff]  }
  0x9b   : > { %10797 = vst [vmem:[#allocation48_spill] sm:$0xff] %v8943_v29 }
  0x9c   : > { %v3417_v22 = vrot.slane %v10801_v60, 2  ;;  %v3419_v56 = vrot.slane %v10802_v0, 2  ;;  %v3420_v2 = vrot.slane %v10803_v11, 2  ;;  %v1021_v60 = vsel %vm1003_vm4, %v1019_v26, %v1020_v19 }
  0x9d   : > { %v1026_v0 = vsel %vm1003_vm4, %v1024_v55, %v1025_v54 }
  0x9e   : > { %v3418_v26 = vsel %vm1003_vm4, %v3415_v18, %v3417_v22 }
  0x9f   : > { %6680 = vmatmul.mubr.msk.bf16.gmra.mrb[28].mxu0 %vm577_vm2, %v8532_v50 }
  0xa0   : > { %6685 = vmatprep.mubr.msk.bf16.mxu0 %vm577_vm2, %v10786_v23  ;;  %v1027_v23 = vrot.slane %v10796_v39, 2  ;;  %v10804_v39 = vld [vmem:[#allocation12_spill] sm:$0xff] }
  0xa1   : > { %6986 = vmatmul.mubr.msk.bf16.gmra.mrb[28].mxu1 %vm2974_vm3, %v8543_v28 }
  0xa2   : > { %6991 = vmatprep.mubr.msk.bf16.mxu1 %vm2974_vm3, %v10787_v48  ;;  %v3414_v48 = vrot.slane %v10798_v14, 2  ;;  %v10805_v14 = vunpack.c.l.bf16 %v10804_v39  ;;  %v1028_v11 = vsel %vm1003_vm4, %v1025_v54, %v1027_v23  ;;  %v10807_v23 = vunpack.c.l.bf16 %v8105_v24 }
  0xa3   : > { %v8989_v54 = vpack.c.bf16 %v1028_v11, %v1026_v0  ;;  %v10808_v39 = vunpack.c.h.bf16 %v8105_v24 }
  0xa4   : > { %v3422_v5 = vrot.slane %v10805_v14, 2 }
  0xa5   : > { %10806 = vst [vmem:[#allocation51_spill] sm:$0xff] %v8989_v54  ;;  %v1030_v14 = vrot.slane %v10808_v39, 2  ;;  %v10818_v39 = vunpack.c.h.bf16 %v8130_v53 }
  0xa6   : > { %v3423_v55 = vsel %vm1003_vm4, %v3420_v2, %v3422_v5  ;;  %v10814_v5 = vld [vmem:[#allocation18_spill] sm:$0xff] }
  0xa7   : > { %6686 = vmatmul.mubr.msk.bf16.vlgmr.msra.gmra.mrb[0].mxu0 %vm577_vm2, %v8667_v42  ;;  %v1023_v42 = vsel %vm1003_vm4, %v1020_v19, %v1022_v10  ;;  %v3421_v10 = vsel %vm1003_vm4, %v3419_v56, %v3420_v2  ;;  %v10813_v56 = vunpack.c.h.bf16 %v8149_v37 }
  0xa8   : > { %6718 = vmatpush3.bf16.msra.mxu0 %v1385_v6  ;;  %6689 = vmatprep.mubr.msk.bf16.mxu0 %vm577_vm2, %v8927_v41  ;;  %v3416_v6 = vsel %vm1003_vm4, %v3414_v48, %v3415_v18  ;;  %v8984_v19 = vpack.c.bf16 %v1023_v42, %v1021_v60  ;;  %v10812_v42 = vunpack.c.l.bf16 %v8149_v37  ;;  %v10815_v60 = vunpack.c.l.bf16 %v10814_v5 }
  0xa9   : > { %6992 = vmatmul.mubr.msk.bf16.vlgmr.msra.gmra.mrb[0].mxu1 %vm2974_vm3, %v8675_v46  ;;  %7743 = vmatprep.subr.msk.bf16.mxu0 %vm626_vm0, %v8954_v33  ;;  %v8997_v18 = vpack.c.bf16 %v3418_v26, %v3416_v6  ;;  %v1035_v2 = vrot.slane %v10813_v56, 2  ;;  %v9005_v11 = vpack.c.bf16 %v3423_v55, %v3421_v10  ;;  %v10822_v5 = vunpack.c.h.bf16 %v8177_v35  ;;  %v10823_v10 = vld [vmem:[#allocation20_spill] sm:$0xff] }
  0xaa   : > { %7024 = vmatpush3.bf16.msra.mxu1 %v8661_v38  ;;  %6995 = vmatprep.mubr.msk.bf16.mxu1 %vm2974_vm3, %v8943_v29  ;;  %v1029_v38 = vrot.slane %v10807_v23, 2  ;;  %v10809_v29 = vld [vmem:[#allocation14_spill] sm:$0xff]  ;;  %v1034_v22 = vrot.slane %v10812_v42, 2  ;;  %v1037_v0 = vrot.slane %v10815_v60, 2  ;;  %v10817_v23 = vunpack.c.l.bf16 %v8130_v53 }
  0xab   : > { %7057 = vmatprep.subr.bf16.mxu1 %v8967_v45  ;;  %v10810_v48 = vunpack.c.l.bf16 %v10809_v29  ;;  %10811 = vst [vmem:[#allocation54_spill] sm:$0xff] %v8997_v18  ;;  %10816 = vst [vmem:[#allocation3_spill] sm:$0xff] %v9005_v11  ;;  %v3425_v29 = vrot.slane %v10818_v39, 2  ;;  %v10821_v42 = vunpack.c.l.bf16 %v8177_v35  ;;  %v3430_v60 = vrot.slane %v10822_v5, 2 }
  0xac   : > { %v3424_v46 = vrot.slane %v10817_v23, 2  ;;  %v10824_v55 = vunpack.c.l.bf16 %v10823_v10  ;;  %v1031_v23 = vsel %vm1003_vm4, %v1029_v38, %v1030_v14 }
  0xad   : > { %v1032_v41 = vrot.slane %v10810_v48, 2  ;;  %v10819_v48 = vld [vmem:[#allocation15_spill] sm:$0xff]  ;;  %v3429_v56 = vrot.slane %v10821_v42, 2 }
  0xae   : > { %v10820_v6 = vunpack.c.l.bf16 %v10819_v48  ;;  %v3432_v28 = vrot.slane %v10824_v55, 2  ;;  %v1036_v48 = vsel %vm1003_vm4, %v1034_v22, %v1035_v2  ;;  %v3426_v42 = vsel %vm1003_vm4, %v3424_v46, %v3425_v29 }
  0xaf   : > { %6690 = vmatmul.mubr.msk.bf16.gmra.mrb[4].mxu0 %vm577_vm2, %v8984_v19  ;;  %v1033_v39 = vsel %vm1003_vm4, %v1030_v14, %v1032_v41  ;;  %v3431_v38 = vsel %vm1003_vm4, %v3429_v56, %v3430_v60  ;;  %v10825_v55 = vunpack.c.l.bf16 %v8188_v20  ;;  %v5984_v56 = vld [vmem:[%s10393_s2 + $0x14] sm:$0xf] }
  0xb0   : > { %v3427_v26 = vrot.slane %v10820_v6, 2  ;;  %6693 = vmatprep.mubr.msk.bf16.mxu0 %vm577_vm2, %v8989_v54  ;;  %v1038_v6 = vsel %vm1003_vm4, %v1035_v2, %v1037_v0  ;;  %v9033_v10 = vpack.c.bf16 %v1033_v39, %v1031_v23  ;;  %v3433_v41 = vsel %vm1003_vm4, %v3430_v60, %v3432_v28  ;;  %v10827_v54 = vld [vmem:[#allocation22_spill] sm:$0xff]  ;;  %v10833_v23 = vld [vmem:[#allocation27_spill] sm:$0xff] }
  0xb1   : > { %6996 = vmatmul.mubr.msk.bf16.gmra.mrb[4].mxu1 %vm2974_vm3, %v8997_v18  ;;  %v9037_v14 = vpack.c.bf16 %v1038_v6, %v1036_v48  ;;  %v1039_v22 = vrot.slane %v10825_v55, 2  ;;  %v10826_v2 = vunpack.c.h.bf16 %v8188_v20  ;;  %v10832_v60 = vld [vmem:[#allocation30_spill] sm:$0xff]  ;;  %v10834_v39 = vld [vmem:[#allocation31_spill] sm:$0xff]  ;;  %v10835_v48 = vld [vmem:[#allocation33_spill] sm:$0xff] }
  0xb2   : > { %6999 = vmatprep.mubr.msk.bf16.mxu1 %vm2974_vm3, %v9005_v11  ;;  %v3428_v5 = vsel %vm1003_vm4, %v3425_v29, %v3427_v26  ;;  %v10828_v11 = vunpack.c.l.bf16 %v10827_v54  ;;  %v9047_v29 = vpack.c.bf16 %v3433_v41, %v3431_v38  ;;  %v10836_v6 = vld [vmem:[#allocation35_spill] sm:$0xff] }
  0xb3   : > { %v1040_v0 = vrot.slane %v10826_v2, 2  ;;  %v9045_v46 = vpack.c.bf16 %v3428_v5, %v3426_v42  ;;  %v9163_v42 = vld [vmem:[%s7917_s10 + $0xc0] sm:$0xff]   ;;  %v323_v41 = vld [vmem:[%s7917_s10 + $0xc8] sm:$0x1] }
  0xb4   : > { %v1042_v18 = vrot.slane %v10828_v11, 2  ;;  %v1597_v11 = vsel %vm626_vm0, %v8954_v33, 0  ;;  %v10830_v33 = vld [vmem:[#allocation24_spill] sm:$0xff]  ;;  %v375_v5 = vunpack.c.l.bf16 %v9163_v42  ;;  %v376_v38 = vunpack.c.h.bf16 %v9163_v42  ;;  %v9169_v2 = vld [vmem:[%s7922_s13 + $0xc0] sm:$0xff]  }
  0xb5   : > { %v1041_v28 = vsel %vm1003_vm4, %v1039_v22, %v1040_v0 }
  0xb6   : > { %v1043_v26 = vsel %vm1003_vm4, %v1040_v0, %v1042_v18  ;;  %v10829_v18 = vld [vmem:[#allocation2_spill] sm:$0xff]  ;;  %v1792_v55 = vrot.slane %v375_v5, 2  ;;  %v1793_v22 = vrot.slane %v376_v38, 2  ;;  %v2765_v0 = vunpack.c.l.bf16 %v9169_v2 }
  0xb7   : > { %6694 = vmatmul.mubr.msk.bf16.gmra.mrb[8].mxu0 %vm577_vm2, %v9033_v10  ;;  %v9059_v54 = vpack.c.bf16 %v1043_v26, %v1041_v28  ;;  %v2713_v28 = vld [vmem:[%s7922_s13 + $0xc8] sm:$0x1]  ;;  %v2766_v26 = vunpack.c.h.bf16 %v9169_v2 }
  0xb8   : > { %6697 = vmatprep.mubr.msk.bf16.mxu0 %vm577_vm2, %v9037_v14 }
  0xb9   : > { %7000 = vmatmul.mubr.msk.bf16.gmra.mrb[8].mxu1 %vm2974_vm3, %v9045_v46 }
  0xba   : > { %7003 = vmatprep.mubr.msk.bf16.mxu1 %vm2974_vm3, %v9047_v29 }
  0xbf   : > { %6698 = vmatmul.mubr.msk.bf16.gmra.mrb[12].mxu0 %vm577_vm2, %v9059_v54 }
  0xc0   : > { %6701 = vmatprep.mubr.msk.bf16.mxu0 %vm577_vm2, %v8725_v1 }
  0xc1   : > { %7004 = vmatmul.mubr.msk.bf16.gmra.mrb[12].mxu1 %vm2974_vm3, %v8711_v3 }
  0xc2   : > { %7007 = vmatprep.mubr.msk.bf16.mxu1 %vm2974_vm3, %v8740_v57 }
  0xc7   : > { %6702 = vmatmul.mubr.msk.bf16.gmra.mrb[16].mxu0 %vm577_vm2, %v8749_v27 }
  0xc8   : > { %6705 = vmatprep.mubr.msk.bf16.mxu0 %vm577_vm2, %v8773_v7 }
  0xc9   : > { %7008 = vmatmul.mubr.msk.bf16.gmra.mrb[16].mxu1 %vm2974_vm3, %v8757_v15 }
  0xca   : > { %7011 = vmatprep.mubr.msk.bf16.mxu1 %vm2974_vm3, %v8786_v49 }
  0xcf   : > { %6706 = vmatmul.mubr.msk.bf16.gmra.mrb[20].mxu0 %vm577_vm2, %v8793_v36 }
  0xd0   : > { %6709 = vmatprep.mubr.msk.bf16.mxu0 %vm577_vm2, %v8819_v17 }
  0xd1   : > { %7012 = vmatmul.mubr.msk.bf16.gmra.mrb[20].mxu1 %vm2974_vm3, %v8801_v8 }
  0xd2   : > { %7015 = vmatprep.mubr.msk.bf16.mxu1 %vm2974_vm3, %v8834_v63 }
  0xd7   : > { %6710 = vmatmul.mubr.msk.bf16.gmra.mrb[24].mxu0 %vm577_vm2, %v8841_v61 }
  0xd8   : > { %6713 = vmatprep.mubr.msk.bf16.mxu0 %vm577_vm2, %v8863_v51 }
  0xd9   : > { %7016 = vmatmul.mubr.msk.bf16.gmra.mrb[24].mxu1 %vm2974_vm3, %v8847_v4 }
  0xda   : > { %7019 = vmatprep.mubr.msk.bf16.mxu1 %vm2974_vm3, %v8880_v44 }
  0xdf   : > { %6714 = vmatmul.mubr.msk.bf16.gmra.mrb[28].mxu0 %vm577_vm2, %v8885_v12 }
  0xe0   : > { %6719 = vmatprep.mubr.msk.bf16.mxu0 %vm577_vm2, %v7941_v13  ;;  %v9111_v13 = vld [vmem:[%s10395_s4 + $0x28] sm:$0xff]  }
  0xe1   : > { %7020 = vmatmul.mubr.msk.bf16.gmra.mrb[28].mxu1 %vm2974_vm3, %v8889_v43 }
  0xe2   : > { %7025 = vmatprep.mubr.msk.bf16.mxu1 %vm2974_vm3, %v10829_v18  ;;  %v377_v18 = vunpack.c.l.bf16 %v323_v41 }
  0xe7   : > { %6720 = vmatmul.mubr.msk.bf16.vlgmr.msra.gmra.mrb[0].mxu0 %vm577_vm2, %v7976_v34 }
  0xe8   : > { %6752 = vmatpush3.bf16.msra.mxu0 %v1597_v11  ;;  %6723 = vmatprep.mubr.msk.bf16.mxu0 %vm577_vm2, %v8009_v52  ;;  %v4199_v11 = vrot.slane %v2765_v0, 2 }
  0xe9   : > { %7026 = vmatmul.mubr.msk.bf16.vlgmr.msra.gmra.mrb[0].mxu1 %vm2974_vm3, %v7998_v47  ;;  %7744 = vmatprep.subr.msk.bf16.mxu0 %vm626_vm0, %v5984_v56 }
  0xea   : > { %7058 = vmatpush3.bf16.msra.mxu1 %v8967_v45  ;;  %7029 = vmatprep.mubr.msk.bf16.mxu1 %vm2974_vm3, %v8050_v21  ;;  %v10831_v45 = vld [vmem:[#allocation25_spill] sm:$0xff] }
  0xeb   : > { %7091 = vmatprep.subr.bf16.mxu1 %v9111_v13 }
  0xef   : > { %6724 = vmatmul.mubr.msk.bf16.gmra.mrb[4].mxu0 %vm577_vm2, %v8065_v30 }
  0xf0   : > { %6727 = vmatprep.mubr.msk.bf16.mxu0 %vm577_vm2, %v8105_v24 }
  0xf1   : > { %7030 = vmatmul.mubr.msk.bf16.gmra.mrb[4].mxu1 %vm2974_vm3, %v8091_v58 }
  0xf2   : > { %7033 = vmatprep.mubr.msk.bf16.mxu1 %vm2974_vm3, %v8130_v53 }
  0xf7   : > { %6728 = vmatmul.mubr.msk.bf16.gmra.mrb[8].mxu0 %vm577_vm2, %v8149_v37 }
  0xf8   : > { %6731 = vmatprep.mubr.msk.bf16.mxu0 %vm577_vm2, %v8188_v20 }
  0xf9   : > { %7034 = vmatmul.mubr.msk.bf16.gmra.mrb[8].mxu1 %vm2974_vm3, %v8177_v35 }
  0xfa   : > { %7037 = vmatprep.mubr.msk.bf16.mxu1 %vm2974_vm3, %v10830_v33 }
  0xff   : > { %6732 = vmatmul.mubr.msk.bf16.gmra.mrb[12].mxu0 %vm577_vm2, %v10831_v45 }
 0x100   : > { %6735 = vmatprep.mubr.msk.bf16.mxu0 %vm577_vm2, %v10832_v60 }
 0x101   : > { %7038 = vmatmul.mubr.msk.bf16.gmra.mrb[12].mxu1 %vm2974_vm3, %v10833_v23 }
 0x102   : > { %7041 = vmatprep.mubr.msk.bf16.mxu1 %vm2974_vm3, %v10834_v39 }
 0x107   : > { %6736 = vmatmul.mubr.msk.bf16.gmra.mrb[16].mxu0 %vm577_vm2, %v10835_v48 }
 0x108   : > { %6739 = vmatprep.mubr.msk.bf16.mxu0 %vm577_vm2, %v8364_v9 }
 0x109   : > { %7042 = vmatmul.mubr.msk.bf16.gmra.mrb[16].mxu1 %vm2974_vm3, %v10836_v6 }
 0x10a   : > { %7045 = vmatprep.mubr.msk.bf16.mxu1 %vm2974_vm3, %v8375_v59  ;;  %v1795_v59 = vrot.slane %v377_v18, 2 }
 0x10f   : > { %6740 = vmatmul.mubr.msk.bf16.gmra.mrb[20].mxu0 %vm577_vm2, %v8402_v16  ;;  %v1796_v16 = vsel %vm1003_vm4, %v1793_v22, %v1795_v59  ;;  %v1806_v59 = vsel %vm626_vm0, %v5984_v56, 0  ;;  %v10844_v56 = vld [vmem:[#allocation17_spill] sm:$0xff] }
 0x110   : > { %6743 = vmatprep.mubr.msk.bf16.mxu0 %vm577_vm2, %v10753_v40  ;;  %v4200_v40 = vrot.slane %v2766_v26, 2 }
 0x111   : > { %7046 = vmatmul.mubr.msk.bf16.gmra.mrb[20].mxu1 %vm2974_vm3, %v8420_v31  ;;  %v2767_v31 = vunpack.c.l.bf16 %v2713_v28  ;;  %v10846_v28 = vld [vmem:[#allocation19_spill] sm:$0xff] }
 0x112   : > { %7049 = vmatprep.mubr.msk.bf16.mxu1 %vm2974_vm3, %v10758_v62  ;;  %v10837_v62 = vld [vmem:[#allocation59_spill] sm:$0xff] }
 0x113   : > { %v4202_v9 = vrot.slane %v2767_v31, 2 }
 0x115   : > { %v4203_v41 = vsel %vm1003_vm4, %v4200_v40, %v4202_v9  ;;  %v6002_v9 = vld [vmem:[%s10393_s2 + $0x18] sm:$0xf] }
 0x117   : > { %6744 = vmatmul.mubr.msk.bf16.gmra.mrb[24].mxu0 %vm577_vm2, %v10763_v32  ;;  %v1794_v32 = vsel %vm1003_vm4, %v1792_v55, %v1793_v22  ;;  %v10839_v55 = vld [vmem:[#allocation7_spill] sm:$0xff]  ;;  %v10845_v22 = vld [vmem:[#allocation21_spill] sm:$0xff] }
 0x118   : > { %6747 = vmatprep.mubr.msk.bf16.mxu0 %vm577_vm2, %v8532_v50  ;;  %v9184_v6 = vpack.c.bf16 %v1796_v16, %v1794_v32  ;;  %v4201_v50 = vsel %vm1003_vm4, %v4199_v11, %v4200_v40  ;;  %v10840_v16 = vld [vmem:[#allocation9_spill] sm:$0xff]  ;;  %v10843_v32 = vld [vmem:[#allocation16_spill] sm:$0xff]  ;;  %v10847_v11 = vld [vmem:[#allocation23_spill] sm:$0xff] }
 0x119   : > { %7050 = vmatmul.mubr.msk.bf16.gmra.mrb[24].mxu1 %vm2974_vm3, %v10768_v25  ;;  %v9190_v25 = vpack.c.bf16 %v4203_v41, %v4201_v50  ;;  %v7798_v50 = vld [vmem:[%s10395_s4 + $0x30] sm:$0xff]   ;;  %v10841_v40 = vld [vmem:[#allocation13_spill] sm:$0xff]  ;;  %v10848_v41 = vld [vmem:[#allocation26_spill] sm:$0xff] }
 0x11a   : > { %7053 = vmatprep.mubr.msk.bf16.mxu1 %vm2974_vm3, %v10837_v62  ;;  %v10838_v62 = vld [vmem:[#allocation5_spill] sm:$0xff] }
 0x11f   : > { %6748 = vmatmul.mubr.msk.bf16.gmra.mrb[28].mxu0 %vm577_vm2, %v9163_v42 }
 0x120   : > { %6753 = vmatprep.mubr.msk.bf16.mxu0 %vm577_vm2, %v10838_v62  ;;  %v10842_v62 = vld [vmem:[#allocation11_spill] sm:$0xff] }
 0x121   : > { %7054 = vmatmul.mubr.msk.bf16.gmra.mrb[28].mxu1 %vm2974_vm3, %v9169_v2 }
 0x122   : > { %7059 = vmatprep.mubr.msk.bf16.mxu1 %vm2974_vm3, %v10839_v55  ;;  %v10850_v55 = vld [vmem:[#allocation28_spill] sm:$0xff] }
 0x127   : > { %6754 = vmatmul.mubr.msk.bf16.vlgmr.msra.gmra.mrb[0].mxu0 %vm577_vm2, %v10840_v16  ;;  %v10864_v16 = vld [vmem:[#allocation61_spill] sm:$0xff] }
 0x128   : > { %6786 = vmatpush3.bf16.msra.mxu0 %v1806_v59  ;;  %6757 = vmatprep.mubr.msk.bf16.mxu0 %vm577_vm2, %v10841_v40  ;;  %v10851_v59 = vld [vmem:[#allocation32_spill] sm:$0xff]  ;;  %v3986_v40 = vrot.slane %v2765_v0, 1 }
 0x129   : > { %7060 = vmatmul.mubr.msk.bf16.vlgmr.msra.gmra.mrb[0].mxu1 %vm2974_vm3, %v10842_v62  ;;  %7745 = vmatprep.subr.msk.bf16.mxu0 %vm626_vm0, %v6002_v9  ;;  %v3989_v62 = vrot.slane %v2767_v31, 1 }
 0x12a   : > { %7092 = vmatpush3.bf16.msra.mxu1 %v9111_v13  ;;  %7063 = vmatprep.mubr.msk.bf16.mxu1 %vm2974_vm3, %v10843_v32  ;;  %v10849_v13 = vld [vmem:[#allocation29_spill] sm:$0xff]  ;;  %v10852_v32 = vld [vmem:[#allocation34_spill] sm:$0xff] }
 0x12b   : > { %7125 = vmatprep.subr.bf16.mxu1 %v7798_v50 }
 0x12f   : > { %6758 = vmatmul.mubr.msk.bf16.gmra.mrb[4].mxu0 %vm577_vm2, %v10844_v56  ;;  %v1586_v56 = vrot.slane %v377_v18, 1  ;;  %v10869_v18 = vld [vmem:[#allocation66_spill] sm:$0xff] }
 0x130   : > { %6761 = vmatprep.mubr.msk.bf16.mxu0 %vm577_vm2, %v10845_v22  ;;  %v10853_v22 = vld [vmem:[#allocation37_spill] sm:$0xff] }
 0x131   : > { %7064 = vmatmul.mubr.msk.bf16.gmra.mrb[4].mxu1 %vm2974_vm3, %v10846_v28  ;;  %v10854_v28 = vld [vmem:[#allocation36_spill] sm:$0xff] }
 0x132   : > { %7067 = vmatprep.mubr.msk.bf16.mxu1 %vm2974_vm3, %v10847_v11  ;;  %v10855_v11 = vld [vmem:[#allocation40_spill] sm:$0xff] }
 0x137   : > { %6762 = vmatmul.mubr.msk.bf16.gmra.mrb[8].mxu0 %vm577_vm2, %v10848_v41  ;;  %v10856_v41 = vld [vmem:[#allocation42_spill] sm:$0xff] }
 0x138   : > { %6765 = vmatprep.mubr.msk.bf16.mxu0 %vm577_vm2, %v10849_v13  ;;  %v10857_v13 = vld [vmem:[#allocation46_spill] sm:$0xff] }
 0x139   : > { %7068 = vmatmul.mubr.msk.bf16.gmra.mrb[8].mxu1 %vm2974_vm3, %v10850_v55  ;;  %v10858_v55 = vld [vmem:[#allocation44_spill] sm:$0xff] }
 0x13a   : > { %7071 = vmatprep.mubr.msk.bf16.mxu1 %vm2974_vm3, %v10851_v59  ;;  %v10859_v59 = vld [vmem:[#allocation50_spill] sm:$0xff] }
 0x13f   : > { %6766 = vmatmul.mubr.msk.bf16.gmra.mrb[12].mxu0 %vm577_vm2, %v10852_v32  ;;  %v10860_v32 = vld [vmem:[#allocation53_spill] sm:$0xff] }
 0x140   : > { %6769 = vmatprep.mubr.msk.bf16.mxu0 %vm577_vm2, %v10853_v22  ;;  %v10861_v22 = vld [vmem:[#allocation57_spill] sm:$0xff] }
 0x141   : > { %7072 = vmatmul.mubr.msk.bf16.gmra.mrb[12].mxu1 %vm2974_vm3, %v10854_v28  ;;  %v10862_v28 = vld [vmem:[#allocation56_spill] sm:$0xff] }
 0x142   : > { %7075 = vmatprep.mubr.msk.bf16.mxu1 %vm2974_vm3, %v10855_v11  ;;  %v10863_v11 = vld [vmem:[#allocation60_spill] sm:$0xff] }
 0x147   : > { %6770 = vmatmul.mubr.msk.bf16.gmra.mrb[16].mxu0 %vm577_vm2, %v10856_v41  ;;  %v1583_v41 = vrot.slane %v375_v5, 1 }
 0x148   : > { %6773 = vmatprep.mubr.msk.bf16.mxu0 %vm577_vm2, %v10857_v13  ;;  %v1584_v13 = vrot.slane %v376_v38, 1 }
 0x149   : > { %7076 = vmatmul.mubr.msk.bf16.gmra.mrb[16].mxu1 %vm2974_vm3, %v10858_v55  ;;  %v3987_v55 = vrot.slane %v2766_v26, 1  ;;  %v10868_v26 = vld [vmem:[#allocation65_spill] sm:$0xff] }
 0x14a   : > { %7079 = vmatprep.mubr.msk.bf16.mxu1 %vm2974_vm3, %v10859_v59  ;;  %v10865_v59 = vld [vmem:[#allocation63_spill] sm:$0xff] }
 0x14b   : > { %v3988_v5 = vsel %vm446_vm1, %v3986_v40, %v3987_v55  ;;  %v3990_v31 = vsel %vm446_vm1, %v3987_v55, %v3989_v62  ;;  %v2008_v40 = vsel %vm626_vm0, %v6002_v9, 0  ;;  %v6019_v62 = vld [vmem:[%s10393_s2 + $0x1c] sm:$0xf]  ;;  %v10872_v9 = vld [vmem:[#allocation54_spill] sm:$0xff] }
 0x14c   : > { %v9269_v0 = vpack.c.bf16 %v3990_v31, %v3988_v5  ;;  %v6036_v55 = vld [vmem:[%s10393_s2 + $0x20] sm:$0xf] }
 0x14d   : > { %v9360_v5 = vld [vmem:[%s10395_s4 + $0x40] sm:$0xff]  }
 0x14f   : > { %6774 = vmatmul.mubr.msk.bf16.gmra.mrb[20].mxu0 %vm577_vm2, %v10860_v32  ;;  %v1587_v32 = vsel %vm446_vm1, %v1584_v13, %v1586_v56  ;;  %v7799_v56 = vld [vmem:[%s10395_s4 + $0x38] sm:$0xff]  }
 0x150   : > { %6777 = vmatprep.mubr.msk.bf16.mxu0 %vm577_vm2, %v10861_v22  ;;  %v1585_v22 = vsel %vm446_vm1, %v1583_v41, %v1584_v13  ;;  %v10873_v41 = vld [vmem:[#allocation51_spill] sm:$0xff] }
 0x151   : > { %7080 = vmatmul.mubr.msk.bf16.gmra.mrb[20].mxu1 %vm2974_vm3, %v10862_v28  ;;  %v10866_v28 = vld [vmem:[#allocation62_spill] sm:$0xff]  ;;  %v9267_v38 = vpack.c.bf16 %v1587_v32, %v1585_v22  ;;  %v10870_v32 = vld [vmem:[#allocation45_spill] sm:$0xff]  ;;  %v10871_v22 = vld [vmem:[#allocation48_spill] sm:$0xff] }
 0x152   : > { %7083 = vmatprep.mubr.msk.bf16.mxu1 %vm2974_vm3, %v10863_v11  ;;  %v10867_v11 = vld [vmem:[#allocation64_spill] sm:$0xff]  ;;  %v10874_v13 = vld [vmem:[#allocation3_spill] sm:$0xff] }
 0x157   : > { %6778 = vmatmul.mubr.msk.bf16.gmra.mrb[24].mxu0 %vm577_vm2, %v10864_v16 }
 0x158   : > { %6781 = vmatprep.mubr.msk.bf16.mxu0 %vm577_vm2, %v10865_v59 }
 0x159   : > { %7084 = vmatmul.mubr.msk.bf16.gmra.mrb[24].mxu1 %vm2974_vm3, %v10866_v28 }
 0x15a   : > { %7087 = vmatprep.mubr.msk.bf16.mxu1 %vm2974_vm3, %v10867_v11 }
 0x15f   : > { %6782 = vmatmul.mubr.msk.bf16.gmra.mrb[28].mxu0 %vm577_vm2, %v9267_v38 }
 0x160   : > { %6787 = vmatprep.mubr.msk.bf16.mxu0 %vm577_vm2, %v10868_v26  ;;  %v2716_v26 = vld [vmem:[%s7922_s13 + $0xd4] sm:$0x1] }
 0x161   : > { %7088 = vmatmul.mubr.msk.bf16.gmra.mrb[28].mxu1 %vm2974_vm3, %v9269_v0 }
 0x162   : > { %7093 = vmatprep.mubr.msk.bf16.mxu1 %vm2974_vm3, %v10869_v18 }
 0x167   : > { %6788 = vmatmul.mubr.msk.bf16.vlgmr.msra.gmra.mrb[0].mxu0 %vm577_vm2, %v10870_v32 }
 0x168   : > { %6820 = vmatpush3.bf16.msra.mxu0 %v2008_v40  ;;  %6791 = vmatprep.mubr.msk.bf16.mxu0 %vm577_vm2, %v8984_v19 }
 0x169   : > { %7094 = vmatmul.mubr.msk.bf16.vlgmr.msra.gmra.mrb[0].mxu1 %vm2974_vm3, %v10871_v22  ;;  %7746 = vmatprep.subr.msk.bf16.mxu0 %vm626_vm0, %v6019_v62 }
 0x16a   : > { %7126 = vmatpush3.bf16.msra.mxu1 %v7798_v50  ;;  %7097 = vmatprep.mubr.msk.bf16.mxu1 %vm2974_vm3, %v10872_v9  ;;  %v2220_v50 = vsel %vm626_vm0, %v6019_v62, 0  ;;  %v10885_v62 = vld [vmem:[#allocation59_spill] sm:$0xff] }
 0x16b   : > { %7159 = vmatprep.subr.bf16.mxu1 %v7799_v56 }
 0x16f   : > { %6792 = vmatmul.mubr.msk.bf16.gmra.mrb[4].mxu0 %vm577_vm2, %v10873_v41 }
 0x170   : > { %6795 = vmatprep.mubr.msk.bf16.mxu0 %vm577_vm2, %v9033_v10 }
 0x171   : > { %7098 = vmatmul.mubr.msk.bf16.gmra.mrb[4].mxu1 %vm2974_vm3, %v10874_v13 }
 0x172   : > { %7101 = vmatprep.mubr.msk.bf16.mxu1 %vm2974_vm3, %v9045_v46 }
 0x177   : > { %6796 = vmatmul.mubr.msk.bf16.gmra.mrb[8].mxu0 %vm577_vm2, %v9037_v14 }
 0x178   : > { %6799 = vmatprep.mubr.msk.bf16.mxu0 %vm577_vm2, %v9059_v54 }
 0x179   : > { %7102 = vmatmul.mubr.msk.bf16.gmra.mrb[8].mxu1 %vm2974_vm3, %v9047_v29 }
 0x17a   : > { %7105 = vmatprep.mubr.msk.bf16.mxu1 %vm2974_vm3, %v8711_v3 }
 0x17f   : > { %6800 = vmatmul.mubr.msk.bf16.gmra.mrb[12].mxu0 %vm577_vm2, %v8725_v1 }
 0x180   : > { %6803 = vmatprep.mubr.msk.bf16.mxu0 %vm577_vm2, %v8749_v27 }
 0x181   : > { %7106 = vmatmul.mubr.msk.bf16.gmra.mrb[12].mxu1 %vm2974_vm3, %v8740_v57 }
 0x182   : > { %7109 = vmatprep.mubr.msk.bf16.mxu1 %vm2974_vm3, %v8757_v15 }
 0x187   : > { %6804 = vmatmul.mubr.msk.bf16.gmra.mrb[16].mxu0 %vm577_vm2, %v8773_v7 }
 0x188   : > { %6807 = vmatprep.mubr.msk.bf16.mxu0 %vm577_vm2, %v8793_v36 }
 0x189   : > { %7110 = vmatmul.mubr.msk.bf16.gmra.mrb[16].mxu1 %vm2974_vm3, %v8786_v49 }
 0x18a   : > { %7113 = vmatprep.mubr.msk.bf16.mxu1 %vm2974_vm3, %v8801_v8 }
 0x18f   : > { %6808 = vmatmul.mubr.msk.bf16.gmra.mrb[20].mxu0 %vm577_vm2, %v8819_v17 }
 0x190   : > { %6811 = vmatprep.mubr.msk.bf16.mxu0 %vm577_vm2, %v8841_v61 }
 0x191   : > { %7114 = vmatmul.mubr.msk.bf16.gmra.mrb[20].mxu1 %vm2974_vm3, %v8834_v63 }
 0x192   : > { %7117 = vmatprep.mubr.msk.bf16.mxu1 %vm2974_vm3, %v8847_v4 }
 0x197   : > { %6812 = vmatmul.mubr.msk.bf16.gmra.mrb[24].mxu0 %vm577_vm2, %v8863_v51 }
 0x198   : > { %6815 = vmatprep.mubr.msk.bf16.mxu0 %vm577_vm2, %v8885_v12 }
 0x199   : > { %7118 = vmatmul.mubr.msk.bf16.gmra.mrb[24].mxu1 %vm2974_vm3, %v8880_v44 }
 0x19a   : > { %7121 = vmatprep.mubr.msk.bf16.mxu1 %vm2974_vm3, %v8889_v43 }
 0x19f   : > { %6816 = vmatmul.mubr.msk.bf16.gmra.mrb[28].mxu0 %vm577_vm2, %v9184_v6 }
 0x1a0   : > { %6821 = vmatprep.mubr.msk.bf16.mxu0 %vm577_vm2, %v7976_v34  ;;  %v10875_v34 = vld [vmem:[#allocation35_spill] sm:$0xff] }
 0x1a1   : > { %7122 = vmatmul.mubr.msk.bf16.gmra.mrb[28].mxu1 %vm2974_vm3, %v9190_v25 }
 0x1a2   : > { %7127 = vmatprep.mubr.msk.bf16.mxu1 %vm2974_vm3, %v7998_v47  ;;  %v10876_v47 = vld [vmem:[#allocation38_spill] sm:$0xff] }
 0x1a7   : > { %6822 = vmatmul.mubr.msk.bf16.vlgmr.msra.gmra.mrb[0].mxu0 %vm577_vm2, %v8009_v52  ;;  %v10877_v52 = vld [vmem:[#allocation41_spill] sm:$0xff] }
 0x1a8   : > { %6854 = vmatpush3.bf16.msra.mxu0 %v2220_v50  ;;  %6825 = vmatprep.mubr.msk.bf16.mxu0 %vm577_vm2, %v8065_v30  ;;  %v10879_v30 = vld [vmem:[#allocation43_spill] sm:$0xff] }
 0x1a9   : > { %7128 = vmatmul.mubr.msk.bf16.vlgmr.msra.gmra.mrb[0].mxu1 %vm2974_vm3, %v8050_v21  ;;  %7747 = vmatprep.subr.msk.bf16.mxu0 %vm626_vm0, %v6036_v55  ;;  %v10878_v21 = vld [vmem:[#allocation39_spill] sm:$0xff] }
 0x1aa   : > { %7160 = vmatpush3.bf16.msra.mxu1 %v7799_v56  ;;  %7131 = vmatprep.mubr.msk.bf16.mxu1 %vm2974_vm3, %v8091_v58  ;;  %v10881_v58 = vld [vmem:[#allocation52_spill] sm:$0xff] }
 0x1ab   : > { %7193 = vmatprep.subr.bf16.mxu1 %v9360_v5 }
 0x1af   : > { %6826 = vmatmul.mubr.msk.bf16.gmra.mrb[4].mxu0 %vm577_vm2, %v8105_v24  ;;  %v10882_v24 = vld [vmem:[#allocation49_spill] sm:$0xff] }
 0x1b0   : > { %6829 = vmatprep.mubr.msk.bf16.mxu0 %vm577_vm2, %v8149_v37  ;;  %v10883_v37 = vld [vmem:[#allocation55_spill] sm:$0xff] }
 0x1b1   : > { %7132 = vmatmul.mubr.msk.bf16.gmra.mrb[4].mxu1 %vm2974_vm3, %v8130_v53  ;;  %v10880_v53 = vld [vmem:[#allocation47_spill] sm:$0xff] }
 0x1b2   : > { %7135 = vmatprep.mubr.msk.bf16.mxu1 %vm2974_vm3, %v8177_v35 }
 0x1b7   : > { %6830 = vmatmul.mubr.msk.bf16.gmra.mrb[8].mxu0 %vm577_vm2, %v8188_v20  ;;  %v324_v20 = vld [vmem:[%s7917_s10 + $0xcc] sm:$0xff]  }
 0x1b8   : > { %6833 = vmatprep.mubr.msk.bf16.mxu0 %vm577_vm2, %v10831_v45  ;;  %v378_v35 = vunpack.c.l.bf16 %v324_v20  ;;  %v326_v45 = vld [vmem:[%s7917_s10 + $0xd4] sm:$0x1] }
 0x1b9   : > { %7136 = vmatmul.mubr.msk.bf16.gmra.mrb[8].mxu1 %vm2974_vm3, %v10830_v33  ;;  %v379_v33 = vunpack.c.h.bf16 %v324_v20  ;;  %v380_v40 = vunpack.c.l.bf16 %v326_v45  ;;  %v2429_v45 = vsel %vm626_vm0, %v6036_v55, 0  ;;  %v10894_v55 = vld [vmem:[#allocation23_spill] sm:$0xff] }
 0x1ba   : > { %7139 = vmatprep.mubr.msk.bf16.mxu1 %vm2974_vm3, %v10833_v23 }
 0x1bb   : > { %v2416_v23 = vrot.slane %v379_v33, 2 }
 0x1bf   : > { %6834 = vmatmul.mubr.msk.bf16.gmra.mrb[12].mxu0 %vm577_vm2, %v10832_v60  ;;  %v2415_v60 = vrot.slane %v378_v35, 2 }
 0x1c0   : > { %6837 = vmatprep.mubr.msk.bf16.mxu0 %vm577_vm2, %v10835_v48  ;;  %v10884_v48 = vld [vmem:[#allocation58_spill] sm:$0xff] }
 0x1c1   : > { %7140 = vmatmul.mubr.msk.bf16.gmra.mrb[12].mxu1 %vm2974_vm3, %v10834_v39  ;;  %v2714_v39 = vld [vmem:[%s7922_s13 + $0xcc] sm:$0xff]  }
 0x1c2   : > { %7143 = vmatprep.mubr.msk.bf16.mxu1 %vm2974_vm3, %v10875_v34  ;;  %v2768_v31 = vunpack.c.l.bf16 %v2714_v39  ;;  %v2769_v18 = vunpack.c.h.bf16 %v2714_v39  ;;  %v2770_v34 = vunpack.c.l.bf16 %v2716_v26  ;;  %v10893_v26 = vld [vmem:[#allocation26_spill] sm:$0xff] }
 0x1c4   : > { %v4834_v56 = vrot.slane %v2768_v31, 2  ;;  %v4835_v50 = vrot.slane %v2769_v18, 2 }
 0x1c7   : > { %6838 = vmatmul.mubr.msk.bf16.gmra.mrb[16].mxu0 %vm577_vm2, %v10876_v47  ;;  %v9423_v47 = vsel %vm1003_vm4, %v2415_v60, %v2416_v23  ;;  %v10888_v60 = vld [vmem:[#allocation13_spill] sm:$0xff] }
 0x1c8   : > { %6841 = vmatprep.mubr.msk.bf16.mxu0 %vm577_vm2, %v10877_v52  ;;  %v2418_v52 = vrot.slane %v380_v40, 2 }
 0x1c9   : > { %7144 = vmatmul.mubr.msk.bf16.gmra.mrb[16].mxu1 %vm2974_vm3, %v10878_v21 }
 0x1ca   : > { %7147 = vmatprep.mubr.msk.bf16.mxu1 %vm2974_vm3, %v10879_v30  ;;  %v9426_v21 = vsel %vm1003_vm4, %v2416_v23, %v2418_v52  ;;  %v4837_v30 = vrot.slane %v2770_v34, 2  ;;  %v10889_v23 = vld [vmem:[#allocation17_spill] sm:$0xff]  ;;  %v10899_v52 = vld [vmem:[#allocation36_spill] sm:$0xff] }
 0x1cf   : > { %6842 = vmatmul.mubr.msk.bf16.gmra.mrb[20].mxu0 %vm577_vm2, %v10880_v53  ;;  %v9431_v53 = vsel %vm1003_vm4, %v4834_v56, %v4835_v50  ;;  %v10896_v56 = vld [vmem:[#allocation29_spill] sm:$0xff] }
 0x1d0   : > { %6845 = vmatprep.mubr.msk.bf16.mxu0 %vm577_vm2, %v10881_v58  ;;  %v9434_v58 = vsel %vm1003_vm4, %v4835_v50, %v4837_v30  ;;  %v10897_v50 = vld [vmem:[#allocation34_spill] sm:$0xff]  ;;  %v10900_v30 = vld [vmem:[#allocation37_spill] sm:$0xff] }
 0x1d1   : > { %7148 = vmatmul.mubr.msk.bf16.gmra.mrb[20].mxu1 %vm2974_vm3, %v10882_v24  ;;  %v10886_v24 = vld [vmem:[#allocation9_spill] sm:$0xff] }
 0x1d2   : > { %7151 = vmatprep.mubr.msk.bf16.mxu1 %vm2974_vm3, %v10883_v37  ;;  %v10887_v37 = vld [vmem:[#allocation11_spill] sm:$0xff] }
 0x1d7   : > { %6846 = vmatmul.mubr.msk.bf16.gmra.mrb[24].mxu0 %vm577_vm2, %v10884_v48  ;;  %v10891_v48 = vld [vmem:[#allocation19_spill] sm:$0xff] }
 0x1d8   : > { %6849 = vmatprep.mubr.msk.bf16.mxu0 %vm577_vm2, %v9163_v42  ;;  %v2422_v42 = vpack.c.bf16 %v9426_v21, %v9423_v47 }
 0x1d9   : > { %7152 = vmatmul.mubr.msk.bf16.gmra.mrb[24].mxu1 %vm2974_vm3, %v10885_v62  ;;  %v10895_v62 = vld [vmem:[#allocation28_spill] sm:$0xff] }
 0x1da   : > { %7155 = vmatprep.mubr.msk.bf16.mxu1 %vm2974_vm3, %v9169_v2  ;;  %v4841_v2 = vpack.c.bf16 %v9434_v58, %v9431_v53 }
 0x1df   : > { %6850 = vmatmul.mubr.msk.bf16.gmra.mrb[28].mxu0 %vm577_vm2, %v324_v20  ;;  %v10890_v20 = vld [vmem:[#allocation16_spill] sm:$0xff] }
 0x1e0   : > { %6855 = vmatprep.mubr.msk.bf16.mxu0 %vm577_vm2, %v10886_v24  ;;  %v10901_v24 = vld [vmem:[#allocation42_spill] sm:$0xff] }
 0x1e1   : > { %7156 = vmatmul.mubr.msk.bf16.gmra.mrb[28].mxu1 %vm2974_vm3, %v2714_v39  ;;  %v10892_v39 = vld [vmem:[#allocation21_spill] sm:$0xff] }
 0x1e2   : > { %7161 = vmatprep.mubr.msk.bf16.mxu1 %vm2974_vm3, %v10887_v37  ;;  %v10902_v37 = vld [vmem:[#allocation40_spill] sm:$0xff] }
 0x1e7   : > { %6856 = vmatmul.mubr.msk.bf16.vlgmr.msra.gmra.mrb[0].mxu0 %vm577_vm2, %v10888_v60  ;;  %v10904_v60 = vld [vmem:[#allocation46_spill] sm:$0xff] }
 0x1e8   : > { %6888 = vmatpush3.bf16.msra.mxu0 %v2429_v45  ;;  %6859 = vmatprep.mubr.msk.bf16.mxu0 %vm577_vm2, %v10889_v23  ;;  %v10903_v45 = vld [vmem:[#allocation44_spill] sm:$0xff]  ;;  %v10905_v23 = vld [vmem:[#allocation53_spill] sm:$0xff] }
 0x1e9   : > { %7162 = vmatmul.mubr.msk.bf16.vlgmr.msra.gmra.mrb[0].mxu1 %vm2974_vm3, %v10890_v20  ;;  %v10906_v20 = vld [vmem:[#allocation50_spill] sm:$0xff] }
 0x1ea   : > { %7194 = vmatpush3.bf16.msra.mxu1 %v9360_v5  ;;  %7165 = vmatprep.mubr.msk.bf16.mxu1 %vm2974_vm3, %v10891_v48  ;;  %v10898_v5 = vld [vmem:[#allocation32_spill] sm:$0xff] }
 0x1eb   : > { %v10907_v48 = vld [vmem:[#allocation56_spill] sm:$0xff] }
 0x1ef   : > { %6860 = vmatmul.mubr.msk.bf16.gmra.mrb[4].mxu0 %vm577_vm2, %v10892_v39  ;;  %v10908_v39 = vld [vmem:[#allocation57_spill] sm:$0xff] }
 0x1f0   : > { %6863 = vmatprep.mubr.msk.bf16.mxu0 %vm577_vm2, %v10893_v26  ;;  %v10909_v26 = vld [vmem:[#allocation60_spill] sm:$0xff] }
 0x1f1   : > { %7166 = vmatmul.mubr.msk.bf16.gmra.mrb[4].mxu1 %vm2974_vm3, %v10894_v55  ;;  %v2206_v55 = vrot.slane %v378_v35, 1 }
 0x1f2   : > { %7169 = vmatprep.mubr.msk.bf16.mxu1 %vm2974_vm3, %v10895_v62  ;;  %v2207_v62 = vrot.slane %v379_v33, 1 }
 0x1f7   : > { %6864 = vmatmul.mubr.msk.bf16.gmra.mrb[8].mxu0 %vm577_vm2, %v10896_v56  ;;  %v2209_v56 = vrot.slane %v380_v40, 1 }
 0x1f8   : > { %6867 = vmatprep.mubr.msk.bf16.mxu0 %vm577_vm2, %v10897_v50  ;;  %v4621_v50 = vrot.slane %v2768_v31, 1 }
 0x1f9   : > { %7170 = vmatmul.mubr.msk.bf16.gmra.mrb[8].mxu1 %vm2974_vm3, %v10898_v5  ;;  %v4622_v5 = vrot.slane %v2769_v18, 1 }
 0x1fa   : > { %7173 = vmatprep.mubr.msk.bf16.mxu1 %vm2974_vm3, %v10899_v52  ;;  %v4624_v52 = vrot.slane %v2770_v34, 1 }
 0x1fc   : > { %v4625_v35 = vsel %vm446_vm1, %v4622_v5, %v4624_v52 }
 0x1ff   : > { %6868 = vmatmul.mubr.msk.bf16.gmra.mrb[12].mxu0 %vm577_vm2, %v10900_v30  ;;  %v2210_v30 = vsel %vm446_vm1, %v2207_v62, %v2209_v56 }
 0x200   : > { %6871 = vmatprep.mubr.msk.bf16.mxu0 %vm577_vm2, %v10901_v24 }
 0x201   : > { %7174 = vmatmul.mubr.msk.bf16.gmra.mrb[12].mxu1 %vm2974_vm3, %v10902_v37 }
 0x202   : > { %7177 = vmatprep.mubr.msk.bf16.mxu1 %vm2974_vm3, %v10903_v45 }
 0x207   : > { %6872 = vmatmul.mubr.msk.bf16.gmra.mrb[16].mxu0 %vm577_vm2, %v10904_v60 }
 0x208   : > { %6875 = vmatprep.mubr.msk.bf16.mxu0 %vm577_vm2, %v10905_v23 }
 0x209   : > { %7178 = vmatmul.mubr.msk.bf16.gmra.mrb[16].mxu1 %vm2974_vm3, %v10906_v20 }
 0x20a   : > { %7181 = vmatprep.mubr.msk.bf16.mxu1 %vm2974_vm3, %v10907_v48 }
 0x20f   : > { %6876 = vmatmul.mubr.msk.bf16.gmra.mrb[20].mxu0 %vm577_vm2, %v10908_v39 }
 0x210   : > { %6879 = vmatprep.mubr.msk.bf16.mxu0 %vm577_vm2, %v10864_v16  ;;  %v2208_v16 = vsel %vm446_vm1, %v2206_v55, %v2207_v62 }
 0x211   : > { %7182 = vmatmul.mubr.msk.bf16.gmra.mrb[20].mxu1 %vm2974_vm3, %v10909_v26  ;;  %v2213_v33 = vpack.c.bf16 %v2210_v30, %v2208_v16 }
 0x212   : > { %7185 = vmatprep.mubr.msk.bf16.mxu1 %vm2974_vm3, %v10866_v28  ;;  %v4623_v28 = vsel %vm446_vm1, %v4621_v50, %v4622_v5 }
 0x213   : > { %v4628_v31 = vpack.c.bf16 %v4625_v35, %v4623_v28 }
 0x217   : > { %6880 = vmatmul.mubr.msk.bf16.gmra.mrb[24].mxu0 %vm577_vm2, %v10865_v59 }
 0x218   : > { %6883 = vmatprep.mubr.msk.bf16.mxu0 %vm577_vm2, %v9267_v38 }
 0x219   : > { %7186 = vmatmul.mubr.msk.bf16.gmra.mrb[24].mxu1 %vm2974_vm3, %v10867_v11 }
 0x21a   : > { %7189 = vmatprep.mubr.msk.bf16.mxu1 %vm2974_vm3, %v9269_v0 }
 0x21f   : > { %6884 = vmatmul.mubr.msk.bf16.gmra.mrb[28].mxu0 %vm577_vm2, %v2213_v33 }
 0x220   : > { %6889 = vmatprep.mubr.msk.bf16.mxu0 %vm577_vm2, %v10870_v32 }
 0x221   : > { %7190 = vmatmul.mubr.msk.bf16.gmra.mrb[28].mxu1 %vm2974_vm3, %v4628_v31 }
 0x222   : > { %7195 = vmatprep.mubr.msk.bf16.mxu1 %vm2974_vm3, %v10871_v22 }
 0x227   : > { %6890 = vmatmul.mubr.msk.bf16.vlgmr.msra.gmra.mrb[0].mxu0 %vm577_vm2, %v8984_v19 }
 0x228   : > { %6893 = vmatprep.mubr.msk.bf16.mxu0 %vm577_vm2, %v10873_v41 }
 0x229   : > { %7196 = vmatmul.mubr.msk.bf16.vlgmr.msra.gmra.mrb[0].mxu1 %vm2974_vm3, %v10872_v9 }
 0x22a   : > { %7199 = vmatprep.mubr.msk.bf16.mxu1 %vm2974_vm3, %v10874_v13 }
 0x22f   : > { %6894 = vmatmul.mubr.msk.bf16.gmra.mrb[4].mxu0 %vm577_vm2, %v9033_v10 }
 0x230   : > { %6897 = vmatprep.mubr.msk.bf16.mxu0 %vm577_vm2, %v9037_v14 }
 0x231   : > { %7200 = vmatmul.mubr.msk.bf16.gmra.mrb[4].mxu1 %vm2974_vm3, %v9045_v46 }
 0x232   : > { %7203 = vmatprep.mubr.msk.bf16.mxu1 %vm2974_vm3, %v9047_v29 }
 0x237   : > { %6898 = vmatmul.mubr.msk.bf16.gmra.mrb[8].mxu0 %vm577_vm2, %v9059_v54 }
 0x238   : > { %6901 = vmatprep.mubr.msk.bf16.mxu0 %vm577_vm2, %v8725_v1 }
 0x239   : > { %7204 = vmatmul.mubr.msk.bf16.gmra.mrb[8].mxu1 %vm2974_vm3, %v8711_v3  ;;  %v9584_v3 = vld [vmem:[%s10396_s5] ss:$0 sm:$0xff] }
 0x23a   : > { %7207 = vmatprep.mubr.msk.bf16.mxu1 %vm2974_vm3, %v8740_v57 }
 0x23f   : > { %6902 = vmatmul.mubr.msk.bf16.gmra.mrb[12].mxu0 %vm577_vm2, %v8749_v27 }
 0x240   : > { %6905 = vmatprep.mubr.msk.bf16.mxu0 %vm577_vm2, %v8773_v7 }
 0x241   : > { %7208 = vmatmul.mubr.msk.bf16.gmra.mrb[12].mxu1 %vm2974_vm3, %v8757_v15 }
 0x242   : > { %7211 = vmatprep.mubr.msk.bf16.mxu1 %vm2974_vm3, %v8786_v49 }
 0x247   : > { %6906 = vmatmul.mubr.msk.bf16.gmra.mrb[16].mxu0 %vm577_vm2, %v8793_v36 }
 0x248   : > { %6909 = vmatprep.mubr.msk.bf16.mxu0 %vm577_vm2, %v8819_v17 }
 0x249   : > { %7212 = vmatmul.mubr.msk.bf16.gmra.mrb[16].mxu1 %vm2974_vm3, %v8801_v8 }
 0x24a   : > { %7215 = vmatprep.mubr.msk.bf16.mxu1 %vm2974_vm3, %v8834_v63 }
 0x24f   : > { %6910 = vmatmul.mubr.msk.bf16.gmra.mrb[20].mxu0 %vm577_vm2, %v8841_v61  ;;  %v9579_v61 = vld [vmem:[%s10394_s3] ss:$0 sm:$0xff] }
 0x250   : > { %6913 = vmatprep.mubr.msk.bf16.mxu0 %vm577_vm2, %v8863_v51 }
 0x251   : > { %7216 = vmatmul.mubr.msk.bf16.gmra.mrb[20].mxu1 %vm2974_vm3, %v8847_v4 }
 0x252   : > { %7219 = vmatprep.mubr.msk.bf16.mxu1 %vm2974_vm3, %v8880_v44 }
 0x257   : > { %6914 = vmatmul.mubr.msk.bf16.gmra.mrb[24].mxu0 %vm577_vm2, %v8885_v12 }
 0x258   : > { %6917 = vmatprep.mubr.msk.bf16.mxu0 %vm577_vm2, %v9184_v6 }
 0x259   : > { %7220 = vmatmul.mubr.msk.bf16.gmra.mrb[24].mxu1 %vm2974_vm3, %v8889_v43 }
 0x25a   : > { %7223 = vmatprep.mubr.msk.bf16.mxu1 %vm2974_vm3, %v9190_v25 }
 0x25f   : > { %6918 = vmatmul.mubr.msk.bf16.gmra.mrb[28].mxu0 %vm577_vm2, %v2422_v42 }
 0x261   : > { %7224 = vmatmul.mubr.msk.bf16.gmra.mrb[28].mxu1 %vm2974_vm3, %v4841_v2 }
 0x2fa   : > { %v6891_v36 = vpop.f32.mrb[0].mxu0 }
 0x2fb   : > { %v2465_v1 = vpop.f32.mrb[1].mxu0  ;;  %v9593_v17 = vadd.f32 %v6891_v36, %v9579_v61 }
 0x2fc   : > { %v7197_v57 = vpop.f32.mrb[0].mxu1  ;;  %v9587_v27 = vadd.f32 %v9579_v61, %v2465_v1  ;;  %v6892_v15 = vpop.f32.mrb[2].mxu0 }
 0x2fd   : > { %v9590_v7 = vadd.f32 %v7197_v57, %v9584_v3  ;;  %v4888_v49 = vpop.f32.mrb[1].mxu1  ;;  %v2468_v8 = vpop.f32.mrb[3].mxu0  ;;  %v9606_v12 = vadd.f32 %v6892_v15, %v9579_v61  ;;  %v5090_v14 = vsel %vm5086_vm5, %v9593_v17, 0.0 }
 0x2fe   : > { %v9596_v63 = vadd.f32 %v9584_v3, %v4888_v49  ;;  %v7198_v4 = vpop.f32.mrb[2].mxu1  ;;  %v9599_v25 = vadd.f32 %v9579_v61, %v2468_v8  ;;  %v5087_v44 = vsel %vm5086_vm5, %v9587_v27, 0.0 }
 0x2ff   : > { %5426 = vrot.lane.b32.xlu1 %v9590_v7, %s7849_s26  ;;  %v4891_v51 = vpop.f32.mrb[3].mxu1  ;;  %v9613_v19 = vadd.f32 %v7198_v4, %v9584_v3  ;;  %v5092_v11 = vsel %vm5086_vm5, %v9606_v12, 0.0 }
 0x300   : > { %v5088_v43 = vsel %vm5086_vm5, %v9599_v25, 0.0  ;;  %5422 = vrot.lane.b32.xlu0 %v9596_v63, %s7849_s26  ;;  %v9618_v46 = vadd.f32 %v9584_v3, %v4891_v51 }
 0x301   : > { %v5089_v10 = vadd.f32 %v5088_v43, %v5087_v44 }
 0x302   : > { %v6895_v29 = vpop.f32.mrb[4].mxu0 }
 0x303   : > { %v5091_v54 = vadd.f32 %v5090_v14, %v5089_v10  ;;  %5428 = vrot.lane.b32.xlu1 %v9613_v19, %s7849_s26  ;;  %v2481_v6 = vpop.f32.mrb[5].mxu0  ;;  %v9633_v13 = vadd.f32 %v6895_v29, %v9579_v61 }
 0x304   : > { %5424 = vrot.lane.b32.xlu0 %v9618_v46, %s7849_s26  ;;  %v7201_v59 = vpop.f32.mrb[4].mxu1  ;;  %v9627_v38 = vadd.f32 %v9579_v61, %v2481_v6  ;;  %v6896_v0 = vpop.f32.mrb[6].mxu0 }
 0x305   : > { %v9630_v32 = vadd.f32 %v7201_v59, %v9584_v3  ;;  %v5093_v22 = vadd.f32 %v5092_v11, %v5091_v54  ;;  %v4904_v9 = vpop.f32.mrb[5].mxu1  ;;  %v2484_v41 = vpop.f32.mrb[7].mxu0  ;;  %v9644_v53 = vadd.f32 %v6896_v0, %v9579_v61  ;;  %v5098_v24 = vsel %vm5086_vm5, %v9633_v13, 0.0 }
 0x306   : > { %v5094_v18 = vsel %vm5086_vm5, %v9627_v38, 0.0  ;;  %v7202_v40 = vpop.f32.mrb[6].mxu1  ;;  %v9638_v34 = vadd.f32 %v9579_v61, %v2484_v41  ;;  %v9655_v37 = vadd.f32 %v9584_v3, %v4904_v9 }
 0x307   : > { %v5095_v47 = vadd.f32 %v5094_v18, %v5093_v22  ;;  %v9641_v21 = vadd.f32 %v7202_v40, %v9584_v3  ;;  %v4907_v42 = vpop.f32.mrb[7].mxu1  ;;  %v5100_v48 = vsel %vm5086_vm5, %v9644_v53, 0.0 }
 0x308   : > { %v5096_v58 = vsel %vm5086_vm5, %v9638_v34, 0.0  ;;  %5434 = vrot.lane.b32.xlu0 %v9630_v32, %s7849_s26  ;;  %v9658_v23 = vadd.f32 %v9584_v3, %v4907_v42 }
 0x309   : > { %v5097_v2 = vadd.f32 %v5096_v58, %v5095_v47  ;;  %5436 = vrot.lane.b32.xlu1 %v9641_v21, %s7849_s26 }
 0x30a   : > { %v6899_v45 = vpop.f32.mrb[8].mxu0 }
 0x30b   : > { %v5099_v60 = vadd.f32 %v5098_v24, %v5097_v2  ;;  %v2497_v20 = vpop.f32.mrb[9].mxu0  ;;  %v9673_v52 = vadd.f32 %v6899_v45, %v9579_v61 }
 0x30c   : > { %5430 = vrot.lane.b32.xlu0 %v9655_v37, %s7849_s26  ;;  %v7205_v39 = vpop.f32.mrb[8].mxu1  ;;  %v9665_v26 = vadd.f32 %v9579_v61, %v2497_v20  ;;  %v6900_v55 = vpop.f32.mrb[10].mxu0 }
 0x30d   : > { %v9668_v62 = vadd.f32 %v7205_v39, %v9584_v3  ;;  %5432 = vrot.lane.b32.xlu1 %v9658_v23, %s7849_s26  ;;  %v5101_v56 = vadd.f32 %v5100_v48, %v5099_v60  ;;  %v4920_v50 = vpop.f32.mrb[9].mxu1  ;;  %v2500_v5 = vpop.f32.mrb[11].mxu0  ;;  %v9684_v36 = vadd.f32 %v6900_v55, %v9579_v61  ;;  %v5106_v15 = vsel %vm5086_vm5, %v9673_v52, 0.0 }
 0x30e   : > { %v5102_v16 = vsel %vm5086_vm5, %v9665_v26, 0.0  ;;  %v7206_v30 = vpop.f32.mrb[10].mxu1  ;;  %v9678_v28 = vadd.f32 %v9579_v61, %v2500_v5  ;;  %v9695_v49 = vadd.f32 %v9584_v3, %v4920_v50 }
 0x30f   : > { %v5103_v35 = vadd.f32 %v5102_v16, %v5101_v56  ;;  %v9681_v33 = vadd.f32 %v7206_v30, %v9584_v3  ;;  %v4923_v31 = vpop.f32.mrb[11].mxu1  ;;  %v5108_v43 = vsel %vm5086_vm5, %v9684_v36, 0.0 }
 0x310   : > { %v5104_v1 = vsel %vm5086_vm5, %v9678_v28, 0.0  ;;  %5442 = vrot.lane.b32.xlu0 %v9668_v62, %s7849_s26  ;;  %v9698_v51 = vadd.f32 %v9584_v3, %v4923_v31 }
 0x311   : > { %v5105_v57 = vadd.f32 %v5104_v1, %v5103_v35  ;;  %5444 = vrot.lane.b32.xlu1 %v9681_v33, %s7849_s26 }
 0x312   : > { %v6903_v8 = vpop.f32.mrb[12].mxu0 }
 0x313   : > { %v5107_v4 = vadd.f32 %v5106_v15, %v5105_v57  ;;  %v2513_v44 = vpop.f32.mrb[13].mxu0  ;;  %v9713_v0 = vadd.f32 %v6903_v8, %v9579_v61 }
 0x314   : > { %5438 = vrot.lane.b32.xlu0 %v9695_v49, %s7849_s26  ;;  %v7209_v10 = vpop.f32.mrb[12].mxu1  ;;  %v9705_v14 = vadd.f32 %v9579_v61, %v2513_v44  ;;  %v6904_v29 = vpop.f32.mrb[14].mxu0 }
 0x315   : > { %v9708_v54 = vadd.f32 %v7209_v10, %v9584_v3  ;;  %5440 = vrot.lane.b32.xlu1 %v9698_v51, %s7849_s26  ;;  %v5109_v6 = vadd.f32 %v5108_v43, %v5107_v4  ;;  %v4936_v11 = vpop.f32.mrb[13].mxu1  ;;  %v2516_v59 = vpop.f32.mrb[15].mxu0  ;;  %v9724_v42 = vadd.f32 %v6904_v29, %v9579_v61  ;;  %v5114_v24 = vsel %vm5086_vm5, %v9713_v0, 0.0 }
 0x316   : > { %v5110_v22 = vsel %vm5086_vm5, %v9705_v14, 0.0  ;;  %v7210_v9 = vpop.f32.mrb[14].mxu1  ;;  %v9718_v41 = vadd.f32 %v9579_v61, %v2516_v59  ;;  %v9735_v45 = vadd.f32 %v9584_v3, %v4936_v11 }
 0x317   : > { %v5111_v18 = vadd.f32 %v5110_v22, %v5109_v6  ;;  %v9721_v40 = vadd.f32 %v7210_v9, %v9584_v3  ;;  %v4939_v47 = vpop.f32.mrb[15].mxu1  ;;  %v5116_v55 = vsel %vm5086_vm5, %v9724_v42, 0.0 }
 0x318   : > { %v5112_v58 = vsel %vm5086_vm5, %v9718_v41, 0.0  ;;  %5450 = vrot.lane.b32.xlu0 %v9708_v54, %s7849_s26  ;;  %v9738_v48 = vadd.f32 %v9584_v3, %v4939_v47 }
 0x319   : > { %v5113_v2 = vadd.f32 %v5112_v58, %v5111_v18  ;;  %5452 = vrot.lane.b32.xlu1 %v9721_v40, %s7849_s26 }
 0x31a   : > { %v6907_v60 = vpop.f32.mrb[16].mxu0  ;;  %10910 = vst [vmem:[#allocation4_spill] sm:$0xff] %v9738_v48 }
 0x31b   : > { %v5115_v20 = vadd.f32 %v5114_v24, %v5113_v2  ;;  %v2529_v39 = vpop.f32.mrb[17].mxu0  ;;  %v9753_v1 = vadd.f32 %v6907_v60, %v9579_v61 }
 0x31c   : > { %5446 = vrot.lane.b32.xlu0 %v9735_v45, %s7849_s26  ;;  %v7213_v56 = vpop.f32.mrb[16].mxu1  ;;  %v9745_v50 = vadd.f32 %v9579_v61, %v2529_v39  ;;  %v6908_v5 = vpop.f32.mrb[18].mxu0 }
 0x31d   : > { %v9748_v16 = vadd.f32 %v7213_v56, %v9584_v3  ;;  %5448 = vrot.lane.b32.xlu1 %v9738_v48, %s7849_s26  ;;  %v5117_v30 = vadd.f32 %v5116_v55, %v5115_v20  ;;  %v4952_v35 = vpop.f32.mrb[17].mxu1  ;;  %v2532_v31 = vpop.f32.mrb[19].mxu0  ;;  %v9764_v10 = vadd.f32 %v6908_v5, %v9579_v61  ;;  %v5122_v11 = vsel %vm5086_vm5, %v9753_v1, 0.0 }
 0x31e   : > { %v5118_v57 = vsel %vm5086_vm5, %v9745_v50, 0.0  ;;  %v7214_v15 = vpop.f32.mrb[18].mxu1  ;;  %v9758_v8 = vadd.f32 %v9579_v61, %v2532_v31  ;;  %v9775_v59 = vadd.f32 %v9584_v3, %v4952_v35 }
 0x31f   : > { %10911 = vst [vmem:[#allocation6_spill] sm:$0xff] %v9748_v16  ;;  %v5119_v4 = vadd.f32 %v5118_v57, %v5117_v30  ;;  %v9761_v44 = vadd.f32 %v7214_v15, %v9584_v3  ;;  %v4955_v43 = vpop.f32.mrb[19].mxu1  ;;  %v5124_v58 = vsel %vm5086_vm5, %v9764_v10, 0.0 }
 0x320   : > { %v5120_v29 = vsel %vm5086_vm5, %v9758_v8, 0.0  ;;  %5458 = vrot.lane.b32.xlu0 %v9748_v16, %s7849_s26  ;;  %10913 = vst [vmem:[#allocation8_spill] sm:$0xff] %v9775_v59  ;;  %v9778_v18 = vadd.f32 %v9584_v3, %v4955_v43 }
 0x321   : > { %10912 = vst [vmem:[#allocation10_spill] sm:$0xff] %v9761_v44  ;;  %v5121_v6 = vadd.f32 %v5120_v29, %v5119_v4  ;;  %5460 = vrot.lane.b32.xlu1 %v9761_v44, %s7849_s26 }
 0x322   : > { %v6911_v22 = vpop.f32.mrb[20].mxu0  ;;  %10914 = vst [vmem:[#allocation12_spill] sm:$0xff] %v9778_v18 }
 0x323   : > { %v5123_v9 = vadd.f32 %v5122_v11, %v5121_v6  ;;  %v2545_v47 = vpop.f32.mrb[21].mxu0  ;;  %v9793_v5 = vadd.f32 %v6911_v22, %v9579_v61 }
 0x324   : > { %5454 = vrot.lane.b32.xlu0 %v9775_v59, %s7849_s26  ;;  %v7217_v2 = vpop.f32.mrb[20].mxu1  ;;  %v9785_v24 = vadd.f32 %v9579_v61, %v2545_v47  ;;  %v6912_v60 = vpop.f32.mrb[22].mxu0 }
 0x325   : > { %v9788_v20 = vadd.f32 %v7217_v2, %v9584_v3  ;;  %5456 = vrot.lane.b32.xlu1 %v9778_v18, %s7849_s26  ;;  %v5125_v39 = vadd.f32 %v5124_v58, %v5123_v9  ;;  %v4968_v55 = vpop.f32.mrb[21].mxu1  ;;  %v2548_v56 = vpop.f32.mrb[23].mxu0  ;;  %v9804_v43 = vadd.f32 %v6912_v60, %v9579_v61  ;;  %v5130_v11 = vsel %vm5086_vm5, %v9793_v5, 0.0 }
 0x326   : > { %v5126_v30 = vsel %vm5086_vm5, %v9785_v24, 0.0  ;;  %v7218_v35 = vpop.f32.mrb[22].mxu1  ;;  %v9798_v31 = vadd.f32 %v9579_v61, %v2548_v56  ;;  %v9815_v22 = vadd.f32 %v9584_v3, %v4968_v55 }
 0x327   : > { %10915 = vst [vmem:[#allocation14_spill] sm:$0xff] %v9788_v20  ;;  %v5127_v57 = vadd.f32 %v5126_v30, %v5125_v39  ;;  %v9801_v15 = vadd.f32 %v7218_v35, %v9584_v3  ;;  %v4971_v4 = vpop.f32.mrb[23].mxu1  ;;  %v5132_v60 = vsel %vm5086_vm5, %v9804_v43, 0.0 }
 0x328   : > { %v5128_v29 = vsel %vm5086_vm5, %v9798_v31, 0.0  ;;  %5466 = vrot.lane.b32.xlu0 %v9788_v20, %s7849_s26  ;;  %10917 = vst [vmem:[#allocation15_spill] sm:$0xff] %v9815_v22  ;;  %v9818_v58 = vadd.f32 %v9584_v3, %v4971_v4 }
 0x329   : > { %10916 = vst [vmem:[#allocation18_spill] sm:$0xff] %v9801_v15  ;;  %v5129_v6 = vadd.f32 %v5128_v29, %v5127_v57  ;;  %5468 = vrot.lane.b32.xlu1 %v9801_v15, %s7849_s26 }
 0x32a   : > { %v6915_v9 = vpop.f32.mrb[24].mxu0  ;;  %10918 = vst [vmem:[#allocation20_spill] sm:$0xff] %v9818_v58 }
 0x32b   : > { %v5131_v47 = vadd.f32 %v5130_v11, %v5129_v6  ;;  %v2561_v2 = vpop.f32.mrb[25].mxu0  ;;  %v9833_v29 = vadd.f32 %v6915_v9, %v9579_v61 }
 0x32c   : > { %5462 = vrot.lane.b32.xlu0 %v9815_v22, %s7849_s26  ;;  %v7221_v39 = vpop.f32.mrb[24].mxu1  ;;  %v9825_v56 = vadd.f32 %v9579_v61, %v2561_v2  ;;  %v6916_v30 = vpop.f32.mrb[26].mxu0 }
 0x32d   : > { %v9828_v55 = vadd.f32 %v7221_v39, %v9584_v3  ;;  %5464 = vrot.lane.b32.xlu1 %v9818_v58, %s7849_s26  ;;  %v5133_v35 = vadd.f32 %v5132_v60, %v5131_v47  ;;  %v4984_v57 = vpop.f32.mrb[25].mxu1  ;;  %v2564_v4 = vpop.f32.mrb[27].mxu0  ;;  %v9844_v58 = vadd.f32 %v6916_v30, %v9579_v61  ;;  %v5138_v60 = vsel %vm5086_vm5, %v9833_v29, 0.0 }
 0x32e   : > { %v5134_v6 = vsel %vm5086_vm5, %v9825_v56, 0.0  ;;  %v7222_v11 = vpop.f32.mrb[26].mxu1  ;;  %v9838_v2 = vadd.f32 %v9579_v61, %v2564_v4 }
 0x32f   : > { %10919 = vst [vmem:[#allocation22_spill] sm:$0xff] %v9828_v55  ;;  %v5135_v15 = vadd.f32 %v5134_v6, %v5133_v35  ;;  %v9841_v39 = vadd.f32 %v7222_v11, %v9584_v3  ;;  %v4987_v22 = vpop.f32.mrb[27].mxu1  ;;  %v9855_v35 = vadd.f32 %v9584_v3, %v4984_v57  ;;  %v5140_v20 = vsel %vm5086_vm5, %v9844_v58, 0.0 }
 0x330   : > { %v5136_v47 = vsel %vm5086_vm5, %v9838_v2, 0.0  ;;  %5474 = vrot.lane.b32.xlu0 %v9828_v55, %s7849_s26  ;;  %v9858_v30 = vadd.f32 %v9584_v3, %v4987_v22 }
 0x331   : > { %10920 = vst [vmem:[#allocation2_spill] sm:$0xff] %v9841_v39  ;;  %v5137_v9 = vadd.f32 %v5136_v47, %v5135_v15  ;;  %5476 = vrot.lane.b32.xlu1 %v9841_v39, %s7849_s26  ;;  %10921 = vst [vmem:[#allocation24_spill] sm:$0xff] %v9855_v35 }
 0x332   : > { %v6919_v4 = vpop.f32.mrb[28].mxu0 }
 0x333   : > { %v5139_v6 = vadd.f32 %v5138_v60, %v5137_v9  ;;  %v2577_v11 = vpop.f32.mrb[29].mxu0  ;;  %v2661_v22 = vadd.f32 %v6919_v4, %v9579_v61 }
 0x334   : > { %5470 = vrot.lane.b32.xlu0 %v9855_v35, %s7849_s26  ;;  %v7225_v15 = vpop.f32.mrb[28].mxu1  ;;  %v2659_v47 = vadd.f32 %v9579_v61, %v2577_v11  ;;  %v6920_v39 = vpop.f32.mrb[30].mxu0 }
 0x335   : > { %5472 = vrot.lane.b32.xlu1 %v9858_v30, %s7849_s26  ;;  %v5141_v57 = vadd.f32 %v5140_v20, %v5139_v6  ;;  %v5000_v55 = vpop.f32.mrb[29].mxu1  ;;  %v2580_v9 = vpop.f32.mrb[31].mxu0  ;;  %v2662_v11 = vadd.f32 %v6920_v39, %v9579_v61  ;;  %v5146_v6 = vsel %vm5086_vm5, %v2661_v22, 0.0 }
 0x336   : > { %v5142_v60 = vsel %vm5086_vm5, %v2659_v47, 0.0  ;;  %v9870_v18 = vadd.f32 %v9584_v3, %v5000_v55  ;;  %v7226_v44 = vpop.f32.mrb[30].mxu1  ;;  %v2660_v35 = vadd.f32 %v9579_v61, %v2580_v9  ;;  %v9882_v55 = vadd.f32 %v7225_v15, %v9584_v3 }
 0x337   : > { %v5143_v59 = vadd.f32 %v5142_v60, %v5141_v57  ;;  %v5003_v16 = vpop.f32.mrb[31].mxu1  ;;  %v5148_v61 = vsel %vm5086_vm5, %v2662_v11, 0.0  ;;  %v9888_v39 = vadd.f32 %v7226_v44, %v9584_v3 }
 0x338   : > { %10922 = vst [vmem:[#allocation25_spill] sm:$0xff] %v9870_v18  ;;  %v5144_v48 = vsel %vm5086_vm5, %v2660_v35, 0.0  ;;  %v9876_v20 = vadd.f32 %v9584_v3, %v5003_v16  ;;  %5478 = vrot.lane.b32.xlu0 %v9870_v18, %s7849_s26  ;;  %10924 = vst [vmem:[#allocation27_spill] sm:$0xff] %v9882_v55 }
 0x339   : > { %v5145_v4 = vadd.f32 %v5144_v48, %v5143_v59  ;;  %10925 = vst [vmem:[#allocation31_spill] sm:$0xff] %v9888_v39 }
 0x33a   : > { %10923 = vst [vmem:[#allocation30_spill] sm:$0xff] %v9876_v20  ;;  %5480 = vrot.lane.b32.xlu1 %v9876_v20, %s7849_s26 }
 0x33b   : > { %v5147_v57 = vadd.f32 %v5146_v6, %v5145_v4 }
 0x33c   : > { %5482 = vrot.lane.b32.xlu0 %v9882_v55, %s7849_s26 }
 0x33d   : > { %v5149_v16 = vadd.f32 %v5148_v61, %v5147_v57 }
 0x33e   : > { %5484 = vrot.lane.b32.xlu1 %v9888_v39, %s7849_s26 }
 0x33f   : > { %v5150_v48 = vrot.slane %v5149_v16, 4 }
 0x341   : > { %v5151_v59 = vadd.f32 %v5150_v48, %v5149_v16 }
 0x343   : > { %v5152_v15 = vrot.slane %v5151_v59, 2 }
 0x345   : > { %v5153_v9 = vadd.f32 %v5152_v15, %v5151_v59 }
 0x347   : > { %v5154_v60 = vrot.slane %v5153_v9, 1 }
 0x349   : > { %v5155_v18 = vadd.f32 %v5154_v60, %v5153_v9 }
 0x34b   : > { %v5157_v20 = vmul.f32 0.00390625, %v5155_v18 }
 0x34d   : > { %v9895_v4 = vsub.f32 %v9678_v28, %v5157_v20  ;;  %v9898_v3 = vsub.f32 %v9684_v36, %v5157_v20  ;;  %v9901_v44 = vsub.f32 %v9705_v14, %v5157_v20  ;;  %v9904_v6 = vsub.f32 %v9718_v41, %v5157_v20 }
 0x34e   : > { %v9907_v57 = vsub.f32 %v9713_v0, %v5157_v20  ;;  %v9910_v61 = vsub.f32 %v9724_v42, %v5157_v20  ;;  %v9913_v18 = vsub.f32 %v9745_v50, %v5157_v20  ;;  %v9916_v28 = vsub.f32 %v9758_v8, %v5157_v20 }
 0x34f   : > { %v9919_v36 = vsub.f32 %v9753_v1, %v5157_v20  ;;  %v9922_v14 = vsub.f32 %v9764_v10, %v5157_v20  ;;  %v9925_v41 = vsub.f32 %v9785_v24, %v5157_v20  ;;  %v9928_v0 = vsub.f32 %v9798_v31, %v5157_v20 }
 0x350   : > { %10926 = vst [vmem:[#allocation33_spill] sm:$0xff] %v9916_v28  ;;  %v9931_v42 = vsub.f32 %v9793_v5, %v5157_v20  ;;  %v9934_v50 = vsub.f32 %v9804_v43, %v5157_v20  ;;  %v9937_v8 = vsub.f32 %v9825_v56, %v5157_v20  ;;  %v9940_v1 = vsub.f32 %v9838_v2, %v5157_v20 }
 0x351   : > { %10927 = vst [vmem:[#allocation5_spill] sm:$0xff] %v9925_v41  ;;  %10928 = vst [vmem:[#allocation7_spill] sm:$0xff] %v9928_v0  ;;  %v9943_v10 = vsub.f32 %v9833_v29, %v5157_v20  ;;  %v9946_v24 = vsub.f32 %v9844_v58, %v5157_v20  ;;  %v9948_v31 = vsub.f32 %v2659_v47, %v5157_v20 }
 0x352   : > { %10929 = vst [vmem:[#allocation61_spill] sm:$0xff] %v9931_v42  ;;  %10930 = vst [vmem:[#allocation63_spill] sm:$0xff] %v9934_v50  ;;  %v9950_v16 = vsub.f32 %v2660_v35, %v5157_v20  ;;  %v9952_v5 = vsub.f32 %v2661_v22, %v5157_v20  ;;  %v9954_v43 = vsub.f32 %v2662_v11, %v5157_v20 }
 0x353   : > { %10931 = vst [vmem:[#allocation62_spill] sm:$0xff] %v9937_v8  ;;  %10932 = vst [vmem:[#allocation64_spill] sm:$0xff] %v9940_v1  ;;  %v9957_v56 = vsub.f32 %v9587_v27, %v5157_v20  ;;  %v9960_v2 = vsub.f32 %v9599_v25, %v5157_v20  ;;  %v9963_v29 = vsub.f32 %v9593_v17, %v5157_v20 }
 0x354   : > { %10933 = vst [vmem:[#allocation65_spill] sm:$0xff] %v9943_v10  ;;  %10934 = vst [vmem:[#allocation66_spill] sm:$0xff] %v9946_v24  ;;  %v9966_v58 = vsub.f32 %v9606_v12, %v5157_v20  ;;  %v9973_v22 = vsub.f32 %v9627_v38, %v5157_v20  ;;  %v9978_v25 = vsub.f32 %v9638_v34, %v5157_v20 }
 0x355   : > { %10935 = vst [vmem:[#allocation45_spill] sm:$0xff] %v9948_v31  ;;  %10936 = vst [vmem:[#allocation48_spill] sm:$0xff] %v9950_v16  ;;  %v5190_v35 = vmul.f32 %v9957_v56, %v9957_v56  ;;  %v5191_v47 = vmul.f32 %v9960_v2, %v9960_v2  ;;  %v5192_v27 = vmul.f32 %v9963_v29, %v9963_v29 }
 0x356   : > { %10937 = vst [vmem:[#allocation54_spill] sm:$0xff] %v9952_v5  ;;  %10938 = vst [vmem:[#allocation51_spill] sm:$0xff] %v9954_v43  ;;  %v5193_v17 = vmul.f32 %v9966_v58, %v9966_v58  ;;  %v9985_v59 = vsub.f32 %v9633_v13, %v5157_v20  ;;  %v5194_v38 = vmul.f32 %v9973_v22, %v9973_v22 }
 0x357   : > { %v5222_v12 = vsel %vm5086_vm5, %v5190_v35, 0.0  ;;  %v5223_v11 = vsel %vm5086_vm5, %v5191_v47, 0.0  ;;  %v5225_v15 = vsel %vm5086_vm5, %v5192_v27, 0.0  ;;  %v9991_v34 = vsub.f32 %v9644_v53, %v5157_v20 }
 0x358   : > { %v5224_v48 = vadd.f32 %v5223_v11, %v5222_v12  ;;  %v5195_v60 = vmul.f32 %v9978_v25, %v9978_v25  ;;  %v5227_v35 = vsel %vm5086_vm5, %v5193_v17, 0.0  ;;  %v9997_v47 = vsub.f32 %v9665_v26, %v5157_v20 }
 0x359   : > { %v5196_v13 = vmul.f32 %v9985_v59, %v9985_v59  ;;  %v5229_v12 = vsel %vm5086_vm5, %v5194_v38, 0.0  ;;  %v5197_v27 = vmul.f32 %v9991_v34, %v9991_v34 }
 0x35a   : > { %v5226_v9 = vadd.f32 %v5225_v15, %v5224_v48  ;;  %v5231_v53 = vsel %vm5086_vm5, %v5195_v60, 0.0  ;;  %v10006_v15 = vsub.f32 %v9673_v52, %v5157_v20  ;;  %v5198_v17 = vmul.f32 %v9997_v47, %v9997_v47 }
 0x35b   : > { %v5233_v26 = vsel %vm5086_vm5, %v5196_v13, 0.0  ;;  %v5201_v52 = vmul.f32 %v9898_v3, %v9898_v3  ;;  %v5202_v13 = vmul.f32 %v9901_v44, %v9901_v44 }
 0x35c   : > { %v5228_v39 = vadd.f32 %v5227_v35, %v5226_v9  ;;  %v5199_v35 = vmul.f32 %v9895_v4, %v9895_v4  ;;  %v5237_v60 = vsel %vm5086_vm5, %v5198_v17, 0.0  ;;  %v5204_v17 = vmul.f32 %v9907_v57, %v9907_v57 }
 0x35e   : > { %v5230_v11 = vadd.f32 %v5229_v12, %v5228_v39  ;;  %v5235_v39 = vsel %vm5086_vm5, %v5197_v27, 0.0  ;;  %v5200_v12 = vmul.f32 %v10006_v15, %v10006_v15  ;;  %v5239_v20 = vsel %vm5086_vm5, %v5199_v35, 0.0 }
 0x35f   : > { %v5203_v27 = vmul.f32 %v9904_v6, %v9904_v6  ;;  %v5205_v35 = vmul.f32 %v9910_v61, %v9910_v61 }
 0x360   : > { %v5232_v48 = vadd.f32 %v5231_v53, %v5230_v11 }
 0x362   : > { %v5234_v9 = vadd.f32 %v5233_v26, %v5232_v48  ;;  %v5241_v48 = vsel %vm5086_vm5, %v5200_v12, 0.0  ;;  %v5206_v12 = vmul.f32 %v9913_v18, %v9913_v18 }
 0x364   : > { %v5236_v38 = vadd.f32 %v5235_v39, %v5234_v9  ;;  %v5243_v9 = vsel %vm5086_vm5, %v5201_v52, 0.0  ;;  %v5207_v52 = vmul.f32 %v9916_v28, %v9916_v28 }
 0x366   : > { %v5238_v11 = vadd.f32 %v5237_v60, %v5236_v38  ;;  %v5245_v38 = vsel %vm5086_vm5, %v5202_v13, 0.0  ;;  %v5208_v13 = vmul.f32 %v9919_v36, %v9919_v36 }
 0x368   : > { %v5240_v53 = vadd.f32 %v5239_v20, %v5238_v11  ;;  %v5247_v11 = vsel %vm5086_vm5, %v5203_v27, 0.0  ;;  %v5209_v27 = vmul.f32 %v9922_v14, %v9922_v14 }
 0x36a   : > { %v5242_v26 = vadd.f32 %v5241_v48, %v5240_v53  ;;  %v5249_v53 = vsel %vm5086_vm5, %v5204_v17, 0.0  ;;  %v5210_v17 = vmul.f32 %v9925_v41, %v9925_v41 }
 0x36c   : > { %v5244_v39 = vadd.f32 %v5243_v9, %v5242_v26  ;;  %v5251_v26 = vsel %vm5086_vm5, %v5205_v35, 0.0  ;;  %v5211_v35 = vmul.f32 %v9928_v0, %v9928_v0  ;;  %v10948_v0 = vld [vmem:[#allocation14_spill] sm:$0xff] }
 0x36d   : > { %v10153_v41 = vadd.f32 1.0, %v10948_v0  ;;  %v10960_v0 = vld [vmem:[#allocation2_spill] sm:$0xff] }
 0x36e   : > { %v5246_v60 = vadd.f32 %v5245_v38, %v5244_v39  ;;  %v5253_v39 = vsel %vm5086_vm5, %v5206_v12, 0.0  ;;  %v5212_v12 = vmul.f32 %v9931_v42, %v9931_v42  ;;  %v10952_v42 = vld [vmem:[#allocation18_spill] sm:$0xff] }
 0x36f   : > { %10949 = vst [vmem:[#allocation39_spill] sm:$0xff] %v10153_v41  ;;  %v10175_v41 = vadd.f32 1.0, %v10960_v0 }
 0x370   : > { %v5248_v20 = vadd.f32 %v5247_v11, %v5246_v60  ;;  %v5255_v60 = vsel %vm5086_vm5, %v5207_v52, 0.0  ;;  %v5213_v52 = vmul.f32 %v9934_v50, %v9934_v50 }
 0x371   : > { %10961 = vst [vmem:[#allocation58_spill] sm:$0xff] %v10175_v41 }
 0x372   : > { %v5250_v48 = vadd.f32 %v5249_v53, %v5248_v20  ;;  %v5257_v20 = vsel %vm5086_vm5, %v5208_v13, 0.0  ;;  %v5214_v13 = vmul.f32 %v9937_v8, %v9937_v8 }
 0x374   : > { %v5252_v9 = vadd.f32 %v5251_v26, %v5250_v48  ;;  %v5259_v48 = vsel %vm5086_vm5, %v5209_v27, 0.0  ;;  %v5215_v27 = vmul.f32 %v9940_v1, %v9940_v1 }
 0x376   : > { %v5254_v38 = vadd.f32 %v5253_v39, %v5252_v9  ;;  %v5261_v9 = vsel %vm5086_vm5, %v5210_v17, 0.0  ;;  %v5216_v17 = vmul.f32 %v9943_v10, %v9943_v10  ;;  %v10946_v10 = vld [vmem:[#allocation12_spill] sm:$0xff] }
 0x378   : > { %v5256_v11 = vadd.f32 %v5255_v60, %v5254_v38  ;;  %v5263_v38 = vsel %vm5086_vm5, %v5211_v35, 0.0  ;;  %v5217_v35 = vmul.f32 %v9946_v24, %v9946_v24  ;;  %v10944_v24 = vld [vmem:[#allocation10_spill] sm:$0xff] }
 0x37a   : > { %v5258_v53 = vadd.f32 %v5257_v20, %v5256_v11  ;;  %v5265_v11 = vsel %vm5086_vm5, %v5212_v12, 0.0  ;;  %v5218_v12 = vmul.f32 %v9948_v31, %v9948_v31 }
 0x37c   : > { %v5260_v26 = vadd.f32 %v5259_v48, %v5258_v53  ;;  %v5267_v53 = vsel %vm5086_vm5, %v5213_v52, 0.0  ;;  %v10071_v52 = vpop.permute.xlu1 %5426 }
 0x37e   : > { %v5262_v39 = vadd.f32 %v5261_v9, %v5260_v26  ;;  %v5269_v26 = vsel %vm5086_vm5, %v5214_v13, 0.0  ;;  %v5219_v13 = vmul.f32 %v9950_v16, %v9950_v16 }
 0x380   : > { %v5264_v60 = vadd.f32 %v5263_v38, %v5262_v39  ;;  %v5271_v39 = vsel %vm5086_vm5, %v5215_v27, 0.0  ;;  %v5220_v27 = vmul.f32 %v9952_v5, %v9952_v5 }
 0x382   : > { %v5266_v20 = vadd.f32 %v5265_v11, %v5264_v60  ;;  %v5273_v60 = vsel %vm5086_vm5, %v5216_v17, 0.0  ;;  %v5221_v17 = vmul.f32 %v9954_v43, %v9954_v43  ;;  %v5281_v16 = vsel %vm5086_vm5, %v5220_v27, 0.0 }
 0x384   : > { %v5268_v48 = vadd.f32 %v5267_v53, %v5266_v20  ;;  %v10073_v20 = vpop.permute.xlu0 %5422  ;;  %v5275_v53 = vsel %vm5086_vm5, %v5217_v35, 0.0 }
 0x386   : > { %v5270_v9 = vadd.f32 %v5269_v26, %v5268_v48  ;;  %v5277_v26 = vsel %vm5086_vm5, %v5218_v12, 0.0 }
 0x388   : > { %v5272_v38 = vadd.f32 %v5271_v39, %v5270_v9  ;;  %v5279_v39 = vsel %vm5086_vm5, %v5219_v13, 0.0  ;;  %v10086_v55 = vpop.permute.xlu0 %5424 }
 0x38a   : > { %v5274_v11 = vadd.f32 %v5273_v60, %v5272_v38  ;;  %v10084_v60 = vpop.permute.xlu1 %5428 }
 0x38c   : > { %v5276_v48 = vadd.f32 %v5275_v53, %v5274_v11  ;;  %v5283_v11 = vsel %vm5086_vm5, %v5221_v17, 0.0 }
 0x38e   : > { %v5278_v9 = vadd.f32 %v5277_v26, %v5276_v48  ;;  %v10090_v5 = vpop.permute.xlu1 %5436  ;;  %v10092_v48 = vpop.permute.xlu0 %5434 }
 0x390   : > { %v5280_v38 = vadd.f32 %v5279_v39, %v5278_v9 }
 0x392   : > { %v5282_v35 = vadd.f32 %v5281_v16, %v5280_v38  ;;  %v10094_v31 = vpop.permute.xlu1 %5432  ;;  %v10096_v9 = vpop.permute.xlu0 %5430 }
 0x394   : > { %v5284_v53 = vadd.f32 %v5283_v11, %v5282_v35  ;;  %v5328_v11 = vadd.f32 1.0, %v9590_v7  ;;  %v10121_v7 = vadd.f32 1.0, %v9681_v33 }
 0x396   : > { %v5285_v12 = vrot.slane %v5284_v53, 4  ;;  %v10098_v8 = vpop.permute.xlu1 %5444  ;;  %v10100_v27 = vpop.permute.xlu0 %5442 }
 0x398   : > { %v5286_v26 = vadd.f32 %v5285_v12, %v5284_v53  ;;  %v5326_v53 = vadd.f32 1.0, %v9596_v63  ;;  %v5327_v12 = vadd.f32 1.0, %v9618_v46  ;;  %v10124_v63 = vadd.f32 1.0, %v9698_v51 }
 0x399   : > { %v10130_v46 = vadd.f32 1.0, %v9735_v45  ;;  %v10150_v45 = vadd.f32 1.0, %v10946_v10 }
 0x39a   : > { %v5287_v43 = vrot.slane %v5286_v26, 2  ;;  %v10102_v38 = vpop.permute.xlu1 %5440  ;;  %v10104_v35 = vpop.permute.xlu0 %5438 }
 0x39b   : > { %10947 = vst [vmem:[#allocation41_spill] sm:$0xff] %v10150_v45 }
 0x39c   : > { %v5288_v13 = vadd.f32 %v5287_v43, %v5286_v26  ;;  %v5329_v43 = vadd.f32 1.0, %v9613_v19  ;;  %v5332_v26 = vadd.f32 1.0, %v9630_v32  ;;  %v10127_v19 = vadd.f32 1.0, %v9708_v54 }
 0x39d   : > { %v10147_v54 = vadd.f32 1.0, %v10944_v24 }
 0x39e   : > { %v5289_v39 = vrot.slane %v5288_v13, 1  ;;  %v10132_v32 = vpop.permute.xlu1 %5452 }
 0x39f   : > { %10945 = vst [vmem:[#allocation38_spill] sm:$0xff] %v10147_v54  ;;  %v10958_v54 = vld [vmem:[#allocation24_spill] sm:$0xff] }
 0x3a0   : > { %v5290_v1 = vadd.f32 %v5289_v39, %v5288_v13  ;;  %v5333_v13 = vadd.f32 1.0, %v9641_v21  ;;  %v5331_v39 = vadd.f32 1.0, %v9658_v23  ;;  %v10135_v21 = vadd.f32 1.0, %v9721_v40  ;;  %v10950_v40 = vld [vmem:[#allocation15_spill] sm:$0xff] }
 0x3a1   : > { %v10156_v50 = vadd.f32 1.0, %v10950_v40  ;;  %v10170_v10 = vadd.f32 1.0, %v10958_v54  ;;  %v10178_v40 = vadd.f32 1.0, %v9858_v30 }
 0x3a2   : > { %v5291_v16 = vmul.f32 0.00390625, %v5290_v1  ;;  %v5330_v1 = vadd.f32 1.0, %v9655_v37  ;;  %v10939_v37 = vld [vmem:[#allocation4_spill] sm:$0xff] }
 0x3a3   : > { %v10138_v23 = vadd.f32 1.0, %v10939_v37  ;;  %10951 = vst [vmem:[#allocation43_spill] sm:$0xff] %v10156_v50  ;;  %v10158_v37 = vpop.permute.xlu0 %5450  ;;  %10959 = vst [vmem:[#allocation55_spill] sm:$0xff] %v10170_v10  ;;  %v10963_v50 = vld [vmem:[#allocation25_spill] sm:$0xff] }
 0x3a4   : > { %v5292_v17 = vadd.f32 1e-05, %v5291_v16  ;;  %v10115_v16 = vadd.f32 1.0, %v9668_v62  ;;  %v10940_v62 = vld [vmem:[#allocation6_spill] sm:$0xff]  ;;  %10962 = vst [vmem:[#allocation59_spill] sm:$0xff] %v10178_v40 }
 0x3a5   : > { %v10141_v33 = vadd.f32 1.0, %v10940_v62  ;;  %v10161_v62 = vadd.f32 1.0, %v10952_v42  ;;  %v10181_v42 = vadd.f32 1.0, %v10963_v50 }
 0x3a6   : > { %7839 = vrsqrt.f32 %v5292_v17  ;;  %v10118_v17 = vadd.f32 1.0, %v9695_v49  ;;  %v10942_v49 = vld [vmem:[#allocation8_spill] sm:$0xff] }
 0x3a7   : > { %10941 = vst [vmem:[#allocation3_spill] sm:$0xff] %v10141_v33  ;;  %v10144_v51 = vadd.f32 1.0, %v10942_v49  ;;  %10953 = vst [vmem:[#allocation47_spill] sm:$0xff] %v10161_v62  ;;  %v10954_v33 = vld [vmem:[#allocation20_spill] sm:$0xff]  ;;  %v10965_v62 = vld [vmem:[#allocation30_spill] sm:$0xff] }
 0x3a8   : > { %v10164_v49 = vadd.f32 1.0, %v10954_v33  ;;  %10964 = vst [vmem:[#allocation9_spill] sm:$0xff] %v10181_v42  ;;  %v10184_v33 = vadd.f32 1.0, %v10965_v62 }
 0x3a9   : > { %10943 = vst [vmem:[#allocation35_spill] sm:$0xff] %v10144_v51  ;;  %v10956_v51 = vld [vmem:[#allocation22_spill] sm:$0xff] }
 0x3aa   : > { %10955 = vst [vmem:[#allocation52_spill] sm:$0xff] %v10164_v49  ;;  %v10167_v24 = vadd.f32 1.0, %v10956_v51  ;;  %10966 = vst [vmem:[#allocation11_spill] sm:$0xff] %v10184_v33  ;;  %v10204_v49 = vpop.permute.xlu0 %5446 }
 0x3ac   : > { %10957 = vst [vmem:[#allocation49_spill] sm:$0xff] %v10167_v24 }
 0x3b0   : > { %v10172_v45 = vpop.eup %7839 }
 0x3b1   : > { %v5296_v51 = vmul.f32 %v10172_v45, %v9963_v29  ;;  %v5294_v54 = vmul.f32 %v10172_v45, %v9957_v56  ;;  %v5297_v0 = vmul.f32 %v10172_v45, %v9966_v58  ;;  %v5295_v30 = vmul.f32 %v10172_v45, %v9960_v2  ;;  %v10202_v56 = vpop.permute.xlu1 %5448 }
 0x3b2   : > { %v5300_v50 = vmul.f32 %v10172_v45, %v9985_v59  ;;  %v5301_v62 = vmul.f32 %v10172_v45, %v9991_v34  ;;  %v5298_v33 = vmul.f32 %v10172_v45, %v9973_v22  ;;  %v5299_v29 = vmul.f32 %v10172_v45, %v9978_v25 }
 0x3b3   : > { %v5360_v42 = vmul.f32 %v5328_v11, %v5296_v51  ;;  %v5358_v58 = vmul.f32 %v5326_v53, %v5294_v54  ;;  %v5361_v40 = vmul.f32 %v5329_v43, %v5297_v0  ;;  %v5359_v10 = vmul.f32 %v5327_v12, %v5295_v30 }
 0x3b4   : > { %v5364_v2 = vmul.f32 %v5332_v26, %v5300_v50  ;;  %v5365_v41 = vmul.f32 %v5333_v13, %v5301_v62  ;;  %v5362_v24 = vmul.f32 %v5330_v1, %v5298_v33  ;;  %v5363_v59 = vmul.f32 %v5331_v39, %v5299_v29  ;;  %v10222_v39 = vpop.permute.xlu0 %5458 }
 0x3b5   : > { %v5520_v34 = vadd.f32 %v10071_v52, %v5360_v42  ;;  %v5518_v22 = vadd.f32 %v10073_v20, %v5358_v58  ;;  %v5521_v28 = vadd.f32 %v10084_v60, %v5361_v40  ;;  %v5519_v25 = vadd.f32 %v10086_v55, %v5359_v10  ;;  %v10215_v60 = vpop.permute.xlu1 %5460 }
 0x3b6   : > { %v5524_v11 = vadd.f32 %v10092_v48, %v5364_v2  ;;  %v5525_v53 = vadd.f32 %v10090_v5, %v5365_v41  ;;  %v5522_v43 = vadd.f32 %v10096_v9, %v5362_v24  ;;  %v5523_v12 = vadd.f32 %v10094_v31, %v5363_v59 }
 0x3b7   : > { %vm5552_vm7 = vcmp.gt.f32.partialorder %v5520_v34, 0.0  ;;  %v5584_v26 = vmul.f32 0.2, %v5520_v34  ;;  %vm5550_vm8 = vcmp.gt.f32.partialorder %v5518_v22, 0.0  ;;  %v5582_v1 = vmul.f32 0.2, %v5518_v22 }
 0x3b8   : > { %vm5553_vm9 = vcmp.gt.f32.partialorder %v5521_v28, 0.0  ;;  %v5585_v52 = vmul.f32 0.2, %v5521_v28  ;;  %vm5551_vm10 = vcmp.gt.f32.partialorder %v5519_v25, 0.0  ;;  %v5583_v20 = vmul.f32 0.2, %v5519_v25 }
 0x3b9   : > { %v5616_v55 = vsel %vm5552_vm7, %v5520_v34, %v5584_v26  ;;  %v5614_v41 = vsel %vm5550_vm8, %v5518_v22, %v5582_v1  ;;  %vm5556_vm11 = vcmp.gt.f32.partialorder %v5524_v11, 0.0  ;;  %v5588_v31 = vmul.f32 0.2, %v5524_v11  ;;  %v10242_v58 = vpop.permute.xlu1 %5456 }
 0x3ba   : > { %v6279_v5 = vpack.c.bf16 %v5616_v55, %v5616_v55  ;;  %v6277_v48 = vpack.c.bf16 %v5614_v41, %v5614_v41  ;;  %v5617_v9 = vsel %vm5553_vm9, %v5521_v28, %v5585_v52  ;;  %v5615_v13 = vsel %vm5551_vm10, %v5519_v25, %v5583_v20 }
 0x3bb   : > { %v6280_v24 = vpack.c.bf16 %v5617_v9, %v5617_v9  ;;  %v6278_v10 = vpack.c.bf16 %v5615_v13, %v5615_v13  ;;  %v5620_v40 = vsel %vm5556_vm11, %v5524_v11, %v5588_v31  ;;  %vm5557_vm12 = vcmp.gt.f32.partialorder %v5525_v53, 0.0 }
 0x3bc   : > { %5777 = vst.msk [vmem:[%s10220_s29 + $0x8] sm:$0xf] %vm5774_vm6, %v6279_v5  ;;  %5775 = vst.msk [vmem:[%s10220_s29] sm:$0xf] %vm5774_vm6, %v6277_v48  ;;  %v6283_v42 = vpack.c.bf16 %v5620_v40, %v5620_v40  ;;  %v5589_v33 = vmul.f32 0.2, %v5525_v53  ;;  %v5304_v54 = vmul.f32 %v10172_v45, %v10006_v15  ;;  %v5305_v0 = vmul.f32 %v10172_v45, %v9898_v3 }
 0x3bd   : > { %vm5554_vm13 = vcmp.gt.f32.partialorder %v5522_v43, 0.0  ;;  %v5586_v51 = vmul.f32 0.2, %v5522_v43  ;;  %5778 = vst.msk [vmem:[%s10220_s29 + $0xc] sm:$0xf] %vm5774_vm6, %v6280_v24  ;;  %vm5555_vm14 = vcmp.gt.f32.partialorder %v5523_v12, 0.0  ;;  %v5302_v62 = vmul.f32 %v10172_v45, %v9997_v47  ;;  %v10270_v1 = vpop.permute.xlu1 %5468 }
 0x3be   : > { %5776 = vst.msk [vmem:[%s10220_s29 + $0x4] sm:$0xf] %vm5774_vm6, %v6278_v10  ;;  %v5587_v28 = vmul.f32 0.2, %v5523_v12  ;;  %5781 = vst.msk [vmem:[%s10220_s29 + $0x18] sm:$0xf] %vm5774_vm6, %v6283_v42  ;;  %v5621_v30 = vsel %vm5557_vm12, %v5525_v53, %v5589_v33  ;;  %v5303_v29 = vmul.f32 %v10172_v45, %v9895_v4  ;;  %v5368_v3 = vmul.f32 %v10115_v16, %v5304_v54  ;;  %v10248_v53 = vpop.permute.xlu0 %5454 }
 0x3bf   : > { %v5618_v50 = vsel %vm5554_vm13, %v5522_v43, %v5586_v51  ;;  %v6284_v2 = vpack.c.bf16 %v5621_v30, %v5621_v30  ;;  %v5369_v22 = vmul.f32 %v10121_v7, %v5305_v0  ;;  %v5366_v25 = vmul.f32 %v10118_v17, %v5302_v62  ;;  %v10967_v33 = vld [vmem:[#allocation33_spill] sm:$0xff]  ;;  %v10968_v54 = vld [vmem:[#allocation3_spill] sm:$0xff]  ;;  %v10969_v30 = vld [vmem:[#allocation38_spill] sm:$0xff] }
 0x3c0   : > { %v6281_v15 = vpack.c.bf16 %v5618_v50, %v5618_v50  ;;  %v5619_v59 = vsel %vm5555_vm14, %v5523_v12, %v5587_v28  ;;  %v5367_v11 = vmul.f32 %v10124_v63, %v5303_v29  ;;  %v5528_v4 = vadd.f32 %v10100_v27, %v5368_v3  ;;  %v10970_v62 = vld [vmem:[#allocation35_spill] sm:$0xff] }
 0x3c1   : > { %v6282_v34 = vpack.c.bf16 %v5619_v59, %v5619_v59  ;;  %5782 = vst.msk [vmem:[%s10220_s29 + $0x1c] sm:$0xf] %vm5774_vm6, %v6284_v2  ;;  %v5308_v47 = vmul.f32 %v10172_v45, %v9907_v57  ;;  %v5309_v16 = vmul.f32 %v10172_v45, %v9910_v61  ;;  %v5306_v7 = vmul.f32 %v10172_v45, %v9901_v44  ;;  %v10294_v51 = vpop.permute.xlu1 %5464  ;;  %v10971_v2 = vld [vmem:[#allocation41_spill] sm:$0xff] }
 0x3c2   : > { %5779 = vst.msk [vmem:[%s10220_s29 + $0x10] sm:$0xf] %vm5774_vm6, %v6281_v15  ;;  %v5529_v17 = vadd.f32 %v10098_v8, %v5369_v22  ;;  %v5526_v63 = vadd.f32 %v10104_v35, %v5366_v25  ;;  %v5527_v43 = vadd.f32 %v10102_v38, %v5367_v11  ;;  %v5307_v27 = vmul.f32 %v10172_v45, %v9904_v6 }
 0x3c3   : > { %5780 = vst.msk [vmem:[%s10220_s29 + $0x14] sm:$0xf] %vm5774_vm6, %v6282_v34  ;;  %vm5560_vm15 = vcmp.gt.f32.partialorder %v5528_v4, 0.0  ;;  %v5592_v12 = vmul.f32 0.2, %v5528_v4  ;;  %v5372_v57 = vmul.f32 %v10127_v19, %v5308_v47  ;;  %v5373_v61 = vmul.f32 %v10135_v21, %v5309_v16  ;;  %v10274_v21 = vpop.permute.xlu0 %5466  ;;  %v10973_v16 = vld [vmem:[#allocation63_spill] sm:$0xff] }
 0x3c4   : > { %vm5561_vm0 = vcmp.gt.f32.partialorder %v5529_v17, 0.0  ;;  %v5593_v26 = vmul.f32 0.2, %v5529_v17  ;;  %vm5558_vm1 = vcmp.gt.f32.partialorder %v5526_v63, 0.0  ;;  %v5590_v44 = vmul.f32 0.2, %v5526_v63 }
 0x3c5   : > { %v5624_v8 = vsel %vm5560_vm15, %v5528_v4, %v5592_v12  ;;  %vm5559_vm2 = vcmp.gt.f32.partialorder %v5527_v43, 0.0  ;;  %v5591_v35 = vmul.f32 0.2, %v5527_v43  ;;  %v5532_v38 = vadd.f32 %v10158_v37, %v5372_v57  ;;  %v10972_v4 = vld [vmem:[#allocation61_spill] sm:$0xff]  ;;  %v10974_v12 = vld [vmem:[#allocation39_spill] sm:$0xff] }
 0x3c6   : > { %v6287_v6 = vpack.c.bf16 %v5624_v8, %v5624_v8  ;;  %v5625_v52 = vsel %vm5561_vm0, %v5529_v17, %v5593_v26  ;;  %v5622_v20 = vsel %vm5558_vm1, %v5526_v63, %v5590_v44  ;;  %v5533_v19 = vadd.f32 %v10132_v32, %v5373_v61 }
 0x3c7   : > { %v6288_v55 = vpack.c.bf16 %v5625_v52, %v5625_v52  ;;  %v6285_v41 = vpack.c.bf16 %v5622_v20, %v5622_v20  ;;  %v5623_v31 = vsel %vm5559_vm2, %v5527_v43, %v5591_v35  ;;  %vm5564_vm3 = vcmp.gt.f32.partialorder %v5532_v38, 0.0  ;;  %v5477_v43 = vpop.permute.xlu1 %5476  ;;  %v10975_v35 = vld [vmem:[#allocation47_spill] sm:$0xff] }
 0x3c8   : > { %5785 = vst.msk [vmem:[%s10220_s29 + $0x28] sm:$0xf] %vm5774_vm6, %v6287_v6  ;;  %v6286_v5 = vpack.c.bf16 %v5623_v31, %v5623_v31  ;;  %v5596_v48 = vmul.f32 0.2, %v5532_v38  ;;  %vm5565_vm4 = vcmp.gt.f32.partialorder %v5533_v19, 0.0  ;;  %v5370_v37 = vmul.f32 %v10130_v46, %v5306_v7  ;;  %v10976_v31 = vld [vmem:[#allocation5_spill] sm:$0xff] }
 0x3c9   : > { %v5597_v9 = vmul.f32 0.2, %v5533_v19  ;;  %5786 = vst.msk [vmem:[%s10220_s29 + $0x2c] sm:$0xf] %vm5774_vm6, %v6288_v55  ;;  %5783 = vst.msk [vmem:[%s10220_s29 + $0x20] sm:$0xf] %vm5774_vm6, %v6285_v41  ;;  %v5371_v32 = vmul.f32 %v10138_v23, %v5307_v27  ;;  %v5312_v13 = vmul.f32 %v10172_v45, %v9919_v36  ;;  %v5313_v24 = vmul.f32 %v10172_v45, %v9922_v14 }
 0x3ca   : > { %5784 = vst.msk [vmem:[%s10220_s29 + $0x24] sm:$0xf] %vm5774_vm6, %v6286_v5  ;;  %v5628_v10 = vsel %vm5564_vm3, %v5532_v38, %v5596_v48  ;;  %v5310_v42 = vmul.f32 %v10172_v45, %v9913_v18  ;;  %v5311_v46 = vmul.f32 %v10172_v45, %v10967_v33  ;;  %v5530_v36 = vadd.f32 %v10204_v49, %v5370_v37  ;;  %v10302_v18 = vpop.permute.xlu0 %5462  ;;  %v10977_v48 = vld [vmem:[#allocation7_spill] sm:$0xff]  ;;  %v10981_v33 = vld [vmem:[#allocation52_spill] sm:$0xff] }
 0x3cb   : > { %v5629_v40 = vsel %vm5565_vm4, %v5533_v19, %v5597_v9  ;;  %v6291_v23 = vpack.c.bf16 %v5628_v10, %v5628_v10  ;;  %v5531_v14 = vadd.f32 %v10202_v56, %v5371_v32  ;;  %v5376_v0 = vmul.f32 %v10968_v54, %v5312_v13  ;;  %v10978_v32 = vld [vmem:[#allocation65_spill] sm:$0xff]  ;;  %v10979_v13 = vld [vmem:[#allocation66_spill] sm:$0xff]  ;;  %v5473_v10 = vpop.permute.xlu1 %5472 }
 0x3cc   : > { %v6292_v28 = vpack.c.bf16 %v5629_v40, %v5629_v40  ;;  %v5377_v50 = vmul.f32 %v10969_v30, %v5313_v24  ;;  %v5374_v29 = vmul.f32 %v10970_v62, %v5310_v42  ;;  %v5375_v15 = vmul.f32 %v10971_v2, %v5311_v46  ;;  %v10980_v40 = vld [vmem:[#allocation43_spill] sm:$0xff]  ;;  %v10984_v30 = vld [vmem:[#allocation62_spill] sm:$0xff] }
 0x3cd   : > { %5789 = vst.msk [vmem:[%s10220_s29 + $0x38] sm:$0xf] %vm5774_vm6, %v6291_v23  ;;  %vm5562_vm5 = vcmp.gt.f32.partialorder %v5530_v36, 0.0  ;;  %v5594_v59 = vmul.f32 0.2, %v5530_v36  ;;  %vm5563_vm7 = vcmp.gt.f32.partialorder %v5531_v14, 0.0  ;;  %v5536_v56 = vadd.f32 %v10222_v39, %v5376_v0 }
 0x3ce   : > { %5790 = vst.msk [vmem:[%s10220_s29 + $0x3c] sm:$0xf] %vm5774_vm6, %v6292_v28  ;;  %v5595_v49 = vmul.f32 0.2, %v5531_v14  ;;  %v5537_v3 = vadd.f32 %v10215_v60, %v5377_v50  ;;  %v5534_v34 = vadd.f32 %v10248_v53, %v5374_v29  ;;  %v5535_v22 = vadd.f32 %v10242_v58, %v5375_v15  ;;  %v5475_v61 = vpop.permute.xlu0 %5474  ;;  %v10982_v28 = vld [vmem:[#allocation49_spill] sm:$0xff] }
 0x3cf   : > { %v5626_v25 = vsel %vm5562_vm5, %v5530_v36, %v5594_v59  ;;  %v5316_v47 = vmul.f32 %v10172_v45, %v10972_v4  ;;  %v5317_v7 = vmul.f32 %v10172_v45, %v10973_v16  ;;  %vm5568_vm8 = vcmp.gt.f32.partialorder %v5536_v56, 0.0 }
 0x3d0   : > { %v5627_v11 = vsel %vm5563_vm7, %v5531_v14, %v5595_v49  ;;  %v6289_v17 = vpack.c.bf16 %v5626_v25, %v5626_v25  ;;  %v5600_v39 = vmul.f32 0.2, %v5536_v56  ;;  %vm5569_vm9 = vcmp.gt.f32.partialorder %v5537_v3, 0.0  ;;  %v10983_v14 = vld [vmem:[#allocation58_spill] sm:$0xff] }
 0x3d1   : > { %v6290_v63 = vpack.c.bf16 %v5627_v11, %v5627_v11  ;;  %v5601_v60 = vmul.f32 0.2, %v5537_v3  ;;  %vm5566_vm10 = vcmp.gt.f32.partialorder %v5534_v34, 0.0  ;;  %v5598_v53 = vmul.f32 0.2, %v5534_v34 }
 0x3d2   : > { %5787 = vst.msk [vmem:[%s10220_s29 + $0x30] sm:$0xf] %vm5774_vm6, %v6289_v17  ;;  %v5632_v58 = vsel %vm5568_vm8, %v5536_v56, %v5600_v39  ;;  %vm5567_vm11 = vcmp.gt.f32.partialorder %v5535_v22, 0.0  ;;  %v5599_v27 = vmul.f32 0.2, %v5535_v22  ;;  %v5380_v57 = vmul.f32 %v10974_v12, %v5316_v47  ;;  %v5471_v0 = vpop.permute.xlu0 %5470 }
 0x3d3   : > { %5788 = vst.msk [vmem:[%s10220_s29 + $0x34] sm:$0xf] %vm5774_vm6, %v6290_v63  ;;  %v6295_v26 = vpack.c.bf16 %v5632_v58, %v5632_v58  ;;  %v5633_v44 = vsel %vm5569_vm9, %v5537_v3, %v5601_v60  ;;  %v5630_v8 = vsel %vm5566_vm10, %v5534_v34, %v5598_v53  ;;  %v5381_v38 = vmul.f32 %v10975_v35, %v5317_v7  ;;  %v10985_v3 = vld [vmem:[#allocation55_spill] sm:$0xff]  ;;  %v10986_v7 = vld [vmem:[#allocation64_spill] sm:$0xff] }
 0x3d4   : > { %v6296_v6 = vpack.c.bf16 %v5633_v44, %v5633_v44  ;;  %v6293_v52 = vpack.c.bf16 %v5630_v8, %v5630_v8  ;;  %v5631_v20 = vsel %vm5567_vm11, %v5535_v22, %v5599_v27  ;;  %v5540_v19 = vadd.f32 %v10274_v21, %v5380_v57  ;;  %v10987_v57 = vld [vmem:[#allocation59_spill] sm:$0xff]  ;;  %v10989_v8 = vld [vmem:[#allocation48_spill] sm:$0xff] }
 0x3d5   : > { %5793 = vst.msk [vmem:[%s10220_s29 + $0x48] sm:$0xf] %vm5774_vm6, %v6295_v26  ;;  %v6294_v55 = vpack.c.bf16 %v5631_v20, %v5631_v20  ;;  %v5541_v41 = vadd.f32 %v10270_v1, %v5381_v38  ;;  %v5314_v5 = vmul.f32 %v10172_v45, %v10976_v31  ;;  %v5315_v9 = vmul.f32 %v10172_v45, %v10977_v48  ;;  %v10988_v26 = vld [vmem:[#allocation45_spill] sm:$0xff]  ;;  %v10990_v38 = vld [vmem:[#allocation54_spill] sm:$0xff]  ;;  %v10993_v31 = vld [vmem:[#allocation51_spill] sm:$0xff] }
 0x3d6   : > { %5794 = vst.msk [vmem:[%s10220_s29 + $0x4c] sm:$0xf] %vm5774_vm6, %v6296_v6  ;;  %5791 = vst.msk [vmem:[%s10220_s29 + $0x40] sm:$0xf] %vm5774_vm6, %v6293_v52  ;;  %vm5572_vm12 = vcmp.gt.f32.partialorder %v5540_v19, 0.0  ;;  %v5320_v21 = vmul.f32 %v10172_v45, %v10978_v32  ;;  %v5321_v24 = vmul.f32 %v10172_v45, %v10979_v13  ;;  %v5318_v50 = vmul.f32 %v10172_v45, %v10984_v30  ;;  %v5479_v53 = vpop.permute.xlu0 %5478  ;;  %v10991_v52 = vld [vmem:[#allocation27_spill] sm:$0xff] }
 0x3d7   : > { %v5604_v37 = vmul.f32 0.2, %v5540_v19  ;;  %5792 = vst.msk [vmem:[%s10220_s29 + $0x44] sm:$0xf] %vm5774_vm6, %v6294_v55  ;;  %vm5573_vm13 = vcmp.gt.f32.partialorder %v5541_v41, 0.0  ;;  %v5378_v42 = vmul.f32 %v10980_v40, %v5314_v5  ;;  %v5379_v46 = vmul.f32 %v10981_v33, %v5315_v9 }
 0x3d8   : > { %v5605_v1 = vmul.f32 0.2, %v5541_v41  ;;  %v5384_v36 = vmul.f32 %v10982_v28, %v5320_v21  ;;  %v5385_v54 = vmul.f32 %v10983_v14, %v5321_v24  ;;  %v5382_v34 = vmul.f32 %v10985_v3, %v5318_v50  ;;  %v10995_v21 = vld [vmem:[#allocation11_spill] sm:$0xff] }
 0x3d9   : > { %v5636_v23 = vsel %vm5572_vm12, %v5540_v19, %v5604_v37  ;;  %v5538_v2 = vadd.f32 %v10302_v18, %v5378_v42  ;;  %v5539_v15 = vadd.f32 %v10294_v51, %v5379_v46  ;;  %v5481_v51 = vpop.permute.xlu1 %5480  ;;  %v5319_v17 = vmul.f32 %v10172_v45, %v10986_v7  ;;  %v10992_v19 = vld [vmem:[#allocation31_spill] sm:$0xff]  ;;  %v10994_v37 = vld [vmem:[#allocation9_spill] sm:$0xff] }
 0x3da   : > { %v6299_v62 = vpack.c.bf16 %v5636_v23, %v5636_v23  ;;  %v5637_v29 = vsel %vm5573_vm13, %v5541_v41, %v5605_v1  ;;  %v5544_v49 = vadd.f32 %v5475_v61, %v5384_v36  ;;  %v5545_v56 = vadd.f32 %v5477_v43, %v5385_v54  ;;  %v5483_v23 = vpop.permute.xlu0 %5482 }
 0x3db   : > { %v6300_v59 = vpack.c.bf16 %v5637_v29, %v5637_v29  ;;  %vm5570_vm14 = vcmp.gt.f32.partialorder %v5538_v2, 0.0  ;;  %v5602_v22 = vmul.f32 0.2, %v5538_v2  ;;  %vm5571_vm15 = vcmp.gt.f32.partialorder %v5539_v15, 0.0 }
 0x3dc   : > { %5797 = vst.msk [vmem:[%s10220_s29 + $0x58] sm:$0xf] %vm5774_vm6, %v6299_v62  ;;  %v5603_v25 = vmul.f32 0.2, %v5539_v15  ;;  %vm5576_vm0 = vcmp.gt.f32.partialorder %v5544_v49, 0.0  ;;  %vm5577_vm1 = vcmp.gt.f32.partialorder %v5545_v56, 0.0  ;;  %v5542_v16 = vadd.f32 %v5471_v0, %v5382_v34 }
 0x3dd   : > { %5798 = vst.msk [vmem:[%s10220_s29 + $0x5c] sm:$0xf] %vm5774_vm6, %v6300_v59  ;;  %v5608_v11 = vmul.f32 0.2, %v5544_v49  ;;  %v5609_v18 = vmul.f32 0.2, %v5545_v56  ;;  %v5634_v4 = vsel %vm5570_vm14, %v5538_v2, %v5602_v22  ;;  %v5383_v61 = vmul.f32 %v10987_v57, %v5319_v17  ;;  %v5485_v24 = vpop.permute.xlu1 %5484 }
 0x3de   : > { %v5635_v47 = vsel %vm5571_vm15, %v5539_v15, %v5603_v25  ;;  %v6297_v63 = vpack.c.bf16 %v5634_v4, %v5634_v4  ;;  %vm5574_vm2 = vcmp.gt.f32.partialorder %v5542_v16, 0.0  ;;  %v5606_v12 = vmul.f32 0.2, %v5542_v16 }
 0x3df   : > { %v6298_v39 = vpack.c.bf16 %v5635_v47, %v5635_v47  ;;  %v5640_v43 = vsel %vm5576_vm0, %v5544_v49, %v5608_v11  ;;  %v5641_v60 = vsel %vm5577_vm1, %v5545_v56, %v5609_v18  ;;  %v5322_v44 = vmul.f32 %v10172_v45, %v10988_v26 }
 0x3e0   : > { %v6303_v58 = vpack.c.bf16 %v5640_v43, %v5640_v43  ;;  %v6304_v27 = vpack.c.bf16 %v5641_v60, %v5641_v60  ;;  %5795 = vst.msk [vmem:[%s10220_s29 + $0x50] sm:$0xf] %vm5774_vm6, %v6297_v63  ;;  %v5323_v35 = vmul.f32 %v10172_v45, %v10989_v8  ;;  %v5324_v6 = vmul.f32 %v10172_v45, %v10990_v38 }
 0x3e1   : > { %5796 = vst.msk [vmem:[%s10220_s29 + $0x54] sm:$0xf] %vm5774_vm6, %v6298_v39  ;;  %v5356_v20 = vadd.f32 1.0, %v10991_v52  ;;  %v5357_v55 = vadd.f32 1.0, %v10992_v19  ;;  %v5638_v41 = vsel %vm5574_vm2, %v5542_v16, %v5606_v12  ;;  %v5325_v5 = vmul.f32 %v10172_v45, %v10993_v31 }
 0x3e2   : > { %5801 = vst.msk [vmem:[%s10220_s29 + $0x68] sm:$0xf] %vm5774_vm6, %v6303_v58  ;;  %5802 = vst.msk [vmem:[%s10220_s29 + $0x6c] sm:$0xf] %vm5774_vm6, %v6304_v27  ;;  %v6301_v48 = vpack.c.bf16 %v5638_v41, %v5638_v41  ;;  %v5543_v9 = vadd.f32 %v5473_v10, %v5383_v61  ;;  %v5386_v32 = vmul.f32 %v10994_v37, %v5322_v44 }
 0x3e3   : > { %v5387_v13 = vmul.f32 %v10995_v21, %v5323_v35  ;;  %v5388_v1 = vmul.f32 %v5356_v20, %v5324_v6  ;;  %v5389_v40 = vmul.f32 %v5357_v55, %v5325_v5 }
 0x3e4   : > { %5799 = vst.msk [vmem:[%s10220_s29 + $0x60] sm:$0xf] %vm5774_vm6, %v6301_v48  ;;  %vm5575_vm3 = vcmp.gt.f32.partialorder %v5543_v9, 0.0  ;;  %v5607_v42 = vmul.f32 0.2, %v5543_v9  ;;  %v5546_v33 = vadd.f32 %v5479_v53, %v5386_v32 }
 0x3e5   : > { %v5547_v46 = vadd.f32 %v5481_v51, %v5387_v13  ;;  %v5548_v28 = vadd.f32 %v5483_v23, %v5388_v1  ;;  %v5549_v36 = vadd.f32 %v5485_v24, %v5389_v40 }
 0x3e6   : > { %v5639_v45 = vsel %vm5575_vm3, %v5543_v9, %v5607_v42  ;;  %vm5578_vm4 = vcmp.gt.f32.partialorder %v5546_v33, 0.0  ;;  %v5610_v10 = vmul.f32 0.2, %v5546_v33 }
 0x3e7   : > { %vm5579_vm5 = vcmp.gt.f32.partialorder %v5547_v46, 0.0  ;;  %v6302_v14 = vpack.c.bf16 %v5639_v45, %v5639_v45  ;;  %v5611_v54 = vmul.f32 0.2, %v5547_v46  ;;  %vm5580_vm7 = vcmp.gt.f32.partialorder %v5548_v28, 0.0 }
 0x3e8   : > { %v5612_v0 = vmul.f32 0.2, %v5548_v28  ;;  %v5642_v30 = vsel %vm5578_vm4, %v5546_v33, %v5610_v10  ;;  %vm5581_vm8 = vcmp.gt.f32.partialorder %v5549_v36, 0.0  ;;  %v5613_v50 = vmul.f32 0.2, %v5549_v36 }
 0x3e9   : > { %5800 = vst.msk [vmem:[%s10220_s29 + $0x64] sm:$0xf] %vm5774_vm6, %v6302_v14  ;;  %v6305_v62 = vpack.c.bf16 %v5642_v30, %v5642_v30  ;;  %v5643_v29 = vsel %vm5579_vm5, %v5547_v46, %v5611_v54 }
 0x3ea   : > { %v5644_v2 = vsel %vm5580_vm7, %v5548_v28, %v5612_v0  ;;  %v6306_v15 = vpack.c.bf16 %v5643_v29, %v5643_v29  ;;  %v5645_v49 = vsel %vm5581_vm8, %v5549_v36, %v5613_v50 }
 0x3eb   : > { %v6307_v59 = vpack.c.bf16 %v5644_v2, %v5644_v2  ;;  %5803 = vst.msk [vmem:[%s10220_s29 + $0x70] sm:$0xf] %vm5774_vm6, %v6305_v62  ;;  %v6308_v56 = vpack.c.bf16 %v5645_v49, %v5645_v49 }
 0x3ec   : > { %5804 = vst.msk [vmem:[%s10220_s29 + $0x74] sm:$0xf] %vm5774_vm6, %v6306_v15 }
 0x3ed   : > { %5805 = vst.msk [vmem:[%s10220_s29 + $0x78] sm:$0xf] %vm5774_vm6, %v6307_v59  ;;  %5806 = vst.msk [vmem:[%s10220_s29 + $0x7c] sm:$0xf] %vm5774_vm6, %v6308_v56 }
 0x3ee PF: > { %s16_s21 = sadd.s32 1, %s7847_s21  }
 0x3ef   : > { %p13_p4 = scmp.ge.s32.totalorder %s16_s21, 4  }
 0x3f1   :  { %15 = sbr.rel (!%p13_p4) target bundleno = 1 (0x1), region = 93 }

// kernel: fused_spade_resnet_block.7
= control target key start
LH: loop header
LB: loop body
LE: loop exit
PB: predicated region body
PF: predicated region fallthrough
CT: control target
= control target key end

     0   :  { %s8132_s27 = smov 0   ;;  %s10720_s0 = inlined_call_operand.vmem [shape: bf16[2,18,18,4], index: 0, kind: input, shape index: {}]   ;;  %s10721_s1 = inlined_call_operand.vmem [shape: f32[2,16,16,8], index: 1, kind: input, shape index: {}]   ;;  %s10722_s2 = inlined_call_operand.vmem [shape: bf16[2,18,18,16], index: 2, kind: input, shape index: {}]   ;;  %s10723_s3 = inlined_call_operand.vmem [shape: bf16[9,4,4], index: 3, kind: input, shape index: {}]   ;;  %s10724_s4 = inlined_call_operand.vmem [shape: f32[1,4], index: 4, kind: input, shape index: {}]   ;;  %s10725_s5 = inlined_call_operand.vmem [shape: bf16[9,16,16], index: 5, kind: input, shape index: {}]   ;;  %s10726_s6 = inlined_call_operand.vmem [shape: f32[1,16], index: 6, kind: input, shape index: {}]   ;;  %s10727_s7 = inlined_call_operand.vmem [shape: bf16[8,4], index: 7, kind: input, shape index: {}]   ;;  %s10728_s8 = inlined_call_operand.vmem [shape: f32[2,16,16,4], index: 8, kind: output, shape index: {}]  }
   0x1 LB: > { %s6029_s28 = sadd.s32 4294967295, %s8084_s27   ;;  %p6033_p0 = scmp.ge.s32.totalorder %s8084_s27, 1  ;;  %s8084_s27 = sphi %s8132_s27, %s18_s27  }
   0x2   : > { %p282_p1 = scmp.lt.s32.totalorder %s8084_s27, 3 }
   0x4   : > { %p283_p2 = pnand %p6033_p0, %p282_p1 }
   0x6   : > { %286 = sbr.rel (%p283_p2) target bundleno = 1186 (0x4a2), region = 52 }
   0xd   : > { %v6056_v0 = vld [vmem:[%s10723_s3 + $0x2] sm:$0x3]  ;;  %vm700_vm0 = vcmask 1041408   ;;  %p326_p3 = scmp.lt.s32.totalorder %s6029_s28, 1  ;;  %v7987_v2 = vld [vmem:[%s10725_s5 + $0x8] sm:$0xff]   ;;  %vm520_vm1 = vcmask 1046528  }
   0xe   : > { %7967 = vmatprep.subr.msk.bf16.mxu1 %vm700_vm0, %v6056_v0  ;;  %v702_v1 = vsel %vm700_vm0, %v6056_v0, 0  ;;  %7966 = vmatprep.subr.msk.bf16.mxu0 %vm700_vm0, %v6056_v0  ;;  %vm651_vm2 = vcmask 31744   ;;  %v8234_v42 = vld [vmem:[%s10725_s5] sm:$0xff]   ;;  %vm3048_vm3 = vcmask 130048   ;;  %vm1077_vm4 = vcmask 1045504   ;;  %s8086_s20 = smov 120  }
   0xf   : > { %7389 = vmatpush3.bf16.msra.mxu1 %v702_v1  ;;  %s11257_s28 = smov (!%p326_p3, %s6029_s28), 1  ;;  %6743 = vmatpush3.bf16.msra.mxu0 %v702_v1  ;;  %vm5192_vm5 = vcmask 64512   ;;  %vm5721_vm6 = vcmask 1043456  }
  0x10   : > { %7048 = vmatprep.subr.bf16.mxu1 %v7987_v2  ;;  %s7977_s11 = smul.u32 216, %s11257_s28 }
  0x12   : > { %s8157_s14 = scalar_lea.vmem %s10720_s0, %s7977_s11  ;;  %s8279_s19 = scalar_lea.vmem %s10722_s2, %s7977_s11 }
  0x13   : > { %v8160_v3 = vld [vmem:[%s8157_s14 + $0x60] sm:$0xff]   ;;  %v8163_v4 = vld [vmem:[%s8157_s14 + $0x68] sm:$0x1]  ;;  %v8166_v5 = vld [vmem:[%s8157_s14 + $0x6c] sm:$0xff]  }
  0x14   : > { %10915 = vst [vmem:[#allocation2_spill] sm:$0xff] %v8160_v3  ;;  %10916 = vst [vmem:[#allocation3_spill] sm:$0xff] %v8163_v4  ;;  %v10752_v6 = vunpack.c.l.bf16 %v8160_v3  ;;  %v10751_v7 = vunpack.c.h.bf16 %v8160_v3  ;;  %v10750_v8 = vunpack.c.l.bf16 %v8163_v4  ;;  %v8172_v9 = vld [vmem:[%s8157_s14 + $0x74] sm:$0x1]  ;;  %v10749_v10 = vunpack.c.l.bf16 %v8166_v5  ;;  %v8176_v11 = vld [vmem:[%s8157_s14 + $0x78] sm:$0xff]  }
  0x15   : > { %10917 = vst [vmem:[#allocation4_spill] sm:$0xff] %v8166_v5  ;;  %10918 = vst [vmem:[#allocation5_spill] sm:$0xff] %v8172_v9  ;;  %v8179_v12 = vld [vmem:[%s8157_s14 + $0x80] sm:$0x1]  ;;  %v10748_v13 = vunpack.c.h.bf16 %v8166_v5  ;;  %v10747_v14 = vunpack.c.l.bf16 %v8172_v9  ;;  %v10746_v15 = vunpack.c.l.bf16 %v8176_v11  ;;  %v10745_v16 = vunpack.c.h.bf16 %v8176_v11  ;;  %v8186_v17 = vld [vmem:[%s8157_s14 + $0x84] sm:$0xff]  }
  0x16   : > { %10919 = vst [vmem:[#allocation6_spill] sm:$0xff] %v8176_v11  ;;  %10920 = vst [vmem:[#allocation7_spill] sm:$0xff] %v8179_v12  ;;  %v561_v18 = vrot.slane %v10752_v6, 1  ;;  %v562_v19 = vrot.slane %v10751_v7, 1  ;;  %v564_v20 = vrot.slane %v10750_v8, 1  ;;  %v566_v21 = vrot.slane %v10749_v10, 1 }
  0x17   : > { %10921 = vst [vmem:[#allocation8_spill] sm:$0xff] %v8186_v17  ;;  %v567_v22 = vrot.slane %v10748_v13, 1  ;;  %v569_v23 = vrot.slane %v10747_v14, 1  ;;  %v10744_v24 = vunpack.c.l.bf16 %v8179_v12  ;;  %v571_v25 = vrot.slane %v10746_v15, 1  ;;  %v8204_v26 = vld [vmem:[%s8157_s14 + $0x8c] sm:$0x1] }
  0x18   : > { %10922 = vst [vmem:[#allocation9_spill] sm:$0xff] %v8204_v26  ;;  %v563_v27 = vsel %vm520_vm1, %v561_v18, %v562_v19  ;;  %v565_v28 = vsel %vm520_vm1, %v562_v19, %v564_v20  ;;  %v572_v29 = vrot.slane %v10745_v16, 1  ;;  %v10743_v30 = vunpack.c.l.bf16 %v8186_v17  ;;  %v8212_v31 = vld [vmem:[%s8157_s14 + $0x90] sm:$0xff]   ;;  %v8221_v36 = vld [vmem:[%s8157_s14 + $0x98] sm:$0x1]  ;;  %v8229_v41 = vld [vmem:[%s8157_s14 + $0x9c] sm:$0xff]  }
  0x19   : > { %10923 = vst [vmem:[#allocation10_spill] sm:$0xff] %v8212_v31  ;;  %v8214_v32 = vpack.c.bf16 %v565_v28, %v563_v27  ;;  %v568_v33 = vsel %vm520_vm1, %v566_v21, %v567_v22  ;;  %v570_v34 = vsel %vm520_vm1, %v567_v22, %v569_v23  ;;  %v574_v35 = vrot.slane %v10744_v24, 1  ;;  %10925 = vst [vmem:[#allocation12_spill] sm:$0xff] %v8221_v36  ;;  %v8244_v47 = vld [vmem:[%s8157_s14 + $0xa4] sm:$0x1]  ;;  %v8262_v56 = vld [vmem:[%s8157_s14 + $0xa8] sm:$0xff]  }
  0x1a   : > { %v8223_v37 = vpack.c.bf16 %v570_v34, %v568_v33  ;;  %v573_v38 = vsel %vm520_vm1, %v571_v25, %v572_v29  ;;  %v10742_v39 = vunpack.c.h.bf16 %v8186_v17  ;;  %v10741_v40 = vunpack.c.l.bf16 %v8204_v26  ;;  %10927 = vst [vmem:[#allocation14_spill] sm:$0xff] %v8229_v41  ;;  %10928 = vst [vmem:[#allocation15_spill] sm:$0xff] %v8244_v47  ;;  %v8272_v61 = vld [vmem:[%s8157_s14 + $0xb0] sm:$0x1]  ;;  %v8295_v21 = vld [vmem:[%s8157_s14 + $0xb4] sm:$0xff]  }
  0x1b   : > { %10924 = vst [vmem:[#allocation11_spill] sm:$0xff] %v8214_v32  ;;  %6760 = vmatprep.mubr.msk.bf16.mxu1 %vm651_vm2, %v8214_v32  ;;  %v575_v43 = vsel %vm520_vm1, %v572_v29, %v574_v35  ;;  %v576_v44 = vrot.slane %v10743_v30, 1  ;;  %v10740_v45 = vunpack.c.l.bf16 %v8212_v31  ;;  %v10739_v46 = vunpack.c.h.bf16 %v8212_v31  ;;  %10930 = vst [vmem:[#allocation17_spill] sm:$0xff] %v8262_v56  ;;  %v8301_v25 = vld [vmem:[%s8157_s14 + $0xbc] sm:$0x1]  ;;  %v8304_v27 = vld [vmem:[%s8279_s19] sm:$0xff]  }
  0x1c   : > { %10926 = vst [vmem:[#allocation13_spill] sm:$0xff] %v8223_v37  ;;  %6761 = vmatmul.mubr.msk.bf16.vlgmr.msra.gmra.mrb[0].mxu1 %vm651_vm2, %v8223_v37  ;;  %v8248_v48 = vpack.c.bf16 %v575_v43, %v573_v38  ;;  %v577_v49 = vrot.slane %v10742_v39, 1  ;;  %v579_v50 = vrot.slane %v10741_v40, 1  ;;  %v10738_v51 = vunpack.c.l.bf16 %v8221_v36  ;;  %10931 = vst [vmem:[#allocation18_spill] sm:$0xff] %v8272_v61  ;;  %v8311_v33 = vld [vmem:[%s8279_s19 + $0x8] sm:$0x1] }
  0x1d   : > { %7049 = vmatpush3.bf16.msra.mxu1 %v7987_v2  ;;  %v581_v52 = vrot.slane %v10740_v45, 1  ;;  %v582_v53 = vrot.slane %v10739_v46, 1  ;;  %v10737_v54 = vunpack.c.l.bf16 %v8229_v41  ;;  %v10736_v55 = vunpack.c.h.bf16 %v8229_v41  ;;  %10933 = vst [vmem:[#allocation20_spill] sm:$0xff] %v8295_v21  ;;  %10935 = vst [vmem:[#allocation22_spill] sm:$0xff] %v8301_v25  ;;  %v8401_v10 = vld [vmem:[%s8279_s19 + $0x3c] sm:$0xff]  }
  0x1e   : > { %10929 = vst [vmem:[#allocation16_spill] sm:$0xff] %v8248_v48  ;;  %6764 = vmatprep.mubr.msk.bf16.mxu1 %vm651_vm2, %v8248_v48  ;;  %v578_v57 = vsel %vm520_vm1, %v576_v44, %v577_v49  ;;  %v580_v58 = vsel %vm520_vm1, %v577_v49, %v579_v50  ;;  %v584_v59 = vrot.slane %v10738_v51, 1  ;;  %v10735_v60 = vunpack.c.l.bf16 %v8244_v47  ;;  %7082 = vmatprep.subr.bf16.mxu1 %v8234_v42  ;;  %v8404_v8 = vld [vmem:[%s8279_s19 + $0x44] sm:$0x1]  ;;  %v8566_v31 = vld [vmem:[%s8279_s19 + $0x9c] sm:$0xff]  }
  0x1f   : > { %v8282_v62 = vpack.c.bf16 %v580_v58, %v578_v57  ;;  %v583_v63 = vsel %vm520_vm1, %v581_v52, %v582_v53  ;;  %v586_v0 = vrot.slane %v10737_v54, 1  ;;  %v587_v1 = vrot.slane %v10736_v55, 1  ;;  %v8372_v55 = vld [vmem:[%s8279_s19 + $0x30] sm:$0xff]   ;;  %10958 = vst [vmem:[#allocation33_spill] sm:$0xff] %v8566_v31 }
  0x20   : > { %v585_v2 = vsel %vm520_vm1, %v582_v53, %v584_v59  ;;  %v589_v18 = vrot.slane %v10735_v60, 1  ;;  %v10734_v19 = vunpack.c.l.bf16 %v8262_v56  ;;  %v10733_v20 = vunpack.c.h.bf16 %v8262_v56  ;;  %v8330_v59 = vld [vmem:[%s8279_s19 + $0xc] sm:$0xff]  }
  0x21   : > { %10932 = vst [vmem:[#allocation19_spill] sm:$0xff] %v8282_v62  ;;  %v8297_v22 = vpack.c.bf16 %v585_v2, %v583_v63  ;;  %v10732_v23 = vunpack.c.l.bf16 %v8272_v61  ;;  %v588_v34 = vsel %vm520_vm1, %v586_v0, %v587_v1  ;;  %v10730_v43 = vunpack.c.l.bf16 %v8295_v21  ;;  %v8369_v60 = vld [vmem:[%s8279_s19 + $0x2c] sm:$0x1]  ;;  %v8545_v61 = vld [vmem:[%s8279_s19 + $0x98] sm:$0x1] }
  0x22   : > { %v591_v28 = vrot.slane %v10734_v19, 1  ;;  %v592_v29 = vrot.slane %v10733_v20, 1  ;;  %v590_v35 = vsel %vm520_vm1, %v587_v1, %v589_v18  ;;  %v10729_v44 = vunpack.c.h.bf16 %v8295_v21  ;;  %v8337_v1 = vld [vmem:[%s8279_s19 + $0x14] sm:$0x1]  ;;  %v8361_v20 = vld [vmem:[%s8279_s19 + $0x24] sm:$0xff]  }
  0x23   : > { %10934 = vst [vmem:[#allocation21_spill] sm:$0xff] %v8297_v22  ;;  %v594_v38 = vrot.slane %v10732_v23, 1  ;;  %v10731_v49 = vunpack.c.l.bf16 %v8301_v25  ;;  %v10770_v50 = vunpack.c.l.bf16 %v8304_v27  ;;  %v10769_v52 = vunpack.c.h.bf16 %v8304_v27  ;;  %v8358_v23 = vld [vmem:[%s8279_s19 + $0x20] sm:$0x1]  ;;  %10939 = vst [vmem:[#allocation26_spill] sm:$0xff] %v8361_v20 }
  0x24   : > { %6765 = vmatmul.mubr.msk.bf16.gmra.mrb[4].mxu1 %vm651_vm2, %v8282_v62  ;;  %v10768_v53 = vunpack.c.l.bf16 %v8311_v33  ;;  %v593_v57 = vsel %vm520_vm1, %v591_v28, %v592_v29  ;;  %v8332_v63 = vpack.c.bf16 %v590_v35, %v588_v34  ;;  %v596_v0 = vrot.slane %v10730_v43, 1 }
  0x25   : > { %6768 = vmatprep.mubr.msk.bf16.mxu1 %vm651_vm2, %v8297_v22  ;;  %v595_v58 = vsel %vm520_vm1, %v592_v29, %v594_v38  ;;  %v597_v2 = vrot.slane %v10729_v44, 1  ;;  %v599_v18 = vrot.slane %v10731_v49, 1  ;;  %v2911_v28 = vrot.slane %v10770_v50, 1  ;;  %v8355_v49 = vld [vmem:[%s8279_s19 + $0x18] sm:$0xff]  }
  0x26   : > { %10936 = vst [vmem:[#allocation23_spill] sm:$0xff] %v8332_v63  ;;  %v2912_v29 = vrot.slane %v10769_v52, 1  ;;  %v8347_v34 = vpack.c.bf16 %v595_v58, %v593_v57  ;;  %v2914_v35 = vrot.slane %v10768_v53, 1  ;;  %v10767_v38 = vunpack.c.l.bf16 %v8330_v59  ;;  %10938 = vst [vmem:[#allocation25_spill] sm:$0xff] %v8355_v49  ;;  %v8491_v53 = vld [vmem:[%s8279_s19 + $0x80] sm:$0x1] }
  0x27   : > { %v10766_v44 = vunpack.c.h.bf16 %v8330_v59  ;;  %v10762_v43 = vunpack.c.l.bf16 %v8337_v1  ;;  %v598_v57 = vsel %vm520_vm1, %v596_v0, %v597_v2  ;;  %v600_v58 = vsel %vm520_vm1, %v597_v2, %v599_v18  ;;  %v8383_v2 = vld [vmem:[%s8279_s19 + $0x38] sm:$0x1] }
  0x28   : > { %10937 = vst [vmem:[#allocation24_spill] sm:$0xff] %v8347_v34  ;;  %v2913_v19 = vsel %vm520_vm1, %v2911_v28, %v2912_v29  ;;  %v2915_v54 = vsel %vm520_vm1, %v2912_v29, %v2914_v35  ;;  %v2916_v51 = vrot.slane %v10767_v38, 1  ;;  %v10761_v0 = vunpack.c.l.bf16 %v8355_v49 }
  0x29   : > { %v2917_v46 = vrot.slane %v10766_v44, 1  ;;  %v2919_v18 = vrot.slane %v10762_v43, 1  ;;  %v10760_v28 = vunpack.c.h.bf16 %v8355_v49  ;;  %v10758_v45 = vunpack.c.l.bf16 %v8358_v23  ;;  %v8479_v44 = vld [vmem:[%s8279_s19 + $0x74] sm:$0x1] }
  0x2a   : > { %v10753_v29 = vunpack.c.l.bf16 %v8361_v20  ;;  %v10754_v35 = vunpack.c.h.bf16 %v8361_v20  ;;  %v10755_v40 = vunpack.c.l.bf16 %v8369_v60  ;;  %v10756_v39 = vunpack.c.l.bf16 %v8372_v55 }
  0x2b   : > { %v10757_v30 = vunpack.c.h.bf16 %v8372_v55  ;;  %v8394_v24 = vpack.c.bf16 %v600_v58, %v598_v57  ;;  %v10759_v16 = vunpack.c.l.bf16 %v8383_v2  ;;  %v3023_v15 = vpack.c.bf16 %v2915_v54, %v2913_v19 }
  0x2c   : > { %6769 = vmatmul.mubr.msk.bf16.gmra.mrb[8].mxu1 %vm651_vm2, %v8332_v63  ;;  %v2918_v14 = vsel %vm520_vm1, %v2916_v51, %v2917_v46  ;;  %v2921_v13 = vrot.slane %v10761_v0, 1  ;;  %v2920_v7 = vsel %vm520_vm1, %v2917_v46, %v2919_v18  ;;  %v2922_v6 = vrot.slane %v10760_v28, 1  ;;  %v8523_v63 = vld [vmem:[%s8279_s19 + $0x8c] sm:$0x1] }
  0x2d   : > { %6772 = vmatprep.mubr.msk.bf16.mxu1 %vm651_vm2, %v8347_v34  ;;  %10940 = vst [vmem:[#allocation27_spill] sm:$0xff] %v8394_v24  ;;  %v2924_v57 = vrot.slane %v10758_v45, 1  ;;  %v2926_v54 = vrot.slane %v10753_v29, 1  ;;  %v2927_v51 = vrot.slane %v10754_v35, 1  ;;  %v2929_v19 = vrot.slane %v10755_v40, 1 }
  0x2e   : > { %v2931_v58 = vrot.slane %v10756_v39, 1  ;;  %v2932_v46 = vrot.slane %v10757_v30, 1  ;;  %v2934_v18 = vrot.slane %v10759_v16, 1  ;;  %v10765_v29 = vunpack.c.l.bf16 %v8401_v10 }
  0x2f   : > { %v10764_v35 = vunpack.c.h.bf16 %v8401_v10  ;;  %v10763_v40 = vunpack.c.l.bf16 %v8404_v8  ;;  %v2923_v39 = vsel %vm520_vm1, %v2921_v13, %v2922_v6  ;;  %v2925_v30 = vsel %vm520_vm1, %v2922_v6, %v2924_v57 }
  0x30   : > { %v8431_v45 = vpack.c.bf16 %v2920_v7, %v2918_v14  ;;  %v2928_v16 = vsel %vm520_vm1, %v2926_v54, %v2927_v51  ;;  %v2930_v28 = vsel %vm520_vm1, %v2927_v51, %v2929_v19  ;;  %v2933_v0 = vsel %vm520_vm1, %v2931_v58, %v2932_v46  ;;  %v8444_v7 = vld [vmem:[%s8279_s19 + $0x48] sm:$0xff]   ;;  %v8447_v14 = vld [vmem:[%s8279_s19 + $0x50] sm:$0x1]  ;;  %v8452_v54 = vld [vmem:[%s8279_s19 + $0x54] sm:$0xff]  }
  0x31   : > { %v2935_v43 = vsel %vm520_vm1, %v2932_v46, %v2934_v18  ;;  %v2937_v13 = vrot.slane %v10764_v35, 1  ;;  %v2939_v6 = vrot.slane %v10763_v40, 1  ;;  %v8449_v57 = vpack.c.bf16 %v2925_v30, %v2923_v39  ;;  %v8457_v51 = vld [vmem:[%s10725_s5 + $0x10] sm:$0xff]   ;;  %v8462_v58 = vld [vmem:[%s8279_s19 + $0x5c] sm:$0x1]  ;;  %v8465_v46 = vld [vmem:[%s8279_s19 + $0x60] sm:$0xff]  }
  0x32   : > { %v8459_v19 = vpack.c.bf16 %v2930_v28, %v2928_v16  ;;  %v8468_v18 = vld [vmem:[%s8279_s19 + $0x68] sm:$0x1]  ;;  %v8470_v40 = vpack.c.bf16 %v2935_v43, %v2933_v0  ;;  %v10775_v30 = vunpack.c.l.bf16 %v8444_v7  ;;  %v10778_v39 = vunpack.c.h.bf16 %v8444_v7  ;;  %v8482_v16 = vld [vmem:[%s8279_s19 + $0x78] sm:$0xff]  }
  0x33   : > { %10941 = vst [vmem:[#allocation28_spill] sm:$0xff] %v8449_v57  ;;  %v10781_v35 = vunpack.c.l.bf16 %v8447_v14  ;;  %v2940_v43 = vsel %vm520_vm1, %v2937_v13, %v2939_v6  ;;  %v10954_v25 = vunpack.c.l.bf16 %v8479_v44  ;;  %v10955_v21 = vunpack.c.l.bf16 %v8482_v16 }
  0x34   : > { %6773 = vmatmul.mubr.msk.bf16.gmra.mrb[12].mxu1 %vm651_vm2, %v8394_v24  ;;  %10942 = vst [vmem:[#allocation29_spill] sm:$0xff] %v8459_v19  ;;  %10943 = vst [vmem:[#allocation30_spill] sm:$0xff] %v8470_v40  ;;  %v2941_v50 = vrot.slane %v10775_v30, 1  ;;  %v10946_v24 = vunpack.c.h.bf16 %v8452_v54  ;;  %v8520_v30 = vld [vmem:[%s8279_s19 + $0x84] sm:$0xff]   ;;  %v10957_v56 = vunpack.c.l.bf16 %v8491_v53  ;;  %v10961_v26 = vunpack.c.l.bf16 %v8523_v63 }
  0x35   : > { %7050 = vmatprep.mubr.msk.bf16.mxu1 %vm3048_vm3, %v3023_v15  ;;  %v2936_v15 = vrot.slane %v10765_v29, 1  ;;  %v8476_v29 = vld [vmem:[%s8279_s19 + $0x6c] sm:$0xff]   ;;  %v2944_v0 = vrot.slane %v10781_v35, 1  ;;  %v10950_v35 = vunpack.c.l.bf16 %v8468_v18 }
  0x36   : > { %v2947_v34 = vrot.slane %v10946_v24, 1  ;;  %v10952_v24 = vunpack.c.l.bf16 %v8476_v29  ;;  %v10953_v37 = vunpack.c.h.bf16 %v8476_v29  ;;  %v2964_v47 = vrot.slane %v10957_v56, 1 }
  0x37   : > { %v2938_v28 = vsel %vm520_vm1, %v2936_v15, %v2937_v13  ;;  %v2942_v15 = vrot.slane %v10778_v39, 1  ;;  %v10947_v39 = vunpack.c.l.bf16 %v8462_v58  ;;  %v10948_v13 = vunpack.c.l.bf16 %v8465_v46 }
  0x38   : > { %v8511_v6 = vpack.c.bf16 %v2940_v43, %v2938_v28  ;;  %v10949_v43 = vunpack.c.h.bf16 %v8465_v46  ;;  %v2954_v62 = vrot.slane %v10950_v35, 1  ;;  %v2956_v48 = vrot.slane %v10952_v24, 1 }
  0x39   : > { %v2949_v52 = vrot.slane %v10947_v39, 1  ;;  %v2951_v28 = vrot.slane %v10948_v13, 1  ;;  %v2957_v32 = vrot.slane %v10953_v37, 1  ;;  %v2959_v39 = vrot.slane %v10954_v25, 1 }
  0x3a   : > { %10944 = vst [vmem:[#allocation31_spill] sm:$0xff] %v8511_v6  ;;  %v2952_v22 = vrot.slane %v10949_v43, 1  ;;  %v2961_v13 = vrot.slane %v10955_v21, 1  ;;  %v10956_v43 = vunpack.c.h.bf16 %v8482_v16  ;;  %v2943_v37 = vsel %vm520_vm1, %v2941_v50, %v2942_v15 }
  0x3b   : > { %v2945_v56 = vsel %vm520_vm1, %v2942_v15, %v2944_v0  ;;  %v2950_v41 = vsel %vm520_vm1, %v2947_v34, %v2949_v52  ;;  %v2958_v36 = vsel %vm520_vm1, %v2956_v48, %v2957_v32  ;;  %v2960_v21 = vsel %vm520_vm1, %v2957_v32, %v2959_v39 }
  0x3c   : > { %7051 = vmatmul.mubr.msk.bf16.vlgmr.msra.gmra.mrb[16].mxu1 %vm3048_vm3, %v8431_v45  ;;  %v2962_v35 = vrot.slane %v10956_v43, 1  ;;  %v2953_v50 = vsel %vm520_vm1, %v2951_v28, %v2952_v22  ;;  %v2955_v25 = vsel %vm520_vm1, %v2952_v22, %v2954_v62  ;;  %v10959_v52 = vunpack.c.l.bf16 %v8520_v30 }
  0x3d   : > { %7083 = vmatpush3.bf16.msra.mxu1 %v8234_v42  ;;  %7054 = vmatprep.mubr.msk.bf16.mxu1 %vm3048_vm3, %v8449_v57  ;;  %v10945_v42 = vunpack.c.l.bf16 %v8452_v54  ;;  %v10960_v15 = vunpack.c.h.bf16 %v8520_v30  ;;  %v2969_v28 = vrot.slane %v10961_v26, 1  ;;  %v10807_v32 = vunpack.c.l.bf16 %v8566_v31  ;;  %v8596_v26 = vld [vmem:[%s8279_s19 + $0xa8] sm:$0xff]  }
  0x3e   : > { %7116 = vmatprep.subr.bf16.mxu1 %v8457_v51  ;;  %v2963_v0 = vsel %vm520_vm1, %v2961_v13, %v2962_v35  ;;  %v8585_v39 = vpack.c.bf16 %v2945_v56, %v2943_v37  ;;  %10966 = vst [vmem:[#allocation35_spill] sm:$0xff] %v8596_v26  ;;  %v8598_v12 = vpack.c.bf16 %v2955_v25, %v2953_v50  ;;  %v10976_v50 = vunpack.c.l.bf16 %v8355_v49 }
  0x3f   : > { %v2946_v38 = vrot.slane %v10945_v42, 1  ;;  %v8534_v42 = vld [vmem:[%s8279_s19 + $0x90] sm:$0xff]   ;;  %v2967_v24 = vrot.slane %v10960_v15, 1 }
  0x40   : > { %10951 = vst [vmem:[#allocation32_spill] sm:$0xff] %v8534_v42  ;;  %v10962_v62 = vunpack.c.l.bf16 %v8534_v42  ;;  %v10963_v48 = vunpack.c.h.bf16 %v8534_v42  ;;  %10967 = vst [vmem:[#allocation36_spill] sm:$0xff] %v8598_v12  ;;  %v3483_v11 = vrot.slane %v10976_v50, 2  ;;  %v10979_v50 = vunpack.c.l.bf16 %v8361_v20 }
  0x41   : > { %v2948_v43 = vsel %vm520_vm1, %v2946_v38, %v2947_v34  ;;  %v2965_v38 = vsel %vm520_vm1, %v2962_v35, %v2964_v47  ;;  %v2966_v34 = vrot.slane %v10959_v52, 1  ;;  %v10964_v47 = vunpack.c.l.bf16 %v8545_v61  ;;  %v8590_v35 = vld [vmem:[%s8279_s19 + $0xa4] sm:$0x1] }
  0x42   : > { %v2971_v22 = vrot.slane %v10962_v62, 1  ;;  %v2972_v17 = vrot.slane %v10963_v48, 1  ;;  %v10806_v52 = vunpack.c.h.bf16 %v8566_v31  ;;  %v8593_v15 = vpack.c.bf16 %v2950_v41, %v2948_v43 }
  0x43   : > { %v2974_v13 = vrot.slane %v10964_v47, 1  ;;  %v8600_v62 = vpack.c.bf16 %v2960_v21, %v2958_v36  ;;  %v8602_v48 = vpack.c.bf16 %v2965_v38, %v2963_v0  ;;  %v8605_v37 = vsel %vm520_vm1, %v2966_v34, %v2967_v24 }
  0x44   : > { %7055 = vmatmul.mubr.msk.bf16.gmra.mrb[20].mxu1 %vm3048_vm3, %v8459_v19  ;;  %10965 = vst [vmem:[#allocation34_spill] sm:$0xff] %v8593_v15  ;;  %v8610_v56 = vsel %vm520_vm1, %v2967_v24, %v2969_v28  ;;  %v8613_v41 = vsel %vm520_vm1, %v2971_v22, %v2972_v17  ;;  %v8618_v36 = vrot.slane %v10807_v32, 1  ;;  %v8627_v25 = vrot.slane %v10806_v52, 1 }
  0x45   : > { %7058 = vmatprep.mubr.msk.bf16.mxu1 %vm3048_vm3, %v8470_v40  ;;  %10968 = vst [vmem:[#allocation37_spill] sm:$0xff] %v8600_v62  ;;  %10969 = vst [vmem:[#allocation38_spill] sm:$0xff] %v8602_v48  ;;  %v8623_v21 = vsel %vm520_vm1, %v2972_v17, %v2974_v13  ;;  %v10970_v0 = vunpack.c.l.bf16 %v8304_v27  ;;  %v10971_v34 = vunpack.c.h.bf16 %v8304_v27  ;;  %v10972_v22 = vunpack.c.l.bf16 %v8311_v33 }
  0x46   : > { %v10973_v17 = vunpack.c.l.bf16 %v8330_v59  ;;  %v10974_v52 = vunpack.c.h.bf16 %v8330_v59  ;;  %v10975_v24 = vunpack.c.l.bf16 %v8337_v1  ;;  %v10977_v33 = vunpack.c.h.bf16 %v8355_v49 }
  0x47   : > { %v3473_v38 = vrot.slane %v10970_v0, 2  ;;  %v3474_v28 = vrot.slane %v10971_v34, 2  ;;  %v3476_v47 = vrot.slane %v10972_v22, 2 }
  0x48   : > { %v3478_v13 = vrot.slane %v10973_v17, 2  ;;  %v3479_v32 = vrot.slane %v10974_v52, 2  ;;  %v3481_v43 = vrot.slane %v10975_v24, 2  ;;  %v3484_v22 = vrot.slane %v10977_v33, 2 }
  0x49   : > { %v8646_v0 = vsel %vm1077_vm4, %v3473_v38, %v3474_v28  ;;  %v8649_v34 = vsel %vm1077_vm4, %v3474_v28, %v3476_v47  ;;  %v10978_v17 = vunpack.c.l.bf16 %v8358_v23  ;;  %v3488_v38 = vrot.slane %v10979_v50, 2 }
  0x4a   : > { %v3480_v1 = vsel %vm1077_vm4, %v3478_v13, %v3479_v32  ;;  %v3482_v24 = vsel %vm1077_vm4, %v3479_v32, %v3481_v43  ;;  %v3485_v28 = vsel %vm1077_vm4, %v3483_v11, %v3484_v22  ;;  %v10980_v33 = vunpack.c.h.bf16 %v8361_v20 }
  0x4b   : > { %v3486_v9 = vrot.slane %v10978_v17, 2  ;;  %v8661_v5 = vpack.c.bf16 %v3482_v24, %v3480_v1  ;;  %v10981_v52 = vunpack.c.l.bf16 %v8369_v60  ;;  %v10982_v13 = vunpack.c.l.bf16 %v8372_v55 }
  0x4c   : > { %7059 = vmatmul.mubr.msk.bf16.gmra.mrb[24].mxu1 %vm3048_vm3, %v8511_v6  ;;  %v3489_v23 = vrot.slane %v10980_v33, 2  ;;  %v10983_v43 = vunpack.c.h.bf16 %v8372_v55  ;;  %v10985_v1 = vunpack.c.l.bf16 %v8401_v10  ;;  %v10986_v60 = vunpack.c.h.bf16 %v8401_v10 }
  0x4d   : > { %7062 = vmatprep.mubr.msk.bf16.mxu1 %vm3048_vm3, %v8585_v39  ;;  %v3487_v47 = vsel %vm1077_vm4, %v3484_v22, %v3486_v9  ;;  %v3491_v4 = vrot.slane %v10981_v52, 2  ;;  %v3493_v32 = vrot.slane %v10982_v13, 2  ;;  %v10984_v9 = vunpack.c.l.bf16 %v8383_v2 }
  0x4e   : > { %v8667_v17 = vpack.c.bf16 %v3487_v47, %v3485_v28  ;;  %v3494_v50 = vrot.slane %v10983_v43, 2  ;;  %v3490_v11 = vsel %vm1077_vm4, %v3488_v38, %v3489_v23  ;;  %v3498_v24 = vrot.slane %v10985_v1, 2 }
  0x4f   : > { %v3496_v22 = vrot.slane %v10984_v9, 2  ;;  %v3499_v52 = vrot.slane %v10986_v60, 2  ;;  %v3492_v28 = vsel %vm1077_vm4, %v3489_v23, %v3491_v4  ;;  %v10987_v33 = vunpack.c.l.bf16 %v8404_v8 }
  0x50   : > { %v3495_v47 = vsel %vm1077_vm4, %v3493_v32, %v3494_v50  ;;  %v10988_v38 = vunpack.c.l.bf16 %v8444_v7  ;;  %v8692_v43 = vpack.c.bf16 %v3492_v28, %v3490_v11  ;;  %v10990_v60 = vunpack.c.h.bf16 %v8444_v7 }
  0x51   : > { %v3501_v13 = vrot.slane %v10987_v33, 2  ;;  %v3497_v9 = vsel %vm1077_vm4, %v3494_v50, %v3496_v22  ;;  %v3500_v1 = vsel %vm1077_vm4, %v3498_v24, %v3499_v52  ;;  %v10991_v8 = vunpack.c.l.bf16 %v8447_v14 }
  0x52   : > { %v3503_v2 = vrot.slane %v10988_v38, 2  ;;  %10989 = vst [vmem:[#allocation39_spill] sm:$0xff] %v8692_v43  ;;  %v3504_v3 = vrot.slane %v10990_v60, 2  ;;  %v10992_v32 = vunpack.c.l.bf16 %v8452_v54  ;;  %v10993_v22 = vunpack.c.h.bf16 %v8452_v54 }
  0x53   : > { %v3502_v4 = vsel %vm1077_vm4, %v3499_v52, %v3501_v13  ;;  %v3506_v23 = vrot.slane %v10991_v8, 2  ;;  %v10994_v28 = vunpack.c.l.bf16 %v8462_v58  ;;  %v10995_v52 = vunpack.c.l.bf16 %v8465_v46 }
  0x54   : > { %7063 = vmatmul.mubr.msk.bf16.gmra.mrb[28].mxu1 %vm3048_vm3, %v8593_v15  ;;  %v3508_v33 = vrot.slane %v10992_v32, 2  ;;  %v8705_v11 = vpack.c.bf16 %v3502_v4, %v3500_v1  ;;  %v3505_v50 = vsel %vm1077_vm4, %v3503_v2, %v3504_v3  ;;  %v3509_v24 = vrot.slane %v10993_v22, 2  ;;  %v8726_v22 = vld [vmem:[%s8279_s19 + $0xb0] sm:$0x1] }
  0x55   : > { %7066 = vmatprep.mubr.msk.bf16.mxu1 %vm3048_vm3, %v8598_v12  ;;  %v8698_v12 = vpack.c.bf16 %v3497_v9, %v3495_v47  ;;  %v3511_v47 = vrot.slane %v10994_v28, 2  ;;  %v3507_v38 = vsel %vm1077_vm4, %v3504_v3, %v3506_v23  ;;  %v3513_v13 = vrot.slane %v10995_v52, 2 }
  0x56   : > { %v10996_v14 = vunpack.c.h.bf16 %v8465_v46  ;;  %v10997_v60 = vunpack.c.l.bf16 %v8468_v18  ;;  %v8719_v4 = vpack.c.bf16 %v3507_v38, %v3505_v50  ;;  %v3510_v2 = vsel %vm1077_vm4, %v3508_v33, %v3509_v24 }
  0x57   : > { %v3512_v8 = vsel %vm1077_vm4, %v3509_v24, %v3511_v47  ;;  %v10998_v58 = vunpack.c.l.bf16 %v8476_v29  ;;  %v10999_v18 = vunpack.c.h.bf16 %v8476_v29  ;;  %v11000_v50 = vunpack.c.l.bf16 %v8479_v44 }
  0x58   : > { %v3514_v9 = vrot.slane %v10996_v14, 2  ;;  %v3516_v1 = vrot.slane %v10997_v60, 2  ;;  %v8728_v3 = vpack.c.bf16 %v3512_v8, %v3510_v2  ;;  %v11001_v47 = vunpack.c.l.bf16 %v8482_v16 }
  0x59   : > { %v3518_v32 = vrot.slane %v10998_v58, 2  ;;  %v3519_v52 = vrot.slane %v10999_v18, 2  ;;  %v3521_v24 = vrot.slane %v11000_v50, 2  ;;  %v11002_v14 = vunpack.c.h.bf16 %v8482_v16 }
  0x5a   : > { %v3515_v23 = vsel %vm1077_vm4, %v3513_v13, %v3514_v9  ;;  %v3517_v28 = vsel %vm1077_vm4, %v3514_v9, %v3516_v1  ;;  %v3523_v38 = vrot.slane %v11001_v47, 2  ;;  %v11003_v60 = vunpack.c.l.bf16 %v8491_v53 }
  0x5b   : > { %v8736_v33 = vpack.c.bf16 %v3517_v28, %v3515_v23  ;;  %v3524_v13 = vrot.slane %v11002_v14, 2  ;;  %v3520_v9 = vsel %vm1077_vm4, %v3518_v32, %v3519_v52  ;;  %v11004_v2 = vunpack.c.l.bf16 %v8520_v30 }
  0x5c   : > { %7067 = vmatmul.mubr.msk.bf16.gmra.mrb[32].mxu1 %vm3048_vm3, %v8600_v62  ;;  %v3526_v1 = vrot.slane %v11003_v60, 2  ;;  %v11005_v44 = vunpack.c.h.bf16 %v8520_v30  ;;  %v2835_v23 = vunpack.c.l.bf16 %v8726_v22  ;;  %v3522_v28 = vsel %vm1077_vm4, %v3519_v52, %v3521_v24  ;;  %v8769_v52 = vld [vmem:[%s8279_s19 + $0xb4] sm:$0xff]  }
  0x5d   : > { %7070 = vmatprep.mubr.msk.bf16.mxu1 %vm3048_vm3, %v8602_v48  ;;  %v3528_v8 = vrot.slane %v11004_v2, 2  ;;  %v3525_v18 = vsel %vm1077_vm4, %v3523_v38, %v3524_v13  ;;  %v11006_v50 = vunpack.c.l.bf16 %v8523_v63  ;;  %v11007_v32 = vunpack.c.l.bf16 %v8590_v35  ;;  %11009 = vst [vmem:[#allocation41_spill] sm:$0xff] %v8769_v52 }
  0x5e   : > { %v3529_v58 = vrot.slane %v11005_v44, 2  ;;  %v8760_v14 = vpack.c.bf16 %v3522_v28, %v3520_v9  ;;  %v3527_v60 = vsel %vm1077_vm4, %v3524_v13, %v3526_v1  ;;  %v8766_v22 = vpack.c.bf16 %v8610_v56, %v8605_v37  ;;  %v2784_v56 = vld [vmem:[%s8279_s19 + $0xbc] sm:$0x1] }
  0x5f   : > { %v3531_v47 = vrot.slane %v11006_v50, 2  ;;  %v2979_v53 = vrot.slane %v11007_v32, 1  ;;  %v8771_v24 = vpack.c.bf16 %v3527_v60, %v3525_v18  ;;  %v8776_v38 = vpack.c.bf16 %v8623_v21, %v8613_v41 }
  0x60   : > { %v3530_v2 = vsel %vm1077_vm4, %v3528_v8, %v3529_v58  ;;  %11008 = vst [vmem:[#allocation40_spill] sm:$0xff] %v8766_v22  ;;  %v11011_v13 = vunpack.c.l.bf16 %v8596_v26  ;;  %v11012_v8 = vunpack.c.h.bf16 %v8596_v26  ;;  %v2984_v37 = vrot.slane %v2835_v23, 1 }
  0x61   : > { %v3532_v63 = vsel %vm1077_vm4, %v3529_v58, %v3531_v47  ;;  %11010 = vst [vmem:[#allocation42_spill] sm:$0xff] %v8776_v38  ;;  %v2978_v28 = vsel %vm520_vm1, %v8618_v36, %v8627_v25  ;;  %v2980_v58 = vsel %vm520_vm1, %v8627_v25, %v2979_v53  ;;  %v2836_v41 = vunpack.c.l.bf16 %v8769_v52 }
  0x62   : > { %v8778_v9 = vpack.c.bf16 %v3532_v63, %v3530_v2  ;;  %v2981_v1 = vrot.slane %v11011_v13, 1  ;;  %v2982_v44 = vrot.slane %v11012_v8, 1  ;;  %v2837_v21 = vunpack.c.h.bf16 %v8769_v52 }
  0x63   : > { %v11013_v18 = vunpack.c.l.bf16 %v8534_v42  ;;  %v11014_v47 = vunpack.c.h.bf16 %v8534_v42  ;;  %v11015_v60 = vunpack.c.l.bf16 %v8545_v61  ;;  %v2838_v36 = vunpack.c.l.bf16 %v2784_v56 }
  0x64   : > { %7071 = vmatmul.mubr.msk.bf16.gmra.mrb[36].mxu1 %vm3048_vm3, %v8766_v22  ;;  %v11016_v25 = vunpack.c.l.bf16 %v8566_v31  ;;  %v11017_v63 = vunpack.c.h.bf16 %v8566_v31  ;;  %v11018_v8 = vunpack.c.l.bf16 %v8590_v35 }
  0x65   : > { %v3533_v50 = vrot.slane %v11013_v18, 2  ;;  %v3534_v32 = vrot.slane %v11014_v47, 2  ;;  %v3536_v2 = vrot.slane %v11015_v60, 2  ;;  %7074 = vmatprep.mubr.msk.bf16.mxu1 %vm3048_vm3, %v8776_v38  ;;  %v2983_v18 = vsel %vm520_vm1, %v2981_v1, %v2982_v44 }
  0x66   : > { %v3538_v53 = vrot.slane %v11016_v25, 2  ;;  %v3539_v13 = vrot.slane %v11017_v63, 2  ;;  %v3541_v22 = vrot.slane %v11018_v8, 2  ;;  %v2985_v47 = vsel %vm520_vm1, %v2982_v44, %v2984_v37 }
  0x67   : > { %v3535_v61 = vsel %vm1077_vm4, %v3533_v50, %v3534_v32  ;;  %v3537_v60 = vsel %vm1077_vm4, %v3534_v32, %v3536_v2  ;;  %v8816_v38 = vpack.c.bf16 %v2980_v58, %v2978_v28  ;;  %v8820_v35 = vpack.c.bf16 %v2985_v47, %v2983_v18 }
  0x68   : > { %v8812_v48 = vpack.c.bf16 %v3537_v60, %v3535_v61  ;;  %v3540_v56 = vsel %vm1077_vm4, %v3538_v53, %v3539_v13  ;;  %v3542_v25 = vsel %vm1077_vm4, %v3539_v13, %v3541_v22  ;;  %v2986_v8 = vrot.slane %v2836_v41, 1 }
  0x69   : > { %11020 = vst [vmem:[#allocation44_spill] sm:$0xff] %v8816_v38  ;;  %v8818_v63 = vpack.c.bf16 %v3542_v25, %v3540_v56  ;;  %v2987_v1 = vrot.slane %v2837_v21, 1  ;;  %v2989_v62 = vrot.slane %v2838_v36, 1  ;;  %v11022_v22 = vunpack.c.l.bf16 %v8596_v26 }
  0x6a   : > { %11019 = vst [vmem:[#allocation43_spill] sm:$0xff] %v8812_v48  ;;  %v11023_v58 = vunpack.c.h.bf16 %v8596_v26  ;;  %v3546_v32 = vrot.slane %v2835_v23, 2  ;;  %v3548_v2 = vrot.slane %v2836_v41, 2  ;;  %v3549_v53 = vrot.slane %v2837_v21, 2  ;;  %v8006_v23 = vld [vmem:[%s10725_s5 + $0x18] sm:$0xff]  }
  0x6b   : > { %11021 = vst [vmem:[#allocation45_spill] sm:$0xff] %v8818_v63  ;;  %v2988_v44 = vsel %vm520_vm1, %v2986_v8, %v2987_v1  ;;  %v2990_v37 = vsel %vm520_vm1, %v2987_v1, %v2989_v62  ;;  %v3543_v28 = vrot.slane %v11022_v22, 2  ;;  %v3551_v13 = vrot.slane %v2838_v36, 2  ;;  %v8924_v8 = vld [vmem:[%s8157_s14 + $0xc] sm:$0xff]   ;;  %v8927_v1 = vld [vmem:[%s8157_s14 + $0x14] sm:$0x1] }
  0x6c   : > { %7075 = vmatmul.mubr.msk.bf16.gmra.mrb[40].mxu1 %vm3048_vm3, %v8816_v38  ;;  %v3544_v50 = vrot.slane %v11023_v58, 2  ;;  %v8832_v18 = vpack.c.bf16 %v2990_v37, %v2988_v44  ;;  %v3550_v62 = vsel %vm1077_vm4, %v3548_v2, %v3549_v53  ;;  %v10828_v44 = vunpack.c.l.bf16 %v8924_v8 }
  0x6d   : > { %7078 = vmatprep.mubr.msk.bf16.mxu1 %vm3048_vm3, %v8820_v35  ;;  %v3552_v56 = vsel %vm1077_vm4, %v3549_v53, %v3551_v13  ;;  %v10827_v37 = vunpack.c.h.bf16 %v8924_v8  ;;  %v10826_v22 = vunpack.c.l.bf16 %v8927_v1 }
  0x6e   : > { %v3545_v47 = vsel %vm1077_vm4, %v3543_v28, %v3544_v50  ;;  %v3547_v61 = vsel %vm1077_vm4, %v3544_v50, %v3546_v32  ;;  %v8840_v25 = vpack.c.bf16 %v3552_v56, %v3550_v62  ;;  %v526_v32 = vrot.slane %v10828_v44, 1  ;;  %v471_v62 = vld [vmem:[%s10723_s3] sm:$0x3] }
  0x6f   : > { %v8836_v60 = vpack.c.bf16 %v3547_v61, %v3545_v47  ;;  %v527_v2 = vrot.slane %v10827_v37, 1  ;;  %v529_v53 = vrot.slane %v10826_v22, 1  ;;  %7968 = vmatprep.subr.msk.bf16.mxu0 %vm700_vm0, %v471_v62  ;;  %v8971_v22 = vld [vmem:[%s8157_s14 + $0x24] sm:$0xff]  }
  0x70   : > { %11025 = vst [vmem:[#allocation47_spill] sm:$0xff] %v8840_v25 }
  0x71   : > { %11024 = vst [vmem:[#allocation46_spill] sm:$0xff] %v8836_v60  ;;  %v528_v56 = vsel %vm520_vm1, %v526_v32, %v527_v2 }
  0x74   : > { %7079 = vmatmul.mubr.msk.bf16.gmra.mrb[44].mxu1 %vm3048_vm3, %v8832_v18 }
  0x75   : > { %7084 = vmatprep.mubr.msk.bf16.mxu1 %vm3048_vm3, %v8304_v27  ;;  %v11026_v27 = vpack.c.bf16 %v8649_v34, %v8646_v0  ;;  %v8915_v0 = vld [vmem:[%s8157_s14] sm:$0xff]   ;;  %v8918_v34 = vld [vmem:[%s8157_s14 + $0x8] sm:$0x1] }
  0x76   : > { %v10831_v41 = vunpack.c.l.bf16 %v8915_v0  ;;  %v10830_v21 = vunpack.c.h.bf16 %v8915_v0  ;;  %v10829_v36 = vunpack.c.l.bf16 %v8918_v34 }
  0x78   : > { %v521_v28 = vrot.slane %v10831_v41, 1  ;;  %v522_v58 = vrot.slane %v10830_v21, 1  ;;  %v524_v50 = vrot.slane %v10829_v36, 1 }
  0x7a   : > { %v523_v13 = vsel %vm520_vm1, %v521_v28, %v522_v58  ;;  %v525_v47 = vsel %vm520_vm1, %v522_v58, %v524_v50  ;;  %v914_v28 = vsel %vm700_vm0, %v471_v62, 0  ;;  %v8961_v58 = vld [vmem:[%s8157_s14 + $0x18] sm:$0xff]   ;;  %v8964_v50 = vld [vmem:[%s8157_s14 + $0x20] sm:$0x1]  ;;  %v10835_v62 = vunpack.c.l.bf16 %v8971_v22 }
  0x7b   : > { %v633_v61 = vpack.c.bf16 %v525_v47, %v523_v13  ;;  %v10834_v47 = vunpack.c.l.bf16 %v8961_v58  ;;  %v10832_v32 = vunpack.c.h.bf16 %v8961_v58 }
  0x7c   : > { %7085 = vmatmul.mubr.msk.bf16.vlgmr.msra.gmra.mrb[16].mxu1 %vm3048_vm3, %v8330_v59 }
  0x7d   : > { %7117 = vmatpush3.bf16.msra.mxu1 %v8457_v51  ;;  %7088 = vmatprep.mubr.msk.bf16.mxu1 %vm3048_vm3, %v8355_v49  ;;  %v8887_v51 = vld [vmem:[%s10725_s5 + $0x20] sm:$0xff]   ;;  %v531_v37 = vrot.slane %v10834_v47, 1  ;;  %v532_v44 = vrot.slane %v10832_v32, 1 }
  0x7e   : > { %7150 = vmatprep.subr.bf16.mxu1 %v8006_v23  ;;  %6744 = vmatprep.mubr.msk.bf16.mxu0 %vm651_vm2, %v633_v61  ;;  %v10833_v61 = vunpack.c.l.bf16 %v8964_v50 }
  0x80   : > { %v534_v21 = vrot.slane %v10833_v61, 1 }
  0x82   : > { %v535_v32 = vsel %vm520_vm1, %v532_v44, %v534_v21 }
  0x84   : > { %7089 = vmatmul.mubr.msk.bf16.gmra.mrb[20].mxu1 %vm3048_vm3, %v8361_v20 }
  0x85   : > { %7092 = vmatprep.mubr.msk.bf16.mxu1 %vm3048_vm3, %v8372_v55 }
  0x8c   : > { %7093 = vmatmul.mubr.msk.bf16.gmra.mrb[24].mxu1 %vm3048_vm3, %v8401_v10 }
  0x8d   : > { %7096 = vmatprep.mubr.msk.bf16.mxu1 %vm3048_vm3, %v8444_v7 }
  0x94   : > { %7097 = vmatmul.mubr.msk.bf16.gmra.mrb[28].mxu1 %vm3048_vm3, %v8452_v54 }
  0x95   : > { %7100 = vmatprep.mubr.msk.bf16.mxu1 %vm3048_vm3, %v8465_v46 }
  0x9c   : > { %7101 = vmatmul.mubr.msk.bf16.gmra.mrb[32].mxu1 %vm3048_vm3, %v8476_v29 }
  0x9d   : > { %7104 = vmatprep.mubr.msk.bf16.mxu1 %vm3048_vm3, %v8482_v16 }
  0xa4   : > { %7105 = vmatmul.mubr.msk.bf16.gmra.mrb[36].mxu1 %vm3048_vm3, %v8520_v30 }
  0xa5   : > { %7108 = vmatprep.mubr.msk.bf16.mxu1 %vm3048_vm3, %v8534_v42 }
  0xac   : > { %7109 = vmatmul.mubr.msk.bf16.gmra.mrb[40].mxu1 %vm3048_vm3, %v8566_v31 }
  0xad   : > { %7112 = vmatprep.mubr.msk.bf16.mxu1 %vm3048_vm3, %v8596_v26 }
  0xb4   : > { %7113 = vmatmul.mubr.msk.bf16.gmra.mrb[44].mxu1 %vm3048_vm3, %v8769_v52 }
  0xb5   : > { %7118 = vmatprep.mubr.msk.bf16.mxu1 %vm3048_vm3, %v11026_v27 }
  0xbc   : > { %7119 = vmatmul.mubr.msk.bf16.vlgmr.msra.gmra.mrb[16].mxu1 %vm3048_vm3, %v8661_v5 }
  0xbd   : > { %7151 = vmatpush3.bf16.msra.mxu1 %v8006_v23  ;;  %7122 = vmatprep.mubr.msk.bf16.mxu1 %vm3048_vm3, %v8667_v17  ;;  %v530_v23 = vsel %vm520_vm1, %v527_v2, %v529_v53  ;;  %v8974_v2 = vld [vmem:[%s8157_s14 + $0x2c] sm:$0x1] }
  0xbe   : > { %7184 = vmatprep.subr.bf16.mxu1 %v8887_v51  ;;  %v8957_v27 = vpack.c.bf16 %v530_v23, %v528_v56  ;;  %v10836_v41 = vunpack.c.l.bf16 %v8974_v2  ;;  %v536_v56 = vrot.slane %v10835_v62, 1 }
  0xc0   : > { %11027 = vst [vmem:[#allocation48_spill] sm:$0xff] %v8957_v27  ;;  %6745 = vmatmul.mubr.msk.bf16.vlgmr.msra.gmra.mrb[0].mxu0 %vm651_vm2, %v8957_v27  ;;  %v539_v61 = vrot.slane %v10836_v41, 1 }
  0xc1   : > { %6777 = vmatpush3.bf16.msra.mxu0 %v914_v28  ;;  %v533_v28 = vsel %vm520_vm1, %v531_v37, %v532_v44 }
  0xc2   : > { %v9006_v47 = vpack.c.bf16 %v535_v32, %v533_v28 }
  0xc4   : > { %7123 = vmatmul.mubr.msk.bf16.gmra.mrb[20].mxu1 %vm3048_vm3, %v8692_v43  ;;  %11033 = vst [vmem:[#allocation53_spill] sm:$0xff] %v9006_v47  ;;  %6748 = vmatprep.mubr.msk.bf16.mxu0 %vm651_vm2, %v9006_v47 }
  0xc5   : > { %7126 = vmatprep.mubr.msk.bf16.mxu1 %vm3048_vm3, %v8698_v12 }
  0xcc   : > { %7127 = vmatmul.mubr.msk.bf16.gmra.mrb[24].mxu1 %vm3048_vm3, %v8705_v11 }
  0xcd   : > { %7130 = vmatprep.mubr.msk.bf16.mxu1 %vm3048_vm3, %v8719_v4 }
  0xd4   : > { %7131 = vmatmul.mubr.msk.bf16.gmra.mrb[28].mxu1 %vm3048_vm3, %v8728_v3 }
  0xd5   : > { %7134 = vmatprep.mubr.msk.bf16.mxu1 %vm3048_vm3, %v8736_v33 }
  0xdc   : > { %7135 = vmatmul.mubr.msk.bf16.gmra.mrb[32].mxu1 %vm3048_vm3, %v8760_v14 }
  0xdd   : > { %7138 = vmatprep.mubr.msk.bf16.mxu1 %vm3048_vm3, %v8771_v24 }
  0xe4   : > { %7139 = vmatmul.mubr.msk.bf16.gmra.mrb[36].mxu1 %vm3048_vm3, %v8778_v9 }
  0xe5   : > { %7142 = vmatprep.mubr.msk.bf16.mxu1 %vm3048_vm3, %v8812_v48 }
  0xec   : > { %7143 = vmatmul.mubr.msk.bf16.gmra.mrb[40].mxu1 %vm3048_vm3, %v8818_v63 }
  0xed   : > { %7146 = vmatprep.mubr.msk.bf16.mxu1 %vm3048_vm3, %v8836_v60 }
  0xef   : > { %v8966_v13 = vpop.f32.mrb[0].mxu1 }
  0xf0   : > { %11028 = vst [vmem:[#allocation49_spill] sm:$0xff] %v8966_v13  ;;  %v8976_v53 = vpop.f32.mrb[1].mxu1 }
  0xf1   : > { %11029 = vst [vmem:[#allocation50_spill] sm:$0xff] %v8976_v53  ;;  %v8983_v23 = vpop.f32.mrb[2].mxu1 }
  0xf2   : > { %11030 = vst [vmem:[#allocation51_spill] sm:$0xff] %v8983_v23  ;;  %v8989_v36 = vpop.f32.mrb[3].mxu1  ;;  %v11032_v23 = vunpack.c.h.bf16 %v8971_v22 }
  0xf3   : > { %11031 = vst [vmem:[#allocation52_spill] sm:$0xff] %v8989_v36  ;;  %v9014_v36 = vld [vmem:[%s8157_s14 + $0x38] sm:$0x1] }
  0xf4   : > { %v537_v53 = vrot.slane %v11032_v23, 1  ;;  %7147 = vmatmul.mubr.msk.bf16.gmra.mrb[44].mxu1 %vm3048_vm3, %v8840_v25  ;;  %v9011_v23 = vld [vmem:[%s8157_s14 + $0x30] sm:$0xff]   ;;  %v11038_v47 = vunpack.c.l.bf16 %v9014_v36 }
  0xf5   : > { %7152 = vmatprep.mubr.msk.bf16.mxu1 %vm3048_vm3, %v8330_v59  ;;  %v10840_v44 = vunpack.c.l.bf16 %v9011_v23  ;;  %v10841_v59 = vunpack.c.h.bf16 %v9011_v23 }
  0xf6   : > { %v538_v37 = vsel %vm520_vm1, %v536_v56, %v537_v53  ;;  %v540_v62 = vsel %vm520_vm1, %v537_v53, %v539_v61  ;;  %v9026_v56 = vld [vmem:[%s8157_s14 + $0x3c] sm:$0xff]   ;;  %v9029_v53 = vld [vmem:[%s8157_s14 + $0x44] sm:$0x1] }
  0xf7   : > { %v9016_v13 = vpop.f32.mrb[4].mxu1  ;;  %v9020_v21 = vpack.c.bf16 %v540_v62, %v538_v37  ;;  %v10848_v28 = vunpack.c.l.bf16 %v9026_v56  ;;  %v541_v37 = vrot.slane %v10840_v44, 1  ;;  %v542_v32 = vrot.slane %v10841_v59, 1 }
  0xf8   : > { %11034 = vst [vmem:[#allocation54_spill] sm:$0xff] %v9016_v13  ;;  %v9031_v61 = vpop.f32.mrb[5].mxu1  ;;  %v9051_v13 = vld [vmem:[%s10725_s5 + $0x28] sm:$0xff]   ;;  %v11040_v44 = vunpack.c.h.bf16 %v9026_v56  ;;  %v11041_v59 = vunpack.c.l.bf16 %v9029_v53 }
  0xf9   : > { %11035 = vst [vmem:[#allocation55_spill] sm:$0xff] %v9020_v21  ;;  %11036 = vst [vmem:[#allocation56_spill] sm:$0xff] %v9031_v61  ;;  %v9036_v62 = vpop.f32.mrb[6].mxu1  ;;  %6749 = vmatmul.mubr.msk.bf16.gmra.mrb[4].mxu0 %vm651_vm2, %v9020_v21  ;;  %v544_v61 = vrot.slane %v11038_v47, 1  ;;  %v546_v41 = vrot.slane %v10848_v28, 1  ;;  %v543_v47 = vsel %vm520_vm1, %v541_v37, %v542_v32 }
  0xfa   : > { %11037 = vst [vmem:[#allocation57_spill] sm:$0xff] %v9036_v62  ;;  %v9046_v27 = vpop.f32.mrb[7].mxu1  ;;  %v547_v62 = vrot.slane %v11040_v44, 1  ;;  %v549_v21 = vrot.slane %v11041_v59, 1  ;;  %v9076_v59 = vld [vmem:[%s8157_s14 + $0x48] sm:$0xff]  }
  0xfb   : > { %11039 = vst [vmem:[#allocation58_spill] sm:$0xff] %v9046_v27  ;;  %v545_v27 = vsel %vm520_vm1, %v542_v32, %v544_v61  ;;  %v9087_v61 = vld [vmem:[%s8157_s14 + $0x54] sm:$0xff]  }
  0xfc   : > { %7153 = vmatmul.mubr.msk.bf16.vlgmr.msra.gmra.mrb[16].mxu1 %vm3048_vm3, %v8355_v49  ;;  %v9063_v25 = vpack.c.bf16 %v545_v27, %v543_v47  ;;  %v548_v60 = vsel %vm520_vm1, %v546_v41, %v547_v62  ;;  %v550_v28 = vsel %vm520_vm1, %v547_v62, %v549_v21  ;;  %v9079_v27 = vld [vmem:[%s8157_s14 + $0x50] sm:$0x1]  ;;  %v10859_v41 = vunpack.c.l.bf16 %v9076_v59 }
  0xfd   : > { %7185 = vmatpush3.bf16.msra.mxu1 %v8887_v51  ;;  %7156 = vmatprep.mubr.msk.bf16.mxu1 %vm3048_vm3, %v8361_v20  ;;  %v9070_v44 = vpack.c.bf16 %v550_v28, %v548_v60  ;;  %v10860_v51 = vunpack.c.h.bf16 %v9076_v59  ;;  %v9090_v60 = vld [vmem:[%s8157_s14 + $0x5c] sm:$0x1]  ;;  %v10861_v62 = vunpack.c.l.bf16 %v9087_v61  ;;  %v11047_v20 = vunpack.c.l.bf16 %v9079_v27 }
  0xfe   : > { %11042 = vst [vmem:[#allocation59_spill] sm:$0xff] %v9063_v25  ;;  %7218 = vmatprep.subr.bf16.mxu1 %v9051_v13  ;;  %6752 = vmatprep.mubr.msk.bf16.mxu0 %vm651_vm2, %v9063_v25  ;;  %v551_v21 = vrot.slane %v10859_v41, 1  ;;  %v11049_v47 = vunpack.c.h.bf16 %v9087_v61  ;;  %v11050_v63 = vunpack.c.l.bf16 %v9090_v60 }
  0xff   : > { %11043 = vst [vmem:[#allocation60_spill] sm:$0xff] %v9070_v44  ;;  %v9081_v32 = vpop.f32.mrb[8].mxu1  ;;  %v556_v37 = vrot.slane %v10861_v62, 1  ;;  %v9192_v62 = vld [vmem:[%s8157_s14 + $0x60] sm:$0xff]  }
 0x100   : > { %11044 = vst [vmem:[#allocation61_spill] sm:$0xff] %v9081_v32  ;;  %v9092_v28 = vpop.f32.mrb[9].mxu1  ;;  %v552_v32 = vrot.slane %v10860_v51, 1 }
 0x101   : > { %11045 = vst [vmem:[#allocation62_spill] sm:$0xff] %v9092_v28  ;;  %v9097_v25 = vpop.f32.mrb[10].mxu1  ;;  %6753 = vmatmul.mubr.msk.bf16.gmra.mrb[8].mxu0 %vm651_vm2, %v9070_v44  ;;  %v554_v28 = vrot.slane %v11047_v20, 1  ;;  %v559_v44 = vrot.slane %v11050_v63, 1 }
 0x102   : > { %11046 = vst [vmem:[#allocation63_spill] sm:$0xff] %v9097_v25  ;;  %v9107_v49 = vpop.f32.mrb[11].mxu1  ;;  %v557_v25 = vrot.slane %v11049_v47, 1  ;;  %v553_v48 = vsel %vm520_vm1, %v551_v21, %v552_v32 }
 0x103   : > { %11048 = vst [vmem:[#allocation64_spill] sm:$0xff] %v9107_v49  ;;  %v555_v41 = vsel %vm520_vm1, %v552_v32, %v554_v28 }
 0x104   : > { %7157 = vmatmul.mubr.msk.bf16.gmra.mrb[20].mxu1 %vm3048_vm3, %v8372_v55  ;;  %v9119_v51 = vpack.c.bf16 %v555_v41, %v553_v48  ;;  %v558_v20 = vsel %vm520_vm1, %v556_v37, %v557_v25  ;;  %v560_v49 = vsel %vm520_vm1, %v557_v25, %v559_v44  ;;  %v9173_v44 = vld [vmem:[%s8279_s19 + $0xc0] sm:$0xff]   ;;  %v9180_v37 = vld [vmem:[%s8279_s19 + $0xc8] sm:$0x1] }
 0x105   : > { %7160 = vmatprep.mubr.msk.bf16.mxu1 %vm3048_vm3, %v8401_v10  ;;  %v9125_v47 = vpack.c.bf16 %v560_v49, %v558_v20  ;;  %v6089_v49 = vld [vmem:[%s10723_s3 + $0x4] sm:$0x3]  ;;  %v10862_v41 = vunpack.c.l.bf16 %v9173_v44  ;;  %v10863_v28 = vunpack.c.h.bf16 %v9173_v44 }
 0x106   : > { %11051 = vst [vmem:[#allocation65_spill] sm:$0xff] %v9119_v51  ;;  %6756 = vmatprep.mubr.msk.bf16.mxu0 %vm651_vm2, %v9119_v51  ;;  %7969 = vmatprep.subr.msk.bf16.mxu0 %vm700_vm0, %v6089_v49  ;;  %v1257_v25 = vsel %vm700_vm0, %v6089_v49, 0  ;;  %v11062_v51 = vunpack.c.l.bf16 %v8927_v1 }
 0x107   : > { %11052 = vst [vmem:[#allocation66_spill] sm:$0xff] %v9125_v47  ;;  %v9129_v63 = vpop.f32.mrb[12].mxu1  ;;  %v4273_v20 = vrot.slane %v10862_v41, 2  ;;  %v4274_v49 = vrot.slane %v10863_v28, 2 }
 0x108   : > { %11053 = vst [vmem:[#allocation67_spill] sm:$0xff] %v9129_v63  ;;  %v9131_v32 = vpop.f32.mrb[13].mxu1  ;;  %v9212_v63 = vld [vmem:[%s8157_s14 + $0x78] sm:$0xff]  }
 0x109   : > { %11054 = vst [vmem:[#allocation68_spill] sm:$0xff] %v9131_v32  ;;  %v9133_v21 = vpop.f32.mrb[14].mxu1  ;;  %6757 = vmatmul.mubr.msk.bf16.gmra.mrb[12].mxu0 %vm651_vm2, %v9125_v47  ;;  %v4275_v41 = vsel %vm1077_vm4, %v4273_v20, %v4274_v49  ;;  %v9217_v20 = vld [vmem:[%s8157_s14 + $0x84] sm:$0xff]   ;;  %v11061_v47 = vunpack.c.h.bf16 %v8924_v8 }
 0x10a   : > { %11055 = vst [vmem:[#allocation69_spill] sm:$0xff] %v9133_v21  ;;  %v9137_v48 = vpop.f32.mrb[15].mxu1  ;;  %6778 = vmatprep.mubr.msk.bf16.mxu0 %vm651_vm2, %v8915_v0 }
 0x10b   : > { %11056 = vst [vmem:[#allocation70_spill] sm:$0xff] %v9137_v48  ;;  %v9197_v48 = vld [vmem:[%s8157_s14 + $0x6c] sm:$0xff]  }
 0x10c   : > { %7161 = vmatmul.mubr.msk.bf16.gmra.mrb[24].mxu1 %vm3048_vm3, %v8444_v7 }
 0x10d   : > { %7164 = vmatprep.mubr.msk.bf16.mxu1 %vm3048_vm3, %v8452_v54 }
 0x111   : > { %6779 = vmatmul.mubr.msk.bf16.vlgmr.msra.gmra.mrb[0].mxu0 %vm651_vm2, %v8924_v8 }
 0x112   : > { %6811 = vmatpush3.bf16.msra.mxu0 %v1257_v25  ;;  %6782 = vmatprep.mubr.msk.bf16.mxu0 %vm651_vm2, %v8961_v58  ;;  %v10864_v25 = vunpack.c.l.bf16 %v9180_v37 }
 0x114   : > { %7165 = vmatmul.mubr.msk.bf16.gmra.mrb[28].mxu1 %vm3048_vm3, %v8465_v46  ;;  %v4276_v28 = vrot.slane %v10864_v25, 2 }
 0x115   : > { %7168 = vmatprep.mubr.msk.bf16.mxu1 %vm3048_vm3, %v8476_v29 }
 0x116   : > { %v4277_v21 = vsel %vm1077_vm4, %v4274_v49, %v4276_v28  ;;  %v9247_v28 = vld [vmem:[%s8157_s14 + $0xa8] sm:$0xff]   ;;  %v11057_v49 = vunpack.c.l.bf16 %v8915_v0 }
 0x117   : > { %v9205_v32 = vpack.c.bf16 %v4277_v21, %v4275_v41  ;;  %v9226_v21 = vld [vmem:[%s10725_s5 + $0x30] sm:$0xff]  }
 0x118   : > { %v9231_v41 = vld [vmem:[%s8157_s14 + $0x90] sm:$0xff]   ;;  %v1078_v25 = vrot.slane %v11057_v49, 2 }
 0x119   : > { %6783 = vmatmul.mubr.msk.bf16.gmra.mrb[4].mxu0 %vm651_vm2, %v8971_v22 }
 0x11a   : > { %6786 = vmatprep.mubr.msk.bf16.mxu0 %vm651_vm2, %v9011_v23 }
 0x11c   : > { %7169 = vmatmul.mubr.msk.bf16.gmra.mrb[32].mxu1 %vm3048_vm3, %v8482_v16 }
 0x11d   : > { %7172 = vmatprep.mubr.msk.bf16.mxu1 %vm3048_vm3, %v8520_v30 }
 0x121   : > { %6787 = vmatmul.mubr.msk.bf16.gmra.mrb[8].mxu0 %vm651_vm2, %v9026_v56 }
 0x122   : > { %6790 = vmatprep.mubr.msk.bf16.mxu0 %vm651_vm2, %v9076_v59 }
 0x124   : > { %7173 = vmatmul.mubr.msk.bf16.gmra.mrb[36].mxu1 %vm3048_vm3, %v8534_v42  ;;  %v1086_v42 = vrot.slane %v11062_v51, 2  ;;  %v11065_v51 = vunpack.c.l.bf16 %v8964_v50 }
 0x125   : > { %7176 = vmatprep.mubr.msk.bf16.mxu1 %vm3048_vm3, %v8566_v31 }
 0x129   : > { %6791 = vmatmul.mubr.msk.bf16.gmra.mrb[12].mxu0 %vm651_vm2, %v9087_v61 }
 0x12a   : > { %6794 = vmatprep.mubr.msk.bf16.mxu0 %vm651_vm2, %v9192_v62 }
 0x12c   : > { %7177 = vmatmul.mubr.msk.bf16.gmra.mrb[40].mxu1 %vm3048_vm3, %v8596_v26 }
 0x12d   : > { %7180 = vmatprep.mubr.msk.bf16.mxu1 %vm3048_vm3, %v8769_v52  ;;  %v11059_v52 = vunpack.c.l.bf16 %v8918_v34  ;;  %v6107_v34 = vld [vmem:[%s10723_s3 + $0x6] sm:$0x3] }
 0x12e   : > { %7970 = vmatprep.subr.msk.bf16.mxu0 %vm700_vm0, %v6107_v34 }
 0x12f   : > { %v1081_v26 = vrot.slane %v11059_v52, 2 }
 0x131   : > { %6795 = vmatmul.mubr.msk.bf16.gmra.mrb[16].mxu0 %vm651_vm2, %v9197_v48 }
 0x132   : > { %6798 = vmatprep.mubr.msk.bf16.mxu0 %vm651_vm2, %v9212_v63 }
 0x134   : > { %7181 = vmatmul.mubr.msk.bf16.gmra.mrb[44].mxu1 %vm3048_vm3, %v9173_v44 }
 0x135   : > { %7186 = vmatprep.mubr.msk.bf16.mxu1 %vm3048_vm3, %v8431_v45  ;;  %v9237_v45 = vld [vmem:[%s8157_s14 + $0x9c] sm:$0xff]  }
 0x139   : > { %6799 = vmatmul.mubr.msk.bf16.gmra.mrb[20].mxu0 %vm651_vm2, %v9217_v20 }
 0x13a   : > { %6802 = vmatprep.mubr.msk.bf16.mxu0 %vm651_vm2, %v9231_v41 }
 0x13c   : > { %7187 = vmatmul.mubr.msk.bf16.vlgmr.msra.gmra.mrb[16].mxu1 %vm3048_vm3, %v8449_v57 }
 0x13d   : > { %7219 = vmatpush3.bf16.msra.mxu1 %v9051_v13  ;;  %7190 = vmatprep.mubr.msk.bf16.mxu1 %vm3048_vm3, %v8459_v19  ;;  %v9252_v13 = vld [vmem:[%s8157_s14 + $0xb4] sm:$0xff]   ;;  %v11058_v19 = vunpack.c.h.bf16 %v8915_v0 }
 0x13e   : > { %7252 = vmatprep.subr.bf16.mxu1 %v9226_v21 }
 0x13f   : > { %v1079_v57 = vrot.slane %v11058_v19, 2 }
 0x141   : > { %6803 = vmatmul.mubr.msk.bf16.gmra.mrb[24].mxu0 %vm651_vm2, %v9237_v45  ;;  %v1080_v49 = vsel %vm1077_vm4, %v1078_v25, %v1079_v57  ;;  %v1082_v0 = vsel %vm1077_vm4, %v1079_v57, %v1081_v26  ;;  %v1459_v57 = vsel %vm700_vm0, %v6107_v34, 0  ;;  %v11066_v25 = vunpack.c.l.bf16 %v8971_v22 }
 0x142   : > { %6806 = vmatprep.mubr.msk.bf16.mxu0 %vm651_vm2, %v9247_v28  ;;  %v1190_v19 = vpack.c.bf16 %v1082_v0, %v1080_v49  ;;  %v11067_v0 = vunpack.c.h.bf16 %v8971_v22 }
 0x143   : > { %v1093_v49 = vrot.slane %v11066_v25, 2 }
 0x144   : > { %7191 = vmatmul.mubr.msk.bf16.gmra.mrb[20].mxu1 %vm3048_vm3, %v8470_v40  ;;  %v11060_v40 = vunpack.c.l.bf16 %v8924_v8 }
 0x145   : > { %7194 = vmatprep.mubr.msk.bf16.mxu1 %vm3048_vm3, %v8511_v6  ;;  %v1084_v6 = vrot.slane %v11061_v47, 2  ;;  %v1091_v47 = vrot.slane %v11065_v51, 2  ;;  %v11071_v51 = vld [vmem:[#allocation37_spill] sm:$0xff] }
 0x146   : > { %v1083_v31 = vrot.slane %v11060_v40, 2 }
 0x147   : > { %v1087_v40 = vsel %vm1077_vm4, %v1084_v6, %v1086_v42  ;;  %v11064_v42 = vunpack.c.h.bf16 %v8961_v58 }
 0x148   : > { %v1085_v52 = vsel %vm1077_vm4, %v1083_v31, %v1084_v6  ;;  %v11063_v31 = vunpack.c.l.bf16 %v8961_v58 }
 0x149   : > { %6807 = vmatmul.mubr.msk.bf16.gmra.mrb[28].mxu0 %vm651_vm2, %v9252_v13  ;;  %v9281_v1 = vpack.c.bf16 %v1087_v40, %v1085_v52  ;;  %v1089_v26 = vrot.slane %v11064_v42, 2  ;;  %v11068_v52 = vunpack.c.l.bf16 %v8974_v2  ;;  %v11073_v2 = vunpack.c.l.bf16 %v9011_v23 }
 0x14a   : > { %6812 = vmatprep.mubr.msk.bf16.mxu0 %vm651_vm2, %v1190_v19  ;;  %v1088_v6 = vrot.slane %v11063_v31, 2  ;;  %v1094_v19 = vrot.slane %v11067_v0, 2 }
 0x14b   : > { %v1096_v40 = vrot.slane %v11068_v52, 2  ;;  %v1092_v31 = vsel %vm1077_vm4, %v1089_v26, %v1091_v47 }
 0x14c   : > { %7195 = vmatmul.mubr.msk.bf16.gmra.mrb[24].mxu1 %vm3048_vm3, %v8585_v39  ;;  %v1090_v34 = vsel %vm1077_vm4, %v1088_v6, %v1089_v26  ;;  %v1095_v50 = vsel %vm1077_vm4, %v1093_v49, %v1094_v19  ;;  %v1098_v6 = vrot.slane %v11073_v2, 2  ;;  %v11074_v26 = vunpack.c.h.bf16 %v9011_v23  ;;  %v11079_v2 = vld [vmem:[#allocation38_spill] sm:$0xff] }
 0x14d   : > { %7198 = vmatprep.mubr.msk.bf16.mxu1 %vm3048_vm3, %v8593_v15  ;;  %v11069_v15 = vld [vmem:[#allocation36_spill] sm:$0xff]  ;;  %v9304_v42 = vpack.c.bf16 %v1092_v31, %v1090_v34  ;;  %v11075_v49 = vunpack.c.l.bf16 %v9014_v36  ;;  %v11078_v31 = vunpack.c.l.bf16 %v9029_v53  ;;  %v11083_v53 = vunpack.c.l.bf16 %v9076_v59 }
 0x14e   : > { %v1099_v47 = vrot.slane %v11074_v26, 2 }
 0x14f   : > { %11070 = vst [vmem:[#allocation36_spill] sm:$0xff] %v9304_v42  ;;  %v1101_v0 = vrot.slane %v11075_v49, 2 }
 0x151   : > { %6813 = vmatmul.mubr.msk.bf16.vlgmr.msra.gmra.mrb[0].mxu0 %vm651_vm2, %v9281_v1 }
 0x152   : > { %6845 = vmatpush3.bf16.msra.mxu0 %v1459_v57  ;;  %v1097_v57 = vsel %vm1077_vm4, %v1094_v19, %v1096_v40  ;;  %6816 = vmatprep.mubr.msk.bf16.mxu0 %vm651_vm2, %v9304_v42  ;;  %v11076_v19 = vunpack.c.l.bf16 %v9026_v56  ;;  %v11077_v40 = vunpack.c.h.bf16 %v9026_v56 }
 0x153   : > { %v9310_v25 = vpack.c.bf16 %v1097_v57, %v1095_v50  ;;  %v1106_v50 = vrot.slane %v11078_v31, 2  ;;  %v1100_v57 = vsel %vm1077_vm4, %v1098_v6, %v1099_v47  ;;  %v1108_v6 = vrot.slane %v11083_v53, 2  ;;  %v11089_v53 = vld [vmem:[#allocation42_spill] sm:$0xff] }
 0x154   : > { %7199 = vmatmul.mubr.msk.bf16.gmra.mrb[28].mxu1 %vm3048_vm3, %v11069_v15  ;;  %v1103_v52 = vrot.slane %v11076_v19, 2  ;;  %v1104_v34 = vrot.slane %v11077_v40, 2  ;;  %v11081_v19 = vld [vmem:[#allocation40_spill] sm:$0xff] }
 0x155   : > { %7202 = vmatprep.mubr.msk.bf16.mxu1 %vm3048_vm3, %v11071_v51  ;;  %11072 = vst [vmem:[#allocation71_spill] sm:$0xff] %v9310_v25  ;;  %v1102_v51 = vsel %vm1077_vm4, %v1099_v47, %v1101_v0  ;;  %v11085_v0 = vunpack.c.l.bf16 %v9079_v27 }
 0x156   : > { %v9332_v26 = vpack.c.bf16 %v1102_v51, %v1100_v57  ;;  %v1105_v36 = vsel %vm1077_vm4, %v1103_v52, %v1104_v34  ;;  %v1107_v49 = vsel %vm1077_vm4, %v1104_v34, %v1106_v50  ;;  %v11084_v51 = vunpack.c.h.bf16 %v9076_v59 }
 0x157   : > { %v9338_v40 = vpack.c.bf16 %v1107_v49, %v1105_v36  ;;  %v1111_v52 = vrot.slane %v11085_v0, 2  ;;  %v11086_v34 = vunpack.c.l.bf16 %v9087_v61  ;;  %v11087_v50 = vunpack.c.h.bf16 %v9087_v61 }
 0x158   : > { %11080 = vst [vmem:[#allocation72_spill] sm:$0xff] %v9332_v26  ;;  %v1109_v47 = vrot.slane %v11084_v51, 2  ;;  %v11088_v36 = vunpack.c.l.bf16 %v9090_v60  ;;  %v11092_v60 = vunpack.c.l.bf16 %v9173_v44 }
 0x159   : > { %6817 = vmatmul.mubr.msk.bf16.gmra.mrb[4].mxu0 %vm651_vm2, %v9310_v25  ;;  %11082 = vst [vmem:[#allocation73_spill] sm:$0xff] %v9338_v40  ;;  %v1113_v31 = vrot.slane %v11086_v34, 2  ;;  %v1114_v57 = vrot.slane %v11087_v50, 2 }
 0x15a   : > { %6820 = vmatprep.mubr.msk.bf16.mxu0 %vm651_vm2, %v9332_v26  ;;  %v1116_v49 = vrot.slane %v11088_v36, 2 }
 0x15b   : > { %v1115_v27 = vsel %vm1077_vm4, %v1113_v31, %v1114_v57  ;;  %v11095_v31 = vld [vmem:[#allocation2_spill] sm:$0xff] }
 0x15c   : > { %7203 = vmatmul.mubr.msk.bf16.gmra.mrb[32].mxu1 %vm3048_vm3, %v11079_v2  ;;  %v1117_v0 = vsel %vm1077_vm4, %v1114_v57, %v1116_v49  ;;  %v11096_v50 = vunpack.c.l.bf16 %v11095_v31  ;;  %v11097_v36 = vunpack.c.h.bf16 %v11095_v31 }
 0x15d   : > { %7206 = vmatprep.mubr.msk.bf16.mxu1 %vm3048_vm3, %v11081_v19  ;;  %v1110_v19 = vsel %vm1077_vm4, %v1108_v6, %v1109_v47  ;;  %v9366_v34 = vpack.c.bf16 %v1117_v0, %v1115_v27  ;;  %v4060_v6 = vrot.slane %v11092_v60, 1  ;;  %v11098_v27 = vld [vmem:[#allocation3_spill] sm:$0xff] }
 0x15e   : > { %v1118_v57 = vrot.slane %v11096_v50, 2  ;;  %v1119_v49 = vrot.slane %v11097_v36, 2  ;;  %v11099_v0 = vunpack.c.l.bf16 %v11098_v27 }
 0x15f   : > { %11091 = vst [vmem:[#allocation75_spill] sm:$0xff] %v9366_v34 }
 0x161   : > { %6821 = vmatmul.mubr.msk.bf16.gmra.mrb[8].mxu0 %vm651_vm2, %v9338_v40  ;;  %v1112_v40 = vsel %vm1077_vm4, %v1109_v47, %v1111_v52  ;;  %v11093_v47 = vunpack.c.h.bf16 %v9173_v44 }
 0x162   : > { %v9360_v51 = vpack.c.bf16 %v1112_v40, %v1110_v19  ;;  %v11094_v19 = vunpack.c.l.bf16 %v9180_v37  ;;  %v11103_v37 = vld [vmem:[#allocation5_spill] sm:$0xff] }
 0x163   : > { %v4061_v52 = vrot.slane %v11093_v47, 1 }
 0x164   : > { %7207 = vmatmul.mubr.msk.bf16.gmra.mrb[36].mxu1 %vm3048_vm3, %v11089_v53  ;;  %11090 = vst [vmem:[#allocation74_spill] sm:$0xff] %v9360_v51  ;;  %6824 = vmatprep.mubr.msk.bf16.mxu0 %vm651_vm2, %v9360_v51  ;;  %v4063_v40 = vrot.slane %v11094_v19, 1  ;;  %v11100_v51 = vld [vmem:[#allocation4_spill] sm:$0xff]  ;;  %v11104_v19 = vunpack.c.l.bf16 %v11103_v37 }
 0x165   : > { %7210 = vmatprep.mubr.msk.bf16.mxu1 %vm3048_vm3, %v8816_v38  ;;  %v1121_v38 = vrot.slane %v11099_v0, 2  ;;  %v11101_v60 = vunpack.c.l.bf16 %v11100_v51  ;;  %v11102_v47 = vunpack.c.h.bf16 %v11100_v51  ;;  %v4062_v51 = vsel %vm520_vm1, %v4060_v6, %v4061_v52 }
 0x166   : > { %v1126_v2 = vrot.slane %v11104_v19, 2  ;;  %v4064_v27 = vsel %vm520_vm1, %v4061_v52, %v4063_v40  ;;  %v11110_v52 = vld [vmem:[#allocation8_spill] sm:$0xff]  ;;  %v11113_v19 = vld [vmem:[#allocation9_spill] sm:$0xff] }
 0x167   : > { %v1123_v53 = vrot.slane %v11101_v60, 2  ;;  %v1124_v26 = vrot.slane %v11102_v47, 2  ;;  %v1122_v25 = vsel %vm1077_vm4, %v1119_v49, %v1121_v38  ;;  %v9406_v38 = vpack.c.bf16 %v4064_v27, %v4062_v51 }
 0x168   : > { %v11111_v40 = vunpack.c.l.bf16 %v11110_v52  ;;  %v11112_v47 = vunpack.c.h.bf16 %v11110_v52  ;;  %v11118_v52 = vld [vmem:[#allocation12_spill] sm:$0xff] }
 0x169   : > { %6825 = vmatmul.mubr.msk.bf16.gmra.mrb[12].mxu0 %vm651_vm2, %v9366_v34  ;;  %v1120_v34 = vsel %vm1077_vm4, %v1118_v57, %v1119_v49  ;;  %v1125_v50 = vsel %vm1077_vm4, %v1123_v53, %v1124_v26  ;;  %v1127_v36 = vsel %vm1077_vm4, %v1124_v26, %v1126_v2  ;;  %v11108_v57 = vld [vmem:[#allocation7_spill] sm:$0xff] }
 0x16a   : > { %v9394_v31 = vpack.c.bf16 %v1122_v25, %v1120_v34  ;;  %v9402_v0 = vpack.c.bf16 %v1127_v36, %v1125_v50  ;;  %v11105_v25 = vld [vmem:[#allocation6_spill] sm:$0xff]  ;;  %v11109_v6 = vunpack.c.l.bf16 %v11108_v57  ;;  %v1133_v60 = vrot.slane %v11111_v40, 2 }
 0x16b   : > { %v11106_v53 = vunpack.c.l.bf16 %v11105_v25  ;;  %v11107_v26 = vunpack.c.h.bf16 %v11105_v25  ;;  %v1134_v37 = vrot.slane %v11112_v47, 2  ;;  %v11114_v50 = vunpack.c.l.bf16 %v11113_v19 }
 0x16c   : > { %7211 = vmatmul.mubr.msk.bf16.gmra.mrb[40].mxu1 %vm3048_vm3, %v8820_v35  ;;  %6828 = vmatprep.mubr.msk.bf16.mxu0 %vm651_vm2, %v9394_v31  ;;  %v1131_v49 = vrot.slane %v11109_v6, 2  ;;  %v11119_v40 = vunpack.c.l.bf16 %v11118_v52 }
 0x16d   : > { %7214 = vmatprep.mubr.msk.bf16.mxu1 %vm3048_vm3, %v8832_v18  ;;  %v1128_v2 = vrot.slane %v11106_v53, 2  ;;  %v1129_v34 = vrot.slane %v11107_v26, 2  ;;  %v1136_v36 = vrot.slane %v11114_v50, 2  ;;  %v1135_v53 = vsel %vm1077_vm4, %v1133_v60, %v1134_v37  ;;  %v9447_v60 = vld [vmem:[%s10725_s5 + $0x38] sm:$0xff]  }
 0x16e   : > { %v1141_v47 = vrot.slane %v11119_v40, 2 }
 0x16f   : > { %v1130_v51 = vsel %vm1077_vm4, %v1128_v2, %v1129_v34  ;;  %v1132_v27 = vsel %vm1077_vm4, %v1129_v34, %v1131_v49  ;;  %v1137_v26 = vsel %vm1077_vm4, %v1134_v37, %v1136_v36  ;;  %v11115_v2 = vld [vmem:[#allocation10_spill] sm:$0xff] }
 0x170   : > { %v9428_v25 = vpack.c.bf16 %v1132_v27, %v1130_v51  ;;  %v9432_v57 = vpack.c.bf16 %v1137_v26, %v1135_v53  ;;  %v11116_v34 = vunpack.c.l.bf16 %v11115_v2  ;;  %v11117_v49 = vunpack.c.h.bf16 %v11115_v2  ;;  %v11120_v37 = vld [vmem:[#allocation14_spill] sm:$0xff]  ;;  %v11123_v27 = vld [vmem:[#allocation15_spill] sm:$0xff] }
 0x171   : > { %6829 = vmatmul.mubr.msk.bf16.gmra.mrb[16].mxu0 %vm651_vm2, %v9402_v0  ;;  %v11121_v19 = vunpack.c.l.bf16 %v11120_v37  ;;  %v11122_v36 = vunpack.c.h.bf16 %v11120_v37  ;;  %v11124_v53 = vunpack.c.l.bf16 %v11123_v27  ;;  %v11132_v27 = vld [vmem:[#allocation20_spill] sm:$0xff] }
 0x172   : > { %6832 = vmatprep.mubr.msk.bf16.mxu0 %vm651_vm2, %v9428_v25  ;;  %v1138_v6 = vrot.slane %v11116_v34, 2 }
 0x173   : > { %v1143_v50 = vrot.slane %v11121_v19, 2  ;;  %v1144_v51 = vrot.slane %v11122_v36, 2  ;;  %v1146_v26 = vrot.slane %v11124_v53, 2  ;;  %v11133_v53 = vunpack.c.l.bf16 %v11132_v27 }
 0x174   : > { %7215 = vmatmul.mubr.msk.bf16.gmra.mrb[44].mxu1 %vm3048_vm3, %v9406_v38 }
 0x175   : > { %7220 = vmatprep.mubr.msk.bf16.mxu1 %vm3048_vm3, %v8661_v5  ;;  %v1139_v5 = vrot.slane %v11117_v49, 2  ;;  %v1145_v52 = vsel %vm1077_vm4, %v1143_v50, %v1144_v51  ;;  %v1147_v40 = vsel %vm1077_vm4, %v1144_v51, %v1146_v26  ;;  %v1153_v26 = vrot.slane %v11133_v53, 2  ;;  %v9574_v53 = vld [vmem:[%s8157_s14 + $0xc0] sm:$0xff]  }
 0x176   : > { %v9466_v37 = vpack.c.bf16 %v1147_v40, %v1145_v52  ;;  %v11135_v52 = vld [vmem:[#allocation22_spill] sm:$0xff] }
 0x177   : > { %v1140_v2 = vsel %vm1077_vm4, %v1138_v6, %v1139_v5  ;;  %v1142_v34 = vsel %vm1077_vm4, %v1139_v5, %v1141_v47  ;;  %v11127_v6 = vld [vmem:[#allocation17_spill] sm:$0xff]  ;;  %v11136_v40 = vunpack.c.l.bf16 %v11135_v52  ;;  %v11150_v52 = vld [vmem:[#allocation66_spill] sm:$0xff] }
 0x178   : > { %v9459_v49 = vpack.c.bf16 %v1142_v34, %v1140_v2  ;;  %11126 = vst [vmem:[#allocation3_spill] sm:$0xff] %v9466_v37  ;;  %v11128_v5 = vunpack.c.l.bf16 %v11127_v6  ;;  %v11129_v19 = vunpack.c.h.bf16 %v11127_v6  ;;  %v11134_v2 = vunpack.c.h.bf16 %v11132_v27  ;;  %v11142_v27 = vld [vmem:[#allocation26_spill] sm:$0xff] }
 0x179   : > { %6833 = vmatmul.mubr.msk.bf16.gmra.mrb[20].mxu0 %vm651_vm2, %v9432_v57 }
 0x17a   : > { %11125 = vst [vmem:[#allocation2_spill] sm:$0xff] %v9459_v49  ;;  %6836 = vmatprep.mubr.msk.bf16.mxu0 %vm651_vm2, %v9459_v49  ;;  %v1148_v47 = vrot.slane %v11128_v5, 2  ;;  %v1149_v50 = vrot.slane %v11129_v19, 2  ;;  %v1154_v34 = vrot.slane %v11134_v2, 2  ;;  %v11148_v2 = vld [vmem:[#allocation32_spill] sm:$0xff] }
 0x17c   : > { %7221 = vmatmul.mubr.msk.bf16.vlgmr.msra.gmra.mrb[16].mxu1 %vm3048_vm3, %v8667_v17  ;;  %v1155_v5 = vsel %vm1077_vm4, %v1153_v26, %v1154_v34  ;;  %v11145_v26 = vld [vmem:[#allocation55_spill] sm:$0xff] }
 0x17d   : > { %7253 = vmatpush3.bf16.msra.mxu1 %v9226_v21  ;;  %7224 = vmatprep.mubr.msk.bf16.mxu1 %vm3048_vm3, %v8692_v43  ;;  %v11130_v21 = vld [vmem:[#allocation18_spill] sm:$0xff]  ;;  %v1156_v43 = vrot.slane %v11136_v40, 2  ;;  %v9616_v40 = vld [vmem:[%s8279_s19 + $0xcc] sm:$0xff]  }
 0x17e   : > { %7286 = vmatprep.subr.bf16.mxu1 %v9447_v60  ;;  %v11131_v36 = vunpack.c.l.bf16 %v11130_v21 }
 0x17f   : > { %v1157_v19 = vsel %vm1077_vm4, %v1154_v34, %v1156_v43  ;;  %v6124_v43 = vld [vmem:[%s10723_s3 + $0x8] sm:$0x3]  ;;  %v11149_v34 = vld [vmem:[#allocation65_spill] sm:$0xff] }
 0x180   : > { %v1151_v51 = vrot.slane %v11131_v36, 2  ;;  %v9495_v21 = vpack.c.bf16 %v1157_v19, %v1155_v5  ;;  %7971 = vmatprep.subr.msk.bf16.mxu0 %vm700_vm0, %v6124_v43  ;;  %v11141_v36 = vld [vmem:[#allocation25_spill] sm:$0xff]  ;;  %v10895_v5 = vunpack.c.l.bf16 %v9616_v40  ;;  %v9621_v19 = vld [vmem:[%s8279_s19 + $0xd4] sm:$0x1]  ;;  %s6417_s19 = sshll.u32 %s11257_s28, 8 }
 0x181   : > { %6837 = vmatmul.mubr.msk.bf16.gmra.mrb[24].mxu0 %vm651_vm2, %v9466_v37  ;;  %v1150_v37 = vsel %vm1077_vm4, %v1148_v47, %v1149_v50  ;;  %v11139_v47 = vld [vmem:[#allocation46_spill] sm:$0xff]  ;;  %s9668_s10 = scalar_lea.vmem %s10721_s1, %s6417_s19  ;;  %s10603_s25 = scalar_lea.vmem %s10728_s8, %s6417_s19 }
 0x182   : > { %v1152_v49 = vsel %vm1077_vm4, %v1149_v50, %v1151_v51  ;;  %v11140_v50 = vld [vmem:[#allocation47_spill] sm:$0xff]  ;;  %v9557_v51 = vld [vmem:[%s10725_s5 + $0x40] sm:$0xff]  }
 0x183   : > { %v9489_v6 = vpack.c.bf16 %v1152_v49, %v1150_v37  ;;  %v1671_v49 = vsel %vm700_vm0, %v6124_v43, 0  ;;  %v11138_v37 = vld [vmem:[#allocation45_spill] sm:$0xff]  ;;  %v4908_v43 = vrot.slane %v10895_v5, 2 }
 0x184   : > { %7225 = vmatmul.mubr.msk.bf16.gmra.mrb[20].mxu1 %vm3048_vm3, %v8698_v12 }
 0x185   : > { %7228 = vmatprep.mubr.msk.bf16.mxu1 %vm3048_vm3, %v8705_v11  ;;  %6840 = vmatprep.mubr.msk.bf16.mxu0 %vm651_vm2, %v9489_v6 }
 0x189   : > { %6841 = vmatmul.mubr.msk.bf16.gmra.mrb[28].mxu0 %vm651_vm2, %v9495_v21 }
 0x18a   : > { %6846 = vmatprep.mubr.msk.bf16.mxu0 %vm651_vm2, %v8924_v8  ;;  %v11137_v8 = vld [vmem:[#allocation43_spill] sm:$0xff] }
 0x18c   : > { %7229 = vmatmul.mubr.msk.bf16.gmra.mrb[24].mxu1 %vm3048_vm3, %v8719_v4 }
 0x18d   : > { %7232 = vmatprep.mubr.msk.bf16.mxu1 %vm3048_vm3, %v8728_v3 }
 0x191   : > { %6847 = vmatmul.mubr.msk.bf16.vlgmr.msra.gmra.mrb[0].mxu0 %vm651_vm2, %v8961_v58 }
 0x192   : > { %6879 = vmatpush3.bf16.msra.mxu0 %v1671_v49  ;;  %6850 = vmatprep.mubr.msk.bf16.mxu0 %vm651_vm2, %v8971_v22 }
 0x194   : > { %7233 = vmatmul.mubr.msk.bf16.gmra.mrb[28].mxu1 %vm3048_vm3, %v8736_v33 }
 0x195   : > { %7236 = vmatprep.mubr.msk.bf16.mxu1 %vm3048_vm3, %v8760_v14 }
 0x199   : > { %6851 = vmatmul.mubr.msk.bf16.gmra.mrb[4].mxu0 %vm651_vm2, %v9011_v23 }
 0x19a   : > { %6854 = vmatprep.mubr.msk.bf16.mxu0 %vm651_vm2, %v9026_v56 }
 0x19c   : > { %7237 = vmatmul.mubr.msk.bf16.gmra.mrb[32].mxu1 %vm3048_vm3, %v8771_v24 }
 0x19d   : > { %7240 = vmatprep.mubr.msk.bf16.mxu1 %vm3048_vm3, %v8778_v9 }
 0x1a1   : > { %6855 = vmatmul.mubr.msk.bf16.gmra.mrb[8].mxu0 %vm651_vm2, %v9076_v59 }
 0x1a2   : > { %6858 = vmatprep.mubr.msk.bf16.mxu0 %vm651_vm2, %v9087_v61 }
 0x1a4   : > { %7241 = vmatmul.mubr.msk.bf16.gmra.mrb[36].mxu1 %vm3048_vm3, %v11137_v8 }
 0x1a5   : > { %7244 = vmatprep.mubr.msk.bf16.mxu1 %vm3048_vm3, %v11138_v37 }
 0x1a9   : > { %6859 = vmatmul.mubr.msk.bf16.gmra.mrb[12].mxu0 %vm651_vm2, %v9192_v62 }
 0x1aa   : > { %6862 = vmatprep.mubr.msk.bf16.mxu0 %vm651_vm2, %v9197_v48 }
 0x1ac   : > { %7245 = vmatmul.mubr.msk.bf16.gmra.mrb[40].mxu1 %vm3048_vm3, %v11139_v47 }
 0x1ad   : > { %7248 = vmatprep.mubr.msk.bf16.mxu1 %vm3048_vm3, %v11140_v50 }
 0x1b1   : > { %6863 = vmatmul.mubr.msk.bf16.gmra.mrb[16].mxu0 %vm651_vm2, %v9212_v63 }
 0x1b2   : > { %6866 = vmatprep.mubr.msk.bf16.mxu0 %vm651_vm2, %v9217_v20 }
 0x1b4   : > { %7249 = vmatmul.mubr.msk.bf16.gmra.mrb[44].mxu1 %vm3048_vm3, %v9205_v32 }
 0x1b5   : > { %7254 = vmatprep.mubr.msk.bf16.mxu1 %vm3048_vm3, %v11141_v36  ;;  %v11153_v36 = vld [vmem:[#allocation11_spill] sm:$0xff] }
 0x1b9   : > { %6867 = vmatmul.mubr.msk.bf16.gmra.mrb[20].mxu0 %vm651_vm2, %v9231_v41 }
 0x1ba   : > { %6870 = vmatprep.mubr.msk.bf16.mxu0 %vm651_vm2, %v9237_v45 }
 0x1bc   : > { %7255 = vmatmul.mubr.msk.bf16.vlgmr.msra.gmra.mrb[16].mxu1 %vm3048_vm3, %v11142_v27  ;;  %v11154_v27 = vld [vmem:[#allocation13_spill] sm:$0xff] }
 0x1bd   : > { %7287 = vmatpush3.bf16.msra.mxu1 %v9447_v60  ;;  %7258 = vmatprep.mubr.msk.bf16.mxu1 %vm3048_vm3, %v8372_v55  ;;  %v11143_v55 = vld [vmem:[#allocation48_spill] sm:$0xff]  ;;  %v6141_v60 = vld [vmem:[%s10723_s3 + $0xa] sm:$0x3] }
 0x1be   : > { %7320 = vmatprep.subr.bf16.mxu1 %v9557_v51  ;;  %7972 = vmatprep.subr.msk.bf16.mxu0 %vm700_vm0, %v6141_v60 }
 0x1c1   : > { %6871 = vmatmul.mubr.msk.bf16.gmra.mrb[24].mxu0 %vm651_vm2, %v9247_v28 }
 0x1c2   : > { %6874 = vmatprep.mubr.msk.bf16.mxu0 %vm651_vm2, %v9252_v13 }
 0x1c4   : > { %7259 = vmatmul.mubr.msk.bf16.gmra.mrb[20].mxu1 %vm3048_vm3, %v8401_v10  ;;  %v1880_v10 = vsel %vm700_vm0, %v6141_v60, 0  ;;  %v11155_v60 = vld [vmem:[#allocation41_spill] sm:$0xff] }
 0x1c5   : > { %7262 = vmatprep.mubr.msk.bf16.mxu1 %vm3048_vm3, %v8444_v7  ;;  %v11144_v7 = vld [vmem:[#allocation53_spill] sm:$0xff] }
 0x1c9   : > { %6875 = vmatmul.mubr.msk.bf16.gmra.mrb[28].mxu0 %vm651_vm2, %v9574_v53 }
 0x1ca   : > { %6880 = vmatprep.mubr.msk.bf16.mxu0 %vm651_vm2, %v11143_v55  ;;  %v10896_v55 = vunpack.c.l.bf16 %v9621_v19 }
 0x1cc   : > { %7263 = vmatmul.mubr.msk.bf16.gmra.mrb[24].mxu1 %vm3048_vm3, %v8452_v54  ;;  %v11146_v54 = vld [vmem:[#allocation59_spill] sm:$0xff] }
 0x1cd   : > { %7266 = vmatprep.mubr.msk.bf16.mxu1 %vm3048_vm3, %v8465_v46  ;;  %v11147_v46 = vld [vmem:[#allocation60_spill] sm:$0xff] }
 0x1d1   : > { %6881 = vmatmul.mubr.msk.bf16.vlgmr.msra.gmra.mrb[0].mxu0 %vm651_vm2, %v11144_v7  ;;  %v9690_v7 = vld [vmem:[%s9668_s10 + $0x10] sm:$0xff] }
 0x1d2   : > { %6913 = vmatpush3.bf16.msra.mxu0 %v1880_v10  ;;  %6884 = vmatprep.mubr.msk.bf16.mxu0 %vm651_vm2, %v11145_v26  ;;  %v11163_v26 = vld [vmem:[#allocation29_spill] sm:$0xff] }
 0x1d4   : > { %7267 = vmatmul.mubr.msk.bf16.gmra.mrb[28].mxu1 %vm3048_vm3, %v8476_v29  ;;  %v11151_v29 = vld [vmem:[#allocation33_spill] sm:$0xff] }
 0x1d5   : > { %7270 = vmatprep.mubr.msk.bf16.mxu1 %vm3048_vm3, %v8482_v16  ;;  %v11152_v16 = vld [vmem:[#allocation35_spill] sm:$0xff] }
 0x1d9   : > { %6885 = vmatmul.mubr.msk.bf16.gmra.mrb[4].mxu0 %vm651_vm2, %v11146_v54 }
 0x1da   : > { %6888 = vmatprep.mubr.msk.bf16.mxu0 %vm651_vm2, %v11147_v46 }
 0x1dc   : > { %7271 = vmatmul.mubr.msk.bf16.gmra.mrb[32].mxu1 %vm3048_vm3, %v8520_v30  ;;  %v10894_v30 = vunpack.c.h.bf16 %v9616_v40 }
 0x1dd   : > { %7274 = vmatprep.mubr.msk.bf16.mxu1 %vm3048_vm3, %v11148_v2  ;;  %v4911_v2 = vrot.slane %v10896_v55, 2  ;;  %v397_v55 = vld [vmem:[%s8157_s14 + $0xc8] sm:$0x1] }
 0x1de   : > { %v4909_v49 = vrot.slane %v10894_v30, 2 }
 0x1e0   : > { %v9637_v10 = vsel %vm1077_vm4, %v4908_v43, %v4909_v49  ;;  %v9644_v30 = vsel %vm1077_vm4, %v4909_v49, %v4911_v2  ;;  %v11157_v43 = vld [vmem:[#allocation19_spill] sm:$0xff] }
 0x1e1   : > { %6889 = vmatmul.mubr.msk.bf16.gmra.mrb[8].mxu0 %vm651_vm2, %v11149_v34  ;;  %v6159_v49 = vld [vmem:[%s10723_s3 + $0xc] sm:$0x3] }
 0x1e2   : > { %6892 = vmatprep.mubr.msk.bf16.mxu0 %vm651_vm2, %v11150_v52  ;;  %7973 = vmatprep.subr.msk.bf16.mxu0 %vm700_vm0, %v6159_v49  ;;  %v9674_v52 = vld [vmem:[%s9668_s10 + $0x8] sm:$0xff] }
 0x1e3   : > { %11160 = vst [vmem:[#allocation5_spill] sm:$0xff] %v9674_v52  ;;  %v5194_v54 = vsel %vm5192_vm5, %v9674_v52, 0.0  ;;  %v9698_v52 = vld [vmem:[%s9668_s10 + $0x18] sm:$0xff] }
 0x1e4   : > { %7275 = vmatmul.mubr.msk.bf16.gmra.mrb[36].mxu1 %vm3048_vm3, %v11151_v29  ;;  %v449_v29 = vunpack.c.l.bf16 %v9574_v53 }
 0x1e5   : > { %7278 = vmatprep.mubr.msk.bf16.mxu1 %vm3048_vm3, %v11152_v16  ;;  %v450_v16 = vunpack.c.h.bf16 %v9574_v53 }
 0x1e6   : > { %v1866_v5 = vrot.slane %v449_v29, 2 }
 0x1e9   : > { %6893 = vmatmul.mubr.msk.bf16.gmra.mrb[12].mxu0 %vm651_vm2, %v11153_v36  ;;  %v11158_v36 = vld [vmem:[#allocation28_spill] sm:$0xff] }
 0x1ea   : > { %6896 = vmatprep.mubr.msk.bf16.mxu0 %vm651_vm2, %v11154_v27  ;;  %v1867_v27 = vrot.slane %v450_v16, 2 }
 0x1ec   : > { %7279 = vmatmul.mubr.msk.bf16.gmra.mrb[40].mxu1 %vm3048_vm3, %v11155_v60  ;;  %v1868_v2 = vsel %vm1077_vm4, %v1866_v5, %v1867_v27  ;;  %v451_v60 = vunpack.c.l.bf16 %v397_v55  ;;  %v11161_v5 = vld [vmem:[#allocation21_spill] sm:$0xff]  ;;  %v11162_v55 = vld [vmem:[#allocation23_spill] sm:$0xff] }
 0x1ed   : > { %7282 = vmatprep.mubr.msk.bf16.mxu1 %vm3048_vm3, %v9173_v44  ;;  %v11156_v44 = vld [vmem:[#allocation16_spill] sm:$0xff] }
 0x1f1   : > { %6897 = vmatmul.mubr.msk.bf16.gmra.mrb[16].mxu0 %vm651_vm2, %v11156_v44  ;;  %v9671_v44 = vld [vmem:[%s9668_s10] sm:$0xff] }
 0x1f2   : > { %6900 = vmatprep.mubr.msk.bf16.mxu0 %vm651_vm2, %v11157_v43  ;;  %v1869_v43 = vrot.slane %v451_v60, 2  ;;  %11159 = vst [vmem:[#allocation4_spill] sm:$0xff] %v9671_v44  ;;  %v5193_v46 = vsel %vm5192_vm5, %v9671_v44, 0.0  ;;  %v11165_v44 = vld [vmem:[#allocation24_spill] sm:$0xff] }
 0x1f4   : > { %7283 = vmatmul.mubr.msk.bf16.gmra.mrb[44].mxu1 %vm3048_vm3, %v9616_v40 }
 0x1f5   : > { %7288 = vmatprep.mubr.msk.bf16.mxu1 %vm3048_vm3, %v11158_v36  ;;  %v1870_v36 = vsel %vm1077_vm4, %v1867_v27, %v1869_v43  ;;  %v11164_v27 = vld [vmem:[#allocation30_spill] sm:$0xff]  ;;  %v1657_v43 = vrot.slane %v449_v29, 1 }
 0x1f6   : > { %v9681_v34 = vpack.c.bf16 %v1870_v36, %v1868_v2  ;;  %v1658_v2 = vrot.slane %v450_v16, 1  ;;  %v1660_v36 = vrot.slane %v451_v60, 1  ;;  %v9711_v60 = vld [vmem:[%s9668_s10 + $0x20] sm:$0xff] }
 0x1f8   : > { %v1661_v29 = vsel %vm520_vm1, %v1658_v2, %v1660_v36  ;;  %v9731_v36 = vld [vmem:[%s9668_s10 + $0x30] sm:$0xff] }
 0x1f9   : > { %6901 = vmatmul.mubr.msk.bf16.gmra.mrb[20].mxu0 %vm651_vm2, %v11161_v5  ;;  %v5196_v5 = vsel %vm5192_vm5, %v9690_v7, 0.0 }
 0x1fa   : > { %6904 = vmatprep.mubr.msk.bf16.mxu0 %vm651_vm2, %v11162_v55  ;;  %v5195_v55 = vadd.f32 %v5194_v54, %v5193_v46  ;;  %v5198_v54 = vsel %vm5192_vm5, %v9698_v52, 0.0  ;;  %v11167_v46 = vld [vmem:[#allocation31_spill] sm:$0xff] }
 0x1fc   : > { %7289 = vmatmul.mubr.msk.bf16.vlgmr.msra.gmra.mrb[16].mxu1 %vm3048_vm3, %v11163_v26  ;;  %v11166_v26 = vld [vmem:[#allocation27_spill] sm:$0xff]  ;;  %v5197_v16 = vadd.f32 %v5196_v5, %v5195_v55 }
 0x1fd   : > { %7321 = vmatpush3.bf16.msra.mxu1 %v9557_v51  ;;  %7292 = vmatprep.mubr.msk.bf16.mxu1 %vm3048_vm3, %v11164_v27  ;;  %v1659_v51 = vsel %vm520_vm1, %v1657_v43, %v1658_v2  ;;  %v5200_v43 = vsel %vm5192_vm5, %v9711_v60, 0.0  ;;  %v9720_v2 = vld [vmem:[%s9668_s10 + $0x28] sm:$0xff] }
 0x1fe   : > { %v9715_v27 = vpack.c.bf16 %v1661_v29, %v1659_v51  ;;  %v5202_v55 = vsel %vm5192_vm5, %v9720_v2, 0.0  ;;  %v2082_v29 = vsel %vm700_vm0, %v6159_v49, 0 }
 0x200   : > { %11168 = vst [vmem:[#allocation6_spill] sm:$0xff] %v9715_v27 }
 0x201   : > { %6905 = vmatmul.mubr.msk.bf16.gmra.mrb[24].mxu0 %vm651_vm2, %v11165_v44  ;;  %v11181_v44 = vld [vmem:[#allocation44_spill] sm:$0xff] }
 0x202   : > { %6908 = vmatprep.mubr.msk.bf16.mxu0 %vm651_vm2, %v11166_v26  ;;  %v5199_v26 = vadd.f32 %v5198_v54, %v5197_v16  ;;  %v9744_v16 = vld [vmem:[%s9668_s10 + $0x38] sm:$0xff]  ;;  %v11170_v54 = vld [vmem:[#allocation71_spill] sm:$0xff] }
 0x203   : > { %v5206_v49 = vsel %vm5192_vm5, %v9744_v16, 0.0 }
 0x204   : > { %7293 = vmatmul.mubr.msk.bf16.gmra.mrb[20].mxu1 %vm3048_vm3, %v11167_v46  ;;  %v5201_v5 = vadd.f32 %v5200_v43, %v5199_v26  ;;  %v9741_v26 = vld [vmem:[%s10723_s3 + $0xe] sm:$0x3]  ;;  %v11171_v46 = vld [vmem:[#allocation37_spill] sm:$0xff]  ;;  %v9757_v43 = vld [vmem:[%s9668_s10 + $0x40] sm:$0xff] }
 0x205   : > { %7296 = vmatprep.mubr.msk.bf16.mxu1 %vm3048_vm3, %v8585_v39  ;;  %v11169_v39 = vld [vmem:[#allocation34_spill] sm:$0xff] }
 0x206   : > { %v5203_v51 = vadd.f32 %v5202_v55, %v5201_v5  ;;  %v11172_v5 = vld [vmem:[#allocation38_spill] sm:$0xff] }
 0x209   : > { %6909 = vmatmul.mubr.msk.bf16.gmra.mrb[28].mxu0 %vm651_vm2, %v9715_v27  ;;  %v9782_v27 = vld [vmem:[%s9668_s10 + $0x58] sm:$0xff] }
 0x20a   : > { %6914 = vmatprep.mubr.msk.bf16.mxu0 %vm651_vm2, %v9281_v1  ;;  %v5204_v1 = vsel %vm5192_vm5, %v9731_v36, 0.0  ;;  %11178 = vst [vmem:[#allocation8_spill] sm:$0xff] %v9782_v27 }
 0x20c   : > { %7297 = vmatmul.mubr.msk.bf16.gmra.mrb[24].mxu1 %vm3048_vm3, %v11169_v39  ;;  %v5208_v39 = vsel %vm5192_vm5, %v9757_v43, 0.0 }
 0x20d   : > { %7300 = vmatprep.mubr.msk.bf16.mxu1 %vm3048_vm3, %v11069_v15  ;;  %v5205_v15 = vadd.f32 %v5204_v1, %v5203_v51  ;;  %v9764_v51 = vld [vmem:[%s9668_s10 + $0x48] sm:$0xff]  ;;  %v11174_v1 = vld [vmem:[#allocation73_spill] sm:$0xff] }
 0x20f   : > { %v5207_v55 = vadd.f32 %v5206_v49, %v5205_v15  ;;  %v9775_v15 = vld [vmem:[%s9668_s10 + $0x50] sm:$0xff]  ;;  %v11177_v49 = vld [vmem:[#allocation42_spill] sm:$0xff] }
 0x210   : > { %11176 = vst [vmem:[#allocation7_spill] sm:$0xff] %v9775_v15 }
 0x211   : > { %6915 = vmatmul.mubr.msk.bf16.vlgmr.msra.gmra.mrb[0].mxu0 %vm651_vm2, %v9304_v42  ;;  %v11175_v42 = vld [vmem:[#allocation40_spill] sm:$0xff] }
 0x212   : > { %6947 = vmatpush3.bf16.msra.mxu0 %v2082_v29  ;;  %6918 = vmatprep.mubr.msk.bf16.mxu0 %vm651_vm2, %v11170_v54  ;;  %v11173_v29 = vld [vmem:[#allocation72_spill] sm:$0xff]  ;;  %v5209_v54 = vadd.f32 %v5208_v39, %v5207_v55  ;;  %v11180_v55 = vld [vmem:[#allocation75_spill] sm:$0xff] }
 0x213   : > { %7974 = vmatprep.subr.msk.bf16.mxu0 %vm700_vm0, %v9741_v26 }
 0x214   : > { %7301 = vmatmul.mubr.msk.bf16.gmra.mrb[28].mxu1 %vm3048_vm3, %v11171_v46  ;;  %v5210_v46 = vsel %vm5192_vm5, %v9764_v51, 0.0 }
 0x215   : > { %7304 = vmatprep.mubr.msk.bf16.mxu1 %vm3048_vm3, %v11172_v5  ;;  %v5211_v5 = vadd.f32 %v5210_v46, %v5209_v54  ;;  %v9793_v54 = vld [vmem:[%s9668_s10 + $0x60] sm:$0xff] }
 0x219   : > { %6919 = vmatmul.mubr.msk.bf16.gmra.mrb[4].mxu0 %vm651_vm2, %v11173_v29  ;;  %v5212_v29 = vsel %vm5192_vm5, %v9775_v15, 0.0 }
 0x21a   : > { %6922 = vmatprep.mubr.msk.bf16.mxu0 %vm651_vm2, %v11174_v1  ;;  %v11179_v1 = vld [vmem:[#allocation74_spill] sm:$0xff]  ;;  %v5213_v39 = vadd.f32 %v5212_v29, %v5211_v5  ;;  %v11182_v29 = vunpack.c.l.bf16 %v9616_v40 }
 0x21c   : > { %7305 = vmatmul.mubr.msk.bf16.gmra.mrb[32].mxu1 %vm3048_vm3, %v11175_v42  ;;  %v5214_v42 = vsel %vm5192_vm5, %v9782_v27, 0.0  ;;  %v4695_v5 = vrot.slane %v11182_v29, 1  ;;  %v9826_v29 = vld [vmem:[%s9668_s10 + $0x78] sm:$0xff] }
 0x21d   : > { %7308 = vmatprep.mubr.msk.bf16.mxu1 %vm3048_vm3, %v11177_v49  ;;  %v5215_v46 = vadd.f32 %v5214_v42, %v5213_v39  ;;  %v5216_v49 = vsel %vm5192_vm5, %v9793_v54, 0.0  ;;  %v9817_v42 = vld [vmem:[%s9668_s10 + $0x70] sm:$0xff] }
 0x221   : > { %6923 = vmatmul.mubr.msk.bf16.gmra.mrb[8].mxu0 %vm651_vm2, %v11179_v1  ;;  %v9800_v1 = vld [vmem:[%s9668_s10 + $0x68] sm:$0xff] }
 0x222   : > { %6926 = vmatprep.mubr.msk.bf16.mxu0 %vm651_vm2, %v11180_v55  ;;  %v11183_v55 = vunpack.c.h.bf16 %v9616_v40  ;;  %v5218_v39 = vsel %vm5192_vm5, %v9800_v1, 0.0 }
 0x224   : > { %7309 = vmatmul.mubr.msk.bf16.gmra.mrb[36].mxu1 %vm3048_vm3, %v11181_v44  ;;  %v4696_v27 = vrot.slane %v11183_v55, 1  ;;  %v11184_v44 = vunpack.c.l.bf16 %v9621_v19 }
 0x225   : > { %7312 = vmatprep.mubr.msk.bf16.mxu1 %vm3048_vm3, %v8820_v35  ;;  %v5217_v35 = vadd.f32 %v5216_v49, %v5215_v46  ;;  %v5220_v46 = vsel %vm5192_vm5, %v9817_v42, 0.0 }
 0x226   : > { %v4698_v15 = vrot.slane %v11184_v44, 1  ;;  %v4697_v40 = vsel %vm520_vm1, %v4695_v5, %v4696_v27  ;;  %v9843_v44 = vld [vmem:[%s9668_s10 + $0x88] sm:$0xff] }
 0x227   : > { %v5219_v55 = vadd.f32 %v5218_v39, %v5217_v35  ;;  %v11185_v35 = vld [vmem:[#allocation2_spill] sm:$0xff]  ;;  %v11186_v39 = vld [vmem:[#allocation3_spill] sm:$0xff] }
 0x228   : > { %v4699_v19 = vsel %vm520_vm1, %v4696_v27, %v4698_v15  ;;  %v9836_v27 = vld [vmem:[%s9668_s10 + $0x80] sm:$0xff] }
 0x229   : > { %6927 = vmatmul.mubr.msk.bf16.gmra.mrb[12].mxu0 %vm651_vm2, %v9394_v31  ;;  %v4702_v49 = vpack.c.bf16 %v4699_v19, %v4697_v40  ;;  %v5224_v5 = vsel %vm5192_vm5, %v9836_v27, 0.0  ;;  %v5226_v19 = vsel %vm5192_vm5, %v9843_v44, 0.0 }
 0x22a   : > { %6930 = vmatprep.mubr.msk.bf16.mxu0 %vm651_vm2, %v9402_v0 }
 0x22c   : > { %7313 = vmatmul.mubr.msk.bf16.gmra.mrb[40].mxu1 %vm3048_vm3, %v8832_v18  ;;  %v5221_v18 = vadd.f32 %v5220_v46, %v5219_v55  ;;  %v11187_v55 = vld [vmem:[#allocation39_spill] sm:$0xff] }
 0x22d   : > { %7316 = vmatprep.mubr.msk.bf16.mxu1 %vm3048_vm3, %v9406_v38  ;;  %v5222_v38 = vsel %vm5192_vm5, %v9826_v29, 0.0 }
 0x22e   : > { %v5223_v15 = vadd.f32 %v5222_v38, %v5221_v18  ;;  %v9861_v18 = vld [vmem:[%s9668_s10 + $0x98] sm:$0xff] }
 0x230   : > { %v5225_v40 = vadd.f32 %v5224_v5, %v5223_v15  ;;  %v5230_v15 = vsel %vm5192_vm5, %v9861_v18, 0.0 }
 0x231   : > { %6931 = vmatmul.mubr.msk.bf16.gmra.mrb[16].mxu0 %vm651_vm2, %v9428_v25 }
 0x232   : > { %6934 = vmatprep.mubr.msk.bf16.mxu0 %vm651_vm2, %v9432_v57  ;;  %v5227_v46 = vadd.f32 %v5226_v19, %v5225_v40  ;;  %v9879_v19 = vld [vmem:[%s9668_s10 + $0xa8] sm:$0xff] }
 0x234   : > { %7317 = vmatmul.mubr.msk.bf16.gmra.mrb[44].mxu1 %vm3048_vm3, %v4702_v49 }
 0x235   : > { %7322 = vmatprep.mubr.msk.bf16.mxu1 %vm3048_vm3, %v8667_v17  ;;  %v9854_v17 = vld [vmem:[%s9668_s10 + $0x90] sm:$0xff] }
 0x236   : > { %v5228_v49 = vsel %vm5192_vm5, %v9854_v17, 0.0 }
 0x237   : > { %v5229_v38 = vadd.f32 %v5228_v49, %v5227_v46  ;;  %v2294_v49 = vsel %vm700_vm0, %v9741_v26, 0  ;;  %v9917_v26 = vld [vmem:[%s9668_s10 + $0xc0] sm:$0xff] }
 0x239   : > { %6935 = vmatmul.mubr.msk.bf16.gmra.mrb[20].mxu0 %vm651_vm2, %v11185_v35  ;;  %v5231_v5 = vadd.f32 %v5230_v15, %v5229_v38  ;;  %v9901_v38 = vld [vmem:[%s10723_s3 + $0x10] sm:$0x3]  ;;  %v9904_v15 = vld [vmem:[%s9668_s10 + $0xb8] sm:$0xff] }
 0x23a   : > { %6938 = vmatprep.mubr.msk.bf16.mxu0 %vm651_vm2, %v11186_v39 }
 0x23c   : > { %7323 = vmatmul.mubr.msk.bf16.vlgmr.msra.gmra.mrb[16].mxu1 %vm3048_vm3, %v11187_v55 }
 0x23d   : > { %7326 = vmatprep.mubr.msk.bf16.mxu1 %vm3048_vm3, %v8698_v12  ;;  %v9872_v12 = vld [vmem:[%s9668_s10 + $0xa0] sm:$0xff] }
 0x23e   : > { %v5232_v40 = vsel %vm5192_vm5, %v9872_v12, 0.0 }
 0x23f   : > { %v5233_v55 = vadd.f32 %v5232_v40, %v5231_v5  ;;  %v9924_v5 = vld [vmem:[%s9668_s10 + $0xc8] sm:$0xff] }
 0x241   : > { %6939 = vmatmul.mubr.msk.bf16.gmra.mrb[24].mxu0 %vm651_vm2, %v9489_v6 }
 0x242   : > { %6942 = vmatprep.mubr.msk.bf16.mxu0 %vm651_vm2, %v9495_v21 }
 0x244   : > { %7327 = vmatmul.mubr.msk.bf16.gmra.mrb[20].mxu1 %vm3048_vm3, %v8705_v11  ;;  %v5234_v11 = vsel %vm5192_vm5, %v9879_v19, 0.0 }
 0x245   : > { %7330 = vmatprep.mubr.msk.bf16.mxu1 %vm3048_vm3, %v8719_v4  ;;  %v9890_v4 = vld [vmem:[%s9668_s10 + $0xb0] sm:$0xff]  ;;  %v5235_v46 = vadd.f32 %v5234_v11, %v5233_v55  ;;  %v9942_v11 = vld [vmem:[%s9668_s10 + $0xd8] sm:$0xff] }
 0x249   : > { %6943 = vmatmul.mubr.msk.bf16.gmra.mrb[28].mxu0 %vm651_vm2, %v9681_v34 }
 0x24a   : > { %6948 = vmatprep.mubr.msk.bf16.mxu0 %vm651_vm2, %v8961_v58  ;;  %v5236_v58 = vsel %vm5192_vm5, %v9890_v4, 0.0 }
 0x24c   : > { %7331 = vmatmul.mubr.msk.bf16.gmra.mrb[24].mxu1 %vm3048_vm3, %v8728_v3  ;;  %v5237_v3 = vadd.f32 %v5236_v58, %v5235_v46 }
 0x24d   : > { %7334 = vmatprep.mubr.msk.bf16.mxu1 %vm3048_vm3, %v8736_v33  ;;  %v5238_v33 = vsel %vm5192_vm5, %v9904_v15, 0.0 }
 0x251   : > { %6949 = vmatmul.mubr.msk.bf16.vlgmr.msra.gmra.mrb[0].mxu0 %vm651_vm2, %v8971_v22  ;;  %v5239_v22 = vadd.f32 %v5238_v33, %v5237_v3  ;;  %v9978_v3 = vld [vmem:[%s9668_s10 + $0xf8] sm:$0xff] }
 0x252   : > { %6981 = vmatpush3.bf16.msra.mxu0 %v2294_v49  ;;  %6952 = vmatprep.mubr.msk.bf16.mxu0 %vm651_vm2, %v9011_v23  ;;  %v5240_v23 = vsel %vm5192_vm5, %v9917_v26, 0.0  ;;  %v9960_v49 = vld [vmem:[%s9668_s10 + $0xe8] sm:$0xff] }
 0x253   : > { %7975 = vmatprep.subr.msk.bf16.mxu0 %vm700_vm0, %v9901_v38  ;;  %v5241_v40 = vadd.f32 %v5240_v23, %v5239_v22  ;;  %v11189_v23 = vld [vmem:[#allocation53_spill] sm:$0xff] }
 0x254   : > { %7335 = vmatmul.mubr.msk.bf16.gmra.mrb[28].mxu1 %vm3048_vm3, %v8760_v14  ;;  %v5242_v14 = vsel %vm5192_vm5, %v9924_v5, 0.0 }
 0x255   : > { %7338 = vmatprep.mubr.msk.bf16.mxu1 %vm3048_vm3, %v8771_v24  ;;  %v9935_v24 = vld [vmem:[%s9668_s10 + $0xd0] sm:$0xff]  ;;  %v5243_v55 = vadd.f32 %v5242_v14, %v5241_v40  ;;  %v11190_v40 = vld [vmem:[#allocation55_spill] sm:$0xff] }
 0x256   : > { %v11191_v14 = vld [vmem:[#allocation59_spill] sm:$0xff] }
 0x259   : > { %6953 = vmatmul.mubr.msk.bf16.gmra.mrb[4].mxu0 %vm651_vm2, %v9026_v56  ;;  %v5244_v56 = vsel %vm5192_vm5, %v9935_v24, 0.0 }
 0x25a   : > { %6956 = vmatprep.mubr.msk.bf16.mxu0 %vm651_vm2, %v9076_v59  ;;  %v5245_v59 = vadd.f32 %v5244_v56, %v5243_v55  ;;  %v11192_v55 = vld [vmem:[#allocation4_spill] sm:$0xff] }
 0x25c   : > { %7339 = vmatmul.mubr.msk.bf16.gmra.mrb[32].mxu1 %vm3048_vm3, %v8778_v9  ;;  %v5246_v9 = vsel %vm5192_vm5, %v9942_v11, 0.0 }
 0x25d   : > { %7342 = vmatprep.mubr.msk.bf16.mxu1 %vm3048_vm3, %v11137_v8  ;;  %v9953_v8 = vld [vmem:[%s9668_s10 + $0xe0] sm:$0xff]  ;;  %v5247_v46 = vadd.f32 %v5246_v9, %v5245_v59  ;;  %v11193_v59 = vld [vmem:[#allocation5_spill] sm:$0xff] }
 0x261   : > { %6957 = vmatmul.mubr.msk.bf16.gmra.mrb[8].mxu0 %vm651_vm2, %v9087_v61  ;;  %v5248_v61 = vsel %vm5192_vm5, %v9953_v8, 0.0 }
 0x262   : > { %6960 = vmatprep.mubr.msk.bf16.mxu0 %vm651_vm2, %v9192_v62  ;;  %v5249_v62 = vadd.f32 %v5248_v61, %v5247_v46  ;;  %v11194_v46 = vld [vmem:[#allocation60_spill] sm:$0xff]  ;;  %v11195_v61 = vld [vmem:[#allocation65_spill] sm:$0xff] }
 0x264   : > { %7343 = vmatmul.mubr.msk.bf16.gmra.mrb[36].mxu1 %vm3048_vm3, %v11138_v37  ;;  %v5250_v37 = vsel %vm5192_vm5, %v9960_v49, 0.0 }
 0x265   : > { %7346 = vmatprep.mubr.msk.bf16.mxu1 %vm3048_vm3, %v11139_v47  ;;  %v9971_v47 = vld [vmem:[%s9668_s10 + $0xf0] sm:$0xff]  ;;  %v5251_v58 = vadd.f32 %v5250_v37, %v5249_v62 }
 0x269   : > { %6961 = vmatmul.mubr.msk.bf16.gmra.mrb[12].mxu0 %vm651_vm2, %v9197_v48  ;;  %v5252_v48 = vsel %vm5192_vm5, %v9971_v47, 0.0 }
 0x26a   : > { %6964 = vmatprep.mubr.msk.bf16.mxu0 %vm651_vm2, %v9212_v63  ;;  %v5253_v63 = vadd.f32 %v5252_v48, %v5251_v58 }
 0x26c   : > { %7347 = vmatmul.mubr.msk.bf16.gmra.mrb[40].mxu1 %vm3048_vm3, %v11140_v50  ;;  %v5254_v50 = vsel %vm5192_vm5, %v9978_v3, 0.0 }
 0x26d   : > { %7350 = vmatprep.mubr.msk.bf16.mxu1 %vm3048_vm3, %v9205_v32  ;;  %v11188_v32 = vpack.c.bf16 %v9644_v30, %v9637_v10  ;;  %v5255_v33 = vadd.f32 %v5254_v50, %v5253_v63 }
 0x271   : > { %6965 = vmatmul.mubr.msk.bf16.gmra.mrb[16].mxu0 %vm651_vm2, %v9217_v20  ;;  %v5256_v20 = vrot.slane %v5255_v33, 4 }
 0x272   : > { %6968 = vmatprep.mubr.msk.bf16.mxu0 %vm651_vm2, %v9231_v41  ;;  %v9999_v41 = vld [vmem:[%s8157_s14 + $0xcc] sm:$0xff]  }
 0x273   : > { %v5257_v22 = vadd.f32 %v5256_v20, %v5255_v33  ;;  %v11197_v33 = vld [vmem:[#allocation11_spill] sm:$0xff] }
 0x274   : > { %7351 = vmatmul.mubr.msk.bf16.gmra.mrb[44].mxu1 %vm3048_vm3, %v11188_v32  ;;  %v11196_v32 = vld [vmem:[#allocation66_spill] sm:$0xff] }
 0x275   : > { %v5258_v30 = vrot.slane %v5257_v22, 2 }
 0x277   : > { %v5259_v10 = vadd.f32 %v5258_v30, %v5257_v22 }
 0x279   : > { %6969 = vmatmul.mubr.msk.bf16.gmra.mrb[20].mxu0 %vm651_vm2, %v9237_v45  ;;  %v5260_v45 = vrot.slane %v5259_v10, 1 }
 0x27a   : > { %6972 = vmatprep.mubr.msk.bf16.mxu0 %vm651_vm2, %v9247_v28 }
 0x27b   : > { %v5261_v28 = vadd.f32 %v5260_v45, %v5259_v10 }
 0x281   : > { %6973 = vmatmul.mubr.msk.bf16.gmra.mrb[24].mxu0 %vm651_vm2, %v9252_v13  ;;  %v2503_v13 = vsel %vm700_vm0, %v9901_v38, 0 }
 0x282   : > { %6976 = vmatprep.mubr.msk.bf16.mxu0 %vm651_vm2, %v9574_v53  ;;  %v10011_v53 = vmul.f32 0.00390625, %v5261_v28  ;;  %v11198_v28 = vld [vmem:[#allocation13_spill] sm:$0xff] }
 0x284   : > { %v10015_v56 = vsub.f32 %v11192_v55, %v10011_v53  ;;  %v10019_v9 = vsub.f32 %v11193_v59, %v10011_v53  ;;  %v10027_v38 = vsub.f32 %v9690_v7, %v10011_v53  ;;  %v10035_v58 = vsub.f32 %v9698_v52, %v10011_v53 }
 0x285   : > { %v10047_v20 = vsub.f32 %v9711_v60, %v10011_v53  ;;  %v10054_v10 = vsub.f32 %v9720_v2, %v10011_v53  ;;  %v10072_v59 = vsub.f32 %v9744_v16, %v10011_v53 }
 0x286   : > { %v5296_v62 = vmul.f32 %v10015_v56, %v10015_v56  ;;  %v5297_v37 = vmul.f32 %v10019_v9, %v10019_v9  ;;  %v5298_v48 = vmul.f32 %v10027_v38, %v10027_v38  ;;  %v5299_v52 = vmul.f32 %v10035_v58, %v10035_v58 }
 0x287   : > { %v5301_v2 = vmul.f32 %v10054_v10, %v10054_v10  ;;  %v5303_v16 = vmul.f32 %v10072_v59, %v10072_v59 }
 0x288   : > { %v5328_v63 = vsel %vm5192_vm5, %v5296_v62, 0.0  ;;  %v5329_v50 = vsel %vm5192_vm5, %v5297_v37, 0.0  ;;  %v5331_v22 = vsel %vm5192_vm5, %v5298_v48, 0.0  ;;  %v5333_v45 = vsel %vm5192_vm5, %v5299_v52, 0.0  ;;  %v11200_v62 = vld [vmem:[#allocation19_spill] sm:$0xff]  ;;  %v11201_v37 = vld [vmem:[#allocation21_spill] sm:$0xff] }
 0x289   : > { %6977 = vmatmul.mubr.msk.bf16.gmra.mrb[28].mxu0 %vm651_vm2, %v9999_v41  ;;  %v5330_v7 = vadd.f32 %v5329_v50, %v5328_v63  ;;  %v10083_v48 = vsub.f32 %v9757_v43, %v10011_v53  ;;  %v11202_v52 = vld [vmem:[#allocation23_spill] sm:$0xff] }
 0x28a   : > { %6982 = vmatprep.mubr.msk.bf16.mxu0 %vm651_vm2, %v11189_v23  ;;  %v5300_v23 = vmul.f32 %v10047_v20, %v10047_v20 }
 0x28b   : > { %v5332_v30 = vadd.f32 %v5331_v22, %v5330_v7  ;;  %v5304_v7 = vmul.f32 %v10083_v48, %v10083_v48  ;;  %v11203_v22 = vld [vmem:[#allocation24_spill] sm:$0xff] }
 0x28d   : > { %v5334_v60 = vadd.f32 %v5333_v45, %v5332_v30  ;;  %v11204_v30 = vld [vmem:[#allocation7_spill] sm:$0xff]  ;;  %v5343_v45 = vsel %vm5192_vm5, %v5304_v7, 0.0 }
 0x291   : > { %6983 = vmatmul.mubr.msk.bf16.vlgmr.msra.gmra.mrb[0].mxu0 %vm651_vm2, %v11190_v40  ;;  %v11199_v40 = vld [vmem:[#allocation16_spill] sm:$0xff] }
 0x292   : > { %6986 = vmatprep.mubr.msk.bf16.mxu0 %vm651_vm2, %v11191_v14  ;;  %7015 = vmatpush3.bf16.msra.mxu0 %v2503_v13  ;;  %v10065_v13 = vsub.f32 %v9731_v36, %v10011_v53  ;;  %v5335_v14 = vsel %vm5192_vm5, %v5300_v23, 0.0  ;;  %v10101_v23 = vsub.f32 %v11204_v30, %v10011_v53 }
 0x293   : > { %v5336_v55 = vadd.f32 %v5335_v14, %v5334_v60  ;;  %v453_v60 = vunpack.c.h.bf16 %v9999_v41 }
 0x299   : > { %6987 = vmatmul.mubr.msk.bf16.gmra.mrb[4].mxu0 %vm651_vm2, %v11194_v46  ;;  %v5302_v46 = vmul.f32 %v10065_v13, %v10065_v13 }
 0x29a   : > { %6990 = vmatprep.mubr.msk.bf16.mxu0 %vm651_vm2, %v11195_v61  ;;  %v5337_v61 = vsel %vm5192_vm5, %v5301_v2, 0.0  ;;  %v11205_v2 = vld [vmem:[#allocation8_spill] sm:$0xff] }
 0x29b   : > { %v5338_v36 = vadd.f32 %v5337_v61, %v5336_v55  ;;  %v5339_v63 = vsel %vm5192_vm5, %v5302_v46, 0.0  ;;  %v10110_v14 = vsub.f32 %v11205_v2, %v10011_v53  ;;  %v5306_v55 = vmul.f32 %v10101_v23, %v10101_v23  ;;  %v10116_v61 = vld [vmem:[%s8157_s14 + $0xd4] sm:$0x1] }
 0x29d   : > { %v5340_v50 = vadd.f32 %v5339_v63, %v5338_v36  ;;  %v2281_v36 = vrot.slane %v453_v60, 1 }
 0x2a1   : > { %6991 = vmatmul.mubr.msk.bf16.gmra.mrb[8].mxu0 %vm651_vm2, %v11196_v32  ;;  %v10090_v32 = vsub.f32 %v9764_v51, %v10011_v53 }
 0x2a2   : > { %6994 = vmatprep.mubr.msk.bf16.mxu0 %vm651_vm2, %v11197_v33  ;;  %v5341_v33 = vsel %vm5192_vm5, %v5303_v16, 0.0  ;;  %v11206_v16 = vld [vmem:[#allocation27_spill] sm:$0xff] }
 0x2a3   : > { %v5342_v43 = vadd.f32 %v5341_v33, %v5340_v50  ;;  %v5305_v51 = vmul.f32 %v10090_v32, %v10090_v32  ;;  %v11207_v50 = vld [vmem:[#allocation6_spill] sm:$0xff]  ;;  %v10131_v33 = vsub.f32 %v9793_v54, %v10011_v53 }
 0x2a5   : > { %v5345_v46 = vsel %vm5192_vm5, %v5305_v51, 0.0  ;;  %v5308_v2 = vmul.f32 %v10131_v33, %v10131_v33 }
 0x2a9   : > { %6995 = vmatmul.mubr.msk.bf16.gmra.mrb[12].mxu0 %vm651_vm2, %v11198_v28  ;;  %v452_v28 = vunpack.c.l.bf16 %v9999_v41 }
 0x2aa   : > { %6998 = vmatprep.mubr.msk.bf16.mxu0 %vm651_vm2, %v11199_v40  ;;  %v5344_v40 = vadd.f32 %v5343_v45, %v5342_v43  ;;  %v5347_v43 = vsel %vm5192_vm5, %v5306_v55, 0.0  ;;  %v10150_v55 = vsub.f32 %v9817_v42, %v10011_v53  ;;  %v5672_v42 = vld [vmem:[%s10727_s7] sm:$0xf] }
 0x2ab   : > { %7976 = vmatprep.subr.msk.bf16.mxu0 %vm5721_vm6, %v5672_v42 }
 0x2ac   : > { %v5346_v63 = vadd.f32 %v5345_v46, %v5344_v40  ;;  %v10140_v40 = vsub.f32 %v9800_v1, %v10011_v53  ;;  %v5351_v1 = vsel %vm5192_vm5, %v5308_v2, 0.0 }
 0x2ae   : > { %v5348_v45 = vadd.f32 %v5347_v43, %v5346_v63  ;;  %v10157_v63 = vsub.f32 %v9826_v29, %v10011_v53  ;;  %v11209_v43 = vld [vmem:[#allocation71_spill] sm:$0xff]  ;;  %v10171_v29 = vsub.f32 %v9836_v27, %v10011_v53 }
 0x2b1   : > { %6999 = vmatmul.mubr.msk.bf16.gmra.mrb[16].mxu0 %vm651_vm2, %v11200_v62  ;;  %v2280_v62 = vrot.slane %v452_v28, 1 }
 0x2b2   : > { %7002 = vmatprep.mubr.msk.bf16.mxu0 %vm651_vm2, %v11201_v37  ;;  %v454_v37 = vunpack.c.l.bf16 %v10116_v61 }
 0x2b4   : > { %v2283_v7 = vrot.slane %v454_v37, 1  ;;  %v2492_v41 = vrot.slane %v454_v37, 2 }
 0x2b6   : > { %v2284_v30 = vsel %vm520_vm1, %v2281_v36, %v2283_v7 }
 0x2b9   : > { %7003 = vmatmul.mubr.msk.bf16.gmra.mrb[20].mxu0 %vm651_vm2, %v11202_v52  ;;  %v5307_v52 = vmul.f32 %v10110_v14, %v10110_v14 }
 0x2ba   : > { %7006 = vmatprep.mubr.msk.bf16.mxu0 %vm651_vm2, %v11203_v22  ;;  %v2282_v22 = vsel %vm520_vm1, %v2280_v62, %v2281_v36  ;;  %v5309_v62 = vmul.f32 %v10140_v40, %v10140_v40 }
 0x2bb   : > { %v2287_v51 = vpack.c.bf16 %v2284_v30, %v2282_v22  ;;  %v5349_v54 = vsel %vm5192_vm5, %v5307_v52, 0.0  ;;  %v5723_v52 = vsel %vm5721_vm6, %v5672_v42, 0  ;;  %v11210_v30 = vld [vmem:[#allocation72_spill] sm:$0xff]  ;;  %v10196_v42 = vsub.f32 %v9861_v18, %v10011_v53 }
 0x2bc   : > { %v5350_v46 = vadd.f32 %v5349_v54, %v5348_v45  ;;  %v5353_v7 = vsel %vm5192_vm5, %v5309_v62, 0.0  ;;  %v10178_v54 = vsub.f32 %v9843_v44, %v10011_v53  ;;  %v11211_v62 = vld [vmem:[#allocation73_spill] sm:$0xff] }
 0x2bd   : > { %v5315_v18 = vmul.f32 %v10196_v42, %v10196_v42 }
 0x2be   : > { %v5352_v36 = vadd.f32 %v5351_v1, %v5350_v46  ;;  %v5312_v46 = vmul.f32 %v10171_v29, %v10171_v29  ;;  %v11212_v1 = vld [vmem:[#allocation74_spill] sm:$0xff]  ;;  %v5313_v44 = vmul.f32 %v10178_v54, %v10178_v54 }
 0x2c0   : > { %v5354_v22 = vadd.f32 %v5353_v7, %v5352_v36  ;;  %v10189_v36 = vsub.f32 %v9854_v17, %v10011_v53 }
 0x2c1   : > { %7007 = vmatmul.mubr.msk.bf16.gmra.mrb[24].mxu0 %vm651_vm2, %v11206_v16  ;;  %v11208_v16 = vld [vmem:[#allocation36_spill] sm:$0xff] }
 0x2c2   : > { %7010 = vmatprep.mubr.msk.bf16.mxu0 %vm651_vm2, %v11207_v50  ;;  %v5310_v50 = vmul.f32 %v10150_v55, %v10150_v55 }
 0x2c4   : > { %v5355_v45 = vsel %vm5192_vm5, %v5310_v50, 0.0  ;;  %v5359_v50 = vsel %vm5192_vm5, %v5312_v46, 0.0 }
 0x2c5   : > { %v5356_v2 = vadd.f32 %v5355_v45, %v5354_v22  ;;  %v11213_v22 = vld [vmem:[#allocation75_spill] sm:$0xff] }
 0x2c9   : > { %7011 = vmatmul.mubr.msk.bf16.gmra.mrb[28].mxu0 %vm651_vm2, %v2287_v51  ;;  %v5311_v51 = vmul.f32 %v10157_v63, %v10157_v63 }
 0x2ca   : > { %7016 = vmatprep.mubr.msk.bf16.mxu0 %vm651_vm2, %v11208_v16 }
 0x2cb   : > { %v5357_v16 = vsel %vm5192_vm5, %v5311_v51, 0.0 }
 0x2cc   : > { %v5358_v27 = vadd.f32 %v5357_v16, %v5356_v2  ;;  %v10214_v2 = vsub.f32 %v9879_v19, %v10011_v53  ;;  %v5365_v16 = vsel %vm5192_vm5, %v5315_v18, 0.0  ;;  %v10268_v18 = vsub.f32 %v9942_v11, %v10011_v53 }
 0x2ce   : > { %v5360_v7 = vadd.f32 %v5359_v50, %v5358_v27  ;;  %v5317_v19 = vmul.f32 %v10214_v2, %v10214_v2  ;;  %11219 = vst [vmem:[#allocation17_spill] sm:$0xff] %v10268_v18  ;;  %v5323_v11 = vmul.f32 %v10268_v18, %v10268_v18 }
 0x2d1   : > { %7017 = vmatmul.mubr.msk.bf16.vlgmr.msra.gmra.mrb[0].mxu0 %vm651_vm2, %v11209_v43  ;;  %v5361_v43 = vsel %vm5192_vm5, %v5313_v44, 0.0  ;;  %v5369_v44 = vsel %vm5192_vm5, %v5317_v19, 0.0 }
 0x2d2   : > { %7355 = vmatpush3.bf16.msra.mxu0 %v5723_v52  ;;  %7020 = vmatprep.mubr.msk.bf16.mxu0 %vm651_vm2, %v11210_v30  ;;  %v5314_v52 = vmul.f32 %v10189_v36, %v10189_v36  ;;  %v5362_v17 = vadd.f32 %v5361_v43, %v5360_v7  ;;  %v10207_v30 = vsub.f32 %v9872_v12, %v10011_v53 }
 0x2d3   : > { %v10225_v12 = vsub.f32 %v9890_v4, %v10011_v53  ;;  %v10243_v4 = vsub.f32 %v9917_v26, %v10011_v53  ;;  %v10261_v26 = vsub.f32 %v9935_v24, %v10011_v53  ;;  %v2490_v24 = vrot.slane %v453_v60, 2 }
 0x2d4   : > { %v5363_v51 = vsel %vm5192_vm5, %v5314_v52, 0.0  ;;  %v5316_v46 = vmul.f32 %v10207_v30, %v10207_v30  ;;  %v10250_v52 = vsub.f32 %v9924_v5, %v10011_v53 }
 0x2d5   : > { %v5364_v45 = vadd.f32 %v5363_v51, %v5362_v17  ;;  %11214 = vst [vmem:[#allocation9_spill] sm:$0xff] %v10225_v12  ;;  %11216 = vst [vmem:[#allocation12_spill] sm:$0xff] %v10243_v4 }
 0x2d6   : > { %11217 = vst [vmem:[#allocation14_spill] sm:$0xff] %v10250_v52  ;;  %11218 = vst [vmem:[#allocation15_spill] sm:$0xff] %v10261_v26  ;;  %v5321_v5 = vmul.f32 %v10250_v52, %v10250_v52 }
 0x2d8   : > { %v5377_v51 = vsel %vm5192_vm5, %v5321_v5, 0.0 }
 0x2d9   : > { %7021 = vmatmul.mubr.msk.bf16.gmra.mrb[4].mxu0 %vm651_vm2, %v11211_v62  ;;  %v5367_v62 = vsel %vm5192_vm5, %v5316_v46, 0.0  ;;  %v10281_v46 = vsub.f32 %v9953_v8, %v10011_v53  ;;  %v10294_v8 = vsub.f32 %v9960_v49, %v10011_v53  ;;  %v10310_v49 = vld [vmem:[%s10726_s6] ss:$0 sm:$0xff] }
 0x2da   : > { %7024 = vmatprep.mubr.msk.bf16.mxu0 %vm651_vm2, %v11212_v1  ;;  %v10232_v1 = vsub.f32 %v9904_v15, %v10011_v53 }
 0x2db   : > { %v5324_v19 = vmul.f32 %v10281_v46, %v10281_v46  ;;  %v5325_v61 = vmul.f32 %v10294_v8, %v10294_v8 }
 0x2dc   : > { %11215 = vst [vmem:[#allocation10_spill] sm:$0xff] %v10232_v1  ;;  %v5319_v15 = vmul.f32 %v10232_v1, %v10232_v1 }
 0x2dd   : > { %v5383_v37 = vsel %vm5192_vm5, %v5324_v19, 0.0 }
 0x2de   : > { %v5373_v43 = vsel %vm5192_vm5, %v5319_v15, 0.0 }
 0x2e1   : > { %7025 = vmatmul.mubr.msk.bf16.gmra.mrb[8].mxu0 %vm651_vm2, %v11213_v22 }
 0x2e2   : > { %7028 = vmatprep.mubr.msk.bf16.mxu0 %vm651_vm2, %v9394_v31  ;;  %v5366_v31 = vadd.f32 %v5365_v16, %v5364_v45 }
 0x2e4   : > { %v5368_v27 = vadd.f32 %v5367_v62, %v5366_v31  ;;  %v5381_v62 = vsel %vm5192_vm5, %v5323_v11, 0.0 }
 0x2e9   : > { %7029 = vmatmul.mubr.msk.bf16.gmra.mrb[12].mxu0 %vm651_vm2, %v9402_v0  ;;  %v5318_v0 = vmul.f32 %v10225_v12, %v10225_v12 }
 0x2ea   : > { %7032 = vmatprep.mubr.msk.bf16.mxu0 %vm651_vm2, %v9428_v25  ;;  %v5370_v25 = vadd.f32 %v5369_v44, %v5368_v27  ;;  %v10314_v44 = vsub.f32 %v9978_v3, %v10011_v53 }
 0x2eb   : > { %v5371_v50 = vsel %vm5192_vm5, %v5318_v0, 0.0 }
 0x2ec   : > { %v5372_v7 = vadd.f32 %v5371_v50, %v5370_v25 }
 0x2f1   : > { %7033 = vmatmul.mubr.msk.bf16.gmra.mrb[16].mxu0 %vm651_vm2, %v9432_v57  ;;  %v5320_v57 = vmul.f32 %v10243_v4, %v10243_v4 }
 0x2f2   : > { %7036 = vmatprep.mubr.msk.bf16.mxu0 %vm651_vm2, %v11185_v35  ;;  %v5374_v35 = vadd.f32 %v5373_v43, %v5372_v7 }
 0x2f3   : > { %v5375_v22 = vsel %vm5192_vm5, %v5320_v57, 0.0 }
 0x2f4   : > { %v5376_v17 = vadd.f32 %v5375_v22, %v5374_v35 }
 0x2f6   : > { %v5378_v45 = vadd.f32 %v5377_v51, %v5376_v17 }
 0x2f9   : > { %7037 = vmatmul.mubr.msk.bf16.gmra.mrb[20].mxu0 %vm651_vm2, %v11186_v39  ;;  %v5322_v39 = vmul.f32 %v10261_v26, %v10261_v26 }
 0x2fa   : > { %7040 = vmatprep.mubr.msk.bf16.mxu0 %vm651_vm2, %v9489_v6  ;;  %v2489_v6 = vrot.slane %v452_v28, 2 }
 0x2fb   : > { %v5379_v16 = vsel %vm5192_vm5, %v5322_v39, 0.0 }
 0x2fc   : > { %v2491_v28 = vsel %vm1077_vm4, %v2489_v6, %v2490_v24  ;;  %v5380_v60 = vadd.f32 %v5379_v16, %v5378_v45 }
 0x2fe   : > { %v5382_v27 = vadd.f32 %v5381_v62, %v5380_v60 }
 0x300   : > { %v5384_v0 = vadd.f32 %v5383_v37, %v5382_v27 }
 0x301   : > { %7041 = vmatmul.mubr.msk.bf16.gmra.mrb[24].mxu0 %vm651_vm2, %v9495_v21  ;;  %v2493_v21 = vsel %vm1077_vm4, %v2490_v24, %v2492_v41 }
 0x302   : > { %7044 = vmatprep.mubr.msk.bf16.mxu0 %vm651_vm2, %v9681_v34  ;;  %v2496_v31 = vpack.c.bf16 %v2493_v21, %v2491_v28  ;;  %v10302_v34 = vsub.f32 %v9971_v47, %v10011_v53  ;;  %v5385_v47 = vsel %vm5192_vm5, %v5325_v61, 0.0  ;;  %v5327_v53 = vmul.f32 %v10314_v44, %v10314_v44 }
 0x303   : > { %v5386_v35 = vadd.f32 %v5385_v47, %v5384_v0 }
 0x304   : > { %v5326_v25 = vmul.f32 %v10302_v34, %v10302_v34  ;;  %v5389_v51 = vsel %vm5192_vm5, %v5327_v53, 0.0 }
 0x306   : > { %v5387_v5 = vsel %vm5192_vm5, %v5326_v25, 0.0 }
 0x307   : > { %v5388_v39 = vadd.f32 %v5387_v5, %v5386_v35 }
 0x309   : > { %7045 = vmatmul.mubr.msk.bf16.gmra.mrb[28].mxu0 %vm651_vm2, %v2496_v31  ;;  %v5390_v16 = vadd.f32 %v5389_v51, %v5388_v39 }
 0x30b   : > { %v5391_v60 = vrot.slane %v5390_v16, 4 }
 0x30d   : > { %v5392_v37 = vadd.f32 %v5391_v60, %v5390_v16 }
 0x30f   : > { %v7324_v15 = vpop.f32.mrb[16].mxu1 }
 0x310   : > { %v10320_v50 = vadd.f32 %v7324_v15, %v10310_v49  ;;  %v4962_v7 = vpop.f32.mrb[17].mxu1  ;;  %v5393_v15 = vrot.slane %v5392_v37, 2 }
 0x311   : > { %v10323_v57 = vadd.f32 %v10310_v49, %v4962_v7  ;;  %v7325_v43 = vpop.f32.mrb[18].mxu1 }
 0x312   : > { %5532 = vrot.lane.b32.xlu1 %v10320_v50, %s8086_s20  ;;  %v4965_v3 = vpop.f32.mrb[19].mxu1  ;;  %v10333_v22 = vadd.f32 %v7325_v43, %v10310_v49  ;;  %v5394_v5 = vadd.f32 %v5393_v15, %v5392_v37 }
 0x313   : > { %5528 = vrot.lane.b32.xlu0 %v10323_v57, %s8086_s20  ;;  %v10336_v17 = vadd.f32 %v10310_v49, %v4965_v3 }
 0x316   : > { %5534 = vrot.lane.b32.xlu1 %v10333_v22, %s8086_s20 }
 0x317   : > { %5530 = vrot.lane.b32.xlu0 %v10336_v17, %s8086_s20  ;;  %v7328_v6 = vpop.f32.mrb[20].mxu1 }
 0x318   : > { %v4978_v24 = vpop.f32.mrb[21].mxu1  ;;  %v10352_v21 = vadd.f32 %v7328_v6, %v10310_v49 }
 0x319   : > { %v10344_v45 = vadd.f32 %v10310_v49, %v4978_v24  ;;  %v7329_v11 = vpop.f32.mrb[22].mxu1  ;;  %v5395_v24 = vrot.slane %v5394_v5, 1 }
 0x31a   : > { %v4981_v41 = vpop.f32.mrb[23].mxu1  ;;  %v10357_v31 = vadd.f32 %v7329_v11, %v10310_v49 }
 0x31b   : > { %v10347_v28 = vadd.f32 %v10310_v49, %v4981_v41  ;;  %5536 = vrot.lane.b32.xlu0 %v10344_v45, %s8086_s20 }
 0x31d   : > { %5538 = vrot.lane.b32.xlu1 %v10347_v28, %s8086_s20 }
 0x31f   : > { %5540 = vrot.lane.b32.xlu0 %v10352_v21, %s8086_s20  ;;  %v7332_v19 = vpop.f32.mrb[24].mxu1 }
 0x320   : > { %v4994_v62 = vpop.f32.mrb[25].mxu1  ;;  %v10372_v47 = vadd.f32 %v7332_v19, %v10310_v49 }
 0x321   : > { %v10362_v27 = vadd.f32 %v10310_v49, %v4994_v62  ;;  %5542 = vrot.lane.b32.xlu1 %v10357_v31, %s8086_s20  ;;  %v7333_v61 = vpop.f32.mrb[26].mxu1  ;;  %v5396_v62 = vadd.f32 %v5395_v24, %v5394_v5 }
 0x322   : > { %v4997_v0 = vpop.f32.mrb[27].mxu1  ;;  %v10377_v7 = vadd.f32 %v7333_v61, %v10310_v49 }
 0x323   : > { %v10367_v25 = vadd.f32 %v10310_v49, %v4997_v0  ;;  %5544 = vrot.lane.b32.xlu0 %v10362_v27, %s8086_s20  ;;  %v5397_v15 = vmul.f32 0.00390625, %v5396_v62 }
 0x325   : > { %5546 = vrot.lane.b32.xlu1 %v10367_v25, %s8086_s20  ;;  %v5398_v24 = vadd.f32 1e-05, %v5397_v15 }
 0x327   : > { %5548 = vrot.lane.b32.xlu0 %v10372_v47, %s8086_s20  ;;  %v7336_v43 = vpop.f32.mrb[28].mxu1  ;;  %8068 = vrsqrt.f32 %v5398_v24 }
 0x328   : > { %v5010_v35 = vpop.f32.mrb[29].mxu1  ;;  %v10392_v6 = vadd.f32 %v7336_v43, %v10310_v49 }
 0x329   : > { %v10382_v3 = vadd.f32 %v10310_v49, %v5010_v35  ;;  %5550 = vrot.lane.b32.xlu1 %v10377_v7, %s8086_s20  ;;  %v7337_v53 = vpop.f32.mrb[30].mxu1 }
 0x32a   : > { %v5013_v39 = vpop.f32.mrb[31].mxu1  ;;  %v10397_v11 = vadd.f32 %v7337_v53, %v10310_v49 }
 0x32b   : > { %v10387_v51 = vadd.f32 %v10310_v49, %v5013_v39  ;;  %5552 = vrot.lane.b32.xlu0 %v10382_v3, %s8086_s20 }
 0x32d   : > { %5554 = vrot.lane.b32.xlu1 %v10387_v51, %s8086_s20 }
 0x32f   : > { %5556 = vrot.lane.b32.xlu0 %v10392_v6, %s8086_s20  ;;  %v7340_v16 = vpop.f32.mrb[32].mxu1 }
 0x330   : > { %v5026_v41 = vpop.f32.mrb[33].mxu1  ;;  %v10412_v0 = vadd.f32 %v7340_v16, %v10310_v49 }
 0x331   : > { %v10402_v60 = vadd.f32 %v10310_v49, %v5026_v41  ;;  %5558 = vrot.lane.b32.xlu1 %v10397_v11, %s8086_s20  ;;  %v7341_v19 = vpop.f32.mrb[34].mxu1  ;;  %v10456_v24 = vpop.eup %8068 }
 0x332   : > { %v5029_v61 = vpop.f32.mrb[35].mxu1  ;;  %v10417_v43 = vadd.f32 %v7341_v19, %v10310_v49 }
 0x333   : > { %v10407_v37 = vadd.f32 %v10310_v49, %v5029_v61  ;;  %5560 = vrot.lane.b32.xlu0 %v10402_v60, %s8086_s20 }
 0x335   : > { %5562 = vrot.lane.b32.xlu1 %v10407_v37, %s8086_s20 }
 0x337   : > { %5564 = vrot.lane.b32.xlu0 %v10412_v0, %s8086_s20  ;;  %v7344_v35 = vpop.f32.mrb[36].mxu1 }
 0x338   : > { %v5042_v53 = vpop.f32.mrb[37].mxu1  ;;  %v10432_v19 = vadd.f32 %v7344_v35, %v10310_v49 }
 0x339   : > { %v10422_v5 = vadd.f32 %v10310_v49, %v5042_v53  ;;  %5566 = vrot.lane.b32.xlu1 %v10417_v43, %s8086_s20  ;;  %v7345_v39 = vpop.f32.mrb[38].mxu1 }
 0x33a   : > { %v5045_v16 = vpop.f32.mrb[39].mxu1  ;;  %11220 = vst [vmem:[#allocation18_spill] sm:$0xff] %v10432_v19  ;;  %v10437_v62 = vadd.f32 %v7345_v39, %v10310_v49 }
 0x33b   : > { %v10427_v41 = vadd.f32 %v10310_v49, %v5045_v16  ;;  %5568 = vrot.lane.b32.xlu0 %v10422_v5, %s8086_s20 }
 0x33c   : > { %11221 = vst [vmem:[#allocation20_spill] sm:$0xff] %v10437_v62 }
 0x33d   : > { %5570 = vrot.lane.b32.xlu1 %v10427_v41, %s8086_s20 }
 0x33f   : > { %5572 = vrot.lane.b32.xlu0 %v10432_v19, %s8086_s20  ;;  %v7348_v61 = vpop.f32.mrb[40].mxu1 }
 0x340   : > { %v5058_v15 = vpop.f32.mrb[41].mxu1  ;;  %v10452_v39 = vadd.f32 %v7348_v61, %v10310_v49 }
 0x341   : > { %v10442_v53 = vadd.f32 %v10310_v49, %v5058_v15  ;;  %5574 = vrot.lane.b32.xlu1 %v10437_v62, %s8086_s20  ;;  %v7349_v35 = vpop.f32.mrb[42].mxu1 }
 0x342   : > { %v5061_v16 = vpop.f32.mrb[43].mxu1  ;;  %11224 = vst [vmem:[#allocation45_spill] sm:$0xff] %v10452_v39  ;;  %v10459_v15 = vadd.f32 %v7349_v35, %v10310_v49  ;;  %v5428_v35 = vmul.f32 %v10456_v24, %v10281_v46 }
 0x343   : > { %11222 = vst [vmem:[#allocation22_spill] sm:$0xff] %v10442_v53  ;;  %v10447_v18 = vadd.f32 %v10310_v49, %v5061_v16  ;;  %5576 = vrot.lane.b32.xlu0 %v10442_v53, %s8086_s20  ;;  %v5430_v53 = vmul.f32 %v10456_v24, %v10302_v34 }
 0x344   : > { %11225 = vst [vmem:[#allocation46_spill] sm:$0xff] %v10459_v15 }
 0x345   : > { %11223 = vst [vmem:[#allocation43_spill] sm:$0xff] %v10447_v18  ;;  %5578 = vrot.lane.b32.xlu1 %v10447_v18, %s8086_s20 }
 0x347   : > { %5580 = vrot.lane.b32.xlu0 %v10452_v39, %s8086_s20  ;;  %v7352_v26 = vpop.f32.mrb[44].mxu1 }
 0x348   : > { %v5158_v16 = vadd.f32 %v7352_v26, %v10310_v49  ;;  %v5074_v52 = vpop.f32.mrb[45].mxu1  ;;  %v5431_v26 = vmul.f32 %v10456_v24, %v10314_v44 }
 0x349   : > { %v5156_v61 = vadd.f32 %v10310_v49, %v5074_v52  ;;  %5582 = vrot.lane.b32.xlu1 %v10459_v15, %s8086_s20  ;;  %v7353_v18 = vpop.f32.mrb[46].mxu1  ;;  %v5429_v52 = vmul.f32 %v10456_v24, %v10294_v8  ;;  %v5435_v8 = vadd.f32 1.0, %v10333_v22 }
 0x34a   : > { %v5462_v4 = vadd.f32 1.0, %v5158_v16  ;;  %v5159_v62 = vadd.f32 %v7353_v18, %v10310_v49  ;;  %v5077_v39 = vpop.f32.mrb[47].mxu1 }
 0x34b   : > { %v5460_v1 = vadd.f32 1.0, %v5156_v61  ;;  %v5157_v12 = vadd.f32 %v10310_v49, %v5077_v39  ;;  %5584 = vrot.lane.b32.xlu0 %v5156_v61, %s8086_s20  ;;  %v5434_v49 = vadd.f32 1.0, %v10320_v50 }
 0x34c   : > { %v5463_v34 = vadd.f32 1.0, %v5159_v62  ;;  %v10478_v15 = vmul.f32 %v5462_v4, %v5430_v53  ;;  %v5402_v4 = vmul.f32 %v10456_v24, %v10027_v38  ;;  %v5433_v53 = vadd.f32 1.0, %v10336_v17 }
 0x34d   : > { %v5461_v19 = vadd.f32 1.0, %v5157_v12  ;;  %5586 = vrot.lane.b32.xlu1 %v5157_v12, %s8086_s20  ;;  %v10481_v46 = vmul.f32 %v5460_v1, %v5428_v35  ;;  %v5403_v12 = vmul.f32 %v10456_v24, %v10035_v58  ;;  %v5432_v1 = vadd.f32 1.0, %v10323_v57 }
 0x34e   : > { %v10483_v18 = vmul.f32 %v5463_v34, %v5431_v26  ;;  %v5404_v57 = vmul.f32 %v10456_v24, %v10047_v20  ;;  %v5405_v17 = vmul.f32 %v10456_v24, %v10054_v10  ;;  %v5437_v34 = vadd.f32 1.0, %v10347_v28 }
 0x34f   : > { %5588 = vrot.lane.b32.xlu0 %v5158_v16, %s8086_s20  ;;  %v10486_v44 = vmul.f32 %v5461_v19, %v5429_v52  ;;  %v5400_v19 = vmul.f32 %v10456_v24, %v10015_v56  ;;  %v5466_v16 = vmul.f32 %v5434_v49, %v5402_v4  ;;  %v5467_v22 = vmul.f32 %v5435_v8, %v5403_v12 }
 0x350   : > { %11226 = vst [vmem:[#allocation47_spill] sm:$0xff] %v10483_v18  ;;  %v5436_v56 = vadd.f32 1.0, %v10344_v45  ;;  %v5438_v4 = vadd.f32 1.0, %v10352_v21  ;;  %v5469_v10 = vmul.f32 %v5437_v34, %v5405_v17  ;;  %v5407_v45 = vmul.f32 %v10456_v24, %v10072_v59 }
 0x351   : > { %5590 = vrot.lane.b32.xlu1 %v5159_v62, %s8086_s20  ;;  %v5401_v62 = vmul.f32 %v10456_v24, %v10019_v9  ;;  %v5464_v61 = vmul.f32 %v5432_v1, %v5400_v19  ;;  %v5406_v1 = vmul.f32 %v10456_v24, %v10065_v13  ;;  %v5409_v13 = vmul.f32 %v10456_v24, %v10090_v32 }
 0x352   : > { %v5468_v20 = vmul.f32 %v5436_v56, %v5404_v57  ;;  %v5411_v32 = vmul.f32 %v10456_v24, %v10110_v14  ;;  %v5444_v14 = vadd.f32 1.0, %v10382_v3  ;;  %v5447_v3 = vadd.f32 1.0, %v10397_v11 }
 0x353   : > { %v5465_v38 = vmul.f32 %v5433_v53, %v5401_v62  ;;  %v5439_v53 = vadd.f32 1.0, %v10357_v31  ;;  %v5470_v19 = vmul.f32 %v5438_v4, %v5406_v1  ;;  %v5408_v62 = vmul.f32 %v10456_v24, %v10083_v48 }
 0x354   : > { %v5440_v31 = vadd.f32 1.0, %v10362_v27  ;;  %v5410_v48 = vmul.f32 %v10456_v24, %v10101_v23  ;;  %v5443_v27 = vadd.f32 1.0, %v10377_v7  ;;  %v5413_v23 = vmul.f32 %v10456_v24, %v10140_v40 }
 0x355   : > { %v5445_v7 = vadd.f32 1.0, %v10387_v51  ;;  %v5415_v40 = vmul.f32 %v10456_v24, %v10157_v63  ;;  %v5448_v63 = vadd.f32 1.0, %v10402_v60  ;;  %v5449_v11 = vadd.f32 1.0, %v10407_v37 }
 0x356   : > { %v5451_v60 = vadd.f32 1.0, %v10417_v43  ;;  %v5453_v43 = vadd.f32 1.0, %v10427_v41 }
 0x384   : > { %v5533_v39 = vpop.permute.xlu1 %5532 }
 0x385   : > { %v5529_v50 = vpop.permute.xlu0 %5528  ;;  %v5626_v26 = vadd.f32 %v5533_v39, %v5466_v16 }
 0x386   : > { %v5624_v9 = vadd.f32 %v5529_v50, %v5464_v61  ;;  %v5441_v50 = vadd.f32 1.0, %v10367_v25  ;;  %v5472_v25 = vmul.f32 %v5440_v31, %v5408_v62 }
 0x388   : > { %v5535_v35 = vpop.permute.xlu1 %5534 }
 0x389   : > { %v5627_v52 = vadd.f32 %v5535_v35, %v5467_v22  ;;  %v5531_v58 = vpop.permute.xlu0 %5530  ;;  %v5471_v22 = vmul.f32 %v5439_v53, %v5407_v45  ;;  %v5446_v53 = vadd.f32 1.0, %v10392_v6  ;;  %v5477_v45 = vmul.f32 %v5445_v7, %v5413_v23  ;;  %v11229_v23 = vld [vmem:[#allocation10_spill] sm:$0xff] }
 0x38a   : > { %v5625_v18 = vadd.f32 %v5531_v58, %v5465_v38  ;;  %v5442_v38 = vadd.f32 1.0, %v10372_v47  ;;  %v5473_v58 = vmul.f32 %v5441_v50, %v5409_v13  ;;  %v5412_v47 = vmul.f32 %v10456_v24, %v10131_v33 }
 0x38b   : > { %v5657_v49 = vpack.c.bf16 %v5627_v52, %v5626_v26  ;;  %v5414_v33 = vmul.f32 %v10456_v24, %v10150_v55  ;;  %v5416_v6 = vmul.f32 %v10456_v24, %v10171_v29  ;;  %v5417_v55 = vmul.f32 %v10456_v24, %v10178_v54 }
 0x38c   : > { %v5656_v8 = vpack.c.bf16 %v5625_v18, %v5624_v9  ;;  %v5474_v34 = vmul.f32 %v5442_v38, %v5410_v48  ;;  %v5476_v51 = vmul.f32 %v5444_v14, %v5412_v47  ;;  %v5479_v13 = vmul.f32 %v5447_v3, %v5415_v40  ;;  %v11228_v47 = vld [vmem:[#allocation9_spill] sm:$0xff]  ;;  %v11230_v14 = vld [vmem:[#allocation20_spill] sm:$0xff]  ;;  %v11232_v40 = vld [vmem:[#allocation14_spill] sm:$0xff] }
 0x38d   : > { %v5537_v12 = vpop.permute.xlu0 %5536  ;;  %v5418_v29 = vmul.f32 %v10456_v24, %v10189_v36  ;;  %v5419_v54 = vmul.f32 %v10456_v24, %v10196_v42  ;;  %v5480_v37 = vmul.f32 %v5448_v63, %v5416_v6  ;;  %v5421_v36 = vmul.f32 %v10456_v24, %v10214_v2 }
 0x38e   : > { %7356 = vmatprep.mubr.msk.bf16.mxu0 %vm5192_vm5, %v5656_v8  ;;  %v5628_v39 = vadd.f32 %v5537_v12, %v5468_v20  ;;  %v5475_v8 = vmul.f32 %v5443_v27, %v5411_v32  ;;  %v5452_v42 = vadd.f32 1.0, %v10422_v5  ;;  %v5423_v2 = vmul.f32 %v10456_v24, %v11229_v23 }
 0x38f   : > { %v5539_v28 = vpop.permute.xlu1 %5538  ;;  %7357 = vmatmul.mubr.msk.bf16.vlgmr.msra.gmra.mrb[0].mxu0 %vm5192_vm5, %v5657_v49  ;;  %v5455_v5 = vadd.f32 1.0, %v11230_v14  ;;  %v5425_v3 = vmul.f32 %v10456_v24, %v11232_v40 }
 0x390   : > { %v5629_v18 = vadd.f32 %v5539_v28, %v5469_v10 }
 0x391   : > { %v5541_v21 = vpop.permute.xlu0 %5540 }
 0x392   : > { %v5658_v16 = vpack.c.bf16 %v5629_v18, %v5628_v39  ;;  %v5630_v61 = vadd.f32 %v5541_v21, %v5470_v19  ;;  %v5478_v19 = vmul.f32 %v5446_v53, %v5414_v33 }
 0x393   : > { %v5543_v59 = vpop.permute.xlu1 %5542 }
 0x394   : > { %v5631_v35 = vadd.f32 %v5543_v59, %v5471_v22  ;;  %7360 = vmatprep.mubr.msk.bf16.mxu0 %vm5192_vm5, %v5658_v16  ;;  %v5450_v22 = vadd.f32 1.0, %v10412_v0  ;;  %v5420_v0 = vmul.f32 %v10456_v24, %v10207_v30  ;;  %v5422_v30 = vmul.f32 %v10456_v24, %v11228_v47 }
 0x395   : > { %v5545_v26 = vpop.permute.xlu0 %5544 }
 0x396   : > { %v5659_v52 = vpack.c.bf16 %v5631_v35, %v5630_v61  ;;  %v5632_v17 = vadd.f32 %v5545_v26, %v5472_v25  ;;  %v5481_v35 = vmul.f32 %v5449_v11, %v5417_v55  ;;  %v5482_v32 = vmul.f32 %v5450_v22, %v5418_v29  ;;  %v11235_v55 = vld [vmem:[#allocation45_spill] sm:$0xff] }
 0x397   : > { %v5547_v57 = vpop.permute.xlu1 %5546  ;;  %v5483_v25 = vmul.f32 %v5451_v60, %v5419_v54  ;;  %v5484_v41 = vmul.f32 %v5452_v42, %v5420_v0  ;;  %v5458_v63 = vadd.f32 1.0, %v11235_v55 }
 0x398   : > { %v5633_v56 = vadd.f32 %v5547_v57, %v5473_v58  ;;  %7361 = vmatmul.mubr.msk.bf16.gmra.mrb[4].mxu0 %vm5192_vm5, %v5659_v52 }
 0x399   : > { %v5549_v9 = vpop.permute.xlu0 %5548 }
 0x39a   : > { %v5660_v49 = vpack.c.bf16 %v5633_v56, %v5632_v17  ;;  %v5634_v12 = vadd.f32 %v5549_v9, %v5474_v34  ;;  %v11227_v56 = vld [vmem:[#allocation18_spill] sm:$0xff] }
 0x39b   : > { %v5551_v4 = vpop.permute.xlu1 %5550  ;;  %v5454_v34 = vadd.f32 1.0, %v11227_v56  ;;  %v11239_v56 = vld [vmem:[#allocation47_spill] sm:$0xff] }
 0x39c   : > { %v5635_v1 = vadd.f32 %v5551_v4, %v5475_v8  ;;  %7364 = vmatprep.mubr.msk.bf16.mxu0 %vm5192_vm5, %v5660_v49  ;;  %v5485_v49 = vmul.f32 %v5453_v43, %v5421_v36 }
 0x39d   : > { %v5553_v20 = vpop.permute.xlu0 %5552 }
 0x39e   : > { %v5661_v10 = vpack.c.bf16 %v5635_v1, %v5634_v12  ;;  %v5636_v39 = vadd.f32 %v5553_v20, %v5476_v51  ;;  %v5486_v1 = vmul.f32 %v5454_v34, %v5422_v30  ;;  %v11231_v20 = vld [vmem:[#allocation12_spill] sm:$0xff] }
 0x39f   : > { %v5555_v28 = vpop.permute.xlu1 %5554  ;;  %v5424_v33 = vmul.f32 %v10456_v24, %v11231_v20 }
 0x3a0   : > { %v5637_v18 = vadd.f32 %v5555_v28, %v5477_v45  ;;  %7365 = vmatmul.mubr.msk.bf16.gmra.mrb[8].mxu0 %vm5192_vm5, %v5661_v10  ;;  %v11233_v10 = vld [vmem:[#allocation22_spill] sm:$0xff]  ;;  %v11234_v45 = vld [vmem:[#allocation43_spill] sm:$0xff] }
 0x3a1   : > { %v5557_v21 = vpop.permute.xlu0 %5556  ;;  %v5456_v51 = vadd.f32 1.0, %v11233_v10  ;;  %v5457_v28 = vadd.f32 1.0, %v11234_v45 }
 0x3a2   : > { %v5662_v62 = vpack.c.bf16 %v5637_v18, %v5636_v39  ;;  %v5638_v50 = vadd.f32 %v5557_v21, %v5478_v19  ;;  %v5487_v18 = vmul.f32 %v5455_v5, %v5423_v2 }
 0x3a3   : > { %v5559_v31 = vpop.permute.xlu1 %5558  ;;  %v5488_v29 = vmul.f32 %v5456_v51, %v5424_v33  ;;  %v5489_v54 = vmul.f32 %v5457_v28, %v5425_v3 }
 0x3a4   : > { %v5639_v16 = vadd.f32 %v5559_v31, %v5479_v13  ;;  %7368 = vmatprep.mubr.msk.bf16.mxu0 %vm5192_vm5, %v5662_v62  ;;  %v11236_v62 = vld [vmem:[#allocation15_spill] sm:$0xff]  ;;  %v11237_v31 = vld [vmem:[#allocation17_spill] sm:$0xff] }
 0x3a5   : > { %v5561_v59 = vpop.permute.xlu0 %5560  ;;  %v5426_v13 = vmul.f32 %v10456_v24, %v11236_v62  ;;  %v11240_v62 = vld [vmem:[#allocation49_spill] sm:$0xff] }
 0x3a6   : > { %v5663_v61 = vpack.c.bf16 %v5639_v16, %v5638_v50  ;;  %v5640_v26 = vadd.f32 %v5561_v59, %v5480_v37  ;;  %v5427_v50 = vmul.f32 %v10456_v24, %v11237_v31  ;;  %v11238_v16 = vld [vmem:[#allocation46_spill] sm:$0xff] }
 0x3a7   : > { %v5563_v38 = vpop.permute.xlu1 %5562  ;;  %v5459_v22 = vadd.f32 1.0, %v11238_v16  ;;  %v11241_v31 = vld [vmem:[#allocation50_spill] sm:$0xff] }
 0x3a8   : > { %v5641_v48 = vadd.f32 %v5563_v38, %v5481_v35  ;;  %7369 = vmatmul.mubr.msk.bf16.gmra.mrb[12].mxu0 %vm5192_vm5, %v5663_v61 }
 0x3a9   : > { %v5565_v27 = vpop.permute.xlu0 %5564 }
 0x3aa   : > { %v5664_v52 = vpack.c.bf16 %v5641_v48, %v5640_v26  ;;  %v5642_v57 = vadd.f32 %v5565_v27, %v5482_v32  ;;  %v5490_v26 = vmul.f32 %v5458_v63, %v5426_v13  ;;  %v5491_v48 = vmul.f32 %v5459_v22, %v5427_v50  ;;  %v11242_v22 = vld [vmem:[#allocation51_spill] sm:$0xff] }
 0x3ab   : > { %v5567_v58 = vpop.permute.xlu1 %5566 }
 0x3ac   : > { %v5643_v17 = vadd.f32 %v5567_v58, %v5483_v25  ;;  %7372 = vmatprep.mubr.msk.bf16.mxu0 %vm5192_vm5, %v5664_v52 }
 0x3ad   : > { %v5569_v9 = vpop.permute.xlu0 %5568 }
 0x3ae   : > { %v5665_v7 = vpack.c.bf16 %v5643_v17, %v5642_v57  ;;  %v5644_v4 = vadd.f32 %v5569_v9, %v5484_v41 }
 0x3af   : > { %v5571_v8 = vpop.permute.xlu1 %5570 }
 0x3b0   : > { %v5645_v12 = vadd.f32 %v5571_v8, %v5485_v49  ;;  %7373 = vmatmul.mubr.msk.bf16.gmra.mrb[16].mxu0 %vm5192_vm5, %v5665_v7 }
 0x3b1   : > { %v5573_v53 = vpop.permute.xlu0 %5572 }
 0x3b2   : > { %v5666_v39 = vpack.c.bf16 %v5645_v12, %v5644_v4  ;;  %v5646_v21 = vadd.f32 %v5573_v53, %v5486_v1 }
 0x3b3   : > { %v5575_v19 = vpop.permute.xlu1 %5574 }
 0x3b4   : > { %v5647_v6 = vadd.f32 %v5575_v19, %v5487_v18  ;;  %7376 = vmatprep.mubr.msk.bf16.mxu0 %vm5192_vm5, %v5666_v39 }
 0x3b5   : > { %v5577_v11 = vpop.permute.xlu0 %5576 }
 0x3b6   : > { %v5667_v59 = vpack.c.bf16 %v5647_v6, %v5646_v21  ;;  %v5648_v61 = vadd.f32 %v5577_v11, %v5488_v29 }
 0x3b7   : > { %v5579_v60 = vpop.permute.xlu1 %5578 }
 0x3b8   : > { %v5649_v37 = vadd.f32 %v5579_v60, %v5489_v54  ;;  %7377 = vmatmul.mubr.msk.bf16.gmra.mrb[20].mxu0 %vm5192_vm5, %v5667_v59  ;;  %v11243_v60 = vld [vmem:[#allocation52_spill] sm:$0xff] }
 0x3b9   : > { %v5581_v35 = vpop.permute.xlu0 %5580 }
 0x3ba   : > { %v5668_v38 = vpack.c.bf16 %v5649_v37, %v5648_v61  ;;  %v5650_v27 = vadd.f32 %v5581_v35, %v5490_v26 }
 0x3bb   : > { %v5583_v32 = vpop.permute.xlu1 %5582 }
 0x3bc   : > { %v5651_v0 = vadd.f32 %v5583_v32, %v5491_v48  ;;  %7380 = vmatprep.mubr.msk.bf16.mxu0 %vm5192_vm5, %v5668_v38  ;;  %v11244_v32 = vld [vmem:[#allocation54_spill] sm:$0xff] }
 0x3bd   : > { %v5585_v24 = vpop.permute.xlu0 %5584 }
 0x3be   : > { %v5669_v36 = vpack.c.bf16 %v5651_v0, %v5650_v27  ;;  %v5652_v43 = vadd.f32 %v5585_v24, %v10481_v46  ;;  %v10596_v46 = vld [vmem:[%s10724_s4] ss:$0 sm:$0xff]  ;;  %v11245_v0 = vld [vmem:[#allocation56_spill] sm:$0xff] }
 0x3bf   : > { %v5587_v42 = vpop.permute.xlu1 %5586  ;;  %v7406_v13 = vadd.f32 %v11240_v62, %v10596_v46  ;;  %v7408_v50 = vadd.f32 %v10596_v46, %v11241_v31  ;;  %v7410_v59 = vadd.f32 %v11242_v22, %v10596_v46  ;;  %v7412_v61 = vadd.f32 %v10596_v46, %v11243_v60 }
 0x3c0   : > { %v5653_v52 = vadd.f32 %v5587_v42, %v10486_v44  ;;  %7381 = vmatmul.mubr.msk.bf16.gmra.mrb[24].mxu0 %vm5192_vm5, %v5669_v36  ;;  %v7414_v27 = vadd.f32 %v11244_v32, %v10596_v46  ;;  %v7416_v24 = vadd.f32 %v10596_v46, %v11245_v0  ;;  %v11246_v42 = vld [vmem:[#allocation57_spill] sm:$0xff] }
 0x3c1   : > { %v5589_v25 = vpop.permute.xlu0 %5588 }
 0x3c2   : > { %v5670_v58 = vpack.c.bf16 %v5653_v52, %v5652_v43  ;;  %v5654_v17 = vadd.f32 %v5589_v25, %v10478_v15  ;;  %v7418_v43 = vadd.f32 %v11246_v42, %v10596_v46 }
 0x3c3   : > { %v5591_v57 = vpop.permute.xlu1 %5590 }
 0x3c4   : > { %v5655_v34 = vadd.f32 %v5591_v57, %v11239_v56  ;;  %7384 = vmatprep.mubr.msk.bf16.mxu0 %vm5192_vm5, %v5670_v58  ;;  %v11247_v58 = vld [vmem:[#allocation58_spill] sm:$0xff] }
 0x3c5   : > { %v7420_v57 = vadd.f32 %v10596_v46, %v11247_v58 }
 0x3c6   : > { %v5671_v9 = vpack.c.bf16 %v5655_v34, %v5654_v17 }
 0x3c8   : > { %7385 = vmatmul.mubr.msk.bf16.gmra.mrb[28].mxu0 %vm5192_vm5, %v5671_v9 }
 0x462   : > { %v7358_v15 = vpop.f32.mrb[0].mxu0 }
 0x463   : > { %v7390_v44 = vadd.f32 %v7358_v15, %v10596_v46  ;;  %v5759_v47 = vpop.f32.mrb[1].mxu0 }
 0x464   : > { %v7391_v30 = vadd.f32 %v10596_v46, %v5759_v47  ;;  %v7359_v23 = vpop.f32.mrb[2].mxu0 }
 0x465   : > { %5920 = vst.msk [vmem:[%s10603_s25 + $0x10] sm:$0xff] %vm651_vm2, %v7390_v44  ;;  %v7392_v2 = vadd.f32 %v7359_v23, %v10596_v46  ;;  %v5762_v14 = vpop.f32.mrb[3].mxu0  ;;  %v11248_v44 = vld [vmem:[#allocation61_spill] sm:$0xff] }
 0x466   : > { %5918 = vst.msk [vmem:[%s10603_s25] sm:$0xff] %vm651_vm2, %v7391_v30  ;;  %v7393_v5 = vadd.f32 %v10596_v46, %v5762_v14  ;;  %v7422_v47 = vadd.f32 %v11248_v44, %v10596_v46  ;;  %v11249_v30 = vld [vmem:[#allocation62_spill] sm:$0xff]  ;;  %v11250_v14 = vld [vmem:[#allocation63_spill] sm:$0xff] }
 0x467   : > { %5921 = vst.msk [vmem:[%s10603_s25 + $0x18] sm:$0xff] %vm651_vm2, %v7392_v2  ;;  %v7424_v23 = vadd.f32 %v10596_v46, %v11249_v30 }
 0x468   : > { %5919 = vst.msk [vmem:[%s10603_s25 + $0x8] sm:$0xff] %vm651_vm2, %v7393_v5  ;;  %v7426_v5 = vadd.f32 %v11250_v14, %v10596_v46 }
 0x46b   : > { %v7362_v7 = vpop.f32.mrb[4].mxu0 }
 0x46c   : > { %v7394_v41 = vadd.f32 %v7362_v7, %v10596_v46  ;;  %v5775_v49 = vpop.f32.mrb[5].mxu0 }
 0x46d   : > { %v7395_v8 = vadd.f32 %v10596_v46, %v5775_v49  ;;  %v7363_v4 = vpop.f32.mrb[6].mxu0  ;;  %v11251_v49 = vld [vmem:[#allocation64_spill] sm:$0xff] }
 0x46e   : > { %5924 = vst.msk [vmem:[%s10603_s25 + $0x30] sm:$0xff] %vm651_vm2, %v7394_v41  ;;  %v7396_v12 = vadd.f32 %v7363_v4, %v10596_v46  ;;  %v5778_v1 = vpop.f32.mrb[7].mxu0 }
 0x46f   : > { %5922 = vst.msk [vmem:[%s10603_s25 + $0x20] sm:$0xff] %vm651_vm2, %v7395_v8  ;;  %v7397_v53 = vadd.f32 %v10596_v46, %v5778_v1  ;;  %v7428_v8 = vadd.f32 %v10596_v46, %v11251_v49 }
 0x470   : > { %5925 = vst.msk [vmem:[%s10603_s25 + $0x38] sm:$0xff] %vm651_vm2, %v7396_v12 }
 0x471   : > { %5923 = vst.msk [vmem:[%s10603_s25 + $0x28] sm:$0xff] %vm651_vm2, %v7397_v53 }
 0x473   : > { %v7366_v20 = vpop.f32.mrb[8].mxu0 }
 0x474   : > { %v7398_v33 = vadd.f32 %v7366_v20, %v10596_v46  ;;  %v5791_v40 = vpop.f32.mrb[9].mxu0 }
 0x475   : > { %v7399_v3 = vadd.f32 %v10596_v46, %v5791_v40  ;;  %v7367_v10 = vpop.f32.mrb[10].mxu0 }
 0x476   : > { %5928 = vst.msk [vmem:[%s10603_s25 + $0x50] sm:$0xff] %vm651_vm2, %v7398_v33  ;;  %v7400_v51 = vadd.f32 %v7367_v10, %v10596_v46  ;;  %v5794_v45 = vpop.f32.mrb[11].mxu0  ;;  %v11252_v33 = vld [vmem:[#allocation67_spill] sm:$0xff] }
 0x477   : > { %5926 = vst.msk [vmem:[%s10603_s25 + $0x40] sm:$0xff] %vm651_vm2, %v7399_v3  ;;  %v7401_v28 = vadd.f32 %v10596_v46, %v5794_v45  ;;  %v7430_v40 = vadd.f32 %v11252_v33, %v10596_v46  ;;  %v11253_v3 = vld [vmem:[#allocation68_spill] sm:$0xff]  ;;  %v11254_v45 = vld [vmem:[#allocation69_spill] sm:$0xff] }
 0x478   : > { %5929 = vst.msk [vmem:[%s10603_s25 + $0x58] sm:$0xff] %vm651_vm2, %v7400_v51  ;;  %v7432_v10 = vadd.f32 %v10596_v46, %v11253_v3 }
 0x479   : > { %5927 = vst.msk [vmem:[%s10603_s25 + $0x48] sm:$0xff] %vm651_vm2, %v7401_v28  ;;  %v7434_v28 = vadd.f32 %v11254_v45, %v10596_v46 }
 0x47b   : > { %v7370_v39 = vpop.f32.mrb[12].mxu0 }
 0x47c   : > { %v7402_v18 = vadd.f32 %v7370_v39, %v10596_v46  ;;  %v5807_v19 = vpop.f32.mrb[13].mxu0 }
 0x47d   : > { %v7403_v21 = vadd.f32 %v10596_v46, %v5807_v19  ;;  %v7371_v6 = vpop.f32.mrb[14].mxu0  ;;  %v11255_v19 = vld [vmem:[#allocation70_spill] sm:$0xff] }
 0x47e   : > { %5932 = vst.msk [vmem:[%s10603_s25 + $0x70] sm:$0xff] %vm651_vm2, %v7402_v18  ;;  %v7404_v55 = vadd.f32 %v7371_v6, %v10596_v46  ;;  %v5810_v63 = vpop.f32.mrb[15].mxu0 }
 0x47f   : > { %5930 = vst.msk [vmem:[%s10603_s25 + $0x60] sm:$0xff] %vm651_vm2, %v7403_v21  ;;  %v7405_v11 = vadd.f32 %v10596_v46, %v5810_v63  ;;  %v7436_v21 = vadd.f32 %v10596_v46, %v11255_v19 }
 0x480   : > { %5933 = vst.msk [vmem:[%s10603_s25 + $0x78] sm:$0xff] %vm651_vm2, %v7404_v55 }
 0x481   : > { %5931 = vst.msk [vmem:[%s10603_s25 + $0x68] sm:$0xff] %vm651_vm2, %v7405_v11 }
 0x483   : > { %v7374_v16 = vpop.f32.mrb[16].mxu0 }
 0x484   : > { %v7407_v29 = vadd.f32 %v7406_v13, %v7374_v16  ;;  %v5823_v54 = vpop.f32.mrb[17].mxu0 }
 0x485   : > { %v7409_v37 = vadd.f32 %v7408_v50, %v5823_v54  ;;  %v7375_v35 = vpop.f32.mrb[18].mxu0 }
 0x486   : > { %5936 = vst.msk [vmem:[%s10603_s25 + $0x90] sm:$0xff] %vm651_vm2, %v7407_v29  ;;  %v7411_v38 = vadd.f32 %v7410_v59, %v7375_v35  ;;  %v5826_v26 = vpop.f32.mrb[19].mxu0 }
 0x487   : > { %5934 = vst.msk [vmem:[%s10603_s25 + $0x80] sm:$0xff] %vm651_vm2, %v7409_v37  ;;  %v7413_v48 = vadd.f32 %v7412_v61, %v5826_v26 }
 0x488   : > { %5937 = vst.msk [vmem:[%s10603_s25 + $0x98] sm:$0xff] %vm651_vm2, %v7411_v38 }
 0x489   : > { %5935 = vst.msk [vmem:[%s10603_s25 + $0x88] sm:$0xff] %vm651_vm2, %v7413_v48 }
 0x48b   : > { %v7378_v36 = vpop.f32.mrb[20].mxu0 }
 0x48c   : > { %v7415_v52 = vadd.f32 %v7414_v27, %v7378_v36  ;;  %v5839_v25 = vpop.f32.mrb[21].mxu0 }
 0x48d   : > { %v7417_v17 = vadd.f32 %v7416_v24, %v5839_v25  ;;  %v7379_v56 = vpop.f32.mrb[22].mxu0 }
 0x48e   : > { %5940 = vst.msk [vmem:[%s10603_s25 + $0xb0] sm:$0xff] %vm651_vm2, %v7415_v52  ;;  %v7419_v34 = vadd.f32 %v7418_v43, %v7379_v56  ;;  %v5842_v9 = vpop.f32.mrb[23].mxu0 }
 0x48f   : > { %5938 = vst.msk [vmem:[%s10603_s25 + $0xa0] sm:$0xff] %vm651_vm2, %v7417_v17  ;;  %v7421_v15 = vadd.f32 %v7420_v57, %v5842_v9 }
 0x490   : > { %5941 = vst.msk [vmem:[%s10603_s25 + $0xb8] sm:$0xff] %vm651_vm2, %v7419_v34 }
 0x491   : > { %5939 = vst.msk [vmem:[%s10603_s25 + $0xa8] sm:$0xff] %vm651_vm2, %v7421_v15 }
 0x493   : > { %v7382_v2 = vpop.f32.mrb[24].mxu0 }
 0x494   : > { %v7423_v7 = vadd.f32 %v7422_v47, %v7382_v2  ;;  %v5855_v41 = vpop.f32.mrb[25].mxu0 }
 0x495   : > { %v7425_v4 = vadd.f32 %v7424_v23, %v5855_v41  ;;  %v7383_v12 = vpop.f32.mrb[26].mxu0 }
 0x496   : > { %5944 = vst.msk [vmem:[%s10603_s25 + $0xd0] sm:$0xff] %vm651_vm2, %v7423_v7  ;;  %v7427_v1 = vadd.f32 %v7426_v5, %v7383_v12  ;;  %v5858_v53 = vpop.f32.mrb[27].mxu0 }
 0x497   : > { %5942 = vst.msk [vmem:[%s10603_s25 + $0xc0] sm:$0xff] %vm651_vm2, %v7425_v4  ;;  %v7429_v20 = vadd.f32 %v7428_v8, %v5858_v53 }
 0x498   : > { %5945 = vst.msk [vmem:[%s10603_s25 + $0xd8] sm:$0xff] %vm651_vm2, %v7427_v1 }
 0x499   : > { %5943 = vst.msk [vmem:[%s10603_s25 + $0xc8] sm:$0xff] %vm651_vm2, %v7429_v20 }
 0x49b   : > { %v7386_v51 = vpop.f32.mrb[28].mxu0 }
 0x49c   : > { %v7431_v39 = vadd.f32 %v7430_v40, %v7386_v51  ;;  %v5871_v18 = vpop.f32.mrb[29].mxu0 }
 0x49d   : > { %v7433_v6 = vadd.f32 %v7432_v10, %v5871_v18  ;;  %v7387_v55 = vpop.f32.mrb[30].mxu0 }
 0x49e   : > { %5948 = vst.msk [vmem:[%s10603_s25 + $0xf0] sm:$0xff] %vm651_vm2, %v7431_v39  ;;  %v7435_v63 = vadd.f32 %v7434_v28, %v7387_v55  ;;  %v5874_v11 = vpop.f32.mrb[31].mxu0 }
 0x49f   : > { %5946 = vst.msk [vmem:[%s10603_s25 + $0xe0] sm:$0xff] %vm651_vm2, %v7433_v6  ;;  %v7437_v62 = vadd.f32 %v7436_v21, %v5874_v11 }
 0x4a0   : > { %5949 = vst.msk [vmem:[%s10603_s25 + $0xf8] sm:$0xff] %vm651_vm2, %v7435_v63 }
 0x4a1   : > { %5947 = vst.msk [vmem:[%s10603_s25 + $0xe8] sm:$0xff] %vm651_vm2, %v7437_v62 }
 0x4a2 PF: > { %s18_s27 = sadd.s32 1, %s8084_s27  }
 0x4a3   : > { %p15_p4 = scmp.ge.s32.totalorder %s18_s27, 4  }
 0x4a5   :  { %17 = sbr.rel (!%p15_p4) target bundleno = 1 (0x1), region = 104 }

</bundles_post_ra>
